<compile_context>
chip_gen: v7x
topology: tpu7x:2x2x1
jax: 0.10.0
libtpu: 0.0.40
codegen_flags: <defaults>
</compile_context>

<pallas_src>
import functools
import math

import jax
import jax.numpy as jnp
from jax.experimental import pallas as pl
from jax.experimental.pallas import tpu as pltpu


# ------------------------------ tiling helpers ------------------------------

def _pick_rows(n, cap=512):
    """Images per conv grid step: n itself if small, else a x8 divisor <= cap."""
    if n <= cap:
        return n
    best = 0
    for d in range(8, cap + 1, 8):
        if n % d == 0:
            best = d
    return best if best else n          # fallback: one block (correct, more VMEM)


def _largest_divisor_leq(n, cap):
    d = max(1, min(n, cap))
    while n % d:
        d -= 1
    return d


def _gru_tiles(L, B, hidden):
    # Batch tile: a leading 'parallel' axis lets v7x's two TensorCores each take
    # half the batch.  Keep tb a multiple of 8 (or tb == B) for layout rules.
    tb = B // 2 if (B >= 16 and B % 16 == 0) else B
    # Time chunk sized from an ~8 MiB double-buffered gi budget.
    per_step = 2 * tb * 3 * hidden * 4
    cap = max(1, (8 * 1024 * 1024) // per_step)
    # TODO(synk): prime L degenerates to tchunk == 1; a cdiv grid + masked tail
    #             would avoid paying per-step overhead L times.
    tchunk = _largest_divisor_leq(L, cap)
    return tb, tchunk


# -----------------------------------------------------------------------------
# Kernel 1: CNN (conv1 -> relu -> conv2 -> relu -> pool) + GRU input projection
# as three back-to-back lane-dense matmuls.
# -----------------------------------------------------------------------------
def cnn_gi_kernel(x_ref, t1_ref, b1_ref, t2_ref, b2_ref, f_ref, bih_ref, o_ref):
    # conv1 (full-image block-Toeplitz), f32 for first-layer precision
    y1 = jnp.maximum(
        jnp.dot(x_ref[...], t1_ref[...], preferred_element_type=jnp.float32)
        + b1_ref[...], 0.0)
    # conv2 (full-image block-Toeplitz), bf16 operands / f32 accumulate
    y2 = jnp.maximum(
        jnp.dot(y1.astype(t2_ref.dtype), t2_ref[...],
                preferred_element_type=jnp.float32) + b2_ref[...], 0.0)
    # fused AdaptiveAvgPool2d((4,4)) + CHW flatten + W_ih projection (+ b_ih)
    o_ref[...] = jnp.dot(y2.astype(f_ref.dtype), f_ref[...],
                         preferred_element_type=jnp.float32) + bih_ref[...]


def cnn_gi(x_lm, t1, b1r, t2, b2r, fmat, bihr, *, rows):
    nr, hw = x_lm.shape
    g3 = fmat.shape[1]
    return pl.pallas_call(
        cnn_gi_kernel,
        out_shape=jax.ShapeDtypeStruct((nr, g3), jnp.float32),
        grid=(nr // rows,),
        in_specs=[
            pl.BlockSpec((rows, hw), lambda i: (i, 0)),
            pl.BlockSpec(t1.shape, lambda i: (0, 0)),
            pl.BlockSpec(b1r.shape, lambda i: (0, 0)),
            pl.BlockSpec(t2.shape, lambda i: (0, 0)),
            pl.BlockSpec(b2r.shape, lambda i: (0, 0)),
            pl.BlockSpec(fmat.shape, lambda i: (0, 0)),
            pl.BlockSpec(bihr.shape, lambda i: (0, 0)),
        ],
        out_specs=pl.BlockSpec((rows, g3), lambda i: (i, 0)),
        compiler_params=pltpu.CompilerParams(
            dimension_semantics=("parallel",),   # megacore-shardable on v7x
            vmem_limit_bytes=48 * 1024 * 1024,   # safe on v7x (64 MiB physical)
        ),
    )(x_lm, t1, b1r, t2, b2r, fmat, bihr)


# -----------------------------------------------------------------------------
# Kernel 2: GRU recurrence (PyTorch gate order [r, z, n]) + classifier head.
# gi already contains b_ih; h and W_hh stay f32 so error does not compound.
# -----------------------------------------------------------------------------
def gru_cls_kernel(gi_ref, whh_ref, bhh_ref, w1_ref, b1_ref, w2_ref, b2_ref,
                   o_ref, h_scr, *, hidden, unroll):
    c = pl.program_id(1)
    hd = hidden
    tb = gi_ref.shape[1]

    @pl.when(c == 0)
    def _():
        h_scr[...] = jnp.zeros_like(h_scr)

    # hoisted out of the time loop
    whh = whh_ref[...]
    bhh = jnp.broadcast_to(bhh_ref[...], (tb, 3 * hd))

    def step(i, h):
        gi = gi_ref[i]                                      # (tb, 3*hd)
        gh = jnp.dot(h, whh, preferred_element_type=jnp.float32) + bhh
        r = jax.nn.sigmoid(gi[:, 0:hd] + gh[:, 0:hd])
        z = jax.nn.sigmoid(gi[:, hd:2 * hd] + gh[:, hd:2 * hd])
        n = jnp.tanh(gi[:, 2 * hd:] + r * gh[:, 2 * hd:])
        return (1.0 - z) * n + z * h

    # partial unroll lets the scheduler overlap the gi load / EUP sigmoid+tanh
    # of one step with the MXU work of the next.
    h = jax.lax.fori_loop(0, gi_ref.shape[0], step, h_scr[...], unroll=unroll)
    h_scr[...] = h

    @pl.when(c == pl.num_programs(1) - 1)
    def _():
        y = jnp.maximum(
            jnp.dot(h, w1_ref[...], preferred_element_type=jnp.float32)
            + b1_ref[...], 0.0)
        o_ref[...] = jnp.dot(y, w2_ref[...],
                             preferred_element_type=jnp.float32) + b2_ref[...]


def gru_cls(gi_tm, whh_t, bhh, fc1_wt, fc1_b, fc2_wt, fc2_b, *, hidden):
    L, B, g3 = gi_tm.shape
    tb, tchunk = _gru_tiles(L, B, hidden)
    kernel = functools.partial(gru_cls_kernel, hidden=hidden,
                               unroll=max(1, min(4, tchunk)))
    # TODO(synk): optionally keep W_hh resident in MXU weight registers via
    #             pltpu.matmul_push_rhs for very long sequences.
    return pl.pallas_call(
        kernel,
        out_shape=jax.ShapeDtypeStruct((B, 2), jnp.float32),
        grid=(B // tb, L // tchunk),
        in_specs=[
            pl.BlockSpec((tchunk, tb, g3), lambda b, c: (c, b, 0)),
            pl.BlockSpec((hidden, g3), lambda b, c: (0, 0)),
            pl.BlockSpec((1, g3), lambda b, c: (0, 0)),
            pl.BlockSpec((hidden, 64), lambda b, c: (0, 0)),
            pl.BlockSpec((1, 64), lambda b, c: (0, 0)),
            pl.BlockSpec((64, 2), lambda b, c: (0, 0)),
            pl.BlockSpec((1, 2), lambda b, c: (0, 0)),
        ],
        out_specs=pl.BlockSpec((tb, 2), lambda b, c: (b, 0)),
        scratch_shapes=[pltpu.VMEM((tb, hidden), jnp.float32)],
        compiler_params=pltpu.CompilerParams(
            # batch axis parallel (v7x TC split); recurrence axis must be serial
            dimension_semantics=("parallel", "arbitrary"),
            vmem_limit_bytes=48 * 1024 * 1024,
        ),
    )(gi_tm, whh_t, bhh, fc1_wt, fc1_b, fc2_wt, fc2_b)


# -----------------------------------------------------------------------------
# Host-side (traced-once) construction of the block-Toeplitz conv matrices and
# the fused pool+flatten+W_ih matrix.
# -----------------------------------------------------------------------------
def _build_cnn_matrices(params, H, W):
    C1, C2 = 16, 32
    HW = H * W
    hh, ww = H // 4, W // 4

    conv1_w = params["conv1_w"].astype(jnp.float32)          # (16, 1, 3, 3)
    conv1_b = params["conv1_b"].astype(jnp.float32)
    conv2_w = params["conv2_w"].astype(jnp.float32)          # (32, 16, 3, 3)
    conv2_b = params["conv2_b"].astype(jnp.float32)

    hi = jnp.arange(H)
    wi = jnp.arange(W)
    dh = hi[:, None] - hi[None, :] + 1                       # (H_in, H_out)
    dw = wi[:, None] - wi[None, :] + 1                       # (W_in, W_out)
    mask = ((dh >= 0) & (dh <= 2))[:, :, None, None] & \
           ((dw >= 0) & (dw <= 2))[None, None, :, :]         # (Hi,Ho,Wi,Wo)
    mask = mask.astype(jnp.float32)
    dh_c = jnp.clip(dh, 0, 2)
    dw_c = jnp.clip(dw, 0, 2)

    # conv1 as (HW, HW*C1): row = hi*W+wi, col = (ho*W+wo)*C1 + c1
    k1 = conv1_w[:, 0]                                        # (C1, 3, 3)
    t1 = k1[:, dh_c][:, :, :, dw_c] * mask[None]              # (C1,Hi,Ho,Wi,Wo)
    t1 = jnp.transpose(t1, (1, 3, 2, 4, 0)).reshape(HW, HW * C1)
    b1r = jnp.tile(conv1_b[None, :], (HW, 1)).reshape(1, HW * C1)

    # conv2 as (HW*C1, HW*C2): row = (hi*W+wi)*C1+c1, col = (ho*W+wo)*C2+c2
    t2 = conv2_w[:, :, dh_c][:, :, :, :, dw_c] * mask[None, None]
    t2 = jnp.transpose(t2, (2, 4, 1, 3, 5, 0)).reshape(HW * C1, HW * C2)
    b2r = jnp.tile(conv2_b[None, :], (HW, 1)).reshape(1, HW * C2)

    # Fused AdaptiveAvgPool2d((4,4)) + CHW flatten + W_ih: pooling is one-hot,
    # so F[(h*W+w)*C2+c2, :] = W_ih^T[c2*16 + bin(h,w), :] / (hh*ww)
    wih_t = jnp.transpose(params["gru_wih"]).astype(jnp.float32)   # (512, 3*128)
    bin_hw = (hi[:, None] // hh) * 4 + (wi[None, :] // ww)         # (H, W)
    gather = (jnp.arange(C2)[None, None, :] * 16
              + bin_hw[:, :, None]).reshape(-1)                    # (HW*C2,)
    fmat = wih_t[gather] * (1.0 / float(hh * ww))                  # (HW*C2, 3*128)
    bihr = params["gru_bih"].reshape(1, -1).astype(jnp.float32)

    return (t1, b1r, t2.astype(jnp.bfloat16), b2r,
            fmat.astype(jnp.bfloat16), bihr)


# -----------------------------------------------------------------------------
# Full forward pass mirroring GRUModel.forward.
# x: (B, T, P, C=1, H, W) -> logits (B, 2)
# -----------------------------------------------------------------------------
def gru_model_forward(x, params):
    B, T, P, C, H, W = x.shape
    assert C == 1 and H % 4 == 0 and W % 4 == 0
    # TODO(synk): general adaptive pooling (unequal windows) for H,W % 4 != 0.
    # TODO(synk): for larger images (H*W > 128) switch conv2 to a row-wise
    #             block-Toeplitz / im2col matmul; the full-image matrix grows
    #             as (H*W)^2.
    assert H * W <= 128
    L = T * P
    hs = 128
    G3 = 3 * hs
    HW = H * W

    t1, b1r, t2, b2r, fmat, bihr = _build_cnn_matrices(params, H, W)

    # Time-major, lane-dense image rows (row = l*B + b) so kernel 1 emits gi
    # already in (L, B, 3*hidden) order (no gi transpose between kernels).
    x_lm = jnp.transpose(x.reshape(B, L, HW), (1, 0, 2)).reshape(L * B, HW)
    x_lm = x_lm.astype(jnp.float32)

    rows = _pick_rows(L * B)
    gi_flat = cnn_gi(x_lm, t1, b1r, t2, b2r, fmat, bihr, rows=rows)   # (L*B, G3)
    gi_tm = gi_flat.reshape(L, B, G3)                                  # free reshape

    whh_t = jnp.transpose(params["gru_whh"]).astype(jnp.float32)       # (128, 384)
    bhhr = params["gru_bhh"].reshape(1, -1).astype(jnp.float32)

    logits = gru_cls(
        gi_tm, whh_t, bhhr,
        jnp.transpose(params["fc1_w"]).astype(jnp.float32),
        params["fc1_b"].reshape(1, -1).astype(jnp.float32),
        jnp.transpose(params["fc2_w"]).astype(jnp.float32),
        params["fc2_b"].reshape(1, -1).astype(jnp.float32),
        hidden=hs,
    )
    return logits


# -----------------------------------------------------------------------------
# Deterministic synthetic parameters (PyTorch-shaped).
# -----------------------------------------------------------------------------
def _uniform(key, shape, bound):
    return jax.random.uniform(key, shape, jnp.float32, -bound, bound)


def init_params(keys):
    hs = 128
    p = {}
    p["conv1_w"] = _uniform(keys[0], (16, 1, 3, 3), 1.0 / math.sqrt(1 * 9))
    p["conv1_b"] = _uniform(keys[1], (16,), 1.0 / math.sqrt(1 * 9))
    p["conv2_w"] = _uniform(keys[2], (32, 16, 3, 3), 1.0 / math.sqrt(16 * 9))
    p["conv2_b"] = _uniform(keys[3], (32,), 1.0 / math.sqrt(16 * 9))
    p["gru_wih"] = _uniform(keys[4], (3 * hs, 512), 1.0 / math.sqrt(hs))
    p["gru_whh"] = _uniform(keys[5], (3 * hs, hs), 1.0 / math.sqrt(hs))
    p["gru_bih"] = _uniform(keys[6], (3 * hs,), 1.0 / math.sqrt(hs))
    p["gru_bhh"] = _uniform(keys[7], (3 * hs,), 1.0 / math.sqrt(hs))
    p["fc1_w"] = _uniform(keys[8], (64, 128), 1.0 / math.sqrt(128))
    p["fc1_b"] = _uniform(keys[9], (64,), 1.0 / math.sqrt(128))
    p["fc2_w"] = _uniform(keys[10], (2, 64), 1.0 / math.sqrt(64))
    p["fc2_b"] = _uniform(keys[11], (2,), 1.0 / math.sqrt(64))
    return p


if __name__ == "__main__":
    key = jax.random.PRNGKey(0)
    keys = jax.random.split(key, 13)

    B, T, P, C, H, W = 2, 2, 2, 1, 8, 8
    x = jax.random.normal(keys[0], (B, T, P, C, H, W), jnp.float32)
    params = init_params(keys[1:])

    fwd = jax.jit(gru_model_forward)
    out = jax.block_until_ready(fwd(x, params))
    assert out.shape == (B, 2), out.shape
    assert bool(jnp.all(jnp.isfinite(out)))
    print("KERNEL_OK")
</pallas_src>

<mosaic_0001>
module attributes {stable_mosaic.version = 11 : i64} {
  func.func @cnn_gi_kernel(%arg0: i32, %arg1: memref<8x64xf32, #tpu.memory_space<vmem>>, %arg2: memref<64x1024xf32, #tpu.memory_space<vmem>>, %arg3: memref<1x1024xf32, #tpu.memory_space<vmem>>, %arg4: memref<1024x2048xbf16, #tpu.memory_space<vmem>>, %arg5: memref<1x2048xf32, #tpu.memory_space<vmem>>, %arg6: memref<2048x384xbf16, #tpu.memory_space<vmem>>, %arg7: memref<1x384xf32, #tpu.memory_space<vmem>>, %arg8: memref<8x384xf32, #tpu.memory_space<vmem>>) attributes {dimension_semantics = [#tpu.dimension_semantics<parallel>], iteration_bounds = array<i64: 1>, scalar_prefetch = 0 : i64, scratch_operands = 0 : i64, tpu.core_type = #tpu.core_type<tc>, window_params = [{transform_indices = @transform_0, window_bounds = array<i64: 8, 64>}, {pipeline_mode = #tpu.pipeline_mode<synchronous>, transform_indices = @transform_1, window_bounds = array<i64: 64, 1024>}, {pipeline_mode = #tpu.pipeline_mode<synchronous>, transform_indices = @transform_2, window_bounds = array<i64: 1, 1024>}, {pipeline_mode = #tpu.pipeline_mode<synchronous>, transform_indices = @transform_3, window_bounds = array<i64: 1024, 2048>}, {pipeline_mode = #tpu.pipeline_mode<synchronous>, transform_indices = @transform_4, window_bounds = array<i64: 1, 2048>}, {pipeline_mode = #tpu.pipeline_mode<synchronous>, transform_indices = @transform_5, window_bounds = array<i64: 2048, 384>}, {pipeline_mode = #tpu.pipeline_mode<synchronous>, transform_indices = @transform_6, window_bounds = array<i64: 1, 384>}, {transform_indices = @transform_7, window_bounds = array<i64: 8, 384>}]} {
    %c0 = arith.constant 0 : index
    %c0_0 = arith.constant 0 : index
    %0 = vector.load %arg1[%c0, %c0_0] : memref<8x64xf32, #tpu.memory_space<vmem>>, vector<8x64xf32>
    %c0_1 = arith.constant 0 : index
    %c0_2 = arith.constant 0 : index
    %1 = vector.load %arg2[%c0_1, %c0_2] : memref<64x1024xf32, #tpu.memory_space<vmem>>, vector<64x1024xf32>
    %cst = arith.constant dense<0.000000e+00> : vector<8x1024xf32>
    %2 = tpu.matmul %0, %1, %cst {dimension_numbers = #tpu.dot_dimension_numbers<[1], [0], [0], [1], [0, 0, 1, 1], [], []>} : vector<8x64xf32>, vector<64x1024xf32>, vector<8x1024xf32> -> vector<8x1024xf32>
    %c0_3 = arith.constant 0 : index
    %c0_4 = arith.constant 0 : index
    %3 = vector.load %arg3[%c0_3, %c0_4] : memref<1x1024xf32, #tpu.memory_space<vmem>>, vector<1x1024xf32>
    %4 = vector.broadcast %3 : vector<1x1024xf32> to vector<8x1024xf32>
    %5 = arith.addf %2, %4 : vector<8x1024xf32>
    %cst_5 = arith.constant 0.000000e+00 : f32
    %6 = vector.broadcast %cst_5 : f32 to vector<8x1024xf32>
    %7 = arith.maximumf %5, %6 : vector<8x1024xf32>
    %8 = arith.truncf %7 : vector<8x1024xf32> to vector<8x1024xbf16>
    %c0_6 = arith.constant 0 : index
    %c0_7 = arith.constant 0 : index
    %9 = vector.load %arg4[%c0_6, %c0_7] : memref<1024x2048xbf16, #tpu.memory_space<vmem>>, vector<1024x2048xbf16>
    %cst_8 = arith.constant dense<0.000000e+00> : vector<8x2048xf32>
    %10 = tpu.matmul %8, %9, %cst_8 {dimension_numbers = #tpu.dot_dimension_numbers<[1], [0], [0], [1], [0, 0, 1, 1], [], []>} : vector<8x1024xbf16>, vector<1024x2048xbf16>, vector<8x2048xf32> -> vector<8x2048xf32>
    %c0_9 = arith.constant 0 : index
    %c0_10 = arith.constant 0 : index
    %11 = vector.load %arg5[%c0_9, %c0_10] : memref<1x2048xf32, #tpu.memory_space<vmem>>, vector<1x2048xf32>
    %12 = vector.broadcast %11 : vector<1x2048xf32> to vector<8x2048xf32>
    %13 = arith.addf %10, %12 : vector<8x2048xf32>
    %cst_11 = arith.constant 0.000000e+00 : f32
    %14 = vector.broadcast %cst_11 : f32 to vector<8x2048xf32>
    %15 = arith.maximumf %13, %14 : vector<8x2048xf32>
    %16 = arith.truncf %15 : vector<8x2048xf32> to vector<8x2048xbf16>
    %c0_12 = arith.constant 0 : index
    %c0_13 = arith.constant 0 : index
    %17 = vector.load %arg6[%c0_12, %c0_13] : memref<2048x384xbf16, #tpu.memory_space<vmem>>, vector<2048x384xbf16>
    %cst_14 = arith.constant dense<0.000000e+00> : vector<8x384xf32>
    %18 = tpu.matmul %16, %17, %cst_14 {dimension_numbers = #tpu.dot_dimension_numbers<[1], [0], [0], [1], [0, 0, 1, 1], [], []>} : vector<8x2048xbf16>, vector<2048x384xbf16>, vector<8x384xf32> -> vector<8x384xf32>
    %c0_15 = arith.constant 0 : index
    %c0_16 = arith.constant 0 : index
    %19 = vector.load %arg7[%c0_15, %c0_16] : memref<1x384xf32, #tpu.memory_space<vmem>>, vector<1x384xf32>
    %20 = vector.broadcast %19 : vector<1x384xf32> to vector<8x384xf32>
    %21 = arith.addf %18, %20 : vector<8x384xf32>
    %c0_17 = arith.constant 0 : index
    %c0_18 = arith.constant 0 : index
    %22 = vector.load %arg8[%c0_17, %c0_18] : memref<8x384xf32, #tpu.memory_space<vmem>>, vector<8x384xf32>
    tpu.vector_store %arg8[%c0_17, %c0_18], %21 {strides = array<i32>} : memref<8x384xf32, #tpu.memory_space<vmem>>, vector<8x384xf32>,
    return
  }
  func.func @transform_0(%arg0: i32) -> (i32, i32) {
    %c0_i32 = arith.constant 0 : i32
    %c0_i32_0 = arith.constant 0 : i32
    return %arg0, %c0_i32 : i32, i32
  }
  func.func @transform_1(%arg0: i32) -> (i32, i32) {
    %c0_i32 = arith.constant 0 : i32
    %c0_i32_0 = arith.constant 0 : i32
    %c0_i32_1 = arith.constant 0 : i32
    return %c0_i32, %c0_i32_0 : i32, i32
  }
  func.func @transform_2(%arg0: i32) -> (i32, i32) {
    %c0_i32 = arith.constant 0 : i32
    %c0_i32_0 = arith.constant 0 : i32
    %c0_i32_1 = arith.constant 0 : i32
    return %c0_i32, %c0_i32_0 : i32, i32
  }
  func.func @transform_3(%arg0: i32) -> (i32, i32) {
    %c0_i32 = arith.constant 0 : i32
    %c0_i32_0 = arith.constant 0 : i32
    %c0_i32_1 = arith.constant 0 : i32
    return %c0_i32, %c0_i32_0 : i32, i32
  }
  func.func @transform_4(%arg0: i32) -> (i32, i32) {
    %c0_i32 = arith.constant 0 : i32
    %c0_i32_0 = arith.constant 0 : i32
    %c0_i32_1 = arith.constant 0 : i32
    return %c0_i32, %c0_i32_0 : i32, i32
  }
  func.func @transform_5(%arg0: i32) -> (i32, i32) {
    %c0_i32 = arith.constant 0 : i32
    %c0_i32_0 = arith.constant 0 : i32
    %c0_i32_1 = arith.constant 0 : i32
    return %c0_i32, %c0_i32_0 : i32, i32
  }
  func.func @transform_6(%arg0: i32) -> (i32, i32) {
    %c0_i32 = arith.constant 0 : i32
    %c0_i32_0 = arith.constant 0 : i32
    %c0_i32_1 = arith.constant 0 : i32
    return %c0_i32, %c0_i32_0 : i32, i32
  }
  func.func @transform_7(%arg0: i32) -> (i32, i32) {
    %c0_i32 = arith.constant 0 : i32
    %c0_i32_0 = arith.constant 0 : i32
    return %arg0, %c0_i32 : i32, i32
  }
}

module attributes {stable_mosaic.version = 11 : i64} {
  func.func @gru_cls_kernel(%arg0: i32, %arg1: i32, %arg2: memref<4x2x384xf32, #tpu.memory_space<vmem>>, %arg3: memref<128x384xf32, #tpu.memory_space<vmem>>, %arg4: memref<1x384xf32, #tpu.memory_space<vmem>>, %arg5: memref<128x64xf32, #tpu.memory_space<vmem>>, %arg6: memref<1x64xf32, #tpu.memory_space<vmem>>, %arg7: memref<64x2xf32, #tpu.memory_space<vmem>>, %arg8: memref<1x2xf32, #tpu.memory_space<vmem>>, %arg9: memref<2x2xf32, #tpu.memory_space<vmem>>, %arg10: memref<2x128xf32, #tpu.memory_space<vmem>>) attributes {dimension_semantics = [#tpu.dimension_semantics<parallel>, #tpu.dimension_semantics<arbitrary>], iteration_bounds = array<i64: 1, 1>, scalar_prefetch = 0 : i64, scratch_operands = 1 : i64, tpu.core_type = #tpu.core_type<tc>, window_params = [{transform_indices = @transform_0, window_bounds = array<i64: 4, 2, 384>}, {pipeline_mode = #tpu.pipeline_mode<synchronous>, transform_indices = @transform_1, window_bounds = array<i64: 128, 384>}, {pipeline_mode = #tpu.pipeline_mode<synchronous>, transform_indices = @transform_2, window_bounds = array<i64: 1, 384>}, {pipeline_mode = #tpu.pipeline_mode<synchronous>, transform_indices = @transform_3, window_bounds = array<i64: 128, 64>}, {pipeline_mode = #tpu.pipeline_mode<synchronous>, transform_indices = @transform_4, window_bounds = array<i64: 1, 64>}, {pipeline_mode = #tpu.pipeline_mode<synchronous>, transform_indices = @transform_5, window_bounds = array<i64: 64, 2>}, {pipeline_mode = #tpu.pipeline_mode<synchronous>, transform_indices = @transform_6, window_bounds = array<i64: 1, 2>}, {transform_indices = @transform_7, window_bounds = array<i64: 2, 2>}]} {
    %c0_i32 = arith.constant 0 : i32
    %0 = arith.cmpi eq, %arg1, %c0_i32 : i32
    %1 = arith.extui %0 : i1 to i32
    %c0_i32_0 = arith.constant 0 : i32
    %2 = arith.cmpi ne, %1, %c0_i32_0 : i32
    scf.if %2 {
      %cst_34 = arith.constant 0.000000e+00 : f32
      %136 = vector.broadcast %cst_34 : f32 to vector<2x128xf32>
      %c0_35 = arith.constant 0 : index
      %c0_36 = arith.constant 0 : index
      %137 = vector.load %arg10[%c0_35, %c0_36] : memref<2x128xf32, #tpu.memory_space<vmem>>, vector<2x128xf32>
      tpu.vector_store %arg10[%c0_35, %c0_36], %136 {strides = array<i32>} : memref<2x128xf32, #tpu.memory_space<vmem>>, vector<2x128xf32>,
    } else {
    }
    %c0 = arith.constant 0 : index
    %c0_1 = arith.constant 0 : index
    %3 = vector.load %arg3[%c0, %c0_1] : memref<128x384xf32, #tpu.memory_space<vmem>>, vector<128x384xf32>
    %c0_2 = arith.constant 0 : index
    %c0_3 = arith.constant 0 : index
    %4 = vector.load %arg4[%c0_2, %c0_3] : memref<1x384xf32, #tpu.memory_space<vmem>>, vector<1x384xf32>
    %5 = vector.shape_cast %4 : vector<1x384xf32> to vector<1x384xf32>
    %6 = vector.broadcast %5 : vector<1x384xf32> to vector<2x384xf32>
    %c0_4 = arith.constant 0 : index
    %c0_5 = arith.constant 0 : index
    %7 = vector.load %arg10[%c0_4, %c0_5] : memref<2x128xf32, #tpu.memory_space<vmem>>, vector<2x128xf32>
    %c0_i32_6 = arith.constant 0 : i32
    %8 = arith.index_cast %c0_i32_6 : i32 to index
    %c0_7 = arith.constant 0 : index
    %c0_8 = arith.constant 0 : index
    %9 = vector.load %arg2[%8, %c0_7, %c0_8] : memref<4x2x384xf32, #tpu.memory_space<vmem>>, vector<1x2x384xf32>
    %10 = vector.shape_cast %9 : vector<1x2x384xf32> to vector<2x384xf32>
    %cst = arith.constant dense<0.000000e+00> : vector<2x384xf32>
    %11 = tpu.matmul %7, %3, %cst {dimension_numbers = #tpu.dot_dimension_numbers<[1], [0], [0], [1], [0, 0, 1, 1], [], []>} : vector<2x128xf32>, vector<128x384xf32>, vector<2x384xf32> -> vector<2x384xf32>
    %12 = arith.addf %11, %6 : vector<2x384xf32>
    %13 = vector.extract_strided_slice %10 {offsets = [0, 0], sizes = [2, 128], strides = [1, 1]} : vector<2x384xf32> to vector<2x128xf32>
    %14 = vector.extract_strided_slice %12 {offsets = [0, 0], sizes = [2, 128], strides = [1, 1]} : vector<2x384xf32> to vector<2x128xf32>
    %15 = arith.addf %13, %14 : vector<2x128xf32>
    %16 = arith.negf %15 : vector<2x128xf32>
    %17 = math.exp %16 : vector<2x128xf32>
    %cst_9 = arith.constant 1.000000e+00 : f32
    %18 = vector.broadcast %cst_9 : f32 to vector<2x128xf32>
    %19 = arith.addf %18, %17 : vector<2x128xf32>
    %20 = arith.divf %18, %19 : vector<2x128xf32>
    %21 = vector.extract_strided_slice %10 {offsets = [0, 128], sizes = [2, 128], strides = [1, 1]} : vector<2x384xf32> to vector<2x128xf32>
    %22 = vector.extract_strided_slice %12 {offsets = [0, 128], sizes = [2, 128], strides = [1, 1]} : vector<2x384xf32> to vector<2x128xf32>
    %23 = arith.addf %21, %22 : vector<2x128xf32>
    %24 = arith.negf %23 : vector<2x128xf32>
    %25 = math.exp %24 : vector<2x128xf32>
    %cst_10 = arith.constant 1.000000e+00 : f32
    %26 = vector.broadcast %cst_10 : f32 to vector<2x128xf32>
    %27 = arith.addf %26, %25 : vector<2x128xf32>
    %28 = arith.divf %26, %27 : vector<2x128xf32>
    %29 = vector.extract_strided_slice %10 {offsets = [0, 256], sizes = [2, 128], strides = [1, 1]} : vector<2x384xf32> to vector<2x128xf32>
    %30 = vector.extract_strided_slice %12 {offsets = [0, 256], sizes = [2, 128], strides = [1, 1]} : vector<2x384xf32> to vector<2x128xf32>
    %31 = arith.mulf %20, %30 : vector<2x128xf32>
    %32 = arith.addf %29, %31 : vector<2x128xf32>
    %33 = math.tanh %32 : vector<2x128xf32>
    %cst_11 = arith.constant 1.000000e+00 : f32
    %34 = vector.broadcast %cst_11 : f32 to vector<2x128xf32>
    %35 = arith.subf %34, %28 : vector<2x128xf32>
    %36 = arith.mulf %35, %33 : vector<2x128xf32>
    %37 = arith.mulf %28, %7 : vector<2x128xf32>
    %38 = arith.addf %36, %37 : vector<2x128xf32>
    %c1_i32 = arith.constant 1 : i32
    %39 = arith.index_cast %c1_i32 : i32 to index
    %c0_12 = arith.constant 0 : index
    %c0_13 = arith.constant 0 : index
    %40 = vector.load %arg2[%39, %c0_12, %c0_13] : memref<4x2x384xf32, #tpu.memory_space<vmem>>, vector<1x2x384xf32>
    %41 = vector.shape_cast %40 : vector<1x2x384xf32> to vector<2x384xf32>
    %cst_14 = arith.constant dense<0.000000e+00> : vector<2x384xf32>
    %42 = tpu.matmul %38, %3, %cst_14 {dimension_numbers = #tpu.dot_dimension_numbers<[1], [0], [0], [1], [0, 0, 1, 1], [], []>} : vector<2x128xf32>, vector<128x384xf32>, vector<2x384xf32> -> vector<2x384xf32>
    %43 = arith.addf %42, %6 : vector<2x384xf32>
    %44 = vector.extract_strided_slice %41 {offsets = [0, 0], sizes = [2, 128], strides = [1, 1]} : vector<2x384xf32> to vector<2x128xf32>
    %45 = vector.extract_strided_slice %43 {offsets = [0, 0], sizes = [2, 128], strides = [1, 1]} : vector<2x384xf32> to vector<2x128xf32>
    %46 = arith.addf %44, %45 : vector<2x128xf32>
    %47 = arith.negf %46 : vector<2x128xf32>
    %48 = math.exp %47 : vector<2x128xf32>
    %cst_15 = arith.constant 1.000000e+00 : f32
    %49 = vector.broadcast %cst_15 : f32 to vector<2x128xf32>
    %50 = arith.addf %49, %48 : vector<2x128xf32>
    %51 = arith.divf %49, %50 : vector<2x128xf32>
    %52 = vector.extract_strided_slice %41 {offsets = [0, 128], sizes = [2, 128], strides = [1, 1]} : vector<2x384xf32> to vector<2x128xf32>
    %53 = vector.extract_strided_slice %43 {offsets = [0, 128], sizes = [2, 128], strides = [1, 1]} : vector<2x384xf32> to vector<2x128xf32>
    %54 = arith.addf %52, %53 : vector<2x128xf32>
    %55 = arith.negf %54 : vector<2x128xf32>
    %56 = math.exp %55 : vector<2x128xf32>
    %cst_16 = arith.constant 1.000000e+00 : f32
    %57 = vector.broadcast %cst_16 : f32 to vector<2x128xf32>
    %58 = arith.addf %57, %56 : vector<2x128xf32>
    %59 = arith.divf %57, %58 : vector<2x128xf32>
    %60 = vector.extract_strided_slice %41 {offsets = [0, 256], sizes = [2, 128], strides = [1, 1]} : vector<2x384xf32> to vector<2x128xf32>
    %61 = vector.extract_strided_slice %43 {offsets = [0, 256], sizes = [2, 128], strides = [1, 1]} : vector<2x384xf32> to vector<2x128xf32>
    %62 = arith.mulf %51, %61 : vector<2x128xf32>
    %63 = arith.addf %60, %62 : vector<2x128xf32>
    %64 = math.tanh %63 : vector<2x128xf32>
    %cst_17 = arith.constant 1.000000e+00 : f32
    %65 = vector.broadcast %cst_17 : f32 to vector<2x128xf32>
    %66 = arith.subf %65, %59 : vector<2x128xf32>
    %67 = arith.mulf %66, %64 : vector<2x128xf32>
    %68 = arith.mulf %59, %38 : vector<2x128xf32>
    %69 = arith.addf %67, %68 : vector<2x128xf32>
    %c2_i32 = arith.constant 2 : i32
    %70 = arith.index_cast %c2_i32 : i32 to index
    %c0_18 = arith.constant 0 : index
    %c0_19 = arith.constant 0 : index
    %71 = vector.load %arg2[%70, %c0_18, %c0_19] : memref<4x2x384xf32, #tpu.memory_space<vmem>>, vector<1x2x384xf32>
    %72 = vector.shape_cast %71 : vector<1x2x384xf32> to vector<2x384xf32>
    %cst_20 = arith.constant dense<0.000000e+00> : vector<2x384xf32>
    %73 = tpu.matmul %69, %3, %cst_20 {dimension_numbers = #tpu.dot_dimension_numbers<[1], [0], [0], [1], [0, 0, 1, 1], [], []>} : vector<2x128xf32>, vector<128x384xf32>, vector<2x384xf32> -> vector<2x384xf32>
    %74 = arith.addf %73, %6 : vector<2x384xf32>
    %75 = vector.extract_strided_slice %72 {offsets = [0, 0], sizes = [2, 128], strides = [1, 1]} : vector<2x384xf32> to vector<2x128xf32>
    %76 = vector.extract_strided_slice %74 {offsets = [0, 0], sizes = [2, 128], strides = [1, 1]} : vector<2x384xf32> to vector<2x128xf32>
    %77 = arith.addf %75, %76 : vector<2x128xf32>
    %78 = arith.negf %77 : vector<2x128xf32>
    %79 = math.exp %78 : vector<2x128xf32>
    %cst_21 = arith.constant 1.000000e+00 : f32
    %80 = vector.broadcast %cst_21 : f32 to vector<2x128xf32>
    %81 = arith.addf %80, %79 : vector<2x128xf32>
    %82 = arith.divf %80, %81 : vector<2x128xf32>
    %83 = vector.extract_strided_slice %72 {offsets = [0, 128], sizes = [2, 128], strides = [1, 1]} : vector<2x384xf32> to vector<2x128xf32>
    %84 = vector.extract_strided_slice %74 {offsets = [0, 128], sizes = [2, 128], strides = [1, 1]} : vector<2x384xf32> to vector<2x128xf32>
    %85 = arith.addf %83, %84 : vector<2x128xf32>
    %86 = arith.negf %85 : vector<2x128xf32>
    %87 = math.exp %86 : vector<2x128xf32>
    %cst_22 = arith.constant 1.000000e+00 : f32
    %88 = vector.broadcast %cst_22 : f32 to vector<2x128xf32>
    %89 = arith.addf %88, %87 : vector<2x128xf32>
    %90 = arith.divf %88, %89 : vector<2x128xf32>
    %91 = vector.extract_strided_slice %72 {offsets = [0, 256], sizes = [2, 128], strides = [1, 1]} : vector<2x384xf32> to vector<2x128xf32>
    %92 = vector.extract_strided_slice %74 {offsets = [0, 256], sizes = [2, 128], strides = [1, 1]} : vector<2x384xf32> to vector<2x128xf32>
    %93 = arith.mulf %82, %92 : vector<2x128xf32>
    %94 = arith.addf %91, %93 : vector<2x128xf32>
    %95 = math.tanh %94 : vector<2x128xf32>
    %cst_23 = arith.constant 1.000000e+00 : f32
    %96 = vector.broadcast %cst_23 : f32 to vector<2x128xf32>
    %97 = arith.subf %96, %90 : vector<2x128xf32>
    %98 = arith.mulf %97, %95 : vector<2x128xf32>
    %99 = arith.mulf %90, %69 : vector<2x128xf32>
    %100 = arith.addf %98, %99 : vector<2x128xf32>
    %c3_i32 = arith.constant 3 : i32
    %101 = arith.index_cast %c3_i32 : i32 to index
    %c0_24 = arith.constant 0 : index
    %c0_25 = arith.constant 0 : index
    %102 = vector.load %arg2[%101, %c0_24, %c0_25] : memref<4x2x384xf32, #tpu.memory_space<vmem>>, vector<1x2x384xf32>
    %103 = vector.shape_cast %102 : vector<1x2x384xf32> to vector<2x384xf32>
    %cst_26 = arith.constant dense<0.000000e+00> : vector<2x384xf32>
    %104 = tpu.matmul %100, %3, %cst_26 {dimension_numbers = #tpu.dot_dimension_numbers<[1], [0], [0], [1], [0, 0, 1, 1], [], []>} : vector<2x128xf32>, vector<128x384xf32>, vector<2x384xf32> -> vector<2x384xf32>
    %105 = arith.addf %104, %6 : vector<2x384xf32>
    %106 = vector.extract_strided_slice %103 {offsets = [0, 0], sizes = [2, 128], strides = [1, 1]} : vector<2x384xf32> to vector<2x128xf32>
    %107 = vector.extract_strided_slice %105 {offsets = [0, 0], sizes = [2, 128], strides = [1, 1]} : vector<2x384xf32> to vector<2x128xf32>
    %108 = arith.addf %106, %107 : vector<2x128xf32>
    %109 = arith.negf %108 : vector<2x128xf32>
    %110 = math.exp %109 : vector<2x128xf32>
    %cst_27 = arith.constant 1.000000e+00 : f32
    %111 = vector.broadcast %cst_27 : f32 to vector<2x128xf32>
    %112 = arith.addf %111, %110 : vector<2x128xf32>
    %113 = arith.divf %111, %112 : vector<2x128xf32>
    %114 = vector.extract_strided_slice %103 {offsets = [0, 128], sizes = [2, 128], strides = [1, 1]} : vector<2x384xf32> to vector<2x128xf32>
    %115 = vector.extract_strided_slice %105 {offsets = [0, 128], sizes = [2, 128], strides = [1, 1]} : vector<2x384xf32> to vector<2x128xf32>
    %116 = arith.addf %114, %115 : vector<2x128xf32>
    %117 = arith.negf %116 : vector<2x128xf32>
    %118 = math.exp %117 : vector<2x128xf32>
    %cst_28 = arith.constant 1.000000e+00 : f32
    %119 = vector.broadcast %cst_28 : f32 to vector<2x128xf32>
    %120 = arith.addf %119, %118 : vector<2x128xf32>
    %121 = arith.divf %119, %120 : vector<2x128xf32>
    %122 = vector.extract_strided_slice %103 {offsets = [0, 256], sizes = [2, 128], strides = [1, 1]} : vector<2x384xf32> to vector<2x128xf32>
    %123 = vector.extract_strided_slice %105 {offsets = [0, 256], sizes = [2, 128], strides = [1, 1]} : vector<2x384xf32> to vector<2x128xf32>
    %124 = arith.mulf %113, %123 : vector<2x128xf32>
    %125 = arith.addf %122, %124 : vector<2x128xf32>
    %126 = math.tanh %125 : vector<2x128xf32>
    %cst_29 = arith.constant 1.000000e+00 : f32
    %127 = vector.broadcast %cst_29 : f32 to vector<2x128xf32>
    %128 = arith.subf %127, %121 : vector<2x128xf32>
    %129 = arith.mulf %128, %126 : vector<2x128xf32>
    %130 = arith.mulf %121, %100 : vector<2x128xf32>
    %131 = arith.addf %129, %130 : vector<2x128xf32>
    %c4_i32 = arith.constant 4 : i32
    %c0_30 = arith.constant 0 : index
    %c0_31 = arith.constant 0 : index
    %132 = vector.load %arg10[%c0_30, %c0_31] : memref<2x128xf32, #tpu.memory_space<vmem>>, vector<2x128xf32>
    tpu.vector_store %arg10[%c0_30, %c0_31], %131 {strides = array<i32>} : memref<2x128xf32, #tpu.memory_space<vmem>>, vector<2x128xf32>,
    %c0_i32_32 = arith.constant 0 : i32
    %133 = arith.cmpi eq, %arg1, %c0_i32_32 : i32
    %134 = arith.extui %133 : i1 to i32
    %c0_i32_33 = arith.constant 0 : i32
    %135 = arith.cmpi ne, %134, %c0_i32_33 : i32
    scf.if %135 {
      %c0_34 = arith.constant 0 : index
      %c0_35 = arith.constant 0 : index
      %136 = vector.load %arg5[%c0_34, %c0_35] : memref<128x64xf32, #tpu.memory_space<vmem>>, vector<128x64xf32>
      %cst_36 = arith.constant dense<0.000000e+00> : vector<2x64xf32>
      %137 = tpu.matmul %131, %136, %cst_36 {dimension_numbers = #tpu.dot_dimension_numbers<[1], [0], [0], [1], [0, 0, 1, 1], [], []>} : vector<2x128xf32>, vector<128x64xf32>, vector<2x64xf32> -> vector<2x64xf32>
      %c0_37 = arith.constant 0 : index
      %c0_38 = arith.constant 0 : index
      %138 = vector.load %arg6[%c0_37, %c0_38] : memref<1x64xf32, #tpu.memory_space<vmem>>, vector<1x64xf32>
      %139 = vector.broadcast %138 : vector<1x64xf32> to vector<2x64xf32>
      %140 = arith.addf %137, %139 : vector<2x64xf32>
      %cst_39 = arith.constant 0.000000e+00 : f32
      %141 = vector.broadcast %cst_39 : f32 to vector<2x64xf32>
      %142 = arith.maximumf %140, %141 : vector<2x64xf32>
      %c0_40 = arith.constant 0 : index
      %c0_41 = arith.constant 0 : index
      %143 = vector.load %arg7[%c0_40, %c0_41] : memref<64x2xf32, #tpu.memory_space<vmem>>, vector<64x2xf32>
      %cst_42 = arith.constant dense<0.000000e+00> : vector<2x2xf32>
      %144 = tpu.matmul %142, %143, %cst_42 {dimension_numbers = #tpu.dot_dimension_numbers<[1], [0], [0], [1], [0, 0, 1, 1], [], []>} : vector<2x64xf32>, vector<64x2xf32>, vector<2x2xf32> -> vector<2x2xf32>
      %c0_43 = arith.constant 0 : index
      %c0_44 = arith.constant 0 : index
      %145 = vector.load %arg8[%c0_43, %c0_44] : memref<1x2xf32, #tpu.memory_space<vmem>>, vector<1x2xf32>
      %146 = vector.broadcast %145 : vector<1x2xf32> to vector<2x2xf32>
      %147 = arith.addf %144, %146 : vector<2x2xf32>
      %c0_45 = arith.constant 0 : index
      %c0_46 = arith.constant 0 : index
      %148 = vector.load %arg9[%c0_45, %c0_46] : memref<2x2xf32, #tpu.memory_space<vmem>>, vector<2x2xf32>
      tpu.vector_store %arg9[%c0_45, %c0_46], %147 {strides = array<i32>} : memref<2x2xf32, #tpu.memory_space<vmem>>, vector<2x2xf32>,
    } else {
    }
    return
  }
  func.func @transform_0(%arg0: i32, %arg1: i32) -> (i32, i32, i32) {
    %c0_i32 = arith.constant 0 : i32
    %c0_i32_0 = arith.constant 0 : i32
    return %arg1, %arg0, %c0_i32 : i32, i32, i32
  }
  func.func @transform_1(%arg0: i32, %arg1: i32) -> (i32, i32) {
    %c0_i32 = arith.constant 0 : i32
    %c0_i32_0 = arith.constant 0 : i32
    %c0_i32_1 = arith.constant 0 : i32
    return %c0_i32, %c0_i32_0 : i32, i32
  }
  func.func @transform_2(%arg0: i32, %arg1: i32) -> (i32, i32) {
    %c0_i32 = arith.constant 0 : i32
    %c0_i32_0 = arith.constant 0 : i32
    %c0_i32_1 = arith.constant 0 : i32
    return %c0_i32, %c0_i32_0 : i32, i32
  }
  func.func @transform_3(%arg0: i32, %arg1: i32) -> (i32, i32) {
    %c0_i32 = arith.constant 0 : i32
    %c0_i32_0 = arith.constant 0 : i32
    %c0_i32_1 = arith.constant 0 : i32
    return %c0_i32, %c0_i32_0 : i32, i32
  }
  func.func @transform_4(%arg0: i32, %arg1: i32) -> (i32, i32) {
    %c0_i32 = arith.constant 0 : i32
    %c0_i32_0 = arith.constant 0 : i32
    %c0_i32_1 = arith.constant 0 : i32
    return %c0_i32, %c0_i32_0 : i32, i32
  }
  func.func @transform_5(%arg0: i32, %arg1: i32) -> (i32, i32) {
    %c0_i32 = arith.constant 0 : i32
    %c0_i32_0 = arith.constant 0 : i32
    %c0_i32_1 = arith.constant 0 : i32
    return %c0_i32, %c0_i32_0 : i32, i32
  }
  func.func @transform_6(%arg0: i32, %arg1: i32) -> (i32, i32) {
    %c0_i32 = arith.constant 0 : i32
    %c0_i32_0 = arith.constant 0 : i32
    %c0_i32_1 = arith.constant 0 : i32
    return %c0_i32, %c0_i32_0 : i32, i32
  }
  func.func @transform_7(%arg0: i32, %arg1: i32) -> (i32, i32) {
    %c0_i32 = arith.constant 0 : i32
    %c0_i32_0 = arith.constant 0 : i32
    return %arg0, %c0_i32 : i32, i32
  }
}

</mosaic_0001>

<bundles_post_ra>
// kernel: tile.14
= control target key start
LH: loop header
LB: loop body
LE: loop exit
PB: predicated region body
PF: predicated region fallthrough
CT: control target
= control target key end

     0   :  { %s64_s0 = inlined_call_operand.vmem [shape: f32[32], index: 0, kind: input, shape index: {}]   ;;  %s65_s1 = inlined_call_operand.vmem [shape: f32[64,1,1,32], index: 1, kind: output, shape index: {}]  }
   0x1   :  { %v4_v0 = vld [vmem:[%s64_s0] ss:$0 sm:$0xff] }
   0x2   :  { %5 = vst [vmem:[%s65_s1] sm:$0xff] %v4_v0  ;;  %20 = vst [vmem:[%s65_s1 + $0x8] sm:$0xff] %v4_v0 }
   0x3   :  { %21 = vst [vmem:[%s65_s1 + $0x10] sm:$0xff] %v4_v0  ;;  %22 = vst [vmem:[%s65_s1 + $0x18] sm:$0xff] %v4_v0 }
   0x4   :  { %23 = vst [vmem:[%s65_s1 + $0x20] sm:$0xff] %v4_v0  ;;  %24 = vst [vmem:[%s65_s1 + $0x28] sm:$0xff] %v4_v0 }
   0x5   :  { %25 = vst [vmem:[%s65_s1 + $0x30] sm:$0xff] %v4_v0  ;;  %26 = vst [vmem:[%s65_s1 + $0x38] sm:$0xff] %v4_v0 }

// kernel: tile.15
= control target key start
LH: loop header
LB: loop body
LE: loop exit
PB: predicated region body
PF: predicated region fallthrough
CT: control target
= control target key end

     0   :  { %s195_s10 = smov 64   ;;  %s196_s11 = smov 96   ;;  %vm3_vm0 = vcmask 261120   ;;  %vm17_vm1 = vcmask 1048320   ;;  %vm33_vm2 = vcmask 785920   ;;  %vm49_vm3 = vcmask 523520   ;;  %s280_s0 = inlined_call_operand.vmem [shape: f32[64,1,1,32], index: 0, kind: input, shape index: {}]   ;;  %s281_s1 = inlined_call_operand.vmem [shape: f32[1,2048], index: 1, kind: output, shape index: {}]  }
   0x1   :  { %v173_v0 = vld [vmem:[%s280_s0 + $0x2] ss:$4 sm:$0xff]   ;;  %v171_v1 = vld [vmem:[%s280_s0 + $0x3] ss:$4 sm:$0xff]   ;;  %v2_v4 = vld [vmem:[%s280_s0] ss:$4 sm:$0xff]  }
   0x2   :  { %31 = vrot.lane.b32.xlu1 %v173_v0, %s195_s10  ;;  %15 = vrot.lane.b32.xlu0 %v171_v1, %s196_s11  ;;  %v174_v2 = vld [vmem:[%s280_s0 + $0x22] ss:$4 sm:$0xff]   ;;  %v172_v3 = vld [vmem:[%s280_s0 + $0x23] ss:$4 sm:$0xff]  }
   0x3   :  { %v170_v5 = vld [vmem:[%s280_s0 + $0x20] ss:$4 sm:$0xff]   ;;  %4 = vst.msk [vmem:[#allocation0] ss:$8 sm:$0xf] %vm3_vm0, %v2_v4  }
   0x4   :  { %5 = vst.msk [vmem:[#allocation0] ss:$8 sm:$0xf0] %vm3_vm0, %v2_v4   ;;  %10 = vst.msk [vmem:[#allocation0 + $0x40] ss:$8 sm:$0xf] %vm3_vm0, %v170_v5  }
   0x5   :  { %12 = vst.msk [vmem:[#allocation0 + $0x40] ss:$8 sm:$0xf0] %vm3_vm0, %v170_v5   ;;  %v176_v6 = vld [vmem:[%s280_s0 + $0x21] ss:$4 sm:$0xff]  }
   0x6   :  { %38 = vrot.lane.b32.xlu1 %v174_v2, %s195_s10  ;;  %22 = vrot.lane.b32.xlu0 %v172_v3, %s196_s11  ;;  %v175_v7 = vld [vmem:[%s280_s0 + $0x1] ss:$4 sm:$0xff]   ;;  %s197_s0 = smov 32  }
   0xa   :  { %54 = vrot.lane.b32.xlu1 %v176_v6, %s197_s0  ;;  %47 = vrot.lane.b32.xlu0 %v175_v7, %s197_s0 }
  0x74   :  { %v32_v8 = vpop.permute.xlu1 %31   ;;  %v16_v9 = vpop.permute.xlu0 %15  }
  0x75   :  { %18 = vst.msk [vmem:[#allocation0] ss:$8 sm:$0xf] %vm17_vm1, %v16_v9   ;;  %19 = vst.msk [vmem:[#allocation0] ss:$8 sm:$0xf0] %vm17_vm1, %v16_v9  }
  0x76   :  { %34 = vst.msk [vmem:[#allocation0] ss:$8 sm:$0xf] %vm33_vm2, %v32_v8   ;;  %35 = vst.msk [vmem:[#allocation0] ss:$8 sm:$0xf0] %vm33_vm2, %v32_v8  }
  0x78   :  { %v39_v10 = vpop.permute.xlu1 %38   ;;  %v23_v11 = vpop.permute.xlu0 %22  }
  0x79   :  { %26 = vst.msk [vmem:[#allocation0 + $0x40] ss:$8 sm:$0xf] %vm17_vm1, %v23_v11   ;;  %28 = vst.msk [vmem:[#allocation0 + $0x40] ss:$8 sm:$0xf0] %vm17_vm1, %v23_v11  }
  0x7a   :  { %42 = vst.msk [vmem:[#allocation0 + $0x40] ss:$8 sm:$0xf] %vm33_vm2, %v39_v10   ;;  %44 = vst.msk [vmem:[#allocation0 + $0x40] ss:$8 sm:$0xf0] %vm33_vm2, %v39_v10  }
  0x7c   :  { %v55_v12 = vpop.permute.xlu1 %54   ;;  %v48_v13 = vpop.permute.xlu0 %47  }
  0x7d   :  { %58 = vst.msk [vmem:[#allocation0 + $0x40] ss:$8 sm:$0xf] %vm49_vm3, %v55_v12   ;;  %60 = vst.msk [vmem:[#allocation0 + $0x40] ss:$8 sm:$0xf0] %vm49_vm3, %v55_v12  }
  0x7e   :  { %50 = vst.msk [vmem:[#allocation0] ss:$8 sm:$0xf] %vm49_vm3, %v48_v13   ;;  %51 = vst.msk [vmem:[#allocation0] ss:$8 sm:$0xf0] %vm49_vm3, %v48_v13  }
  0x84   :  { %v109_v14 = vld [vmem:[#allocation0 + $0x40] sm:$0x1]  ;;  %v115_v15 = vld [vmem:[#allocation0 + $0x48] sm:$0x1]  ;;  %v121_v16 = vld [vmem:[#allocation0 + $0x50] sm:$0x1] }
  0x85   :  { %184 = vst [vmem:[%s281_s1 + $0x8] sm:$0x1] %v109_v14  ;;  %185 = vst [vmem:[%s281_s1 + $0x9] sm:$0x1] %v115_v15  ;;  %v127_v17 = vld [vmem:[#allocation0 + $0x58] sm:$0x1] }
  0x86   :  { %186 = vst [vmem:[%s281_s1 + $0xa] sm:$0x1] %v121_v16  ;;  %v133_v18 = vld [vmem:[#allocation0 + $0x60] sm:$0x1]  ;;  %v139_v19 = vld [vmem:[#allocation0 + $0x68] sm:$0x1] }
  0x87   :  { %187 = vst [vmem:[%s281_s1 + $0xb] sm:$0x1] %v127_v17  ;;  %188 = vst [vmem:[%s281_s1 + $0xc] sm:$0x1] %v133_v18  ;;  %v145_v20 = vld [vmem:[#allocation0 + $0x70] sm:$0x1] }
  0x88   :  { %189 = vst [vmem:[%s281_s1 + $0xd] sm:$0x1] %v139_v19  ;;  %v151_v21 = vld [vmem:[#allocation0 + $0x78] sm:$0x1]  ;;  %v64_v22 = vld [vmem:[#allocation0] sm:$0x1] }
  0x89   :  { %190 = vst [vmem:[%s281_s1 + $0xe] sm:$0x1] %v145_v20  ;;  %191 = vst [vmem:[%s281_s1 + $0xf] sm:$0x1] %v151_v21  ;;  %v68_v23 = vld [vmem:[#allocation0 + $0x8] sm:$0x1] }
  0x8a   :  { %66 = vst [vmem:[%s281_s1] sm:$0x1] %v64_v22  ;;  %v73_v24 = vld [vmem:[#allocation0 + $0x10] sm:$0x1]  ;;  %v79_v25 = vld [vmem:[#allocation0 + $0x18] sm:$0x1] }
  0x8b   :  { %177 = vst [vmem:[%s281_s1 + $0x1] sm:$0x1] %v68_v23  ;;  %178 = vst [vmem:[%s281_s1 + $0x2] sm:$0x1] %v73_v24  ;;  %v85_v26 = vld [vmem:[#allocation0 + $0x20] sm:$0x1] }
  0x8c   :  { %179 = vst [vmem:[%s281_s1 + $0x3] sm:$0x1] %v79_v25  ;;  %v91_v27 = vld [vmem:[#allocation0 + $0x28] sm:$0x1]  ;;  %v97_v28 = vld [vmem:[#allocation0 + $0x30] sm:$0x1] }
  0x8d   :  { %180 = vst [vmem:[%s281_s1 + $0x4] sm:$0x1] %v85_v26  ;;  %181 = vst [vmem:[%s281_s1 + $0x5] sm:$0x1] %v91_v27  ;;  %v103_v29 = vld [vmem:[#allocation0 + $0x38] sm:$0x1] }
  0x8e   :  { %182 = vst [vmem:[%s281_s1 + $0x6] sm:$0x1] %v97_v28  ;;  %183 = vst [vmem:[%s281_s1 + $0x7] sm:$0x1] %v103_v29 }

// kernel: tile.10
= control target key start
LH: loop header
LB: loop body
LE: loop exit
PB: predicated region body
PF: predicated region fallthrough
CT: control target
= control target key end

     0   :  { %s64_s0 = inlined_call_operand.vmem [shape: f32[16], index: 0, kind: input, shape index: {}]   ;;  %s65_s1 = inlined_call_operand.vmem [shape: f32[64,1,1,16], index: 1, kind: output, shape index: {}]  }
   0x1   :  { %v4_v0 = vld [vmem:[%s64_s0] ss:$0 sm:$0xff] }
   0x2   :  { %5 = vst [vmem:[%s65_s1] sm:$0xff] %v4_v0  ;;  %20 = vst [vmem:[%s65_s1 + $0x8] sm:$0xff] %v4_v0 }
   0x3   :  { %21 = vst [vmem:[%s65_s1 + $0x10] sm:$0xff] %v4_v0  ;;  %22 = vst [vmem:[%s65_s1 + $0x18] sm:$0xff] %v4_v0 }
   0x4   :  { %23 = vst [vmem:[%s65_s1 + $0x20] sm:$0xff] %v4_v0  ;;  %24 = vst [vmem:[%s65_s1 + $0x28] sm:$0xff] %v4_v0 }
   0x5   :  { %25 = vst [vmem:[%s65_s1 + $0x30] sm:$0xff] %v4_v0  ;;  %26 = vst [vmem:[%s65_s1 + $0x38] sm:$0xff] %v4_v0 }

// kernel: tile.11
= control target key start
LH: loop header
LB: loop body
LE: loop exit
PB: predicated region body
PF: predicated region fallthrough
CT: control target
= control target key end

     0   :  { %vm4_vm0 = vcmask 1047556   ;;  %s167_s16 = smov 112   ;;  %s168_s19 = smov 80   ;;  %vm6_vm1 = vcmask 130048   ;;  %vm17_vm2 = vcmask 1048448   ;;  %vm28_vm3 = vcmask 917248   ;;  %s264_s0 = inlined_call_operand.vmem [shape: f32[64,1,1,16], index: 0, kind: input, shape index: {}]   ;;  %s265_s1 = inlined_call_operand.vmem [shape: f32[1,1024], index: 1, kind: output, shape index: {}]  }
   0x1   :  { %v139_v0 = vld [vmem:[%s264_s0 + $0x7] ss:$8 sm:$0xf]   ;;  %v143_v2 = vld [vmem:[%s264_s0 + $0x5] ss:$8 sm:$0xf]  }
   0x2   :  { %v140_v1 = vld [vmem:[%s264_s0 + $0x7] ss:$8 sm:$0xf0]   ;;  %v144_v4 = vld [vmem:[%s264_s0 + $0x5] ss:$8 sm:$0xf0]  }
   0x3   :  { %v14_v3 = vsel %vm4_vm0, %v140_v1, %v139_v0  ;;  %v141_v5 = vld [vmem:[%s264_s0 + $0x6] ss:$8 sm:$0xf]   ;;  %v36_v6 = vsel %vm4_vm0, %v144_v4, %v143_v2  ;;  %v145_v9 = vld [vmem:[%s264_s0 + $0x4] ss:$8 sm:$0xf]  }
   0x4   :  { %15 = vrot.lane.b32.xlu0 %v14_v3, %s167_s16  ;;  %v142_v7 = vld [vmem:[%s264_s0 + $0x6] ss:$8 sm:$0xf0]   ;;  %37 = vrot.lane.b32.xlu1 %v36_v6, %s168_s19  ;;  %v146_v10 = vld [vmem:[%s264_s0 + $0x4] ss:$8 sm:$0xf0]  }
   0x5   :  { %v25_v8 = vsel %vm4_vm0, %v142_v7, %v141_v5  ;;  %v47_v11 = vsel %vm4_vm0, %v146_v10, %v145_v9  ;;  %v147_v12 = vld [vmem:[%s264_s0 + $0x3] ss:$8 sm:$0xf]   ;;  %v149_v14 = vld [vmem:[%s264_s0 + $0x2] ss:$8 sm:$0xf]  }
   0x6   :  { %v148_v13 = vld [vmem:[%s264_s0 + $0x3] ss:$8 sm:$0xf0]   ;;  %s169_s30 = smov 96   ;;  %s170_s4 = smov 64   ;;  %vm39_vm4 = vcmask 786048  }
   0x7   :  { %v150_v15 = vld [vmem:[%s264_s0 + $0x2] ss:$8 sm:$0xf0]   ;;  %v58_v16 = vsel %vm4_vm0, %v148_v13, %v147_v12  ;;  %v151_v17 = vld [vmem:[%s264_s0 + $0x1] ss:$8 sm:$0xf]  }
   0x8   :  { %26 = vrot.lane.b32.xlu0 %v25_v8, %s169_s30  ;;  %48 = vrot.lane.b32.xlu1 %v47_v11, %s170_s4  ;;  %v152_v18 = vld [vmem:[%s264_s0 + $0x1] ss:$8 sm:$0xf0]   ;;  %v69_v19 = vsel %vm4_vm0, %v150_v15, %v149_v14  ;;  %v2_v20 = vld [vmem:[%s264_s0] ss:$8 sm:$0xf]  }
   0x9   :  { %v3_v21 = vld [vmem:[%s264_s0] ss:$8 sm:$0xf0]   ;;  %s171_s0 = smov 48   ;;  %s172_s13 = smov 32   ;;  %v80_v23 = vsel %vm4_vm0, %v152_v18, %v151_v17  ;;  %vm50_vm5 = vcmask 654848  }
   0xa   :  { %v5_v22 = vsel %vm4_vm0, %v3_v21, %v2_v20  ;;  %s173_s14 = smov 16   ;;  %vm61_vm6 = vcmask 523648   ;;  %vm72_vm7 = vcmask 392448   ;;  %vm83_vm8 = vcmask 261248  }
   0xb   :  { %7 = vst.msk [vmem:[#allocation0] ss:$8 sm:$0xf] %vm6_vm1, %v5_v22   ;;  %8 = vst.msk [vmem:[#allocation0] ss:$8 sm:$0xf0] %vm6_vm1, %v5_v22  }
   0xc   :  { %59 = vrot.lane.b32.xlu0 %v58_v16, %s171_s0  ;;  %70 = vrot.lane.b32.xlu1 %v69_v19, %s172_s13 }
  0x10   :  { %81 = vrot.lane.b32.xlu0 %v80_v23, %s173_s14 }
  0x76   :  { %v16_v24 = vpop.permute.xlu0 %15   ;;  %v38_v25 = vpop.permute.xlu1 %37  }
  0x77   :  { %18 = vst.msk [vmem:[#allocation0] ss:$8 sm:$0xf] %vm17_vm2, %v16_v24   ;;  %19 = vst.msk [vmem:[#allocation0] ss:$8 sm:$0xf0] %vm17_vm2, %v16_v24  }
  0x7a   :  { %v27_v26 = vpop.permute.xlu0 %26   ;;  %v49_v27 = vpop.permute.xlu1 %48  }
  0x7b   :  { %29 = vst.msk [vmem:[#allocation0] ss:$8 sm:$0xf] %vm28_vm3, %v27_v26   ;;  %30 = vst.msk [vmem:[#allocation0] ss:$8 sm:$0xf0] %vm28_vm3, %v27_v26  }
  0x7c   :  { %40 = vst.msk [vmem:[#allocation0] ss:$8 sm:$0xf] %vm39_vm4, %v38_v25   ;;  %41 = vst.msk [vmem:[#allocation0] ss:$8 sm:$0xf0] %vm39_vm4, %v38_v25  }
  0x7d   :  { %51 = vst.msk [vmem:[#allocation0] ss:$8 sm:$0xf] %vm50_vm5, %v49_v27   ;;  %52 = vst.msk [vmem:[#allocation0] ss:$8 sm:$0xf0] %vm50_vm5, %v49_v27  }
  0x7e   :  { %v60_v28 = vpop.permute.xlu0 %59   ;;  %v71_v29 = vpop.permute.xlu1 %70  }
  0x7f   :  { %62 = vst.msk [vmem:[#allocation0] ss:$8 sm:$0xf] %vm61_vm6, %v60_v28   ;;  %63 = vst.msk [vmem:[#allocation0] ss:$8 sm:$0xf0] %vm61_vm6, %v60_v28  }
  0x80   :  { %73 = vst.msk [vmem:[#allocation0] ss:$8 sm:$0xf] %vm72_vm7, %v71_v29   ;;  %74 = vst.msk [vmem:[#allocation0] ss:$8 sm:$0xf0] %vm72_vm7, %v71_v29  }
  0x82   :  { %v82_v30 = vpop.permute.xlu0 %81  }
  0x83   :  { %84 = vst.msk [vmem:[#allocation0] ss:$8 sm:$0xf] %vm83_vm8, %v82_v30   ;;  %85 = vst.msk [vmem:[#allocation0] ss:$8 sm:$0xf0] %vm83_vm8, %v82_v30  }
  0x8a   :  { %v89_v31 = vld [vmem:[#allocation0] sm:$0x1]  ;;  %v93_v32 = vld [vmem:[#allocation0 + $0x8] sm:$0x1]  ;;  %v98_v33 = vld [vmem:[#allocation0 + $0x10] sm:$0x1] }
  0x8b   :  { %91 = vst [vmem:[%s265_s1] sm:$0x1] %v89_v31  ;;  %153 = vst [vmem:[%s265_s1 + $0x1] sm:$0x1] %v93_v32  ;;  %v104_v34 = vld [vmem:[#allocation0 + $0x18] sm:$0x1] }
  0x8c   :  { %154 = vst [vmem:[%s265_s1 + $0x2] sm:$0x1] %v98_v33  ;;  %v110_v35 = vld [vmem:[#allocation0 + $0x20] sm:$0x1]  ;;  %v116_v36 = vld [vmem:[#allocation0 + $0x28] sm:$0x1] }
  0x8d   :  { %155 = vst [vmem:[%s265_s1 + $0x3] sm:$0x1] %v104_v34  ;;  %156 = vst [vmem:[%s265_s1 + $0x4] sm:$0x1] %v110_v35  ;;  %v122_v37 = vld [vmem:[#allocation0 + $0x30] sm:$0x1] }
  0x8e   :  { %157 = vst [vmem:[%s265_s1 + $0x5] sm:$0x1] %v116_v36  ;;  %v128_v38 = vld [vmem:[#allocation0 + $0x38] sm:$0x1]  ;;  %158 = vst [vmem:[%s265_s1 + $0x6] sm:$0x1] %v122_v37 }
  0x8f   :  { %159 = vst [vmem:[%s265_s1 + $0x7] sm:$0x1] %v128_v38 }

// kernel: gru_model_forward.2
= control target key start
LH: loop header
LB: loop body
LE: loop exit
PB: predicated region body
PF: predicated region fallthrough
CT: control target
= control target key end

     0   :  { %v13550_v3 = vmov 0.0   ;;  %vm134_vm0 = vcmask 523264   ;;  %s18327_s1 = inlined_call_operand.vmem [shape: f32[64,1024], index: 1, kind: input, shape index: {}]   ;;  %s18328_s0 = inlined_call_operand.vmem [shape: f32[8,64], index: 0, kind: input, shape index: {}]   ;;  %s18329_s3 = inlined_call_operand.vmem [shape: bf16[1024,2048], index: 3, kind: input, shape index: {}]   ;;  %s18330_s2 = inlined_call_operand.vmem [shape: f32[1,1024], index: 2, kind: input, shape index: {}]   ;;  %s18331_s4 = inlined_call_operand.vmem [shape: f32[1,2048], index: 4, kind: input, shape index: {}]   ;;  %s18332_s5 = inlined_call_operand.vmem [shape: bf16[2048,384], index: 5, kind: input, shape index: {}]   ;;  %s18333_s6 = inlined_call_operand.vmem [shape: f32[1,384], index: 6, kind: input, shape index: {}]   ;;  %s18334_s7 = inlined_call_operand.vmem [shape: f32[8,384], index: 7, kind: output, shape index: {}]  }
   0x1   :  { %v29_v0 = vld [vmem:[%s18327_s1 + $0x8] sm:$0xff]  ;;  %v28_v2 = vld [vmem:[%s18327_s1] sm:$0xff]  ;;  %202 = vmatprep.mubr.f32.mxu0 %v13550_v3  ;;  %273 = vmatprep.mubr.f32.mxu1 %v13550_v3  ;;  %v31_v28 = vld [vmem:[%s18327_s1 + $0x18] sm:$0xff] }
   0x2   :  { %v37_v1 = vld [vmem:[%s18327_s1 + $0x48] sm:$0xff]  ;;  %v36_v5 = vld [vmem:[%s18327_s1 + $0x40] sm:$0xff]  ;;  %v39_v29 = vld [vmem:[%s18327_s1 + $0x58] sm:$0xff] }
   0x3   :  { %v12830_v4 = vpack.c.bf16 %v37_v1, %v29_v0  ;;  %v45_v6 = vld [vmem:[%s18327_s1 + $0x88] sm:$0xff]  ;;  %v12832_v8 = vpack.c.bf16 %v36_v5, %v28_v2  ;;  %v44_v10 = vld [vmem:[%s18327_s1 + $0x80] sm:$0xff]  ;;  %v30_v30 = vld [vmem:[%s18327_s1 + $0x10] sm:$0xff]  ;;  %v12846_v32 = vpack.c.bf16 %v39_v29, %v31_v28 }
   0x4   :  { %v53_v7 = vld [vmem:[%s18327_s1 + $0xc8] sm:$0xff]  ;;  %v52_v11 = vld [vmem:[%s18327_s1 + $0xc0] sm:$0xff]  ;;  %v38_v33 = vld [vmem:[%s18327_s1 + $0x50] sm:$0xff] }
   0x5   :  { %v12834_v9 = vpack.c.bf16 %v53_v7, %v45_v6  ;;  %v61_v12 = vld [vmem:[%s18327_s1 + $0x108] sm:$0xff]  ;;  %12831 = vmatprep.subr.bf16.mxu0 %v12830_v4  ;;  %v12836_v14 = vpack.c.bf16 %v52_v11, %v44_v10  ;;  %v60_v16 = vld [vmem:[%s18327_s1 + $0x100] sm:$0xff]  ;;  %v47_v34 = vld [vmem:[%s18327_s1 + $0x98] sm:$0xff]  ;;  %v12848_v38 = vpack.c.bf16 %v38_v33, %v30_v30  ;;  %12847 = vmatprep.subr.bf16.mxu1 %v12846_v32 }
   0x6   :  { %v69_v13 = vld [vmem:[%s18327_s1 + $0x148] sm:$0xff]  ;;  %12833 = vmatpush1.bf16.msra.mxu0 %v12832_v8  ;;  %v68_v17 = vld [vmem:[%s18327_s1 + $0x140] sm:$0xff]  ;;  %v55_v35 = vld [vmem:[%s18327_s1 + $0xd8] sm:$0xff] }
   0x7   :  { %12835 = vmatprep.subr.bf16.mxu0 %v12834_v9  ;;  %v12838_v15 = vpack.c.bf16 %v69_v13, %v61_v12  ;;  %v77_v18 = vld [vmem:[%s18327_s1 + $0x188] sm:$0xff]  ;;  %v12840_v20 = vpack.c.bf16 %v68_v17, %v60_v16  ;;  %v76_v22 = vld [vmem:[%s18327_s1 + $0x180] sm:$0xff]  ;;  %v12850_v39 = vpack.c.bf16 %v55_v35, %v47_v34  ;;  %v46_v40 = vld [vmem:[%s18327_s1 + $0x90] sm:$0xff]  ;;  %12849 = vmatpush1.bf16.msra.mxu1 %v12848_v38 }
   0x8   :  { %v85_v19 = vld [vmem:[%s18327_s1 + $0x1c8] sm:$0xff]  ;;  %v84_v23 = vld [vmem:[%s18327_s1 + $0x1c0] sm:$0xff]  ;;  %v54_v41 = vld [vmem:[%s18327_s1 + $0xd0] sm:$0xff] }
   0x9   :  { %v12842_v21 = vpack.c.bf16 %v85_v19, %v77_v18  ;;  %v33_v24 = vld [vmem:[%s18327_s1 + $0x28] sm:$0xff]  ;;  %v32_v26 = vld [vmem:[%s18327_s1 + $0x20] sm:$0xff]  ;;  %v12844_v31 = vpack.c.bf16 %v84_v23, %v76_v22  ;;  %v63_v43 = vld [vmem:[%s18327_s1 + $0x118] sm:$0xff]  ;;  %v12852_v46 = vpack.c.bf16 %v54_v41, %v46_v40  ;;  %12851 = vmatprep.subr.bf16.mxu1 %v12850_v39 }
   0xa   :  { %12837 = vmatpush1.bf16.msra.mxu0 %v12836_v14  ;;  %v41_v25 = vld [vmem:[%s18327_s1 + $0x68] sm:$0xff]  ;;  %v40_v27 = vld [vmem:[%s18327_s1 + $0x60] sm:$0xff]  ;;  %v71_v44 = vld [vmem:[%s18327_s1 + $0x158] sm:$0xff] }
   0xb   :  { %12839 = vmatprep.subr.bf16.mxu0 %v12838_v15  ;;  %v12862_v36 = vpack.c.bf16 %v41_v25, %v33_v24  ;;  %v49_v37 = vld [vmem:[%s18327_s1 + $0xa8] sm:$0xff]  ;;  %v13692_v45 = vld [vmem:[%s18328_s0] sm:$0xff]  ;;  %v12864_v47 = vpack.c.bf16 %v40_v27, %v32_v26  ;;  %v62_v49 = vld [vmem:[%s18327_s1 + $0x110] sm:$0xff]  ;;  %v12854_v53 = vpack.c.bf16 %v71_v44, %v63_v43  ;;  %12853 = vmatpush1.bf16.msra.mxu1 %v12852_v46 }
   0xc   :  { %v57_v42 = vld [vmem:[%s18327_s1 + $0xe8] sm:$0xff]  ;;  %v48_v48 = vld [vmem:[%s18327_s1 + $0xa0] sm:$0xff]  ;;  %v70_v50 = vld [vmem:[%s18327_s1 + $0x150] sm:$0xff] }
   0xd   :  { %v12866_v51 = vpack.c.bf16 %v57_v42, %v49_v37  ;;  %v56_v52 = vld [vmem:[%s18327_s1 + $0xe0] sm:$0xff]  ;;  %v79_v54 = vld [vmem:[%s18327_s1 + $0x198] sm:$0xff]  ;;  %v65_v56 = vld [vmem:[%s18327_s1 + $0x128] sm:$0xff]  ;;  %v12856_v58 = vpack.c.bf16 %v70_v50, %v62_v49  ;;  %12855 = vmatprep.subr.bf16.mxu1 %v12854_v53 }
   0xe   :  { %12841 = vmatpush1.bf16.msra.mxu0 %v12840_v20  ;;  %v87_v55 = vld [vmem:[%s18327_s1 + $0x1d8] sm:$0xff]  ;;  %v73_v57 = vld [vmem:[%s18327_s1 + $0x168] sm:$0xff]  ;;  %v12868_v59 = vpack.c.bf16 %v56_v52, %v48_v48  ;;  %v64_v60 = vld [vmem:[%s18327_s1 + $0x120] sm:$0xff] }
   0xf   :  { %12843 = vmatprep.subr.bf16.mxu0 %v12842_v21  ;;  %v12858_v61 = vpack.c.bf16 %v87_v55, %v79_v54  ;;  %v78_v62 = vld [vmem:[%s18327_s1 + $0x190] sm:$0xff]  ;;  %v12870_v0 = vpack.c.bf16 %v73_v57, %v65_v56  ;;  %v72_v1 = vld [vmem:[%s18327_s1 + $0x160] sm:$0xff]  ;;  %v35_v2 = vld [vmem:[%s18327_s1 + $0x38] sm:$0xff]  ;;  %12857 = vmatpush1.bf16.msra.mxu1 %v12856_v58 }
  0x10   :  { %v86_v63 = vld [vmem:[%s18327_s1 + $0x1d0] sm:$0xff]  ;;  %v43_v4 = vld [vmem:[%s18327_s1 + $0x78] sm:$0xff]  ;;  %v81_v5 = vld [vmem:[%s18327_s1 + $0x1a8] sm:$0xff]  ;;  %v12872_v8 = vpack.c.bf16 %v72_v1, %v64_v60 }
  0x11   :  { %v89_v6 = vld [vmem:[%s18327_s1 + $0x1e8] sm:$0xff]  ;;  %v12860_v7 = vpack.c.bf16 %v86_v63, %v78_v62  ;;  %v80_v9 = vld [vmem:[%s18327_s1 + $0x1a0] sm:$0xff]  ;;  %12859 = vmatprep.subr.bf16.mxu1 %v12858_v61  ;;  %v12878_v10 = vpack.c.bf16 %v43_v4, %v35_v2  ;;  %v34_v11 = vld [vmem:[%s18327_s1 + $0x30] sm:$0xff] }
  0x12   :  { %12845 = vmatpush1.bf16.msra.mxu0 %v12844_v31  ;;  %v42_v12 = vld [vmem:[%s18327_s1 + $0x70] sm:$0xff]  ;;  %v12874_v13 = vpack.c.bf16 %v89_v6, %v81_v5  ;;  %v88_v14 = vld [vmem:[%s18327_s1 + $0x1e0] sm:$0xff]  ;;  %v51_v15 = vld [vmem:[%s18327_s1 + $0xb8] sm:$0xff] }
  0x13   :  { %12863 = vmatprep.subr.bf16.mxu0 %v12862_v36  ;;  %v59_v16 = vld [vmem:[%s18327_s1 + $0xf8] sm:$0xff]  ;;  %v950_v17 = vld [vmem:[%s18329_s3 + $0x1000] sm:$0xff]  ;;  %12861 = vmatpush1.bf16.msra.mxu1 %v12860_v7  ;;  %v12880_v19 = vpack.c.bf16 %v42_v12, %v34_v11  ;;  %v12876_v20 = vpack.c.bf16 %v88_v14, %v80_v9  ;;  %v50_v22 = vld [vmem:[%s18327_s1 + $0xb0] sm:$0xff] }
  0x14   :  { %v958_v18 = vld [vmem:[%s18329_s3 + $0x1040] sm:$0xff]  ;;  %12879 = vmatprep.subr.bf16.mxu1 %v12878_v10  ;;  %v12882_v21 = vpack.c.bf16 %v59_v16, %v51_v15  ;;  %v58_v23 = vld [vmem:[%s18327_s1 + $0xf0] sm:$0xff]  ;;  %v67_v24 = vld [vmem:[%s18327_s1 + $0x138] sm:$0xff] }
  0x15   :  { %11242 = vmatmul.mubr.msk.f32.vlgmr.msra.gmra.mrb[0].mxu0 %vm134_vm0, %v13692_v45  ;;  %v75_v25 = vld [vmem:[%s18327_s1 + $0x178] sm:$0xff]  ;;  %v11759_v26 = vcombine.high %v950_v17, %v958_v18  ;;  %v966_v27 = vld [vmem:[%s18329_s3 + $0x1080] sm:$0xff]  ;;  %v12884_v29 = vpack.c.bf16 %v58_v23, %v50_v22  ;;  %v66_v31 = vld [vmem:[%s18327_s1 + $0x130] sm:$0xff]  ;;  %v11758_v33 = vcombine.low %v950_v17, %v958_v18 }
  0x16   :  { %12865 = vmatpush1.bf16.msra.mxu0 %v12864_v47  ;;  %344 = vmatprep.mubr.f32.mxu0 %v13550_v3  ;;  %v974_v28 = vld [vmem:[%s18329_s3 + $0x10c0] sm:$0xff]  ;;  %v12886_v30 = vpack.c.bf16 %v75_v25, %v67_v24  ;;  %v74_v32 = vld [vmem:[%s18327_s1 + $0x170] sm:$0xff]  ;;  %v83_v34 = vld [vmem:[%s18327_s1 + $0x1b8] sm:$0xff] }
  0x17   :  { %12867 = vmatprep.subr.bf16.mxu0 %v12866_v51  ;;  %11243 = vmatmul.mubr.msk.f32.vlgmr.msra.gmra.mrb[0].mxu1 %vm134_vm0, %v13692_v45  ;;  %v11775_v35 = vcombine.high %v966_v27, %v974_v28  ;;  %v982_v36 = vld [vmem:[%s18329_s3 + $0x1100] sm:$0xff]  ;;  %v12888_v38 = vpack.c.bf16 %v74_v32, %v66_v31  ;;  %v82_v40 = vld [vmem:[%s18327_s1 + $0x1b0] sm:$0xff]  ;;  %v11774_v42 = vcombine.low %v966_v27, %v974_v28 }
  0x18   :  { %12881 = vmatpush1.bf16.msra.mxu1 %v12880_v19  ;;  %415 = vmatprep.mubr.f32.mxu1 %v13550_v3  ;;  %v91_v3 = vld [vmem:[%s18327_s1 + $0x1f8] sm:$0xff]  ;;  %v990_v37 = vld [vmem:[%s18329_s3 + $0x1140] sm:$0xff]  ;;  %v90_v41 = vld [vmem:[%s18327_s1 + $0x1f0] sm:$0xff] }
  0x19   :  { %12883 = vmatprep.subr.bf16.mxu1 %v12882_v21  ;;  %v12890_v39 = vpack.c.bf16 %v91_v3, %v83_v34  ;;  %v438_v43 = vld [vmem:[%s18329_s3] sm:$0xff]  ;;  %v11791_v46 = vcombine.high %v982_v36, %v990_v37  ;;  %v12892_v49 = vpack.c.bf16 %v90_v41, %v82_v40  ;;  %v11790_v51 = vcombine.low %v982_v36, %v990_v37 }
  0x1a   :  { %12869 = vmatpush1.bf16.msra.mxu0 %v12868_v59  ;;  %v446_v44 = vld [vmem:[%s18329_s3 + $0x40] sm:$0xff] }
  0x1b   :  { %12871 = vmatprep.subr.bf16.mxu0 %v12870_v0  ;;  %v998_v47 = vld [vmem:[%s18329_s3 + $0x1180] sm:$0xff]  ;;  %v11247_v50 = vcombine.high %v438_v43, %v446_v44  ;;  %v11246_v57 = vcombine.low %v438_v43, %v446_v44 }
  0x1c   :  { %12885 = vmatpush1.bf16.msra.mxu1 %v12884_v29  ;;  %v1006_v48 = vld [vmem:[%s18329_s3 + $0x11c0] sm:$0xff] }
  0x1d   :  { %12887 = vmatprep.subr.bf16.mxu1 %v12886_v30  ;;  %v454_v52 = vld [vmem:[%s18329_s3 + $0x80] sm:$0xff]  ;;  %v11807_v54 = vcombine.high %v998_v47, %v1006_v48  ;;  %v11806_v59 = vcombine.low %v998_v47, %v1006_v48 }
  0x1e   :  { %12873 = vmatpush1.bf16.msra.mxu0 %v12872_v8  ;;  %v462_v53 = vld [vmem:[%s18329_s3 + $0xc0] sm:$0xff] }
  0x1f   :  { %12875 = vmatprep.subr.bf16.mxu0 %v12874_v13  ;;  %v1014_v55 = vld [vmem:[%s18329_s3 + $0x1200] sm:$0xff]  ;;  %v11263_v58 = vcombine.high %v454_v52, %v462_v53  ;;  %v11262_v1 = vcombine.low %v454_v52, %v462_v53 }
  0x20   :  { %12889 = vmatpush1.bf16.msra.mxu1 %v12888_v38  ;;  %v1022_v56 = vld [vmem:[%s18329_s3 + $0x1240] sm:$0xff] }
  0x21   :  { %12891 = vmatprep.subr.bf16.mxu1 %v12890_v39  ;;  %v470_v60 = vld [vmem:[%s18329_s3 + $0x100] sm:$0xff]  ;;  %v11823_v62 = vcombine.high %v1014_v55, %v1022_v56  ;;  %v11822_v4 = vcombine.low %v1014_v55, %v1022_v56 }
  0x22   :  { %12877 = vmatpush1.bf16.msra.mxu0 %v12876_v20  ;;  %v478_v61 = vld [vmem:[%s18329_s3 + $0x140] sm:$0xff] }
  0x23   :  { %6748 = vmatprep.subr.bf16.mxu0 %v11759_v26  ;;  %v1030_v63 = vld [vmem:[%s18329_s3 + $0x1280] sm:$0xff]  ;;  %v11279_v2 = vcombine.high %v470_v60, %v478_v61  ;;  %v11278_v9 = vcombine.low %v470_v60, %v478_v61 }
  0x24   :  { %12893 = vmatpush1.bf16.msra.mxu1 %v12892_v49  ;;  %v1038_v0 = vld [vmem:[%s18329_s3 + $0x12c0] sm:$0xff] }
  0x25   :  { %11244 = vmatmul.mubr.msk.f32.vlgmr.msra.gmra.mrb[2].mxu0 %vm134_vm0, %v13692_v45  ;;  %6666 = vmatprep.subr.bf16.mxu1 %v11247_v50  ;;  %v486_v5 = vld [vmem:[%s18329_s3 + $0x180] sm:$0xff]  ;;  %v11839_v6 = vcombine.high %v1030_v63, %v1038_v0  ;;  %v11838_v11 = vcombine.low %v1030_v63, %v1038_v0 }
  0x26   :  { %6749 = vmatpush1.bf16.msra.mxu0 %v11758_v33  ;;  %v1046_v7 = vld [vmem:[%s18329_s3 + $0x1300] sm:$0xff] }
  0x27   :  { %6750 = vmatprep.subr.bf16.mxu0 %v11775_v35  ;;  %11245 = vmatmul.mubr.msk.f32.vlgmr.msra.gmra.mrb[2].mxu1 %vm134_vm0, %v13692_v45  ;;  %v494_v45 = vld [vmem:[%s18329_s3 + $0x1c0] sm:$0xff] }
  0x28   :  { %6667 = vmatpush1.bf16.msra.mxu1 %v11246_v57  ;;  %v1054_v8 = vld [vmem:[%s18329_s3 + $0x1340] sm:$0xff]  ;;  %v11295_v10 = vcombine.high %v486_v5, %v494_v45  ;;  %v11294_v17 = vcombine.low %v486_v5, %v494_v45 }
  0x29   :  { %6668 = vmatprep.subr.bf16.mxu1 %v11263_v58  ;;  %v502_v12 = vld [vmem:[%s18329_s3 + $0x200] sm:$0xff]  ;;  %v11855_v14 = vcombine.high %v1046_v7, %v1054_v8  ;;  %v11854_v19 = vcombine.low %v1046_v7, %v1054_v8 }
  0x2a   :  { %6751 = vmatpush1.bf16.msra.mxu0 %v11774_v42  ;;  %v510_v13 = vld [vmem:[%s18329_s3 + $0x240] sm:$0xff] }
  0x2b   :  { %6752 = vmatprep.subr.bf16.mxu0 %v11791_v46  ;;  %v1062_v15 = vld [vmem:[%s18329_s3 + $0x1380] sm:$0xff]  ;;  %v11311_v18 = vcombine.high %v502_v12, %v510_v13  ;;  %v11310_v25 = vcombine.low %v502_v12, %v510_v13 }
  0x2c   :  { %6669 = vmatpush1.bf16.msra.mxu1 %v11262_v1  ;;  %v1070_v16 = vld [vmem:[%s18329_s3 + $0x13c0] sm:$0xff] }
  0x2d   :  { %6670 = vmatprep.subr.bf16.mxu1 %v11279_v2  ;;  %v518_v20 = vld [vmem:[%s18329_s3 + $0x280] sm:$0xff]  ;;  %v11871_v22 = vcombine.high %v1062_v15, %v1070_v16  ;;  %v11870_v27 = vcombine.low %v1062_v15, %v1070_v16 }
  0x2e   :  { %6753 = vmatpush1.bf16.msra.mxu0 %v11790_v51  ;;  %v526_v21 = vld [vmem:[%s18329_s3 + $0x2c0] sm:$0xff] }
  0x2f   :  { %6754 = vmatprep.subr.bf16.mxu0 %v11807_v54  ;;  %v1078_v23 = vld [vmem:[%s18329_s3 + $0x1400] sm:$0xff]  ;;  %v11327_v26 = vcombine.high %v518_v20, %v526_v21  ;;  %v11326_v33 = vcombine.low %v518_v20, %v526_v21 }
  0x30   :  { %6671 = vmatpush1.bf16.msra.mxu1 %v11278_v9  ;;  %v1086_v24 = vld [vmem:[%s18329_s3 + $0x1440] sm:$0xff] }
  0x31   :  { %6672 = vmatprep.subr.bf16.mxu1 %v11295_v10  ;;  %v534_v28 = vld [vmem:[%s18329_s3 + $0x300] sm:$0xff]  ;;  %v11887_v30 = vcombine.high %v1078_v23, %v1086_v24  ;;  %v11886_v3 = vcombine.low %v1078_v23, %v1086_v24 }
  0x32   :  { %6755 = vmatpush1.bf16.msra.mxu0 %v11806_v59  ;;  %v542_v29 = vld [vmem:[%s18329_s3 + $0x340] sm:$0xff] }
  0x33   :  { %6756 = vmatprep.subr.bf16.mxu0 %v11823_v62  ;;  %v1094_v31 = vld [vmem:[%s18329_s3 + $0x1480] sm:$0xff]  ;;  %v11343_v34 = vcombine.high %v534_v28, %v542_v29  ;;  %v11342_v38 = vcombine.low %v534_v28, %v542_v29 }
  0x34   :  { %6673 = vmatpush1.bf16.msra.mxu1 %v11294_v17  ;;  %v1102_v32 = vld [vmem:[%s18329_s3 + $0x14c0] sm:$0xff] }
  0x35   :  { %6674 = vmatprep.subr.bf16.mxu1 %v11311_v18  ;;  %v550_v35 = vld [vmem:[%s18329_s3 + $0x380] sm:$0xff]  ;;  %v11903_v37 = vcombine.high %v1094_v31, %v1102_v32  ;;  %v11902_v40 = vcombine.low %v1094_v31, %v1102_v32 }
  0x36   :  { %6757 = vmatpush1.bf16.msra.mxu0 %v11822_v4  ;;  %v558_v36 = vld [vmem:[%s18329_s3 + $0x3c0] sm:$0xff] }
  0x37   :  { %6758 = vmatprep.subr.bf16.mxu0 %v11839_v6  ;;  %v11359_v39 = vcombine.high %v550_v35, %v558_v36  ;;  %v566_v41 = vld [vmem:[%s18329_s3 + $0x400] sm:$0xff]  ;;  %v11358_v43 = vcombine.low %v550_v35, %v558_v36 }
  0x38   :  { %6675 = vmatpush1.bf16.msra.mxu1 %v11310_v25  ;;  %v574_v42 = vld [vmem:[%s18329_s3 + $0x440] sm:$0xff] }
  0x39   :  { %6676 = vmatprep.subr.bf16.mxu1 %v11327_v26  ;;  %v11375_v44 = vcombine.high %v566_v41, %v574_v42  ;;  %v582_v46 = vld [vmem:[%s18329_s3 + $0x480] sm:$0xff]  ;;  %v11374_v48 = vcombine.low %v566_v41, %v574_v42  ;;  %v94_v42 = vlaneseq }
  0x3a   :  { %6759 = vmatpush1.bf16.msra.mxu0 %v11838_v11  ;;  %v590_v47 = vld [vmem:[%s18329_s3 + $0x4c0] sm:$0xff] }
  0x3b   :  { %6760 = vmatprep.subr.bf16.mxu0 %v11855_v14  ;;  %v11391_v49 = vcombine.high %v582_v46, %v590_v47  ;;  %v598_v50 = vld [vmem:[%s18329_s3 + $0x500] sm:$0xff]  ;;  %v11390_v52 = vcombine.low %v582_v46, %v590_v47 }
  0x3c   :  { %6677 = vmatpush1.bf16.msra.mxu1 %v11326_v33  ;;  %v606_v51 = vld [vmem:[%s18329_s3 + $0x540] sm:$0xff] }
  0x3d   :  { %6678 = vmatprep.subr.bf16.mxu1 %v11343_v34  ;;  %v11407_v53 = vcombine.high %v598_v50, %v606_v51  ;;  %v614_v54 = vld [vmem:[%s18329_s3 + $0x580] sm:$0xff]  ;;  %v11406_v56 = vcombine.low %v598_v50, %v606_v51 }
  0x3e   :  { %6761 = vmatpush1.bf16.msra.mxu0 %v11854_v19  ;;  %v622_v55 = vld [vmem:[%s18329_s3 + $0x5c0] sm:$0xff] }
  0x3f   :  { %6762 = vmatprep.subr.bf16.mxu0 %v11871_v22  ;;  %v11423_v57 = vcombine.high %v614_v54, %v622_v55  ;;  %v630_v58 = vld [vmem:[%s18329_s3 + $0x600] sm:$0xff]  ;;  %v11422_v60 = vcombine.low %v614_v54, %v622_v55 }
  0x40   :  { %6679 = vmatpush1.bf16.msra.mxu1 %v11342_v38  ;;  %v638_v59 = vld [vmem:[%s18329_s3 + $0x640] sm:$0xff] }
  0x41   :  { %6680 = vmatprep.subr.bf16.mxu1 %v11359_v39  ;;  %v11439_v61 = vcombine.high %v630_v58, %v638_v59  ;;  %v646_v62 = vld [vmem:[%s18329_s3 + $0x680] sm:$0xff]  ;;  %v11438_v0 = vcombine.low %v630_v58, %v638_v59 }
  0x42   :  { %6763 = vmatpush1.bf16.msra.mxu0 %v11870_v27  ;;  %v654_v63 = vld [vmem:[%s18329_s3 + $0x6c0] sm:$0xff] }
  0x43   :  { %6764 = vmatprep.subr.bf16.mxu0 %v11887_v30  ;;  %v11455_v1 = vcombine.high %v646_v62, %v654_v63  ;;  %v11454_v2 = vcombine.low %v646_v62, %v654_v63  ;;  %v662_v4 = vld [vmem:[%s18329_s3 + $0x700] sm:$0xff] }
  0x44   :  { %6681 = vmatpush1.bf16.msra.mxu1 %v11358_v43  ;;  %v670_v5 = vld [vmem:[%s18329_s3 + $0x740] sm:$0xff]  ;;  %v14012_v43 = vshrl.u32 %v94_v42, 7 }
  0x45   :  { %6682 = vmatprep.subr.bf16.mxu1 %v11375_v44  ;;  %v1110_v45 = vld [vmem:[%s18329_s3 + $0x1500] sm:$0xff]  ;;  %v11471_v6 = vcombine.high %v662_v4, %v670_v5  ;;  %v11470_v8 = vcombine.low %v662_v4, %v670_v5 }
  0x46   :  { %6765 = vmatpush1.bf16.msra.mxu0 %v11886_v3  ;;  %v1118_v7 = vld [vmem:[%s18329_s3 + $0x1540] sm:$0xff]  ;;  %v14015_v44 = vsub.s32 0, %v14012_v43  ;;  %v14023_v47 = vsub.s32 1, %v14012_v43  ;;  %v14038_v59 = vsub.s32 3, %v14012_v43  ;;  %v14056_v4 = vsub.s32 5, %v14012_v43 }
  0x47   :  { %6766 = vmatprep.subr.bf16.mxu0 %v11903_v37  ;;  %v11918_v9 = vcombine.low %v1110_v45, %v1118_v7  ;;  %v11919_v10 = vcombine.high %v1110_v45, %v1118_v7  ;;  %v678_v11 = vld [vmem:[%s18329_s3 + $0x780] sm:$0xff] }
  0x48   :  { %6683 = vmatpush1.bf16.msra.mxu1 %v11374_v48  ;;  %v686_v12 = vld [vmem:[%s18329_s3 + $0x7c0] sm:$0xff] }
  0x49   :  { %6684 = vmatprep.subr.bf16.mxu1 %v11391_v49  ;;  %v1126_v13 = vld [vmem:[%s18329_s3 + $0x1580] sm:$0xff]  ;;  %v11487_v14 = vcombine.high %v678_v11, %v686_v12  ;;  %v11486_v16 = vcombine.low %v678_v11, %v686_v12 }
  0x4a   :  { %6767 = vmatpush1.bf16.msra.mxu0 %v11902_v40  ;;  %v1134_v15 = vld [vmem:[%s18329_s3 + $0x15c0] sm:$0xff] }
  0x4b   :  { %6768 = vmatprep.subr.bf16.mxu0 %v11919_v10  ;;  %v11934_v17 = vcombine.low %v1126_v13, %v1134_v15  ;;  %v11935_v18 = vcombine.high %v1126_v13, %v1134_v15  ;;  %v694_v19 = vld [vmem:[%s18329_s3 + $0x800] sm:$0xff] }
  0x4c   :  { %6685 = vmatpush1.bf16.msra.mxu1 %v11390_v52  ;;  %v702_v20 = vld [vmem:[%s18329_s3 + $0x840] sm:$0xff] }
  0x4d   :  { %6686 = vmatprep.subr.bf16.mxu1 %v11407_v53  ;;  %v1142_v21 = vld [vmem:[%s18329_s3 + $0x1600] sm:$0xff]  ;;  %v11503_v22 = vcombine.high %v694_v19, %v702_v20  ;;  %v11502_v24 = vcombine.low %v694_v19, %v702_v20 }
  0x4e   :  { %6769 = vmatpush1.bf16.msra.mxu0 %v11918_v9  ;;  %v1150_v23 = vld [vmem:[%s18329_s3 + $0x1640] sm:$0xff] }
  0x4f   :  { %6770 = vmatprep.subr.bf16.mxu0 %v11935_v18  ;;  %v11950_v25 = vcombine.low %v1142_v21, %v1150_v23  ;;  %v11951_v26 = vcombine.high %v1142_v21, %v1150_v23  ;;  %v1158_v27 = vld [vmem:[%s18329_s3 + $0x1680] sm:$0xff] }
  0x50   :  { %6687 = vmatpush1.bf16.msra.mxu1 %v11406_v56  ;;  %v1166_v28 = vld [vmem:[%s18329_s3 + $0x16c0] sm:$0xff] }
  0x51   :  { %6688 = vmatprep.subr.bf16.mxu1 %v11423_v57  ;;  %v11966_v29 = vcombine.low %v1158_v27, %v1166_v28  ;;  %v11967_v30 = vcombine.high %v1158_v27, %v1166_v28  ;;  %v1174_v31 = vld [vmem:[%s18329_s3 + $0x1700] sm:$0xff] }
  0x52   :  { %6771 = vmatpush1.bf16.msra.mxu0 %v11934_v17  ;;  %v1182_v32 = vld [vmem:[%s18329_s3 + $0x1740] sm:$0xff] }
  0x53   :  { %6772 = vmatprep.subr.bf16.mxu0 %v11951_v26  ;;  %v11982_v33 = vcombine.low %v1174_v31, %v1182_v32  ;;  %v11983_v34 = vcombine.high %v1174_v31, %v1182_v32  ;;  %v1190_v3 = vld [vmem:[%s18329_s3 + $0x1780] sm:$0xff] }
  0x54   :  { %6689 = vmatpush1.bf16.msra.mxu1 %v11422_v60  ;;  %v1198_v35 = vld [vmem:[%s18329_s3 + $0x17c0] sm:$0xff] }
  0x55   :  { %6690 = vmatprep.subr.bf16.mxu1 %v11439_v61  ;;  %v11998_v36 = vcombine.low %v1190_v3, %v1198_v35  ;;  %v11999_v37 = vcombine.high %v1190_v3, %v1198_v35  ;;  %v14001_v38 = vld [vmem:[%s18329_s3 + $0x1800] sm:$0xff] }
  0x56   :  { %6773 = vmatpush1.bf16.msra.mxu0 %v11950_v25  ;;  %v14006_v39 = vld [vmem:[%s18329_s3 + $0x1840] sm:$0xff] }
  0x57   :  { %6774 = vmatprep.subr.bf16.mxu0 %v11967_v30  ;;  %v12014_v40 = vcombine.low %v14001_v38, %v14006_v39  ;;  %v12015_v41 = vcombine.high %v14001_v38, %v14006_v39  ;;  %v14020_v46 = vld [vmem:[%s18330_s2] sm:$0xff]  ;;  %v14092_v30 = vsub.s32 7, %v14012_v43 }
  0x58   :  { %6691 = vmatpush1.bf16.msra.mxu1 %v11438_v0  ;;  %v97_v48 = vrot.slane %v14020_v46, %v14015_v44  ;;  %v101_v49 = vrot.slane %v14020_v46, %v14023_v47  ;;  %v710_v56 = vld [vmem:[%s18329_s3 + $0x880] sm:$0xff]  ;;  %v14051_v0 = vsub.s32 4, %v14012_v43  ;;  %v117_v12 = vrot.slane %v14020_v46, %v14056_v4 }
  0x59   :  { %6692 = vmatprep.subr.bf16.mxu1 %v11455_v1  ;;  %v718_v57 = vld [vmem:[%s18329_s3 + $0x8c0] sm:$0xff]  ;;  %v109_v1 = vrot.slane %v14020_v46, %v14038_v59  ;;  %v125_v42 = vrot.slane %v14020_v46, %v14092_v30 }
  0x5a   :  { %6775 = vmatpush1.bf16.msra.mxu0 %v11966_v29  ;;  %v11519_v61 = vcombine.high %v710_v56, %v718_v57  ;;  %v726_v62 = vld [vmem:[%s18329_s3 + $0x900] sm:$0xff]  ;;  %v113_v9 = vrot.slane %v14020_v46, %v14051_v0 }
  0x5b   :  { %6776 = vmatprep.subr.bf16.mxu0 %v11983_v34  ;;  %v734_v63 = vld [vmem:[%s18329_s3 + $0x940] sm:$0xff] }
  0x5c   :  { %6693 = vmatpush1.bf16.msra.mxu1 %v11454_v2  ;;  %v11518_v2 = vcombine.low %v710_v56, %v718_v57  ;;  %v11535_v5 = vcombine.high %v726_v62, %v734_v63  ;;  %v750_v7 = vld [vmem:[%s18329_s3 + $0x9c0] sm:$0xff]  ;;  %v11534_v11 = vcombine.low %v726_v62, %v734_v63 }
  0x5d   :  { %6694 = vmatprep.subr.bf16.mxu1 %v11471_v6  ;;  %v742_v6 = vld [vmem:[%s18329_s3 + $0x980] sm:$0xff] }
  0x5e   :  { %6777 = vmatpush1.bf16.msra.mxu0 %v11982_v33  ;;  %v11551_v13 = vcombine.high %v742_v6, %v750_v7  ;;  %v766_v17 = vld [vmem:[%s18329_s3 + $0xa40] sm:$0xff] }
  0x5f   :  { %6778 = vmatprep.subr.bf16.mxu0 %v11999_v37  ;;  %v774_v25 = vld [vmem:[%s18329_s3 + $0xa80] sm:$0xff] }
  0x60   :  { %6695 = vmatpush1.bf16.msra.mxu1 %v11470_v8  ;;  %v782_v27 = vld [vmem:[%s18329_s3 + $0xac0] sm:$0xff] }
  0x61   :  { %6696 = vmatprep.subr.bf16.mxu1 %v11487_v14  ;;  %v1222_v28 = vld [vmem:[%s18329_s3 + $0x1880] sm:$0xff]  ;;  %v11583_v34 = vcombine.high %v774_v25, %v782_v27 }
  0x62   :  { %6779 = vmatpush1.bf16.msra.mxu0 %v11998_v36  ;;  %v1230_v29 = vld [vmem:[%s18329_s3 + $0x18c0] sm:$0xff] }
  0x63   :  { %6789 = vmatprep.subr.bf16.mxu0 %v12015_v41  ;;  %v12031_v3 = vcombine.high %v1222_v28, %v1230_v29  ;;  %v790_v35 = vld [vmem:[%s18329_s3 + $0xb00] sm:$0xff] }
  0x64   :  { %6697 = vmatpush1.bf16.msra.mxu1 %v11486_v16  ;;  %v758_v16 = vld [vmem:[%s18329_s3 + $0xa00] sm:$0xff] }
  0x65   :  { %6707 = vmatprep.subr.bf16.mxu1 %v11503_v22  ;;  %v11550_v22 = vcombine.low %v742_v6, %v750_v7  ;;  %v11566_v32 = vcombine.low %v758_v16, %v766_v17  ;;  %v798_v36 = vld [vmem:[%s18329_s3 + $0xb40] sm:$0xff] }
  0x66   :  { %v1238_v37 = vld [vmem:[%s18329_s3 + $0x1900] sm:$0xff]  ;;  %v11598_v56 = vcombine.low %v790_v35, %v798_v36 }
  0x67   :  { %v1246_v41 = vld [vmem:[%s18329_s3 + $0x1940] sm:$0xff] }
  0x68   :  { %v1254_v38 = vld [vmem:[%s18329_s3 + $0x1980] sm:$0xff]  ;;  %v12046_v57 = vcombine.low %v1238_v37, %v1246_v41 }
  0x69   :  { %v1262_v39 = vld [vmem:[%s18329_s3 + $0x19c0] sm:$0xff] }
  0x6a   :  { %v12063_v62 = vcombine.high %v1254_v38, %v1262_v39  ;;  %v822_v63 = vld [vmem:[%s18329_s3 + $0xc00] sm:$0xff] }
  0x6b   :  { %v1278_v6 = vld [vmem:[%s18329_s3 + $0x1a40] sm:$0xff] }
  0xe8   :  { %v204_v50 = vpop.f32.mrb[0].mxu0 }
  0xe9   :  { %v205_v51 = vadd.f32 %v204_v50, %v97_v48  ;;  %v206_v52 = vpop.f32.mrb[1].mxu0  ;;  %v11582_v48 = vcombine.low %v774_v25, %v782_v27  ;;  %v11599_v50 = vcombine.high %v790_v35, %v798_v36 }
  0xea   :  { %v207_v53 = vadd.f32 %v206_v52, %v101_v49  ;;  %v14058_v45 = vpop.f32.mrb[0].mxu1  ;;  %v12030_v49 = vcombine.low %v1222_v28, %v1230_v29  ;;  %v806_v52 = vld [vmem:[%s18329_s3 + $0xb80] sm:$0xff] }
  0xeb   :  { %v422_v54 = vmax.f32 %v205_v51, 0.0  ;;  %v277_v8 = vpop.f32.mrb[1].mxu1  ;;  %v12047_v51 = vcombine.high %v1238_v37, %v1246_v41  ;;  %v870_v29 = vld [vmem:[%s18329_s3 + $0xd80] sm:$0xff] }
  0xec   :  { %v423_v55 = vmax.f32 %v207_v53, 0.0  ;;  %v278_v10 = vadd.f32 %v277_v8, %v109_v1 }
  0xed   :  { %v14035_v58 = vpack.c.bf16 %v422_v54, %v422_v54  ;;  %v814_v54 = vld [vmem:[%s18329_s3 + $0xbc0] sm:$0xff] }
  0xee   :  { %v14040_v60 = vpack.c.bf16 %v423_v55, %v423_v55  ;;  %v425_v14 = vmax.f32 %v278_v10, 0.0  ;;  %v11614_v8 = vcombine.low %v806_v52, %v814_v54 }
  0xf0   :  { %6698 = vmatprep.mubr.bf16.mxu1 %v14040_v60  ;;  %v14076_v20 = vpack.c.bf16 %v425_v14, %v425_v14  ;;  %v1286_v14 = vld [vmem:[%s18329_s3 + $0x1a80] sm:$0xff] }
  0xf1   :  { %6699 = vmatmul.mubr.bf16.vlgmr.msra.gmra.mrb[4].mxu1 %v14035_v58 }
  0xf2   :  { %6708 = vmatpush1.bf16.msra.mxu1 %v11502_v24  ;;  %v11567_v24 = vcombine.high %v758_v16, %v766_v17  ;;  %6739 = vmatprep.mubr.bf16.mxu1 %v14076_v20 }
  0xf3   :  { %6709 = vmatprep.subr.bf16.mxu1 %v11519_v61  ;;  %v11615_v61 = vcombine.high %v806_v52, %v814_v54 }
  0xf6   :  { %6710 = vmatpush1.bf16.msra.mxu1 %v11518_v2  ;;  %v830_v2 = vld [vmem:[%s18329_s3 + $0xc40] sm:$0xff] }
  0xf7   :  { %6711 = vmatprep.subr.bf16.mxu1 %v11535_v5  ;;  %v1270_v5 = vld [vmem:[%s18329_s3 + $0x1a00] sm:$0xff]  ;;  %v11631_v10 = vcombine.high %v822_v63, %v830_v2  ;;  %v11630_v16 = vcombine.low %v822_v63, %v830_v2 }
  0xf8   :  { %v346_v15 = vpop.f32.mrb[2].mxu0  ;;  %v12078_v17 = vcombine.low %v1270_v5, %v1278_v6  ;;  %v918_v2 = vld [vmem:[%s18329_s3 + $0xf00] sm:$0xff] }
  0xf9   :  { %v347_v18 = vadd.f32 %v346_v15, %v113_v9  ;;  %v348_v19 = vpop.f32.mrb[3].mxu0  ;;  %v12062_v9 = vcombine.low %v1254_v38, %v1262_v39  ;;  %v1294_v15 = vld [vmem:[%s18329_s3 + $0x1ac0] sm:$0xff] }
  0xfa   :  { %v349_v21 = vadd.f32 %v348_v19, %v117_v12  ;;  %6712 = vmatpush1.bf16.msra.mxu1 %v11534_v11  ;;  %v14120_v53 = vpop.f32.mrb[2].mxu1  ;;  %v12079_v11 = vcombine.high %v1270_v5, %v1278_v6  ;;  %v838_v12 = vld [vmem:[%s18329_s3 + $0xc80] sm:$0xff]  ;;  %v12095_v19 = vcombine.high %v1286_v14, %v1294_v15 }
  0xfb   :  { %v426_v23 = vmax.f32 %v347_v18, 0.0  ;;  %6713 = vmatprep.subr.bf16.mxu1 %v11551_v13  ;;  %v846_v13 = vld [vmem:[%s18329_s3 + $0xcc0] sm:$0xff] }
  0xfc   :  { %v427_v26 = vmax.f32 %v349_v21, 0.0  ;;  %v11647_v18 = vcombine.high %v838_v12, %v846_v13  ;;  %v854_v21 = vld [vmem:[%s18329_s3 + $0xd00] sm:$0xff]  ;;  %v11646_v25 = vcombine.low %v838_v12, %v846_v13 }
  0xfd   :  { %v14096_v33 = vpack.c.bf16 %v426_v23, %v426_v23  ;;  %v1302_v23 = vld [vmem:[%s18329_s3 + $0x1b00] sm:$0xff] }
  0xfe   :  { %v14094_v31 = vpack.c.bf16 %v427_v26, %v427_v26  ;;  %6714 = vmatpush1.bf16.msra.mxu1 %v11550_v22  ;;  %v862_v22 = vld [vmem:[%s18329_s3 + $0xd40] sm:$0xff]  ;;  %v12094_v26 = vcombine.low %v1286_v14, %v1294_v15 }
  0xff   :  { %6715 = vmatprep.subr.bf16.mxu1 %v11567_v24  ;;  %v1310_v24 = vld [vmem:[%s18329_s3 + $0x1b40] sm:$0xff]  ;;  %v11663_v27 = vcombine.high %v854_v21, %v862_v22  ;;  %v11662_v35 = vcombine.low %v854_v21, %v862_v22 }
 0x100   :  { %6780 = vmatprep.mubr.bf16.mxu0 %v14094_v31  ;;  %v12111_v28 = vcombine.high %v1302_v23, %v1310_v24  ;;  %v12110_v36 = vcombine.low %v1302_v23, %v1310_v24  ;;  %v902_v39 = vld [vmem:[%s18329_s3 + $0xe80] sm:$0xff] }
 0x101   :  { %6781 = vmatmul.mubr.bf16.vlgmr.msra.gmra.mrb[4].mxu0 %v14096_v33  ;;  %v926_v5 = vld [vmem:[%s18329_s3 + $0xf40] sm:$0xff] }
 0x102   :  { %6716 = vmatpush1.bf16.msra.mxu1 %v11566_v32  ;;  %6790 = vmatpush1.bf16.msra.mxu0 %v12014_v40  ;;  %v419_v40 = vpop.f32.mrb[3].mxu1  ;;  %v878_v32 = vld [vmem:[%s18329_s3 + $0xdc0] sm:$0xff]  ;;  %v11727_v12 = vcombine.high %v918_v2, %v926_v5 }
 0x103   :  { %6717 = vmatprep.subr.bf16.mxu1 %v11583_v34  ;;  %6791 = vmatprep.subr.bf16.mxu0 %v12031_v3  ;;  %v420_v55 = vadd.f32 %v419_v40, %v125_v42  ;;  %v1318_v34 = vld [vmem:[%s18329_s3 + $0x1b80] sm:$0xff]  ;;  %v11679_v37 = vcombine.high %v870_v29, %v878_v32 }
 0x104   :  { %v1326_v3 = vld [vmem:[%s18329_s3 + $0x1bc0] sm:$0xff] }
 0x105   :  { %v429_v1 = vmax.f32 %v420_v55, 0.0  ;;  %v12127_v41 = vcombine.high %v1318_v34, %v1326_v3  ;;  %v886_v42 = vld [vmem:[%s18329_s3 + $0xe00] sm:$0xff]  ;;  %v12126_v52 = vcombine.low %v1318_v34, %v1326_v3 }
 0x106   :  { %6718 = vmatpush1.bf16.msra.mxu1 %v11582_v48  ;;  %6792 = vmatpush1.bf16.msra.mxu0 %v12030_v49  ;;  %v894_v48 = vld [vmem:[%s18329_s3 + $0xe40] sm:$0xff] }
 0x107   :  { %6719 = vmatprep.subr.bf16.mxu1 %v11599_v50  ;;  %6793 = vmatprep.subr.bf16.mxu0 %v12047_v51  ;;  %v14143_v7 = vpack.c.bf16 %v429_v1, %v429_v1  ;;  %v1334_v49 = vld [vmem:[%s18329_s3 + $0x1c00] sm:$0xff]  ;;  %v11678_v51 = vcombine.low %v870_v29, %v878_v32  ;;  %v11695_v54 = vcombine.high %v886_v42, %v894_v48 }
 0x108   :  { %v1342_v50 = vld [vmem:[%s18329_s3 + $0x1c40] sm:$0xff] }
 0x109   :  { %6821 = vmatprep.mubr.bf16.mxu0 %v14143_v7  ;;  %v12143_v38 = vcombine.high %v1334_v49, %v1342_v50  ;;  %v910_v40 = vld [vmem:[%s18329_s3 + $0xec0] sm:$0xff] }
 0x10a   :  { %6720 = vmatpush1.bf16.msra.mxu1 %v11598_v56  ;;  %6794 = vmatpush1.bf16.msra.mxu0 %v12046_v57  ;;  %v1350_v55 = vld [vmem:[%s18329_s3 + $0x1c80] sm:$0xff]  ;;  %v14207_v57 = vsub.s32 2, %v14012_v43  ;;  %v11711_v63 = vcombine.high %v902_v39, %v910_v40 }
 0x10b   :  { %6721 = vmatprep.subr.bf16.mxu1 %v11615_v61  ;;  %6795 = vmatprep.subr.bf16.mxu0 %v12063_v62  ;;  %v1358_v56 = vld [vmem:[%s18329_s3 + $0x1cc0] sm:$0xff]  ;;  %v11694_v61 = vcombine.low %v886_v42, %v894_v48  ;;  %v12142_v62 = vcombine.low %v1334_v49, %v1342_v50  ;;  %v14263_v42 = vsub.s32 6, %v14012_v43  ;;  %v471_v43 = vld [vmem:[%s18329_s3 + $0x108] sm:$0xff] }
 0x10c   :  { %v12159_v1 = vcombine.high %v1350_v55, %v1358_v56  ;;  %v1366_v6 = vld [vmem:[%s18329_s3 + $0x1d00] sm:$0xff] }
 0x10d   :  { %v934_v14 = vld [vmem:[%s18329_s3 + $0xf80] sm:$0xff] }
 0x10e   :  { %6722 = vmatpush1.bf16.msra.mxu1 %v11614_v8  ;;  %6796 = vmatpush1.bf16.msra.mxu0 %v12062_v9  ;;  %v1374_v8 = vld [vmem:[%s18329_s3 + $0x1d40] sm:$0xff]  ;;  %v105_v9 = vrot.slane %v14020_v46, %v14207_v57 }
 0x10f   :  { %6723 = vmatprep.subr.bf16.mxu1 %v11631_v10  ;;  %6797 = vmatprep.subr.bf16.mxu0 %v12079_v11  ;;  %v11710_v10 = vcombine.low %v902_v39, %v910_v40  ;;  %v12158_v11 = vcombine.low %v1350_v55, %v1358_v56  ;;  %v12175_v13 = vcombine.high %v1366_v6, %v1374_v8  ;;  %v942_v15 = vld [vmem:[%s18329_s3 + $0xfc0] sm:$0xff] }
 0x110   :  { %v12174_v21 = vcombine.low %v1366_v6, %v1374_v8  ;;  %v11743_v22 = vcombine.high %v934_v14, %v942_v15  ;;  %v1398_v24 = vld [vmem:[%s18329_s3 + $0x1e00] sm:$0xff]  ;;  %v121_v39 = vrot.slane %v14020_v46, %v14263_v42  ;;  %v487_v46 = vld [vmem:[%s18329_s3 + $0x188] sm:$0xff] }
 0x111   :  { %v1414_v3 = vld [vmem:[%s18329_s3 + $0x1e80] sm:$0xff] }
 0x112   :  { %6724 = vmatpush1.bf16.msra.mxu1 %v11630_v16  ;;  %6798 = vmatpush1.bf16.msra.mxu0 %v12078_v17  ;;  %v1382_v16 = vld [vmem:[%s18329_s3 + $0x1d80] sm:$0xff] }
 0x113   :  { %6725 = vmatprep.subr.bf16.mxu1 %v11647_v18  ;;  %6799 = vmatprep.subr.bf16.mxu0 %v12095_v19  ;;  %v1390_v17 = vld [vmem:[%s18329_s3 + $0x1dc0] sm:$0xff]  ;;  %v276_v18 = vadd.f32 %v14058_v45, %v105_v9  ;;  %v11726_v19 = vcombine.low %v918_v2, %v926_v5  ;;  %v439_v45 = vld [vmem:[%s18329_s3 + $0x8] sm:$0xff]  ;;  %v418_v2 = vadd.f32 %v14120_v53, %v121_v39  ;;  %v440_v53 = vld [vmem:[%s18329_s3 + $0x10] sm:$0xff] }
 0x114   :  { %v12191_v23 = vcombine.high %v1382_v16, %v1390_v17  ;;  %v12190_v29 = vcombine.low %v1382_v16, %v1390_v17  ;;  %v575_v39 = vld [vmem:[%s18329_s3 + $0x448] sm:$0xff] }
 0x116   :  { %6726 = vmatpush1.bf16.msra.mxu1 %v11646_v25  ;;  %6800 = vmatpush1.bf16.msra.mxu0 %v12094_v26  ;;  %v1406_v25 = vld [vmem:[%s18329_s3 + $0x1e40] sm:$0xff]  ;;  %v447_v26 = vld [vmem:[%s18329_s3 + $0x48] sm:$0xff] }
 0x117   :  { %6727 = vmatprep.subr.bf16.mxu1 %v11663_v27  ;;  %6801 = vmatprep.subr.bf16.mxu0 %v12111_v28  ;;  %v424_v27 = vmax.f32 %v276_v18, 0.0  ;;  %v11742_v28 = vcombine.low %v934_v14, %v942_v15  ;;  %v12207_v32 = vcombine.high %v1398_v24, %v1406_v25  ;;  %v11249_v34 = vcombine.high %v439_v45, %v447_v26  ;;  %v519_v18 = vld [vmem:[%s18329_s3 + $0x288] sm:$0xff] }
 0x118   :  { %v12206_v48 = vcombine.low %v1398_v24, %v1406_v25  ;;  %v11248_v49 = vcombine.low %v439_v45, %v447_v26  ;;  %v535_v26 = vld [vmem:[%s18329_s3 + $0x308] sm:$0xff] }
 0x11a   :  { %6728 = vmatpush1.bf16.msra.mxu1 %v11662_v35  ;;  %6802 = vmatpush1.bf16.msra.mxu0 %v12110_v36  ;;  %v1422_v35 = vld [vmem:[%s18329_s3 + $0x1ec0] sm:$0xff]  ;;  %v14254_v36 = vpack.c.bf16 %v424_v27, %v424_v27 }
 0x11b   :  { %6729 = vmatprep.subr.bf16.mxu1 %v11679_v37  ;;  %6803 = vmatprep.subr.bf16.mxu0 %v12127_v41  ;;  %v455_v37 = vld [vmem:[%s18329_s3 + $0x88] sm:$0xff]  ;;  %v12223_v50 = vcombine.high %v1414_v3, %v1422_v35  ;;  %v12222_v40 = vcombine.low %v1414_v3, %v1422_v35 }
 0x11c   :  { %v463_v41 = vld [vmem:[%s18329_s3 + $0xc8] sm:$0xff] }
 0x11d   :  { %v11264_v55 = vcombine.low %v455_v37, %v463_v41 }
 0x11e   :  { %6730 = vmatpush1.bf16.msra.mxu1 %v11678_v51  ;;  %6804 = vmatpush1.bf16.msra.mxu0 %v12126_v52  ;;  %v1430_v51 = vld [vmem:[%s18329_s3 + $0x1f00] sm:$0xff]  ;;  %v11265_v52 = vcombine.high %v455_v37, %v463_v41  ;;  %v551_v41 = vld [vmem:[%s18329_s3 + $0x388] sm:$0xff] }
 0x11f   :  { %6731 = vmatprep.subr.bf16.mxu1 %v11695_v54  ;;  %6805 = vmatprep.subr.bf16.mxu0 %v12143_v38  ;;  %v1438_v54 = vld [vmem:[%s18329_s3 + $0x1f40] sm:$0xff]  ;;  %v479_v38 = vld [vmem:[%s18329_s3 + $0x148] sm:$0xff] }
 0x120   :  { %v12239_v56 = vcombine.high %v1430_v51, %v1438_v54  ;;  %v12238_v5 = vcombine.low %v1430_v51, %v1438_v54  ;;  %v11280_v6 = vcombine.low %v471_v43, %v479_v38 }
 0x122   :  { %6732 = vmatpush1.bf16.msra.mxu1 %v11694_v61  ;;  %6806 = vmatpush1.bf16.msra.mxu0 %v12142_v62  ;;  %v11281_v61 = vcombine.high %v471_v43, %v479_v38  ;;  %v1446_v62 = vld [vmem:[%s18329_s3 + $0x1f80] sm:$0xff]  ;;  %v567_v38 = vld [vmem:[%s18329_s3 + $0x408] sm:$0xff] }
 0x123   :  { %6733 = vmatprep.subr.bf16.mxu1 %v11711_v63  ;;  %6807 = vmatprep.subr.bf16.mxu0 %v12159_v1  ;;  %v1454_v63 = vld [vmem:[%s18329_s3 + $0x1fc0] sm:$0xff]  ;;  %v495_v1 = vld [vmem:[%s18329_s3 + $0x1c8] sm:$0xff] }
 0x124   :  { %v12255_v8 = vcombine.high %v1446_v62, %v1454_v63  ;;  %v11297_v9 = vcombine.high %v487_v46, %v495_v1  ;;  %v12254_v14 = vcombine.low %v1446_v62, %v1454_v63  ;;  %v11296_v15 = vcombine.low %v487_v46, %v495_v1  ;;  %v583_v46 = vld [vmem:[%s18329_s3 + $0x488] sm:$0xff] }
 0x125   :  { %v11377_v62 = vcombine.high %v567_v38, %v575_v39  ;;  %v591_v1 = vld [vmem:[%s18329_s3 + $0x4c8] sm:$0xff] }
 0x126   :  { %6734 = vmatpush1.bf16.msra.mxu1 %v11710_v10  ;;  %6808 = vmatpush1.bf16.msra.mxu0 %v12158_v11  ;;  %v503_v10 = vld [vmem:[%s18329_s3 + $0x208] sm:$0xff] }
 0x127   :  { %6735 = vmatprep.subr.bf16.mxu1 %v11727_v12  ;;  %6809 = vmatprep.subr.bf16.mxu0 %v12175_v13  ;;  %v511_v11 = vld [vmem:[%s18329_s3 + $0x248] sm:$0xff]  ;;  %v448_v12 = vld [vmem:[%s18329_s3 + $0x50] sm:$0xff]  ;;  %v428_v13 = vmax.f32 %v418_v2, 0.0 }
 0x128   :  { %v11313_v16 = vcombine.high %v503_v10, %v511_v11  ;;  %v11251_v17 = vcombine.high %v440_v53, %v448_v12  ;;  %v11312_v24 = vcombine.low %v503_v10, %v511_v11  ;;  %v11250_v25 = vcombine.low %v440_v53, %v448_v12  ;;  %v520_v2 = vld [vmem:[%s18329_s3 + $0x290] sm:$0xff]  ;;  %v599_v11 = vld [vmem:[%s18329_s3 + $0x508] sm:$0xff] }
 0x129   :  { %v607_v53 = vld [vmem:[%s18329_s3 + $0x548] sm:$0xff]  ;;  %v536_v12 = vld [vmem:[%s18329_s3 + $0x310] sm:$0xff] }
 0x12a   :  { %6736 = vmatpush1.bf16.msra.mxu1 %v11726_v19  ;;  %6810 = vmatpush1.bf16.msra.mxu0 %v12174_v21  ;;  %v527_v19 = vld [vmem:[%s18329_s3 + $0x2c8] sm:$0xff]  ;;  %v14312_v21 = vpack.c.bf16 %v428_v13, %v428_v13  ;;  %v544_v13 = vld [vmem:[%s18329_s3 + $0x350] sm:$0xff] }
 0x12b   :  { %6737 = vmatprep.subr.bf16.mxu1 %v11743_v22  ;;  %6811 = vmatprep.subr.bf16.mxu0 %v12191_v23  ;;  %v456_v22 = vld [vmem:[%s18329_s3 + $0x90] sm:$0xff]  ;;  %v11329_v45 = vcombine.high %v519_v18, %v527_v19 }
 0x12c   :  { %v464_v23 = vld [vmem:[%s18329_s3 + $0xd0] sm:$0xff] }
 0x12d   :  { %v11267_v27 = vcombine.high %v456_v22, %v464_v23  ;;  %v11266_v3 = vcombine.low %v456_v22, %v464_v23  ;;  %v552_v22 = vld [vmem:[%s18329_s3 + $0x390] sm:$0xff] }
 0x12e   :  { %6738 = vmatpush1.bf16.msra.mxu1 %v11742_v28  ;;  %6812 = vmatpush1.bf16.msra.mxu0 %v12190_v29  ;;  %v543_v28 = vld [vmem:[%s18329_s3 + $0x348] sm:$0xff]  ;;  %v472_v29 = vld [vmem:[%s18329_s3 + $0x110] sm:$0xff] }
 0x12f   :  { %6813 = vmatprep.subr.bf16.mxu0 %v12207_v32  ;;  %6830 = vmatprep.subr.bf16.mxu1 %v11249_v34  ;;  %v480_v32 = vld [vmem:[%s18329_s3 + $0x150] sm:$0xff]  ;;  %v11328_v34 = vcombine.low %v519_v18, %v527_v19  ;;  %v11345_v35 = vcombine.high %v535_v26, %v543_v28  ;;  %v11344_v51 = vcombine.low %v535_v26, %v543_v28  ;;  %v615_v18 = vld [vmem:[%s18329_s3 + $0x588] sm:$0xff] }
 0x130   :  { %v11283_v37 = vcombine.high %v472_v29, %v480_v32  ;;  %v623_v19 = vld [vmem:[%s18329_s3 + $0x5c8] sm:$0xff]  ;;  %v560_v23 = vld [vmem:[%s18329_s3 + $0x3d0] sm:$0xff] }
 0x131   :  { %6740 = vmatmul.mubr.bf16.vlgmr.msra.gmra.mrb[4].mxu1 %v14254_v36  ;;  %v11363_v26 = vcombine.high %v552_v22, %v560_v23  ;;  %v639_v28 = vld [vmem:[%s18329_s3 + $0x648] sm:$0xff] }
 0x132   :  { %6814 = vmatpush1.bf16.msra.mxu0 %v12206_v48  ;;  %6831 = vmatpush1.bf16.msra.mxu1 %v11248_v49  ;;  %v559_v48 = vld [vmem:[%s18329_s3 + $0x3c8] sm:$0xff]  ;;  %v488_v49 = vld [vmem:[%s18329_s3 + $0x190] sm:$0xff] }
 0x133   :  { %6862 = vmatprep.mubr.bf16.mxu1 %v14040_v60  ;;  %6815 = vmatprep.subr.bf16.mxu0 %v12223_v50  ;;  %v496_v50 = vld [vmem:[%s18329_s3 + $0x1d0] sm:$0xff]  ;;  %v11361_v54 = vcombine.high %v551_v41, %v559_v48 }
 0x134   :  { %6832 = vmatprep.subr.bf16.mxu1 %v11265_v52  ;;  %v11282_v52 = vcombine.low %v472_v29, %v480_v32  ;;  %v11299_v43 = vcombine.high %v488_v49, %v496_v50  ;;  %v568_v29 = vld [vmem:[%s18329_s3 + $0x410] sm:$0xff] }
 0x135   :  { %v576_v32 = vld [vmem:[%s18329_s3 + $0x450] sm:$0xff] }
 0x136   :  { %6816 = vmatpush1.bf16.msra.mxu0 %v12222_v40  ;;  %6833 = vmatpush1.bf16.msra.mxu1 %v11264_v55  ;;  %v504_v40 = vld [vmem:[%s18329_s3 + $0x210] sm:$0xff] }
 0x137   :  { %6817 = vmatprep.subr.bf16.mxu0 %v12239_v56  ;;  %6834 = vmatprep.subr.bf16.mxu1 %v11281_v61  ;;  %v512_v55 = vld [vmem:[%s18329_s3 + $0x250] sm:$0xff]  ;;  %v11360_v56 = vcombine.low %v551_v41, %v559_v48  ;;  %v11298_v61 = vcombine.low %v488_v49, %v496_v50  ;;  %v647_v41 = vld [vmem:[%s18329_s3 + $0x688] sm:$0xff] }
 0x138   :  { %v11315_v63 = vcombine.high %v504_v40, %v512_v55  ;;  %v655_v48 = vld [vmem:[%s18329_s3 + $0x6c8] sm:$0xff]  ;;  %v584_v49 = vld [vmem:[%s18329_s3 + $0x490] sm:$0xff] }
 0x139   :  { %v592_v50 = vld [vmem:[%s18329_s3 + $0x4d0] sm:$0xff] }
 0x13a   :  { %6818 = vmatpush1.bf16.msra.mxu0 %v12238_v5  ;;  %6835 = vmatpush1.bf16.msra.mxu1 %v11280_v6  ;;  %v528_v5 = vld [vmem:[%s18329_s3 + $0x2d0] sm:$0xff]  ;;  %v11376_v6 = vcombine.low %v567_v38, %v575_v39  ;;  %v663_v38 = vld [vmem:[%s18329_s3 + $0x708] sm:$0xff] }
 0x13b   :  { %6819 = vmatprep.subr.bf16.mxu0 %v12255_v8  ;;  %6836 = vmatprep.subr.bf16.mxu1 %v11297_v9  ;;  %v11314_v8 = vcombine.low %v504_v40, %v512_v55  ;;  %v11393_v9 = vcombine.high %v583_v46, %v591_v1  ;;  %v11331_v10 = vcombine.high %v520_v2, %v528_v5  ;;  %v671_v39 = vld [vmem:[%s18329_s3 + $0x748] sm:$0xff]  ;;  %v600_v40 = vld [vmem:[%s18329_s3 + $0x510] sm:$0xff] }
 0x13c   :  { %v608_v55 = vld [vmem:[%s18329_s3 + $0x550] sm:$0xff] }
 0x13e   :  { %6820 = vmatpush1.bf16.msra.mxu0 %v12254_v14  ;;  %6837 = vmatpush1.bf16.msra.mxu1 %v11296_v15  ;;  %v11392_v14 = vcombine.low %v583_v46, %v591_v1  ;;  %v11330_v15 = vcombine.low %v520_v2, %v528_v5  ;;  %v679_v46 = vld [vmem:[%s18329_s3 + $0x788] sm:$0xff]  ;;  %v616_v2 = vld [vmem:[%s18329_s3 + $0x590] sm:$0xff] }
 0x13f   :  { %6838 = vmatprep.subr.bf16.mxu1 %v11313_v16  ;;  %6994 = vmatprep.subr.bf16.mxu0 %v11251_v17  ;;  %v11409_v16 = vcombine.high %v599_v11, %v607_v53  ;;  %v11347_v17 = vcombine.high %v536_v12, %v544_v13  ;;  %v687_v1 = vld [vmem:[%s18329_s3 + $0x7c8] sm:$0xff]  ;;  %v624_v5 = vld [vmem:[%s18329_s3 + $0x5d0] sm:$0xff] }
 0x141   :  { %6822 = vmatmul.mubr.bf16.vlgmr.msra.gmra.mrb[4].mxu0 %v14312_v21 }
 0x142   :  { %6839 = vmatpush1.bf16.msra.mxu1 %v11312_v24  ;;  %6995 = vmatpush1.bf16.msra.mxu0 %v11250_v25  ;;  %v11408_v24 = vcombine.low %v599_v11, %v607_v53  ;;  %v11346_v25 = vcombine.low %v536_v12, %v544_v13  ;;  %v695_v11 = vld [vmem:[%s18329_s3 + $0x808] sm:$0xff]  ;;  %v632_v12 = vld [vmem:[%s18329_s3 + $0x610] sm:$0xff] }
 0x143   :  { %7026 = vmatprep.mubr.bf16.mxu0 %v14040_v60  ;;  %6840 = vmatprep.subr.bf16.mxu1 %v11329_v45  ;;  %v11425_v45 = vcombine.high %v615_v18, %v623_v19  ;;  %v703_v53 = vld [vmem:[%s18329_s3 + $0x848] sm:$0xff]  ;;  %v640_v13 = vld [vmem:[%s18329_s3 + $0x650] sm:$0xff] }
 0x144   :  { %6996 = vmatprep.subr.bf16.mxu0 %v11267_v27  ;;  %v631_v27 = vld [vmem:[%s18329_s3 + $0x608] sm:$0xff] }
 0x146   :  { %6841 = vmatpush1.bf16.msra.mxu1 %v11328_v34  ;;  %6997 = vmatpush1.bf16.msra.mxu0 %v11266_v3  ;;  %v11424_v34 = vcombine.low %v615_v18, %v623_v19  ;;  %v11362_v3 = vcombine.low %v552_v22, %v560_v23  ;;  %v711_v18 = vld [vmem:[%s18329_s3 + $0x888] sm:$0xff]  ;;  %v648_v22 = vld [vmem:[%s18329_s3 + $0x690] sm:$0xff] }
 0x147   :  { %6842 = vmatprep.subr.bf16.mxu1 %v11345_v35  ;;  %6998 = vmatprep.subr.bf16.mxu0 %v11283_v37  ;;  %v11441_v35 = vcombine.high %v631_v27, %v639_v28  ;;  %v11379_v37 = vcombine.high %v568_v29, %v576_v32  ;;  %v719_v19 = vld [vmem:[%s18329_s3 + $0x8c8] sm:$0xff]  ;;  %v656_v23 = vld [vmem:[%s18329_s3 + $0x6d0] sm:$0xff] }
 0x14a   :  { %6843 = vmatpush1.bf16.msra.mxu1 %v11344_v51  ;;  %6999 = vmatpush1.bf16.msra.mxu0 %v11282_v52  ;;  %v11440_v51 = vcombine.low %v631_v27, %v639_v28  ;;  %v11378_v52 = vcombine.low %v568_v29, %v576_v32  ;;  %v727_v27 = vld [vmem:[%s18329_s3 + $0x908] sm:$0xff]  ;;  %v664_v29 = vld [vmem:[%s18329_s3 + $0x710] sm:$0xff] }
 0x14b   :  { %6844 = vmatprep.subr.bf16.mxu1 %v11361_v54  ;;  %7000 = vmatprep.subr.bf16.mxu0 %v11299_v43  ;;  %v11457_v54 = vcombine.high %v647_v41, %v655_v48  ;;  %v11395_v43 = vcombine.high %v584_v49, %v592_v50  ;;  %v735_v28 = vld [vmem:[%s18329_s3 + $0x948] sm:$0xff]  ;;  %v672_v32 = vld [vmem:[%s18329_s3 + $0x750] sm:$0xff] }
 0x14e   :  { %6845 = vmatpush1.bf16.msra.mxu1 %v11360_v56  ;;  %7001 = vmatpush1.bf16.msra.mxu0 %v11298_v61  ;;  %v11456_v56 = vcombine.low %v647_v41, %v655_v48  ;;  %v11394_v61 = vcombine.low %v584_v49, %v592_v50  ;;  %v743_v41 = vld [vmem:[%s18329_s3 + $0x988] sm:$0xff]  ;;  %v680_v49 = vld [vmem:[%s18329_s3 + $0x790] sm:$0xff] }
 0x14f   :  { %6846 = vmatprep.subr.bf16.mxu1 %v11377_v62  ;;  %7002 = vmatprep.subr.bf16.mxu0 %v11315_v63  ;;  %v11473_v62 = vcombine.high %v663_v38, %v671_v39  ;;  %v11411_v63 = vcombine.high %v600_v40, %v608_v55  ;;  %v751_v48 = vld [vmem:[%s18329_s3 + $0x9c8] sm:$0xff]  ;;  %v688_v50 = vld [vmem:[%s18329_s3 + $0x7d0] sm:$0xff] }
 0x152   :  { %6847 = vmatpush1.bf16.msra.mxu1 %v11376_v6  ;;  %7003 = vmatpush1.bf16.msra.mxu0 %v11314_v8  ;;  %v11472_v6 = vcombine.low %v663_v38, %v671_v39  ;;  %v11410_v8 = vcombine.low %v600_v40, %v608_v55  ;;  %v759_v38 = vld [vmem:[%s18329_s3 + $0xa08] sm:$0xff]  ;;  %v696_v40 = vld [vmem:[%s18329_s3 + $0x810] sm:$0xff] }
 0x153   :  { %6848 = vmatprep.subr.bf16.mxu1 %v11393_v9  ;;  %7004 = vmatprep.subr.bf16.mxu0 %v11331_v10  ;;  %v11489_v9 = vcombine.high %v679_v46, %v687_v1  ;;  %v11427_v10 = vcombine.high %v616_v2, %v624_v5  ;;  %v767_v39 = vld [vmem:[%s18329_s3 + $0xa48] sm:$0xff]  ;;  %v704_v55 = vld [vmem:[%s18329_s3 + $0x850] sm:$0xff] }
 0x156   :  { %6849 = vmatpush1.bf16.msra.mxu1 %v11392_v14  ;;  %7005 = vmatpush1.bf16.msra.mxu0 %v11330_v15  ;;  %v11488_v14 = vcombine.low %v679_v46, %v687_v1  ;;  %v11426_v15 = vcombine.low %v616_v2, %v624_v5  ;;  %v775_v46 = vld [vmem:[%s18329_s3 + $0xa88] sm:$0xff]  ;;  %v712_v2 = vld [vmem:[%s18329_s3 + $0x890] sm:$0xff] }
 0x157   :  { %6850 = vmatprep.subr.bf16.mxu1 %v11409_v16  ;;  %7006 = vmatprep.subr.bf16.mxu0 %v11347_v17  ;;  %v11505_v16 = vcombine.high %v695_v11, %v703_v53  ;;  %v11443_v17 = vcombine.high %v632_v12, %v640_v13  ;;  %v783_v1 = vld [vmem:[%s18329_s3 + $0xac8] sm:$0xff]  ;;  %v720_v5 = vld [vmem:[%s18329_s3 + $0x8d0] sm:$0xff] }
 0x15a   :  { %6851 = vmatpush1.bf16.msra.mxu1 %v11408_v24  ;;  %7007 = vmatpush1.bf16.msra.mxu0 %v11346_v25  ;;  %v11504_v24 = vcombine.low %v695_v11, %v703_v53  ;;  %v11442_v25 = vcombine.low %v632_v12, %v640_v13  ;;  %v791_v11 = vld [vmem:[%s18329_s3 + $0xb08] sm:$0xff]  ;;  %v728_v12 = vld [vmem:[%s18329_s3 + $0x910] sm:$0xff] }
 0x15b   :  { %6852 = vmatprep.subr.bf16.mxu1 %v11425_v45  ;;  %7008 = vmatprep.subr.bf16.mxu0 %v11363_v26  ;;  %v11521_v45 = vcombine.high %v711_v18, %v719_v19  ;;  %v11459_v26 = vcombine.high %v648_v22, %v656_v23  ;;  %v799_v53 = vld [vmem:[%s18329_s3 + $0xb48] sm:$0xff]  ;;  %v736_v13 = vld [vmem:[%s18329_s3 + $0x950] sm:$0xff] }
 0x15e   :  { %6853 = vmatpush1.bf16.msra.mxu1 %v11424_v34  ;;  %7009 = vmatpush1.bf16.msra.mxu0 %v11362_v3  ;;  %v11520_v34 = vcombine.low %v711_v18, %v719_v19  ;;  %v11458_v3 = vcombine.low %v648_v22, %v656_v23  ;;  %v807_v18 = vld [vmem:[%s18329_s3 + $0xb88] sm:$0xff]  ;;  %v744_v22 = vld [vmem:[%s18329_s3 + $0x990] sm:$0xff] }
 0x15f   :  { %6854 = vmatprep.subr.bf16.mxu1 %v11441_v35  ;;  %7010 = vmatprep.subr.bf16.mxu0 %v11379_v37  ;;  %v11537_v35 = vcombine.high %v727_v27, %v735_v28  ;;  %v11475_v37 = vcombine.high %v664_v29, %v672_v32  ;;  %v815_v19 = vld [vmem:[%s18329_s3 + $0xbc8] sm:$0xff]  ;;  %v752_v23 = vld [vmem:[%s18329_s3 + $0x9d0] sm:$0xff] }
 0x162   :  { %6855 = vmatpush1.bf16.msra.mxu1 %v11440_v51  ;;  %7011 = vmatpush1.bf16.msra.mxu0 %v11378_v52  ;;  %v11536_v51 = vcombine.low %v727_v27, %v735_v28  ;;  %v11474_v52 = vcombine.low %v664_v29, %v672_v32  ;;  %v823_v27 = vld [vmem:[%s18329_s3 + $0xc08] sm:$0xff]  ;;  %v760_v29 = vld [vmem:[%s18329_s3 + $0xa10] sm:$0xff] }
 0x163   :  { %6856 = vmatprep.subr.bf16.mxu1 %v11457_v54  ;;  %7012 = vmatprep.subr.bf16.mxu0 %v11395_v43  ;;  %v11553_v54 = vcombine.high %v743_v41, %v751_v48  ;;  %v11491_v43 = vcombine.high %v680_v49, %v688_v50  ;;  %v831_v28 = vld [vmem:[%s18329_s3 + $0xc48] sm:$0xff]  ;;  %v768_v32 = vld [vmem:[%s18329_s3 + $0xa50] sm:$0xff] }
 0x166   :  { %6857 = vmatpush1.bf16.msra.mxu1 %v11456_v56  ;;  %7013 = vmatpush1.bf16.msra.mxu0 %v11394_v61  ;;  %v11552_v56 = vcombine.low %v743_v41, %v751_v48  ;;  %v11490_v61 = vcombine.low %v680_v49, %v688_v50  ;;  %v839_v41 = vld [vmem:[%s18329_s3 + $0xc88] sm:$0xff]  ;;  %v776_v49 = vld [vmem:[%s18329_s3 + $0xa90] sm:$0xff] }
 0x167   :  { %6858 = vmatprep.subr.bf16.mxu1 %v11473_v62  ;;  %7014 = vmatprep.subr.bf16.mxu0 %v11411_v63  ;;  %v11569_v62 = vcombine.high %v759_v38, %v767_v39  ;;  %v11507_v63 = vcombine.high %v696_v40, %v704_v55  ;;  %v847_v48 = vld [vmem:[%s18329_s3 + $0xcc8] sm:$0xff]  ;;  %v784_v50 = vld [vmem:[%s18329_s3 + $0xad0] sm:$0xff] }
 0x16a   :  { %6859 = vmatpush1.bf16.msra.mxu1 %v11472_v6  ;;  %7015 = vmatpush1.bf16.msra.mxu0 %v11410_v8  ;;  %v11568_v6 = vcombine.low %v759_v38, %v767_v39  ;;  %v11506_v8 = vcombine.low %v696_v40, %v704_v55  ;;  %v855_v38 = vld [vmem:[%s18329_s3 + $0xd08] sm:$0xff]  ;;  %v792_v40 = vld [vmem:[%s18329_s3 + $0xb10] sm:$0xff] }
 0x16b   :  { %6860 = vmatprep.subr.bf16.mxu1 %v11489_v9  ;;  %7016 = vmatprep.subr.bf16.mxu0 %v11427_v10  ;;  %v11585_v9 = vcombine.high %v775_v46, %v783_v1  ;;  %v11523_v10 = vcombine.high %v712_v2, %v720_v5  ;;  %v863_v39 = vld [vmem:[%s18329_s3 + $0xd48] sm:$0xff]  ;;  %v800_v55 = vld [vmem:[%s18329_s3 + $0xb50] sm:$0xff] }
 0x16e   :  { %6861 = vmatpush1.bf16.msra.mxu1 %v11488_v14  ;;  %7017 = vmatpush1.bf16.msra.mxu0 %v11426_v15  ;;  %v11584_v14 = vcombine.low %v775_v46, %v783_v1  ;;  %v11522_v15 = vcombine.low %v712_v2, %v720_v5  ;;  %v871_v46 = vld [vmem:[%s18329_s3 + $0xd88] sm:$0xff]  ;;  %v808_v2 = vld [vmem:[%s18329_s3 + $0xb90] sm:$0xff] }
 0x16f   :  { %6871 = vmatprep.subr.bf16.mxu1 %v11505_v16  ;;  %7018 = vmatprep.subr.bf16.mxu0 %v11443_v17  ;;  %v11601_v16 = vcombine.high %v791_v11, %v799_v53  ;;  %v11539_v17 = vcombine.high %v728_v12, %v736_v13  ;;  %v879_v1 = vld [vmem:[%s18329_s3 + $0xdc8] sm:$0xff]  ;;  %v816_v5 = vld [vmem:[%s18329_s3 + $0xbd0] sm:$0xff] }
 0x171   :  { %6863 = vmatmul.mubr.bf16.vlgmr.msra.gmra.mrb[8].mxu1 %v14035_v58 }
 0x172   :  { %6872 = vmatpush1.bf16.msra.mxu1 %v11504_v24  ;;  %6903 = vmatprep.mubr.bf16.mxu1 %v14076_v20  ;;  %v11600_v24 = vcombine.low %v791_v11, %v799_v53  ;;  %v887_v11 = vld [vmem:[%s18329_s3 + $0xe08] sm:$0xff] }
 0x173   :  { %7019 = vmatpush1.bf16.msra.mxu0 %v11442_v25  ;;  %6873 = vmatprep.subr.bf16.mxu1 %v11521_v45  ;;  %v11538_v25 = vcombine.low %v728_v12, %v736_v13  ;;  %v11617_v45 = vcombine.high %v807_v18, %v815_v19  ;;  %v895_v53 = vld [vmem:[%s18329_s3 + $0xe48] sm:$0xff]  ;;  %v824_v12 = vld [vmem:[%s18329_s3 + $0xc10] sm:$0xff] }
 0x174   :  { %7020 = vmatprep.subr.bf16.mxu0 %v11459_v26  ;;  %v11555_v26 = vcombine.high %v744_v22, %v752_v23  ;;  %v832_v13 = vld [vmem:[%s18329_s3 + $0xc50] sm:$0xff] }
 0x176   :  { %6874 = vmatpush1.bf16.msra.mxu1 %v11520_v34  ;;  %v11616_v34 = vcombine.low %v807_v18, %v815_v19  ;;  %v903_v18 = vld [vmem:[%s18329_s3 + $0xe88] sm:$0xff] }
 0x177   :  { %7021 = vmatpush1.bf16.msra.mxu0 %v11458_v3  ;;  %6875 = vmatprep.subr.bf16.mxu1 %v11537_v35  ;;  %v11554_v3 = vcombine.low %v744_v22, %v752_v23  ;;  %v11633_v35 = vcombine.high %v823_v27, %v831_v28  ;;  %v911_v19 = vld [vmem:[%s18329_s3 + $0xec8] sm:$0xff]  ;;  %v840_v22 = vld [vmem:[%s18329_s3 + $0xc90] sm:$0xff] }
 0x178   :  { %7022 = vmatprep.subr.bf16.mxu0 %v11475_v37  ;;  %v11571_v37 = vcombine.high %v760_v29, %v768_v32  ;;  %v848_v23 = vld [vmem:[%s18329_s3 + $0xcd0] sm:$0xff] }
 0x17a   :  { %6876 = vmatpush1.bf16.msra.mxu1 %v11536_v51  ;;  %v11632_v51 = vcombine.low %v823_v27, %v831_v28  ;;  %v919_v27 = vld [vmem:[%s18329_s3 + $0xf08] sm:$0xff] }
 0x17b   :  { %7023 = vmatpush1.bf16.msra.mxu0 %v11474_v52  ;;  %6877 = vmatprep.subr.bf16.mxu1 %v11553_v54  ;;  %v11570_v52 = vcombine.low %v760_v29, %v768_v32  ;;  %v11649_v54 = vcombine.high %v839_v41, %v847_v48  ;;  %v927_v28 = vld [vmem:[%s18329_s3 + $0xf48] sm:$0xff]  ;;  %v856_v29 = vld [vmem:[%s18329_s3 + $0xd10] sm:$0xff] }
 0x17c   :  { %7024 = vmatprep.subr.bf16.mxu0 %v11491_v43  ;;  %v11587_v43 = vcombine.high %v776_v49, %v784_v50  ;;  %v864_v32 = vld [vmem:[%s18329_s3 + $0xd50] sm:$0xff] }
 0x17e   :  { %6878 = vmatpush1.bf16.msra.mxu1 %v11552_v56  ;;  %v11648_v56 = vcombine.low %v839_v41, %v847_v48  ;;  %v935_v41 = vld [vmem:[%s18329_s3 + $0xf88] sm:$0xff] }
 0x17f   :  { %7025 = vmatpush1.bf16.msra.mxu0 %v11490_v61  ;;  %6879 = vmatprep.subr.bf16.mxu1 %v11569_v62  ;;  %v11586_v61 = vcombine.low %v776_v49, %v784_v50  ;;  %v11665_v62 = vcombine.high %v855_v38, %v863_v39  ;;  %v943_v48 = vld [vmem:[%s18329_s3 + $0xfc8] sm:$0xff]  ;;  %v872_v49 = vld [vmem:[%s18329_s3 + $0xd90] sm:$0xff] }
 0x180   :  { %7035 = vmatprep.subr.bf16.mxu0 %v11507_v63  ;;  %v11603_v63 = vcombine.high %v792_v40, %v800_v55  ;;  %v880_v50 = vld [vmem:[%s18329_s3 + $0xdd0] sm:$0xff] }
 0x182   :  { %7027 = vmatmul.mubr.bf16.vlgmr.msra.gmra.mrb[8].mxu0 %v14035_v58  ;;  %6880 = vmatpush1.bf16.msra.mxu1 %v11568_v6  ;;  %v11664_v6 = vcombine.low %v855_v38, %v863_v39  ;;  %v951_v38 = vld [vmem:[%s18329_s3 + $0x1008] sm:$0xff] }
 0x183   :  { %7036 = vmatpush1.bf16.msra.mxu0 %v11506_v8  ;;  %7067 = vmatprep.mubr.bf16.mxu0 %v14076_v20  ;;  %v11602_v8 = vcombine.low %v792_v40, %v800_v55  ;;  %v959_v39 = vld [vmem:[%s18329_s3 + $0x1048] sm:$0xff]  ;;  %v888_v40 = vld [vmem:[%s18329_s3 + $0xe10] sm:$0xff] }
 0x184   :  { %6881 = vmatprep.subr.bf16.mxu1 %v11585_v9  ;;  %7037 = vmatprep.subr.bf16.mxu0 %v11523_v10  ;;  %v11681_v9 = vcombine.high %v871_v46, %v879_v1  ;;  %v11619_v10 = vcombine.high %v808_v2, %v816_v5  ;;  %v896_v55 = vld [vmem:[%s18329_s3 + $0xe50] sm:$0xff] }
 0x186   :  { %6882 = vmatpush1.bf16.msra.mxu1 %v11584_v14  ;;  %v11680_v14 = vcombine.low %v871_v46, %v879_v1  ;;  %v967_v46 = vld [vmem:[%s18329_s3 + $0x1088] sm:$0xff] }
 0x187   :  { %7038 = vmatpush1.bf16.msra.mxu0 %v11522_v15  ;;  %6883 = vmatprep.subr.bf16.mxu1 %v11601_v16  ;;  %v11618_v15 = vcombine.low %v808_v2, %v816_v5  ;;  %v11697_v16 = vcombine.high %v887_v11, %v895_v53  ;;  %v975_v1 = vld [vmem:[%s18329_s3 + $0x10c8] sm:$0xff]  ;;  %v904_v2 = vld [vmem:[%s18329_s3 + $0xe90] sm:$0xff] }
 0x188   :  { %7039 = vmatprep.subr.bf16.mxu0 %v11539_v17  ;;  %v11635_v17 = vcombine.high %v824_v12, %v832_v13  ;;  %v912_v5 = vld [vmem:[%s18329_s3 + $0xed0] sm:$0xff] }
 0x18a   :  { %6884 = vmatpush1.bf16.msra.mxu1 %v11600_v24  ;;  %v11696_v24 = vcombine.low %v887_v11, %v895_v53  ;;  %v983_v11 = vld [vmem:[%s18329_s3 + $0x1108] sm:$0xff] }
 0x18b   :  { %7040 = vmatpush1.bf16.msra.mxu0 %v11538_v25  ;;  %6885 = vmatprep.subr.bf16.mxu1 %v11617_v45  ;;  %v11634_v25 = vcombine.low %v824_v12, %v832_v13  ;;  %v11713_v45 = vcombine.high %v903_v18, %v911_v19  ;;  %v991_v53 = vld [vmem:[%s18329_s3 + $0x1148] sm:$0xff]  ;;  %v920_v12 = vld [vmem:[%s18329_s3 + $0xf10] sm:$0xff] }
 0x18c   :  { %7041 = vmatprep.subr.bf16.mxu0 %v11555_v26  ;;  %v11651_v26 = vcombine.high %v840_v22, %v848_v23  ;;  %v928_v13 = vld [vmem:[%s18329_s3 + $0xf50] sm:$0xff] }
 0x18e   :  { %6886 = vmatpush1.bf16.msra.mxu1 %v11616_v34  ;;  %v11712_v34 = vcombine.low %v903_v18, %v911_v19  ;;  %v999_v18 = vld [vmem:[%s18329_s3 + $0x1188] sm:$0xff] }
 0x18f   :  { %7042 = vmatpush1.bf16.msra.mxu0 %v11554_v3  ;;  %6887 = vmatprep.subr.bf16.mxu1 %v11633_v35  ;;  %v11650_v3 = vcombine.low %v840_v22, %v848_v23  ;;  %v11729_v35 = vcombine.high %v919_v27, %v927_v28  ;;  %v1007_v19 = vld [vmem:[%s18329_s3 + $0x11c8] sm:$0xff]  ;;  %v936_v22 = vld [vmem:[%s18329_s3 + $0xf90] sm:$0xff] }
 0x190   :  { %7043 = vmatprep.subr.bf16.mxu0 %v11571_v37  ;;  %v11667_v37 = vcombine.high %v856_v29, %v864_v32  ;;  %v944_v23 = vld [vmem:[%s18329_s3 + $0xfd0] sm:$0xff] }
 0x192   :  { %6888 = vmatpush1.bf16.msra.mxu1 %v11632_v51  ;;  %v11728_v51 = vcombine.low %v919_v27, %v927_v28  ;;  %v1015_v27 = vld [vmem:[%s18329_s3 + $0x1208] sm:$0xff] }
 0x193   :  { %7044 = vmatpush1.bf16.msra.mxu0 %v11570_v52  ;;  %6889 = vmatprep.subr.bf16.mxu1 %v11649_v54  ;;  %v11666_v52 = vcombine.low %v856_v29, %v864_v32  ;;  %v11745_v54 = vcombine.high %v935_v41, %v943_v48  ;;  %v1023_v28 = vld [vmem:[%s18329_s3 + $0x1248] sm:$0xff]  ;;  %v952_v29 = vld [vmem:[%s18329_s3 + $0x1010] sm:$0xff] }
 0x194   :  { %7045 = vmatprep.subr.bf16.mxu0 %v11587_v43  ;;  %v11683_v43 = vcombine.high %v872_v49, %v880_v50  ;;  %v960_v32 = vld [vmem:[%s18329_s3 + $0x1050] sm:$0xff] }
 0x196   :  { %6890 = vmatpush1.bf16.msra.mxu1 %v11648_v56  ;;  %v11744_v56 = vcombine.low %v935_v41, %v943_v48  ;;  %v1031_v41 = vld [vmem:[%s18329_s3 + $0x1288] sm:$0xff] }
 0x197   :  { %7046 = vmatpush1.bf16.msra.mxu0 %v11586_v61  ;;  %6891 = vmatprep.subr.bf16.mxu1 %v11665_v62  ;;  %v11682_v61 = vcombine.low %v872_v49, %v880_v50  ;;  %v11761_v62 = vcombine.high %v951_v38, %v959_v39  ;;  %v1039_v48 = vld [vmem:[%s18329_s3 + $0x12c8] sm:$0xff]  ;;  %v968_v49 = vld [vmem:[%s18329_s3 + $0x1090] sm:$0xff] }
 0x198   :  { %7047 = vmatprep.subr.bf16.mxu0 %v11603_v63  ;;  %v11699_v63 = vcombine.high %v888_v40, %v896_v55  ;;  %v976_v50 = vld [vmem:[%s18329_s3 + $0x10d0] sm:$0xff] }
 0x19a   :  { %6892 = vmatpush1.bf16.msra.mxu1 %v11664_v6  ;;  %v11760_v6 = vcombine.low %v951_v38, %v959_v39  ;;  %v1047_v38 = vld [vmem:[%s18329_s3 + $0x1308] sm:$0xff] }
 0x19b   :  { %7048 = vmatpush1.bf16.msra.mxu0 %v11602_v8  ;;  %6893 = vmatprep.subr.bf16.mxu1 %v11681_v9  ;;  %v11698_v8 = vcombine.low %v888_v40, %v896_v55  ;;  %v11777_v9 = vcombine.high %v967_v46, %v975_v1  ;;  %v1055_v39 = vld [vmem:[%s18329_s3 + $0x1348] sm:$0xff]  ;;  %v984_v40 = vld [vmem:[%s18329_s3 + $0x1110] sm:$0xff] }
 0x19c   :  { %7049 = vmatprep.subr.bf16.mxu0 %v11619_v10  ;;  %v11715_v10 = vcombine.high %v904_v2, %v912_v5  ;;  %v992_v55 = vld [vmem:[%s18329_s3 + $0x1150] sm:$0xff] }
 0x19e   :  { %6894 = vmatpush1.bf16.msra.mxu1 %v11680_v14  ;;  %v11776_v14 = vcombine.low %v967_v46, %v975_v1  ;;  %v1063_v46 = vld [vmem:[%s18329_s3 + $0x1388] sm:$0xff] }
 0x19f   :  { %7050 = vmatpush1.bf16.msra.mxu0 %v11618_v15  ;;  %6895 = vmatprep.subr.bf16.mxu1 %v11697_v16  ;;  %v11714_v15 = vcombine.low %v904_v2, %v912_v5  ;;  %v11793_v16 = vcombine.high %v983_v11, %v991_v53  ;;  %v1071_v1 = vld [vmem:[%s18329_s3 + $0x13c8] sm:$0xff]  ;;  %v1000_v2 = vld [vmem:[%s18329_s3 + $0x1190] sm:$0xff] }
 0x1a0   :  { %7051 = vmatprep.subr.bf16.mxu0 %v11635_v17  ;;  %v11731_v17 = vcombine.high %v920_v12, %v928_v13  ;;  %v1008_v5 = vld [vmem:[%s18329_s3 + $0x11d0] sm:$0xff] }
 0x1a2   :  { %6896 = vmatpush1.bf16.msra.mxu1 %v11696_v24  ;;  %v11792_v24 = vcombine.low %v983_v11, %v991_v53  ;;  %v1079_v11 = vld [vmem:[%s18329_s3 + $0x1408] sm:$0xff] }
 0x1a3   :  { %7052 = vmatpush1.bf16.msra.mxu0 %v11634_v25  ;;  %6897 = vmatprep.subr.bf16.mxu1 %v11713_v45  ;;  %v11730_v25 = vcombine.low %v920_v12, %v928_v13  ;;  %v11809_v45 = vcombine.high %v999_v18, %v1007_v19  ;;  %v1087_v53 = vld [vmem:[%s18329_s3 + $0x1448] sm:$0xff]  ;;  %v1016_v12 = vld [vmem:[%s18329_s3 + $0x1210] sm:$0xff] }
 0x1a4   :  { %7053 = vmatprep.subr.bf16.mxu0 %v11651_v26  ;;  %v11747_v26 = vcombine.high %v936_v22, %v944_v23  ;;  %v1024_v13 = vld [vmem:[%s18329_s3 + $0x1250] sm:$0xff] }
 0x1a6   :  { %6898 = vmatpush1.bf16.msra.mxu1 %v11712_v34  ;;  %v11808_v34 = vcombine.low %v999_v18, %v1007_v19  ;;  %v1095_v18 = vld [vmem:[%s18329_s3 + $0x1488] sm:$0xff] }
 0x1a7   :  { %7054 = vmatpush1.bf16.msra.mxu0 %v11650_v3  ;;  %6899 = vmatprep.subr.bf16.mxu1 %v11729_v35  ;;  %v11746_v3 = vcombine.low %v936_v22, %v944_v23  ;;  %v11825_v35 = vcombine.high %v1015_v27, %v1023_v28  ;;  %v1103_v19 = vld [vmem:[%s18329_s3 + $0x14c8] sm:$0xff]  ;;  %v1032_v22 = vld [vmem:[%s18329_s3 + $0x1290] sm:$0xff] }
 0x1a8   :  { %7055 = vmatprep.subr.bf16.mxu0 %v11667_v37  ;;  %v11763_v37 = vcombine.high %v952_v29, %v960_v32  ;;  %v1040_v23 = vld [vmem:[%s18329_s3 + $0x12d0] sm:$0xff] }
 0x1aa   :  { %6900 = vmatpush1.bf16.msra.mxu1 %v11728_v51  ;;  %v11824_v51 = vcombine.low %v1015_v27, %v1023_v28  ;;  %v1111_v27 = vld [vmem:[%s18329_s3 + $0x1508] sm:$0xff] }
 0x1ab   :  { %7056 = vmatpush1.bf16.msra.mxu0 %v11666_v52  ;;  %6901 = vmatprep.subr.bf16.mxu1 %v11745_v54  ;;  %v11762_v52 = vcombine.low %v952_v29, %v960_v32  ;;  %v11841_v54 = vcombine.high %v1031_v41, %v1039_v48  ;;  %v1119_v28 = vld [vmem:[%s18329_s3 + $0x1548] sm:$0xff]  ;;  %v1048_v29 = vld [vmem:[%s18329_s3 + $0x1310] sm:$0xff] }
 0x1ac   :  { %7057 = vmatprep.subr.bf16.mxu0 %v11683_v43  ;;  %v11779_v43 = vcombine.high %v968_v49, %v976_v50  ;;  %v1056_v32 = vld [vmem:[%s18329_s3 + $0x1350] sm:$0xff] }
 0x1ae   :  { %6902 = vmatpush1.bf16.msra.mxu1 %v11744_v56  ;;  %v11840_v56 = vcombine.low %v1031_v41, %v1039_v48  ;;  %v1127_v41 = vld [vmem:[%s18329_s3 + $0x1588] sm:$0xff] }
 0x1af   :  { %7058 = vmatpush1.bf16.msra.mxu0 %v11682_v61  ;;  %6912 = vmatprep.subr.bf16.mxu1 %v11761_v62  ;;  %v11778_v61 = vcombine.low %v968_v49, %v976_v50  ;;  %v11857_v62 = vcombine.high %v1047_v38, %v1055_v39  ;;  %v1135_v48 = vld [vmem:[%s18329_s3 + $0x15c8] sm:$0xff]  ;;  %v1064_v49 = vld [vmem:[%s18329_s3 + $0x1390] sm:$0xff] }
 0x1b0   :  { %7059 = vmatprep.subr.bf16.mxu0 %v11699_v63  ;;  %v11795_v63 = vcombine.high %v984_v40, %v992_v55  ;;  %v1072_v50 = vld [vmem:[%s18329_s3 + $0x13d0] sm:$0xff] }
 0x1b1   :  { %6904 = vmatmul.mubr.bf16.vlgmr.msra.gmra.mrb[8].mxu1 %v14254_v36 }
 0x1b2   :  { %6913 = vmatpush1.bf16.msra.mxu1 %v11760_v6  ;;  %6944 = vmatprep.mubr.bf16.mxu1 %v14094_v31  ;;  %v11856_v6 = vcombine.low %v1047_v38, %v1055_v39  ;;  %v1143_v38 = vld [vmem:[%s18329_s3 + $0x1608] sm:$0xff] }
 0x1b3   :  { %7060 = vmatpush1.bf16.msra.mxu0 %v11698_v8  ;;  %6914 = vmatprep.subr.bf16.mxu1 %v11777_v9  ;;  %v11794_v8 = vcombine.low %v984_v40, %v992_v55  ;;  %v11873_v9 = vcombine.high %v1063_v46, %v1071_v1  ;;  %v1151_v39 = vld [vmem:[%s18329_s3 + $0x1648] sm:$0xff]  ;;  %v1080_v40 = vld [vmem:[%s18329_s3 + $0x1410] sm:$0xff] }
 0x1b4   :  { %7061 = vmatprep.subr.bf16.mxu0 %v11715_v10  ;;  %v11811_v10 = vcombine.high %v1000_v2, %v1008_v5  ;;  %v1088_v55 = vld [vmem:[%s18329_s3 + $0x1450] sm:$0xff] }
 0x1b6   :  { %6915 = vmatpush1.bf16.msra.mxu1 %v11776_v14  ;;  %v11872_v14 = vcombine.low %v1063_v46, %v1071_v1  ;;  %v1159_v46 = vld [vmem:[%s18329_s3 + $0x1688] sm:$0xff] }
 0x1b7   :  { %7062 = vmatpush1.bf16.msra.mxu0 %v11714_v15  ;;  %6916 = vmatprep.subr.bf16.mxu1 %v11793_v16  ;;  %v11810_v15 = vcombine.low %v1000_v2, %v1008_v5  ;;  %v11889_v16 = vcombine.high %v1079_v11, %v1087_v53  ;;  %v1167_v1 = vld [vmem:[%s18329_s3 + $0x16c8] sm:$0xff]  ;;  %v1096_v2 = vld [vmem:[%s18329_s3 + $0x1490] sm:$0xff] }
 0x1b8   :  { %7063 = vmatprep.subr.bf16.mxu0 %v11731_v17  ;;  %v11827_v17 = vcombine.high %v1016_v12, %v1024_v13  ;;  %v1104_v5 = vld [vmem:[%s18329_s3 + $0x14d0] sm:$0xff] }
 0x1ba   :  { %6917 = vmatpush1.bf16.msra.mxu1 %v11792_v24  ;;  %v11888_v24 = vcombine.low %v1079_v11, %v1087_v53  ;;  %v1175_v11 = vld [vmem:[%s18329_s3 + $0x1708] sm:$0xff] }
 0x1bb   :  { %7064 = vmatpush1.bf16.msra.mxu0 %v11730_v25  ;;  %6918 = vmatprep.subr.bf16.mxu1 %v11809_v45  ;;  %v11826_v25 = vcombine.low %v1016_v12, %v1024_v13  ;;  %v11905_v45 = vcombine.high %v1095_v18, %v1103_v19  ;;  %v1183_v53 = vld [vmem:[%s18329_s3 + $0x1748] sm:$0xff]  ;;  %v1112_v12 = vld [vmem:[%s18329_s3 + $0x1510] sm:$0xff] }
 0x1bc   :  { %7065 = vmatprep.subr.bf16.mxu0 %v11747_v26  ;;  %v11843_v26 = vcombine.high %v1032_v22, %v1040_v23  ;;  %v1120_v13 = vld [vmem:[%s18329_s3 + $0x1550] sm:$0xff] }
 0x1be   :  { %6919 = vmatpush1.bf16.msra.mxu1 %v11808_v34  ;;  %v11904_v34 = vcombine.low %v1095_v18, %v1103_v19  ;;  %v1191_v18 = vld [vmem:[%s18329_s3 + $0x1788] sm:$0xff] }
 0x1bf   :  { %7066 = vmatpush1.bf16.msra.mxu0 %v11746_v3  ;;  %6920 = vmatprep.subr.bf16.mxu1 %v11825_v35  ;;  %v11842_v3 = vcombine.low %v1032_v22, %v1040_v23  ;;  %v11921_v35 = vcombine.high %v1111_v27, %v1119_v28  ;;  %v1199_v19 = vld [vmem:[%s18329_s3 + $0x17c8] sm:$0xff]  ;;  %v1128_v22 = vld [vmem:[%s18329_s3 + $0x1590] sm:$0xff] }
 0x1c0   :  { %7076 = vmatprep.subr.bf16.mxu0 %v11763_v37  ;;  %v11859_v37 = vcombine.high %v1048_v29, %v1056_v32  ;;  %v1136_v23 = vld [vmem:[%s18329_s3 + $0x15d0] sm:$0xff] }
 0x1c2   :  { %7068 = vmatmul.mubr.bf16.vlgmr.msra.gmra.mrb[8].mxu0 %v14254_v36  ;;  %6921 = vmatpush1.bf16.msra.mxu1 %v11824_v51  ;;  %v11920_v51 = vcombine.low %v1111_v27, %v1119_v28  ;;  %v1207_v27 = vld [vmem:[%s18329_s3 + $0x1808] sm:$0xff] }
 0x1c3   :  { %7077 = vmatpush1.bf16.msra.mxu0 %v11762_v52  ;;  %7108 = vmatprep.mubr.bf16.mxu0 %v14094_v31  ;;  %v11858_v52 = vcombine.low %v1048_v29, %v1056_v32  ;;  %v1215_v28 = vld [vmem:[%s18329_s3 + $0x1848] sm:$0xff]  ;;  %v1144_v29 = vld [vmem:[%s18329_s3 + $0x1610] sm:$0xff] }
 0x1c4   :  { %6922 = vmatprep.subr.bf16.mxu1 %v11841_v54  ;;  %7078 = vmatprep.subr.bf16.mxu0 %v11779_v43  ;;  %v11937_v54 = vcombine.high %v1127_v41, %v1135_v48  ;;  %v11875_v43 = vcombine.high %v1064_v49, %v1072_v50  ;;  %v1152_v32 = vld [vmem:[%s18329_s3 + $0x1650] sm:$0xff] }
 0x1c6   :  { %6923 = vmatpush1.bf16.msra.mxu1 %v11840_v56  ;;  %v11936_v56 = vcombine.low %v1127_v41, %v1135_v48  ;;  %v1223_v41 = vld [vmem:[%s18329_s3 + $0x1888] sm:$0xff] }
 0x1c7   :  { %7079 = vmatpush1.bf16.msra.mxu0 %v11778_v61  ;;  %6924 = vmatprep.subr.bf16.mxu1 %v11857_v62  ;;  %v11874_v61 = vcombine.low %v1064_v49, %v1072_v50  ;;  %v11953_v62 = vcombine.high %v1143_v38, %v1151_v39  ;;  %v1231_v48 = vld [vmem:[%s18329_s3 + $0x18c8] sm:$0xff]  ;;  %v1160_v49 = vld [vmem:[%s18329_s3 + $0x1690] sm:$0xff] }
 0x1c8   :  { %7080 = vmatprep.subr.bf16.mxu0 %v11795_v63  ;;  %v11891_v63 = vcombine.high %v1080_v40, %v1088_v55  ;;  %v1168_v50 = vld [vmem:[%s18329_s3 + $0x16d0] sm:$0xff] }
 0x1ca   :  { %6925 = vmatpush1.bf16.msra.mxu1 %v11856_v6  ;;  %v11952_v6 = vcombine.low %v1143_v38, %v1151_v39  ;;  %v1239_v38 = vld [vmem:[%s18329_s3 + $0x1908] sm:$0xff] }
 0x1cb   :  { %7081 = vmatpush1.bf16.msra.mxu0 %v11794_v8  ;;  %6926 = vmatprep.subr.bf16.mxu1 %v11873_v9  ;;  %v11890_v8 = vcombine.low %v1080_v40, %v1088_v55  ;;  %v11969_v9 = vcombine.high %v1159_v46, %v1167_v1  ;;  %v1247_v39 = vld [vmem:[%s18329_s3 + $0x1948] sm:$0xff]  ;;  %v1176_v40 = vld [vmem:[%s18329_s3 + $0x1710] sm:$0xff] }
 0x1cc   :  { %7082 = vmatprep.subr.bf16.mxu0 %v11811_v10  ;;  %v11907_v10 = vcombine.high %v1096_v2, %v1104_v5  ;;  %v1184_v55 = vld [vmem:[%s18329_s3 + $0x1750] sm:$0xff] }
 0x1ce   :  { %6927 = vmatpush1.bf16.msra.mxu1 %v11872_v14  ;;  %v11968_v14 = vcombine.low %v1159_v46, %v1167_v1  ;;  %v1255_v46 = vld [vmem:[%s18329_s3 + $0x1988] sm:$0xff] }
 0x1cf   :  { %7083 = vmatpush1.bf16.msra.mxu0 %v11810_v15  ;;  %6928 = vmatprep.subr.bf16.mxu1 %v11889_v16  ;;  %v11906_v15 = vcombine.low %v1096_v2, %v1104_v5  ;;  %v11985_v16 = vcombine.high %v1175_v11, %v1183_v53  ;;  %v1263_v1 = vld [vmem:[%s18329_s3 + $0x19c8] sm:$0xff]  ;;  %v1192_v2 = vld [vmem:[%s18329_s3 + $0x1790] sm:$0xff] }
 0x1d0   :  { %7084 = vmatprep.subr.bf16.mxu0 %v11827_v17  ;;  %v11923_v17 = vcombine.high %v1112_v12, %v1120_v13  ;;  %v1200_v5 = vld [vmem:[%s18329_s3 + $0x17d0] sm:$0xff] }
 0x1d2   :  { %6929 = vmatpush1.bf16.msra.mxu1 %v11888_v24  ;;  %v11984_v24 = vcombine.low %v1175_v11, %v1183_v53  ;;  %v1271_v11 = vld [vmem:[%s18329_s3 + $0x1a08] sm:$0xff] }
 0x1d3   :  { %7085 = vmatpush1.bf16.msra.mxu0 %v11826_v25  ;;  %6930 = vmatprep.subr.bf16.mxu1 %v11905_v45  ;;  %v11922_v25 = vcombine.low %v1112_v12, %v1120_v13  ;;  %v12001_v45 = vcombine.high %v1191_v18, %v1199_v19  ;;  %v1279_v53 = vld [vmem:[%s18329_s3 + $0x1a48] sm:$0xff]  ;;  %v1208_v12 = vld [vmem:[%s18329_s3 + $0x1810] sm:$0xff] }
 0x1d4   :  { %7086 = vmatprep.subr.bf16.mxu0 %v11843_v26  ;;  %v11939_v26 = vcombine.high %v1128_v22, %v1136_v23  ;;  %v1216_v13 = vld [vmem:[%s18329_s3 + $0x1850] sm:$0xff] }
 0x1d6   :  { %6931 = vmatpush1.bf16.msra.mxu1 %v11904_v34  ;;  %v12000_v34 = vcombine.low %v1191_v18, %v1199_v19  ;;  %v1287_v18 = vld [vmem:[%s18329_s3 + $0x1a88] sm:$0xff] }
 0x1d7   :  { %7087 = vmatpush1.bf16.msra.mxu0 %v11842_v3  ;;  %6932 = vmatprep.subr.bf16.mxu1 %v11921_v35  ;;  %v11938_v3 = vcombine.low %v1128_v22, %v1136_v23  ;;  %v12017_v35 = vcombine.high %v1207_v27, %v1215_v28  ;;  %v1295_v19 = vld [vmem:[%s18329_s3 + $0x1ac8] sm:$0xff]  ;;  %v1224_v22 = vld [vmem:[%s18329_s3 + $0x1890] sm:$0xff] }
 0x1d8   :  { %7088 = vmatprep.subr.bf16.mxu0 %v11859_v37  ;;  %v11955_v37 = vcombine.high %v1144_v29, %v1152_v32  ;;  %v1232_v23 = vld [vmem:[%s18329_s3 + $0x18d0] sm:$0xff] }
 0x1da   :  { %6933 = vmatpush1.bf16.msra.mxu1 %v11920_v51  ;;  %v12016_v51 = vcombine.low %v1207_v27, %v1215_v28  ;;  %v1303_v27 = vld [vmem:[%s18329_s3 + $0x1b08] sm:$0xff] }
 0x1db   :  { %7089 = vmatpush1.bf16.msra.mxu0 %v11858_v52  ;;  %6934 = vmatprep.subr.bf16.mxu1 %v11937_v54  ;;  %v11954_v52 = vcombine.low %v1144_v29, %v1152_v32  ;;  %v12033_v54 = vcombine.high %v1223_v41, %v1231_v48  ;;  %v1311_v28 = vld [vmem:[%s18329_s3 + $0x1b48] sm:$0xff]  ;;  %v1240_v29 = vld [vmem:[%s18329_s3 + $0x1910] sm:$0xff] }
 0x1dc   :  { %7090 = vmatprep.subr.bf16.mxu0 %v11875_v43  ;;  %v11971_v43 = vcombine.high %v1160_v49, %v1168_v50  ;;  %v1248_v32 = vld [vmem:[%s18329_s3 + $0x1950] sm:$0xff] }
 0x1de   :  { %6935 = vmatpush1.bf16.msra.mxu1 %v11936_v56  ;;  %v12032_v56 = vcombine.low %v1223_v41, %v1231_v48  ;;  %v12051_v41 = vcombine.high %v1240_v29, %v1248_v32  ;;  %v1319_v48 = vld [vmem:[%s18329_s3 + $0x1b88] sm:$0xff] }
 0x1df   :  { %7091 = vmatpush1.bf16.msra.mxu0 %v11874_v61  ;;  %6936 = vmatprep.subr.bf16.mxu1 %v11953_v62  ;;  %v11970_v61 = vcombine.low %v1160_v49, %v1168_v50  ;;  %v12049_v62 = vcombine.high %v1239_v38, %v1247_v39  ;;  %v1327_v49 = vld [vmem:[%s18329_s3 + $0x1bc8] sm:$0xff] }
 0x1e0   :  { %7092 = vmatprep.subr.bf16.mxu0 %v11891_v63  ;;  %v11987_v63 = vcombine.high %v1176_v40, %v1184_v55 }
 0x1e2   :  { %6937 = vmatpush1.bf16.msra.mxu1 %v11952_v6  ;;  %v12048_v6 = vcombine.low %v1239_v38, %v1247_v39  ;;  %v12050_v39 = vcombine.low %v1240_v29, %v1248_v32  ;;  %v1383_v29 = vld [vmem:[%s18329_s3 + $0x1d88] sm:$0xff] }
 0x1e3   :  { %7093 = vmatpush1.bf16.msra.mxu0 %v11890_v8  ;;  %6938 = vmatprep.subr.bf16.mxu1 %v11969_v9  ;;  %v11986_v8 = vcombine.low %v1176_v40, %v1184_v55  ;;  %v12065_v9 = vcombine.high %v1255_v46, %v1263_v1  ;;  %v12129_v40 = vcombine.high %v1319_v48, %v1327_v49  ;;  %v1391_v32 = vld [vmem:[%s18329_s3 + $0x1dc8] sm:$0xff] }
 0x1e4   :  { %7094 = vmatprep.subr.bf16.mxu0 %v11907_v10  ;;  %v12003_v10 = vcombine.high %v1192_v2, %v1200_v5 }
 0x1e6   :  { %6939 = vmatpush1.bf16.msra.mxu1 %v11968_v14  ;;  %v12064_v14 = vcombine.low %v1255_v46, %v1263_v1  ;;  %v12128_v46 = vcombine.low %v1319_v48, %v1327_v49 }
 0x1e7   :  { %7095 = vmatpush1.bf16.msra.mxu0 %v11906_v15  ;;  %6940 = vmatprep.subr.bf16.mxu1 %v11985_v16  ;;  %v12002_v15 = vcombine.low %v1192_v2, %v1200_v5  ;;  %v12081_v16 = vcombine.high %v1271_v11, %v1279_v53  ;;  %v1462_v5 = vld [vmem:[%s18331_s4] sm:$0xff] }
 0x1e8   :  { %7096 = vmatprep.subr.bf16.mxu0 %v11923_v17  ;;  %v12019_v17 = vcombine.high %v1208_v12, %v1216_v13 }
 0x1ea   :  { %6941 = vmatpush1.bf16.msra.mxu1 %v11984_v24  ;;  %v12080_v24 = vcombine.low %v1271_v11, %v1279_v53  ;;  %v1296_v11 = vld [vmem:[%s18329_s3 + $0x1ad0] sm:$0xff] }
 0x1eb   :  { %7097 = vmatpush1.bf16.msra.mxu0 %v11922_v25  ;;  %6942 = vmatprep.subr.bf16.mxu1 %v12001_v45  ;;  %v12018_v25 = vcombine.low %v1208_v12, %v1216_v13  ;;  %v12097_v45 = vcombine.high %v1287_v18, %v1295_v19  ;;  %v1469_v12 = vrot.slane %v1462_v5, %v14015_v44 }
 0x1ec   :  { %7098 = vmatprep.subr.bf16.mxu0 %v11939_v26  ;;  %v12035_v26 = vcombine.high %v1224_v22, %v1232_v23 }
 0x1ee   :  { %6943 = vmatpush1.bf16.msra.mxu1 %v12000_v34  ;;  %v12096_v34 = vcombine.low %v1287_v18, %v1295_v19  ;;  %v1375_v18 = vld [vmem:[%s18329_s3 + $0x1d48] sm:$0xff]  ;;  %v1304_v19 = vld [vmem:[%s18329_s3 + $0x1b10] sm:$0xff] }
 0x1ef   :  { %7099 = vmatpush1.bf16.msra.mxu0 %v11938_v3  ;;  %6953 = vmatprep.subr.bf16.mxu1 %v12017_v35  ;;  %v12034_v3 = vcombine.low %v1224_v22, %v1232_v23  ;;  %v12113_v35 = vcombine.high %v1303_v27, %v1311_v28  ;;  %v1312_v22 = vld [vmem:[%s18329_s3 + $0x1b50] sm:$0xff] }
 0x1f0   :  { %7100 = vmatprep.subr.bf16.mxu0 %v11955_v37 }
 0x1f1   :  { %6945 = vmatmul.mubr.bf16.vlgmr.msra.gmra.mrb[8].mxu1 %v14096_v33 }
 0x1f2   :  { %6954 = vmatpush1.bf16.msra.mxu1 %v12016_v51  ;;  %6985 = vmatprep.mubr.bf16.mxu1 %v14143_v7  ;;  %v1256_v51 = vld [vmem:[%s18329_s3 + $0x1990] sm:$0xff] }
 0x1f3   :  { %7101 = vmatpush1.bf16.msra.mxu0 %v11954_v52  ;;  %6955 = vmatprep.subr.bf16.mxu1 %v12033_v54  ;;  %v1264_v52 = vld [vmem:[%s18329_s3 + $0x19d0] sm:$0xff] }
 0x1f4   :  { %7102 = vmatprep.subr.bf16.mxu0 %v11971_v43  ;;  %v12112_v43 = vcombine.low %v1303_v27, %v1311_v28  ;;  %v12067_v55 = vcombine.high %v1256_v51, %v1264_v52  ;;  %v12066_v1 = vcombine.low %v1256_v51, %v1264_v52  ;;  %v12115_v28 = vcombine.high %v1304_v19, %v1312_v22 }
 0x1f5   :  { %v12114_v51 = vcombine.low %v1304_v19, %v1312_v22  ;;  %v12193_v52 = vcombine.high %v1383_v29, %v1391_v32  ;;  %v1384_v19 = vld [vmem:[%s18329_s3 + $0x1d90] sm:$0xff] }
 0x1f6   :  { %6956 = vmatpush1.bf16.msra.mxu1 %v12032_v56  ;;  %v1335_v56 = vld [vmem:[%s18329_s3 + $0x1c08] sm:$0xff]  ;;  %v1392_v22 = vld [vmem:[%s18329_s3 + $0x1dd0] sm:$0xff] }
 0x1f7   :  { %7103 = vmatpush1.bf16.msra.mxu0 %v11970_v61  ;;  %6957 = vmatprep.subr.bf16.mxu1 %v12049_v62  ;;  %v1343_v61 = vld [vmem:[%s18329_s3 + $0x1c48] sm:$0xff]  ;;  %v1272_v62 = vld [vmem:[%s18329_s3 + $0x1a10] sm:$0xff] }
 0x1f8   :  { %7104 = vmatprep.subr.bf16.mxu0 %v11987_v63  ;;  %v1280_v63 = vld [vmem:[%s18329_s3 + $0x1a50] sm:$0xff]  ;;  %v12145_v2 = vcombine.high %v1335_v56, %v1343_v61  ;;  %v12144_v53 = vcombine.low %v1335_v56, %v1343_v61 }
 0x1f9   :  { %v12082_v13 = vcombine.low %v1272_v62, %v1280_v63 }
 0x1fa   :  { %6958 = vmatpush1.bf16.msra.mxu1 %v12048_v6  ;;  %v12083_v6 = vcombine.high %v1272_v62, %v1280_v63  ;;  %v1415_v63 = vld [vmem:[%s18329_s3 + $0x1e88] sm:$0xff] }
 0x1fb   :  { %7105 = vmatpush1.bf16.msra.mxu0 %v11986_v8  ;;  %6959 = vmatprep.subr.bf16.mxu1 %v12065_v9  ;;  %v1351_v8 = vld [vmem:[%s18329_s3 + $0x1c88] sm:$0xff] }
 0x1fc   :  { %7106 = vmatprep.subr.bf16.mxu0 %v12003_v10  ;;  %v1359_v9 = vld [vmem:[%s18329_s3 + $0x1cc8] sm:$0xff]  ;;  %v1288_v10 = vld [vmem:[%s18329_s3 + $0x1a90] sm:$0xff] }
 0x1fd   :  { %v12160_v23 = vcombine.low %v1351_v8, %v1359_v9 }
 0x1fe   :  { %6960 = vmatpush1.bf16.msra.mxu1 %v12064_v14  ;;  %v12161_v14 = vcombine.high %v1351_v8, %v1359_v9 }
 0x1ff   :  { %7107 = vmatpush1.bf16.msra.mxu0 %v12002_v15  ;;  %6961 = vmatprep.subr.bf16.mxu1 %v12081_v16  ;;  %v1473_v15 = vrot.slane %v1462_v5, %v14023_v47  ;;  %v12099_v16 = vcombine.high %v1288_v10, %v1296_v11 }
 0x200   :  { %7117 = vmatprep.subr.bf16.mxu0 %v12019_v17  ;;  %v1367_v17 = vld [vmem:[%s18329_s3 + $0x1d08] sm:$0xff] }
 0x201   :  { %v12176_v49 = vcombine.low %v1367_v17, %v1375_v18 }
 0x202   :  { %7109 = vmatmul.mubr.bf16.vlgmr.msra.gmra.mrb[8].mxu0 %v14096_v33  ;;  %6962 = vmatpush1.bf16.msra.mxu1 %v12080_v24 }
 0x203   :  { %7118 = vmatpush1.bf16.msra.mxu0 %v12018_v25  ;;  %7149 = vmatprep.mubr.bf16.mxu0 %v14143_v7  ;;  %v12098_v25 = vcombine.low %v1288_v10, %v1296_v11  ;;  %v1431_v10 = vld [vmem:[%s18329_s3 + $0x1f08] sm:$0xff] }
 0x204   :  { %v6741_v37 = vpop.f32.mrb[4].mxu1  ;;  %6963 = vmatprep.subr.bf16.mxu1 %v12097_v45  ;;  %7119 = vmatprep.subr.bf16.mxu0 %v12035_v26  ;;  %v12177_v45 = vcombine.high %v1367_v17, %v1375_v18  ;;  %v1439_v11 = vld [vmem:[%s18329_s3 + $0x1f48] sm:$0xff] }
 0x205   :  { %v6743_v50 = vpop.f32.mrb[5].mxu1  ;;  %v12894_v24 = vadd.f32 %v6741_v37, %v1469_v12  ;;  %v1328_v37 = vld [vmem:[%s18329_s3 + $0x1bd0] sm:$0xff]  ;;  %v1447_v17 = vld [vmem:[%s18329_s3 + $0x1f88] sm:$0xff] }
 0x206   :  { %v6745_v54 = vpop.f32.mrb[6].mxu1  ;;  %6964 = vmatpush1.bf16.msra.mxu1 %v12096_v34  ;;  %v12896_v26 = vadd.f32 %v6743_v50, %v1473_v15  ;;  %v1376_v12 = vld [vmem:[%s18329_s3 + $0x1d50] sm:$0xff]  ;;  %v12241_v15 = vcombine.high %v1431_v10, %v1439_v11  ;;  %v1455_v18 = vld [vmem:[%s18329_s3 + $0x1fc8] sm:$0xff] }
 0x207   :  { %7120 = vmatpush1.bf16.msra.mxu0 %v12034_v3  ;;  %v6746_v38 = vpop.f32.mrb[7].mxu1  ;;  %6965 = vmatprep.subr.bf16.mxu1 %v12113_v35  ;;  %v1320_v35 = vld [vmem:[%s18329_s3 + $0x1b90] sm:$0xff] }
 0x208   :  { %7121 = vmatprep.subr.bf16.mxu0 %v12051_v41  ;;  %v12131_v54 = vcombine.high %v1320_v35, %v1328_v37  ;;  %v1407_v38 = vld [vmem:[%s18329_s3 + $0x1e48] sm:$0xff]  ;;  %v12130_v56 = vcombine.low %v1320_v35, %v1328_v37 }
 0x20a   :  { %6966 = vmatpush1.bf16.msra.mxu1 %v12112_v43  ;;  %v1399_v43 = vld [vmem:[%s18329_s3 + $0x1e08] sm:$0xff] }
 0x20b   :  { %7122 = vmatpush1.bf16.msra.mxu0 %v12050_v39  ;;  %6967 = vmatprep.subr.bf16.mxu1 %v12129_v40  ;;  %v1336_v39 = vld [vmem:[%s18329_s3 + $0x1c10] sm:$0xff]  ;;  %v12209_v61 = vcombine.high %v1399_v43, %v1407_v38  ;;  %v12208_v5 = vcombine.low %v1399_v43, %v1407_v38 }
 0x20c   :  { %7123 = vmatprep.subr.bf16.mxu0 %v12067_v55  ;;  %v1344_v40 = vld [vmem:[%s18329_s3 + $0x1c50] sm:$0xff]  ;;  %v12192_v55 = vcombine.low %v1383_v29, %v1391_v32  ;;  %v12256_v32 = vcombine.low %v1447_v17, %v1455_v18 }
 0x20d   :  { %v12147_v62 = vcombine.high %v1336_v39, %v1344_v40  ;;  %v1408_v29 = vld [vmem:[%s18329_s3 + $0x1e50] sm:$0xff] }
 0x20e   :  { %6968 = vmatpush1.bf16.msra.mxu1 %v12128_v46  ;;  %v1423_v46 = vld [vmem:[%s18329_s3 + $0x1ec8] sm:$0xff] }
 0x20f   :  { %7124 = vmatpush1.bf16.msra.mxu0 %v12066_v1  ;;  %6969 = vmatprep.subr.bf16.mxu1 %v12145_v2  ;;  %v1352_v1 = vld [vmem:[%s18329_s3 + $0x1c90] sm:$0xff]  ;;  %v12225_v8 = vcombine.high %v1415_v63, %v1423_v46 }
 0x210   :  { %7125 = vmatprep.subr.bf16.mxu0 %v12083_v6  ;;  %v1360_v2 = vld [vmem:[%s18329_s3 + $0x1cd0] sm:$0xff]  ;;  %v12146_v6 = vcombine.low %v1336_v39, %v1344_v40  ;;  %v473_v39 = vld [vmem:[%s18329_s3 + $0x118] sm:$0xff] }
 0x211   :  { %v12163_v9 = vcombine.high %v1352_v1, %v1360_v2  ;;  %v481_v40 = vld [vmem:[%s18329_s3 + $0x158] sm:$0xff] }
 0x212   :  { %6970 = vmatpush1.bf16.msra.mxu1 %v12144_v53  ;;  %v1368_v53 = vld [vmem:[%s18329_s3 + $0x1d10] sm:$0xff] }
 0x213   :  { %7126 = vmatpush1.bf16.msra.mxu0 %v12082_v13  ;;  %6971 = vmatprep.subr.bf16.mxu1 %v12161_v14  ;;  %v12224_v13 = vcombine.low %v1415_v63, %v1423_v46  ;;  %v12162_v14 = vcombine.low %v1352_v1, %v1360_v2  ;;  %v11285_v63 = vcombine.high %v473_v39, %v481_v40  ;;  %v489_v1 = vld [vmem:[%s18329_s3 + $0x198] sm:$0xff] }
 0x214   :  { %v6823_v27 = vpop.f32.mrb[4].mxu0  ;;  %7127 = vmatprep.subr.bf16.mxu0 %v12099_v16  ;;  %v12179_v16 = vcombine.high %v1368_v53, %v1376_v12  ;;  %v497_v2 = vld [vmem:[%s18329_s3 + $0x1d8] sm:$0xff] }
 0x215   :  { %v14981_v34 = vadd.f32 %v12894_v24, %v6823_v27  ;;  %v6825_v3 = vpop.f32.mrb[5].mxu0  ;;  %v12178_v24 = vcombine.low %v1368_v53, %v1376_v12  ;;  %v449_v27 = vld [vmem:[%s18329_s3 + $0x58] sm:$0xff] }
 0x216   :  { %v14989_v41 = vadd.f32 %v12896_v26, %v6825_v3  ;;  %v6827_v48 = vpop.f32.mrb[6].mxu0  ;;  %6972 = vmatpush1.bf16.msra.mxu1 %v12160_v23  ;;  %v12240_v23 = vcombine.low %v1431_v10, %v1439_v11  ;;  %v441_v26 = vld [vmem:[%s18329_s3 + $0x18] sm:$0xff]  ;;  %v12194_v3 = vcombine.low %v1384_v19, %v1392_v22  ;;  %v11301_v10 = vcombine.high %v489_v1, %v497_v2 }
 0x217   :  { %7128 = vmatpush1.bf16.msra.mxu0 %v12098_v25  ;;  %v6828_v50 = vpop.f32.mrb[7].mxu0  ;;  %6973 = vmatprep.subr.bf16.mxu1 %v12177_v45  ;;  %v12257_v25 = vcombine.high %v1447_v17, %v1455_v18  ;;  %v12195_v45 = vcombine.high %v1384_v19, %v1392_v22  ;;  %v11253_v35 = vcombine.high %v441_v26, %v449_v27  ;;  %v457_v48 = vld [vmem:[%s18329_s3 + $0x98] sm:$0xff] }
 0x218   :  { %7129 = vmatprep.subr.bf16.mxu0 %v12115_v28  ;;  %v1400_v28 = vld [vmem:[%s18329_s3 + $0x1e10] sm:$0xff]  ;;  %v505_v53 = vld [vmem:[%s18329_s3 + $0x218] sm:$0xff] }
 0x219   :  { %v12211_v37 = vcombine.high %v1400_v28, %v1408_v29  ;;  %v1416_v50 = vld [vmem:[%s18329_s3 + $0x1e90] sm:$0xff]  ;;  %v513_v12 = vld [vmem:[%s18329_s3 + $0x258] sm:$0xff] }
 0x21a   :  { %6974 = vmatpush1.bf16.msra.mxu1 %v12176_v49  ;;  %v465_v49 = vld [vmem:[%s18329_s3 + $0xd8] sm:$0xff]  ;;  %v11317_v17 = vcombine.high %v505_v53, %v513_v12 }
 0x21b   :  { %7130 = vmatpush1.bf16.msra.mxu0 %v12114_v51  ;;  %6975 = vmatprep.subr.bf16.mxu1 %v12193_v52  ;;  %v1424_v51 = vld [vmem:[%s18329_s3 + $0x1ed0] sm:$0xff]  ;;  %v11252_v52 = vcombine.low %v441_v26, %v449_v27  ;;  %v11269_v43 = vcombine.high %v457_v48, %v465_v49  ;;  %v521_v19 = vld [vmem:[%s18329_s3 + $0x298] sm:$0xff] }
 0x21c   :  { %7131 = vmatprep.subr.bf16.mxu0 %v12131_v54  ;;  %v12210_v54 = vcombine.low %v1400_v28, %v1408_v29  ;;  %v12227_v38 = vcombine.high %v1416_v50, %v1424_v51  ;;  %v529_v22 = vld [vmem:[%s18329_s3 + $0x2d8] sm:$0xff] }
 0x21d   :  { %v11333_v26 = vcombine.high %v521_v19, %v529_v22  ;;  %v537_v28 = vld [vmem:[%s18329_s3 + $0x318] sm:$0xff] }
 0x21e   :  { %6976 = vmatpush1.bf16.msra.mxu1 %v12192_v55  ;;  %v1432_v55 = vld [vmem:[%s18329_s3 + $0x1f10] sm:$0xff]  ;;  %v545_v29 = vld [vmem:[%s18329_s3 + $0x358] sm:$0xff] }
 0x21f   :  { %7132 = vmatpush1.bf16.msra.mxu0 %v12130_v56  ;;  %6977 = vmatprep.subr.bf16.mxu1 %v12209_v61  ;;  %v1440_v56 = vld [vmem:[%s18329_s3 + $0x1f50] sm:$0xff]  ;;  %v11268_v61 = vcombine.low %v457_v48, %v465_v49  ;;  %v11349_v48 = vcombine.high %v537_v28, %v545_v29 }
 0x220   :  { %7133 = vmatprep.subr.bf16.mxu0 %v12147_v62  ;;  %v12226_v62 = vcombine.low %v1416_v50, %v1424_v51  ;;  %v12243_v46 = vcombine.high %v1432_v55, %v1440_v56  ;;  %v553_v50 = vld [vmem:[%s18329_s3 + $0x398] sm:$0xff] }
 0x221   :  { %v561_v51 = vld [vmem:[%s18329_s3 + $0x3d8] sm:$0xff] }
 0x222   :  { %6978 = vmatpush1.bf16.msra.mxu1 %v12208_v5  ;;  %v1448_v5 = vld [vmem:[%s18329_s3 + $0x1f90] sm:$0xff] }
 0x223   :  { %7134 = vmatpush1.bf16.msra.mxu0 %v12146_v6  ;;  %6979 = vmatprep.subr.bf16.mxu1 %v12225_v8  ;;  %v1456_v6 = vld [vmem:[%s18329_s3 + $0x1fd0] sm:$0xff]  ;;  %v11284_v8 = vcombine.low %v473_v39, %v481_v40  ;;  %v11365_v39 = vcombine.high %v553_v50, %v561_v51 }
 0x224   :  { %7135 = vmatprep.subr.bf16.mxu0 %v12163_v9  ;;  %v12242_v9 = vcombine.low %v1432_v55, %v1440_v56  ;;  %v12259_v11 = vcombine.high %v1448_v5, %v1456_v6  ;;  %v569_v55 = vld [vmem:[%s18329_s3 + $0x418] sm:$0xff] }
 0x225   :  { %v577_v56 = vld [vmem:[%s18329_s3 + $0x458] sm:$0xff] }
 0x226   :  { %6980 = vmatpush1.bf16.msra.mxu1 %v12224_v13  ;;  %v442_v13 = vld [vmem:[%s18329_s3 + $0x20] sm:$0xff] }
 0x227   :  { %7136 = vmatpush1.bf16.msra.mxu0 %v12162_v14  ;;  %6981 = vmatprep.subr.bf16.mxu1 %v12241_v15  ;;  %v450_v14 = vld [vmem:[%s18329_s3 + $0x60] sm:$0xff]  ;;  %v11300_v15 = vcombine.low %v489_v1, %v497_v2  ;;  %v11381_v1 = vcombine.high %v569_v55, %v577_v56 }
 0x228   :  { %7137 = vmatprep.subr.bf16.mxu0 %v12179_v16  ;;  %v12258_v16 = vcombine.low %v1448_v5, %v1456_v6  ;;  %v11255_v18 = vcombine.high %v442_v13, %v450_v14  ;;  %v585_v5 = vld [vmem:[%s18329_s3 + $0x498] sm:$0xff] }
 0x229   :  { %v593_v6 = vld [vmem:[%s18329_s3 + $0x4d8] sm:$0xff] }
 0x22a   :  { %6982 = vmatpush1.bf16.msra.mxu1 %v12240_v23  ;;  %v458_v23 = vld [vmem:[%s18329_s3 + $0xa0] sm:$0xff] }
 0x22b   :  { %7138 = vmatpush1.bf16.msra.mxu0 %v12178_v24  ;;  %6983 = vmatprep.subr.bf16.mxu1 %v12257_v25  ;;  %v466_v24 = vld [vmem:[%s18329_s3 + $0xe0] sm:$0xff]  ;;  %v11316_v25 = vcombine.low %v505_v53, %v513_v12  ;;  %v11397_v53 = vcombine.high %v585_v5, %v593_v6 }
 0x22c   :  { %7139 = vmatprep.subr.bf16.mxu0 %v12195_v45  ;;  %v11254_v45 = vcombine.low %v442_v13, %v450_v14  ;;  %v11271_v27 = vcombine.high %v458_v23, %v466_v24  ;;  %v601_v13 = vld [vmem:[%s18329_s3 + $0x518] sm:$0xff] }
 0x22d   :  { %v609_v14 = vld [vmem:[%s18329_s3 + $0x558] sm:$0xff] }
 0x22e   :  { %6984 = vmatpush1.bf16.msra.mxu1 %v12256_v32  ;;  %v474_v32 = vld [vmem:[%s18329_s3 + $0x120] sm:$0xff] }
 0x22f   :  { %7140 = vmatpush1.bf16.msra.mxu0 %v12194_v3  ;;  %7158 = vmatprep.subr.bf16.mxu1 %v11253_v35  ;;  %v482_v3 = vld [vmem:[%s18329_s3 + $0x160] sm:$0xff]  ;;  %v11332_v35 = vcombine.low %v521_v19, %v529_v22  ;;  %v11413_v19 = vcombine.high %v601_v13, %v609_v14 }
 0x230   :  { %7141 = vmatprep.subr.bf16.mxu0 %v12211_v37  ;;  %v11270_v37 = vcombine.low %v458_v23, %v466_v24  ;;  %v11287_v49 = vcombine.high %v474_v32, %v482_v3  ;;  %v617_v23 = vld [vmem:[%s18329_s3 + $0x598] sm:$0xff] }
 0x231   :  { %6986 = vmatmul.mubr.bf16.vlgmr.msra.gmra.mrb[8].mxu1 %v14312_v21  ;;  %v625_v24 = vld [vmem:[%s18329_s3 + $0x5d8] sm:$0xff] }
 0x232   :  { %7159 = vmatpush1.bf16.msra.mxu1 %v11252_v52  ;;  %7190 = vmatprep.mubr.bf16.mxu1 %v14040_v60  ;;  %v490_v52 = vld [vmem:[%s18329_s3 + $0x1a0] sm:$0xff] }
 0x233   :  { %7142 = vmatpush1.bf16.msra.mxu0 %v12210_v54  ;;  %7160 = vmatprep.subr.bf16.mxu1 %v11269_v43  ;;  %v498_v54 = vld [vmem:[%s18329_s3 + $0x1e0] sm:$0xff]  ;;  %v11348_v43 = vcombine.low %v537_v28, %v545_v29  ;;  %v11429_v28 = vcombine.high %v617_v23, %v625_v24 }
 0x234   :  { %7143 = vmatprep.subr.bf16.mxu0 %v12227_v38  ;;  %v11286_v38 = vcombine.low %v474_v32, %v482_v3  ;;  %v11303_v40 = vcombine.high %v490_v52, %v498_v54  ;;  %v633_v32 = vld [vmem:[%s18329_s3 + $0x618] sm:$0xff] }
 0x235   :  { %v641_v3 = vld [vmem:[%s18329_s3 + $0x658] sm:$0xff] }
 0x236   :  { %7161 = vmatpush1.bf16.msra.mxu1 %v11268_v61  ;;  %v506_v61 = vld [vmem:[%s18329_s3 + $0x220] sm:$0xff] }
 0x237   :  { %7144 = vmatpush1.bf16.msra.mxu0 %v12226_v62  ;;  %7162 = vmatprep.subr.bf16.mxu1 %v11285_v63  ;;  %v514_v62 = vld [vmem:[%s18329_s3 + $0x260] sm:$0xff]  ;;  %v11364_v63 = vcombine.low %v553_v50, %v561_v51  ;;  %v11445_v50 = vcombine.high %v633_v32, %v641_v3 }
 0x238   :  { %7145 = vmatprep.subr.bf16.mxu0 %v12243_v46  ;;  %v11302_v46 = vcombine.low %v490_v52, %v498_v54  ;;  %v11319_v2 = vcombine.high %v506_v61, %v514_v62  ;;  %v649_v52 = vld [vmem:[%s18329_s3 + $0x698] sm:$0xff] }
 0x239   :  { %v657_v54 = vld [vmem:[%s18329_s3 + $0x6d8] sm:$0xff] }
 0x23a   :  { %7163 = vmatpush1.bf16.msra.mxu1 %v11284_v8  ;;  %v522_v8 = vld [vmem:[%s18329_s3 + $0x2a0] sm:$0xff] }
 0x23b   :  { %7146 = vmatpush1.bf16.msra.mxu0 %v12242_v9  ;;  %7164 = vmatprep.subr.bf16.mxu1 %v11301_v10  ;;  %v530_v9 = vld [vmem:[%s18329_s3 + $0x2e0] sm:$0xff]  ;;  %v11380_v10 = vcombine.low %v569_v55, %v577_v56  ;;  %v11461_v55 = vcombine.high %v649_v52, %v657_v54 }
 0x23c   :  { %7147 = vmatprep.subr.bf16.mxu0 %v12259_v11  ;;  %v11318_v11 = vcombine.low %v506_v61, %v514_v62  ;;  %v11335_v12 = vcombine.high %v522_v8, %v530_v9  ;;  %v665_v61 = vld [vmem:[%s18329_s3 + $0x718] sm:$0xff] }
 0x23d   :  { %v673_v62 = vld [vmem:[%s18329_s3 + $0x758] sm:$0xff] }
 0x23e   :  { %7165 = vmatpush1.bf16.msra.mxu1 %v11300_v15  ;;  %v538_v15 = vld [vmem:[%s18329_s3 + $0x320] sm:$0xff] }
 0x23f   :  { %7148 = vmatpush1.bf16.msra.mxu0 %v12258_v16  ;;  %7166 = vmatprep.subr.bf16.mxu1 %v11317_v17  ;;  %v546_v16 = vld [vmem:[%s18329_s3 + $0x360] sm:$0xff]  ;;  %v11396_v17 = vcombine.low %v585_v5, %v593_v6  ;;  %v11477_v5 = vcombine.high %v665_v61, %v673_v62 }
 0x240   :  { %7322 = vmatprep.subr.bf16.mxu0 %v11255_v18  ;;  %v11334_v18 = vcombine.low %v522_v8, %v530_v9  ;;  %v11351_v22 = vcombine.high %v538_v15, %v546_v16  ;;  %v681_v8 = vld [vmem:[%s18329_s3 + $0x798] sm:$0xff] }
 0x241   :  { %v689_v9 = vld [vmem:[%s18329_s3 + $0x7d8] sm:$0xff] }
 0x242   :  { %7150 = vmatmul.mubr.bf16.vlgmr.msra.gmra.mrb[8].mxu0 %v14312_v21  ;;  %7167 = vmatpush1.bf16.msra.mxu1 %v11316_v25  ;;  %v554_v25 = vld [vmem:[%s18329_s3 + $0x3a0] sm:$0xff] }
 0x243   :  { %7323 = vmatpush1.bf16.msra.mxu0 %v11254_v45  ;;  %7354 = vmatprep.mubr.bf16.mxu0 %v14040_v60  ;;  %v562_v45 = vld [vmem:[%s18329_s3 + $0x3e0] sm:$0xff] }
 0x244   :  { %7168 = vmatprep.subr.bf16.mxu1 %v11333_v26  ;;  %7324 = vmatprep.subr.bf16.mxu0 %v11271_v27  ;;  %v11412_v26 = vcombine.low %v601_v13, %v609_v14  ;;  %v11350_v27 = vcombine.low %v538_v15, %v546_v16  ;;  %v11367_v29 = vcombine.high %v554_v25, %v562_v45  ;;  %v697_v15 = vld [vmem:[%s18329_s3 + $0x818] sm:$0xff] }
 0x245   :  { %v11493_v13 = vcombine.high %v681_v8, %v689_v9  ;;  %v705_v16 = vld [vmem:[%s18329_s3 + $0x858] sm:$0xff] }
 0x246   :  { %7169 = vmatpush1.bf16.msra.mxu1 %v11332_v35  ;;  %v570_v35 = vld [vmem:[%s18329_s3 + $0x420] sm:$0xff] }
 0x247   :  { %7325 = vmatpush1.bf16.msra.mxu0 %v11270_v37  ;;  %7170 = vmatprep.subr.bf16.mxu1 %v11349_v48  ;;  %v578_v37 = vld [vmem:[%s18329_s3 + $0x460] sm:$0xff]  ;;  %v11428_v48 = vcombine.low %v617_v23, %v625_v24  ;;  %v11509_v23 = vcombine.high %v697_v15, %v705_v16 }
 0x248   :  { %7326 = vmatprep.subr.bf16.mxu0 %v11287_v49  ;;  %v11366_v49 = vcombine.low %v554_v25, %v562_v45  ;;  %v11383_v51 = vcombine.high %v570_v35, %v578_v37  ;;  %v713_v25 = vld [vmem:[%s18329_s3 + $0x898] sm:$0xff] }
 0x249   :  { %v721_v45 = vld [vmem:[%s18329_s3 + $0x8d8] sm:$0xff] }
 0x24a   :  { %7171 = vmatpush1.bf16.msra.mxu1 %v11348_v43  ;;  %v586_v43 = vld [vmem:[%s18329_s3 + $0x4a0] sm:$0xff] }
 0x24b   :  { %7327 = vmatpush1.bf16.msra.mxu0 %v11286_v38  ;;  %7172 = vmatprep.subr.bf16.mxu1 %v11365_v39  ;;  %v594_v38 = vld [vmem:[%s18329_s3 + $0x4e0] sm:$0xff]  ;;  %v11444_v39 = vcombine.low %v633_v32, %v641_v3  ;;  %v11525_v32 = vcombine.high %v713_v25, %v721_v45 }
 0x24c   :  { %7328 = vmatprep.subr.bf16.mxu0 %v11303_v40  ;;  %v11382_v40 = vcombine.low %v570_v35, %v578_v37  ;;  %v11399_v56 = vcombine.high %v586_v43, %v594_v38  ;;  %v729_v35 = vld [vmem:[%s18329_s3 + $0x918] sm:$0xff] }
 0x24d   :  { %v737_v37 = vld [vmem:[%s18329_s3 + $0x958] sm:$0xff] }
 0x24e   :  { %7173 = vmatpush1.bf16.msra.mxu1 %v11364_v63  ;;  %v602_v63 = vld [vmem:[%s18329_s3 + $0x520] sm:$0xff] }
 0x24f   :  { %7329 = vmatpush1.bf16.msra.mxu0 %v11302_v46  ;;  %7174 = vmatprep.subr.bf16.mxu1 %v11381_v1  ;;  %v610_v46 = vld [vmem:[%s18329_s3 + $0x560] sm:$0xff]  ;;  %v11460_v1 = vcombine.low %v649_v52, %v657_v54  ;;  %v11541_v52 = vcombine.high %v729_v35, %v737_v37 }
 0x250   :  { %7330 = vmatprep.subr.bf16.mxu0 %v11319_v2  ;;  %v11398_v2 = vcombine.low %v586_v43, %v594_v38  ;;  %v11415_v6 = vcombine.high %v602_v63, %v610_v46  ;;  %v745_v43 = vld [vmem:[%s18329_s3 + $0x998] sm:$0xff] }
 0x251   :  { %v753_v38 = vld [vmem:[%s18329_s3 + $0x9d8] sm:$0xff] }
 0x252   :  { %7175 = vmatpush1.bf16.msra.mxu1 %v11380_v10  ;;  %v618_v10 = vld [vmem:[%s18329_s3 + $0x5a0] sm:$0xff] }
 0x253   :  { %7331 = vmatpush1.bf16.msra.mxu0 %v11318_v11  ;;  %7176 = vmatprep.subr.bf16.mxu1 %v11397_v53  ;;  %v626_v11 = vld [vmem:[%s18329_s3 + $0x5e0] sm:$0xff]  ;;  %v11476_v53 = vcombine.low %v665_v61, %v673_v62  ;;  %v11557_v61 = vcombine.high %v745_v43, %v753_v38 }
 0x254   :  { %7332 = vmatprep.subr.bf16.mxu0 %v11335_v12  ;;  %v11414_v12 = vcombine.low %v602_v63, %v610_v46  ;;  %v11431_v14 = vcombine.high %v618_v10, %v626_v11  ;;  %v761_v63 = vld [vmem:[%s18329_s3 + $0xa18] sm:$0xff] }
 0x255   :  { %v769_v46 = vld [vmem:[%s18329_s3 + $0xa58] sm:$0xff] }
 0x256   :  { %7177 = vmatpush1.bf16.msra.mxu1 %v11396_v17  ;;  %v634_v17 = vld [vmem:[%s18329_s3 + $0x620] sm:$0xff] }
 0x257   :  { %7333 = vmatpush1.bf16.msra.mxu0 %v11334_v18  ;;  %7178 = vmatprep.subr.bf16.mxu1 %v11413_v19  ;;  %v642_v18 = vld [vmem:[%s18329_s3 + $0x660] sm:$0xff]  ;;  %v11492_v19 = vcombine.low %v681_v8, %v689_v9  ;;  %v11573_v8 = vcombine.high %v761_v63, %v769_v46 }
 0x258   :  { %7334 = vmatprep.subr.bf16.mxu0 %v11351_v22  ;;  %v11430_v22 = vcombine.low %v618_v10, %v626_v11  ;;  %v11447_v24 = vcombine.high %v634_v17, %v642_v18  ;;  %v777_v10 = vld [vmem:[%s18329_s3 + $0xa98] sm:$0xff] }
 0x259   :  { %v785_v11 = vld [vmem:[%s18329_s3 + $0xad8] sm:$0xff] }
 0x25a   :  { %7179 = vmatpush1.bf16.msra.mxu1 %v11412_v26  ;;  %v650_v26 = vld [vmem:[%s18329_s3 + $0x6a0] sm:$0xff] }
 0x25b   :  { %7335 = vmatpush1.bf16.msra.mxu0 %v11350_v27  ;;  %7180 = vmatprep.subr.bf16.mxu1 %v11429_v28  ;;  %v658_v27 = vld [vmem:[%s18329_s3 + $0x6e0] sm:$0xff]  ;;  %v11508_v28 = vcombine.low %v697_v15, %v705_v16  ;;  %v11589_v15 = vcombine.high %v777_v10, %v785_v11 }
 0x25c   :  { %7336 = vmatprep.subr.bf16.mxu0 %v11367_v29  ;;  %v11446_v29 = vcombine.low %v634_v17, %v642_v18  ;;  %v11463_v3 = vcombine.high %v650_v26, %v658_v27  ;;  %v793_v17 = vld [vmem:[%s18329_s3 + $0xb18] sm:$0xff] }
 0x25d   :  { %v801_v18 = vld [vmem:[%s18329_s3 + $0xb58] sm:$0xff] }
 0x25e   :  { %7181 = vmatpush1.bf16.msra.mxu1 %v11428_v48  ;;  %v666_v48 = vld [vmem:[%s18329_s3 + $0x720] sm:$0xff] }
 0x25f   :  { %7337 = vmatpush1.bf16.msra.mxu0 %v11366_v49  ;;  %7182 = vmatprep.subr.bf16.mxu1 %v11445_v50  ;;  %v674_v49 = vld [vmem:[%s18329_s3 + $0x760] sm:$0xff]  ;;  %v11524_v50 = vcombine.low %v713_v25, %v721_v45  ;;  %v11605_v25 = vcombine.high %v793_v17, %v801_v18 }
 0x260   :  { %7338 = vmatprep.subr.bf16.mxu0 %v11383_v51  ;;  %v11462_v51 = vcombine.low %v650_v26, %v658_v27  ;;  %v11479_v54 = vcombine.high %v666_v48, %v674_v49  ;;  %v809_v26 = vld [vmem:[%s18329_s3 + $0xb98] sm:$0xff] }
 0x261   :  { %v817_v27 = vld [vmem:[%s18329_s3 + $0xbd8] sm:$0xff] }
 0x262   :  { %7183 = vmatpush1.bf16.msra.mxu1 %v11444_v39  ;;  %v682_v39 = vld [vmem:[%s18329_s3 + $0x7a0] sm:$0xff] }
 0x263   :  { %7339 = vmatpush1.bf16.msra.mxu0 %v11382_v40  ;;  %7184 = vmatprep.subr.bf16.mxu1 %v11461_v55  ;;  %v690_v40 = vld [vmem:[%s18329_s3 + $0x7e0] sm:$0xff]  ;;  %v11540_v55 = vcombine.low %v729_v35, %v737_v37  ;;  %v11621_v35 = vcombine.high %v809_v26, %v817_v27 }
 0x264   :  { %7340 = vmatprep.subr.bf16.mxu0 %v11399_v56  ;;  %v11478_v56 = vcombine.low %v666_v48, %v674_v49  ;;  %v11495_v62 = vcombine.high %v682_v39, %v690_v40  ;;  %v825_v48 = vld [vmem:[%s18329_s3 + $0xc18] sm:$0xff] }
 0x265   :  { %v833_v49 = vld [vmem:[%s18329_s3 + $0xc58] sm:$0xff] }
 0x266   :  { %7185 = vmatpush1.bf16.msra.mxu1 %v11460_v1  ;;  %v698_v1 = vld [vmem:[%s18329_s3 + $0x820] sm:$0xff] }
 0x267   :  { %7341 = vmatpush1.bf16.msra.mxu0 %v11398_v2  ;;  %7186 = vmatprep.subr.bf16.mxu1 %v11477_v5  ;;  %v706_v2 = vld [vmem:[%s18329_s3 + $0x860] sm:$0xff]  ;;  %v11556_v5 = vcombine.low %v745_v43, %v753_v38  ;;  %v11637_v43 = vcombine.high %v825_v48, %v833_v49 }
 0x268   :  { %7342 = vmatprep.subr.bf16.mxu0 %v11415_v6  ;;  %v11494_v6 = vcombine.low %v682_v39, %v690_v40  ;;  %v11511_v9 = vcombine.high %v698_v1, %v706_v2  ;;  %v841_v39 = vld [vmem:[%s18329_s3 + $0xc98] sm:$0xff] }
 0x269   :  { %v849_v40 = vld [vmem:[%s18329_s3 + $0xcd8] sm:$0xff] }
 0x26a   :  { %7187 = vmatpush1.bf16.msra.mxu1 %v11476_v53  ;;  %v714_v53 = vld [vmem:[%s18329_s3 + $0x8a0] sm:$0xff] }
 0x26b   :  { %7343 = vmatpush1.bf16.msra.mxu0 %v11414_v12  ;;  %7188 = vmatprep.subr.bf16.mxu1 %v11493_v13  ;;  %v722_v12 = vld [vmem:[%s18329_s3 + $0x8e0] sm:$0xff]  ;;  %v11572_v13 = vcombine.low %v761_v63, %v769_v46  ;;  %v11653_v63 = vcombine.high %v841_v39, %v849_v40 }
 0x26c   :  { %7344 = vmatprep.subr.bf16.mxu0 %v11431_v14  ;;  %v11510_v14 = vcombine.low %v698_v1, %v706_v2  ;;  %v11527_v16 = vcombine.high %v714_v53, %v722_v12  ;;  %v857_v1 = vld [vmem:[%s18329_s3 + $0xd18] sm:$0xff] }
 0x26d   :  { %v865_v2 = vld [vmem:[%s18329_s3 + $0xd58] sm:$0xff] }
 0x26e   :  { %7189 = vmatpush1.bf16.msra.mxu1 %v11492_v19  ;;  %v730_v19 = vld [vmem:[%s18329_s3 + $0x920] sm:$0xff] }
 0x26f   :  { %7345 = vmatpush1.bf16.msra.mxu0 %v11430_v22  ;;  %7199 = vmatprep.subr.bf16.mxu1 %v11509_v23  ;;  %v738_v22 = vld [vmem:[%s18329_s3 + $0x960] sm:$0xff]  ;;  %v11588_v23 = vcombine.low %v777_v10, %v785_v11  ;;  %v11669_v10 = vcombine.high %v857_v1, %v865_v2 }
 0x270   :  { %7346 = vmatprep.subr.bf16.mxu0 %v11447_v24  ;;  %v11526_v24 = vcombine.low %v714_v53, %v722_v12  ;;  %v11543_v45 = vcombine.high %v730_v19, %v738_v22  ;;  %v873_v53 = vld [vmem:[%s18329_s3 + $0xd98] sm:$0xff] }
 0x271   :  { %7191 = vmatmul.mubr.bf16.vlgmr.msra.gmra.mrb[12].mxu1 %v14035_v58  ;;  %v881_v12 = vld [vmem:[%s18329_s3 + $0xdd8] sm:$0xff] }
 0x272   :  { %7200 = vmatpush1.bf16.msra.mxu1 %v11508_v28  ;;  %7231 = vmatprep.mubr.bf16.mxu1 %v14076_v20  ;;  %v746_v28 = vld [vmem:[%s18329_s3 + $0x9a0] sm:$0xff] }
 0x273   :  { %7347 = vmatpush1.bf16.msra.mxu0 %v11446_v29  ;;  %7201 = vmatprep.subr.bf16.mxu1 %v11525_v32  ;;  %v754_v29 = vld [vmem:[%s18329_s3 + $0x9e0] sm:$0xff]  ;;  %v11604_v32 = vcombine.low %v793_v17, %v801_v18  ;;  %v11685_v17 = vcombine.high %v873_v53, %v881_v12 }
 0x274   :  { %7348 = vmatprep.subr.bf16.mxu0 %v11463_v3  ;;  %v11542_v3 = vcombine.low %v730_v19, %v738_v22  ;;  %v11559_v37 = vcombine.high %v746_v28, %v754_v29  ;;  %v889_v19 = vld [vmem:[%s18329_s3 + $0xe18] sm:$0xff] }
 0x275   :  { %v897_v22 = vld [vmem:[%s18329_s3 + $0xe58] sm:$0xff] }
 0x276   :  { %7202 = vmatpush1.bf16.msra.mxu1 %v11524_v50  ;;  %v762_v50 = vld [vmem:[%s18329_s3 + $0xa20] sm:$0xff] }
 0x277   :  { %7349 = vmatpush1.bf16.msra.mxu0 %v11462_v51  ;;  %7203 = vmatprep.subr.bf16.mxu1 %v11541_v52  ;;  %v770_v51 = vld [vmem:[%s18329_s3 + $0xa60] sm:$0xff]  ;;  %v11620_v52 = vcombine.low %v809_v26, %v817_v27  ;;  %v11701_v26 = vcombine.high %v889_v19, %v897_v22 }
 0x278   :  { %7350 = vmatprep.subr.bf16.mxu0 %v11479_v54  ;;  %v11558_v54 = vcombine.low %v746_v28, %v754_v29  ;;  %v11575_v38 = vcombine.high %v762_v50, %v770_v51  ;;  %v905_v28 = vld [vmem:[%s18329_s3 + $0xe98] sm:$0xff] }
 0x279   :  { %v913_v29 = vld [vmem:[%s18329_s3 + $0xed8] sm:$0xff] }
 0x27a   :  { %7204 = vmatpush1.bf16.msra.mxu1 %v11540_v55  ;;  %v778_v55 = vld [vmem:[%s18329_s3 + $0xaa0] sm:$0xff] }
 0x27b   :  { %7351 = vmatpush1.bf16.msra.mxu0 %v11478_v56  ;;  %7205 = vmatprep.subr.bf16.mxu1 %v11557_v61  ;;  %v786_v56 = vld [vmem:[%s18329_s3 + $0xae0] sm:$0xff]  ;;  %v11636_v61 = vcombine.low %v825_v48, %v833_v49  ;;  %v11717_v48 = vcombine.high %v905_v28, %v913_v29 }
 0x27c   :  { %7352 = vmatprep.subr.bf16.mxu0 %v11495_v62  ;;  %v11574_v62 = vcombine.low %v762_v50, %v770_v51  ;;  %v11591_v46 = vcombine.high %v778_v55, %v786_v56  ;;  %v921_v50 = vld [vmem:[%s18329_s3 + $0xf18] sm:$0xff] }
 0x27d   :  { %v929_v51 = vld [vmem:[%s18329_s3 + $0xf58] sm:$0xff] }
 0x27e   :  { %7206 = vmatpush1.bf16.msra.mxu1 %v11556_v5  ;;  %v794_v5 = vld [vmem:[%s18329_s3 + $0xb20] sm:$0xff] }
 0x27f   :  { %7353 = vmatpush1.bf16.msra.mxu0 %v11494_v6  ;;  %7207 = vmatprep.subr.bf16.mxu1 %v11573_v8  ;;  %v802_v6 = vld [vmem:[%s18329_s3 + $0xb60] sm:$0xff]  ;;  %v11652_v8 = vcombine.low %v841_v39, %v849_v40  ;;  %v11733_v39 = vcombine.high %v921_v50, %v929_v51 }
 0x280   :  { %7363 = vmatprep.subr.bf16.mxu0 %v11511_v9  ;;  %v11590_v9 = vcombine.low %v778_v55, %v786_v56  ;;  %v11607_v11 = vcombine.high %v794_v5, %v802_v6  ;;  %v937_v55 = vld [vmem:[%s18329_s3 + $0xf98] sm:$0xff] }
 0x281   :  { %v945_v56 = vld [vmem:[%s18329_s3 + $0xfd8] sm:$0xff] }
 0x282   :  { %7355 = vmatmul.mubr.bf16.vlgmr.msra.gmra.mrb[12].mxu0 %v14035_v58  ;;  %7208 = vmatpush1.bf16.msra.mxu1 %v11572_v13  ;;  %v810_v13 = vld [vmem:[%s18329_s3 + $0xba0] sm:$0xff] }
 0x283   :  { %7364 = vmatpush1.bf16.msra.mxu0 %v11510_v14  ;;  %7395 = vmatprep.mubr.bf16.mxu0 %v14076_v20  ;;  %v818_v14 = vld [vmem:[%s18329_s3 + $0xbe0] sm:$0xff] }
 0x284   :  { %7209 = vmatprep.subr.bf16.mxu1 %v11589_v15  ;;  %7365 = vmatprep.subr.bf16.mxu0 %v11527_v16  ;;  %v11668_v15 = vcombine.low %v857_v1, %v865_v2  ;;  %v11606_v16 = vcombine.low %v794_v5, %v802_v6  ;;  %v11623_v18 = vcombine.high %v810_v13, %v818_v14  ;;  %v953_v5 = vld [vmem:[%s18329_s3 + $0x1018] sm:$0xff] }
 0x285   :  { %v11749_v1 = vcombine.high %v937_v55, %v945_v56  ;;  %v961_v6 = vld [vmem:[%s18329_s3 + $0x1058] sm:$0xff] }
 0x286   :  { %7210 = vmatpush1.bf16.msra.mxu1 %v11588_v23  ;;  %v826_v23 = vld [vmem:[%s18329_s3 + $0xc20] sm:$0xff] }
 0x287   :  { %7366 = vmatpush1.bf16.msra.mxu0 %v11526_v24  ;;  %7211 = vmatprep.subr.bf16.mxu1 %v11605_v25  ;;  %v834_v24 = vld [vmem:[%s18329_s3 + $0xc60] sm:$0xff]  ;;  %v11684_v25 = vcombine.low %v873_v53, %v881_v12  ;;  %v11765_v53 = vcombine.high %v953_v5, %v961_v6 }
 0x288   :  { %7367 = vmatprep.subr.bf16.mxu0 %v11543_v45  ;;  %v11622_v45 = vcombine.low %v810_v13, %v818_v14  ;;  %v11639_v27 = vcombine.high %v826_v23, %v834_v24  ;;  %v969_v13 = vld [vmem:[%s18329_s3 + $0x1098] sm:$0xff] }
 0x289   :  { %v977_v14 = vld [vmem:[%s18329_s3 + $0x10d8] sm:$0xff] }
 0x28a   :  { %7212 = vmatpush1.bf16.msra.mxu1 %v11604_v32  ;;  %v842_v32 = vld [vmem:[%s18329_s3 + $0xca0] sm:$0xff] }
 0x28b   :  { %7368 = vmatpush1.bf16.msra.mxu0 %v11542_v3  ;;  %7213 = vmatprep.subr.bf16.mxu1 %v11621_v35  ;;  %v850_v3 = vld [vmem:[%s18329_s3 + $0xce0] sm:$0xff]  ;;  %v11700_v35 = vcombine.low %v889_v19, %v897_v22  ;;  %v11781_v19 = vcombine.high %v969_v13, %v977_v14 }
 0x28c   :  { %7369 = vmatprep.subr.bf16.mxu0 %v11559_v37  ;;  %v11638_v37 = vcombine.low %v826_v23, %v834_v24  ;;  %v11655_v49 = vcombine.high %v842_v32, %v850_v3  ;;  %v985_v23 = vld [vmem:[%s18329_s3 + $0x1118] sm:$0xff] }
 0x28d   :  { %v993_v24 = vld [vmem:[%s18329_s3 + $0x1158] sm:$0xff] }
 0x28e   :  { %7214 = vmatpush1.bf16.msra.mxu1 %v11620_v52  ;;  %v858_v52 = vld [vmem:[%s18329_s3 + $0xd20] sm:$0xff] }
 0x28f   :  { %7370 = vmatpush1.bf16.msra.mxu0 %v11558_v54  ;;  %7215 = vmatprep.subr.bf16.mxu1 %v11637_v43  ;;  %v866_v54 = vld [vmem:[%s18329_s3 + $0xd60] sm:$0xff]  ;;  %v11716_v43 = vcombine.low %v905_v28, %v913_v29  ;;  %v11797_v28 = vcombine.high %v985_v23, %v993_v24 }
 0x290   :  { %7371 = vmatprep.subr.bf16.mxu0 %v11575_v38  ;;  %v11654_v38 = vcombine.low %v842_v32, %v850_v3  ;;  %v11671_v40 = vcombine.high %v858_v52, %v866_v54  ;;  %v1001_v32 = vld [vmem:[%s18329_s3 + $0x1198] sm:$0xff] }
 0x291   :  { %v1009_v3 = vld [vmem:[%s18329_s3 + $0x11d8] sm:$0xff] }
 0x292   :  { %7216 = vmatpush1.bf16.msra.mxu1 %v11636_v61  ;;  %v874_v61 = vld [vmem:[%s18329_s3 + $0xda0] sm:$0xff] }
 0x293   :  { %7372 = vmatpush1.bf16.msra.mxu0 %v11574_v62  ;;  %7217 = vmatprep.subr.bf16.mxu1 %v11653_v63  ;;  %v882_v62 = vld [vmem:[%s18329_s3 + $0xde0] sm:$0xff]  ;;  %v11732_v63 = vcombine.low %v921_v50, %v929_v51  ;;  %v11813_v50 = vcombine.high %v1001_v32, %v1009_v3 }
 0x294   :  { %7373 = vmatprep.subr.bf16.mxu0 %v11591_v46  ;;  %v11670_v46 = vcombine.low %v858_v52, %v866_v54  ;;  %v11687_v2 = vcombine.high %v874_v61, %v882_v62  ;;  %v1017_v52 = vld [vmem:[%s18329_s3 + $0x1218] sm:$0xff] }
 0x295   :  { %v1025_v54 = vld [vmem:[%s18329_s3 + $0x1258] sm:$0xff] }
 0x296   :  { %7218 = vmatpush1.bf16.msra.mxu1 %v11652_v8  ;;  %v890_v8 = vld [vmem:[%s18329_s3 + $0xe20] sm:$0xff] }
 0x297   :  { %7374 = vmatpush1.bf16.msra.mxu0 %v11590_v9  ;;  %7219 = vmatprep.subr.bf16.mxu1 %v11669_v10  ;;  %v898_v9 = vld [vmem:[%s18329_s3 + $0xe60] sm:$0xff]  ;;  %v11748_v10 = vcombine.low %v937_v55, %v945_v56  ;;  %v11829_v55 = vcombine.high %v1017_v52, %v1025_v54 }
 0x298   :  { %7375 = vmatprep.subr.bf16.mxu0 %v11607_v11  ;;  %v11686_v11 = vcombine.low %v874_v61, %v882_v62  ;;  %v11703_v12 = vcombine.high %v890_v8, %v898_v9  ;;  %v1033_v61 = vld [vmem:[%s18329_s3 + $0x1298] sm:$0xff] }
 0x299   :  { %v1041_v62 = vld [vmem:[%s18329_s3 + $0x12d8] sm:$0xff] }
 0x29a   :  { %7220 = vmatpush1.bf16.msra.mxu1 %v11668_v15  ;;  %v906_v15 = vld [vmem:[%s18329_s3 + $0xea0] sm:$0xff] }
 0x29b   :  { %7376 = vmatpush1.bf16.msra.mxu0 %v11606_v16  ;;  %7221 = vmatprep.subr.bf16.mxu1 %v11685_v17  ;;  %v914_v16 = vld [vmem:[%s18329_s3 + $0xee0] sm:$0xff]  ;;  %v11764_v17 = vcombine.low %v953_v5, %v961_v6  ;;  %v11845_v5 = vcombine.high %v1033_v61, %v1041_v62 }
 0x29c   :  { %7377 = vmatprep.subr.bf16.mxu0 %v11623_v18  ;;  %v11702_v18 = vcombine.low %v890_v8, %v898_v9  ;;  %v11719_v22 = vcombine.high %v906_v15, %v914_v16  ;;  %v1049_v8 = vld [vmem:[%s18329_s3 + $0x1318] sm:$0xff] }
 0x29d   :  { %v1057_v9 = vld [vmem:[%s18329_s3 + $0x1358] sm:$0xff] }
 0x29e   :  { %7222 = vmatpush1.bf16.msra.mxu1 %v11684_v25  ;;  %v922_v25 = vld [vmem:[%s18329_s3 + $0xf20] sm:$0xff] }
 0x29f   :  { %7378 = vmatpush1.bf16.msra.mxu0 %v11622_v45  ;;  %7223 = vmatprep.subr.bf16.mxu1 %v11701_v26  ;;  %v930_v45 = vld [vmem:[%s18329_s3 + $0xf60] sm:$0xff]  ;;  %v11780_v26 = vcombine.low %v969_v13, %v977_v14  ;;  %v11861_v13 = vcombine.high %v1049_v8, %v1057_v9 }
 0x2a0   :  { %7379 = vmatprep.subr.bf16.mxu0 %v11639_v27  ;;  %v11718_v27 = vcombine.low %v906_v15, %v914_v16  ;;  %v11735_v29 = vcombine.high %v922_v25, %v930_v45  ;;  %v1065_v15 = vld [vmem:[%s18329_s3 + $0x1398] sm:$0xff] }
 0x2a1   :  { %v1073_v16 = vld [vmem:[%s18329_s3 + $0x13d8] sm:$0xff] }
 0x2a2   :  { %7224 = vmatpush1.bf16.msra.mxu1 %v11700_v35  ;;  %v938_v35 = vld [vmem:[%s18329_s3 + $0xfa0] sm:$0xff] }
 0x2a3   :  { %7380 = vmatpush1.bf16.msra.mxu0 %v11638_v37  ;;  %7225 = vmatprep.subr.bf16.mxu1 %v11717_v48  ;;  %v946_v37 = vld [vmem:[%s18329_s3 + $0xfe0] sm:$0xff]  ;;  %v11796_v48 = vcombine.low %v985_v23, %v993_v24  ;;  %v11877_v23 = vcombine.high %v1065_v15, %v1073_v16 }
 0x2a4   :  { %7381 = vmatprep.subr.bf16.mxu0 %v11655_v49  ;;  %v11734_v49 = vcombine.low %v922_v25, %v930_v45  ;;  %v11751_v51 = vcombine.high %v938_v35, %v946_v37  ;;  %v1081_v25 = vld [vmem:[%s18329_s3 + $0x1418] sm:$0xff] }
 0x2a5   :  { %v1089_v45 = vld [vmem:[%s18329_s3 + $0x1458] sm:$0xff] }
 0x2a6   :  { %7226 = vmatpush1.bf16.msra.mxu1 %v11716_v43  ;;  %v954_v43 = vld [vmem:[%s18329_s3 + $0x1020] sm:$0xff] }
 0x2a7   :  { %7382 = vmatpush1.bf16.msra.mxu0 %v11654_v38  ;;  %7227 = vmatprep.subr.bf16.mxu1 %v11733_v39  ;;  %v962_v38 = vld [vmem:[%s18329_s3 + $0x1060] sm:$0xff]  ;;  %v11812_v39 = vcombine.low %v1001_v32, %v1009_v3  ;;  %v11893_v32 = vcombine.high %v1081_v25, %v1089_v45 }
 0x2a8   :  { %7383 = vmatprep.subr.bf16.mxu0 %v11671_v40  ;;  %v11750_v40 = vcombine.low %v938_v35, %v946_v37  ;;  %v11767_v56 = vcombine.high %v954_v43, %v962_v38  ;;  %v1097_v35 = vld [vmem:[%s18329_s3 + $0x1498] sm:$0xff] }
 0x2a9   :  { %v1105_v37 = vld [vmem:[%s18329_s3 + $0x14d8] sm:$0xff] }
 0x2aa   :  { %7228 = vmatpush1.bf16.msra.mxu1 %v11732_v63  ;;  %v970_v63 = vld [vmem:[%s18329_s3 + $0x10a0] sm:$0xff] }
 0x2ab   :  { %7384 = vmatpush1.bf16.msra.mxu0 %v11670_v46  ;;  %7229 = vmatprep.subr.bf16.mxu1 %v11749_v1  ;;  %v978_v46 = vld [vmem:[%s18329_s3 + $0x10e0] sm:$0xff]  ;;  %v11828_v1 = vcombine.low %v1017_v52, %v1025_v54  ;;  %v11909_v52 = vcombine.high %v1097_v35, %v1105_v37 }
 0x2ac   :  { %7385 = vmatprep.subr.bf16.mxu0 %v11687_v2  ;;  %v11766_v2 = vcombine.low %v954_v43, %v962_v38  ;;  %v11783_v6 = vcombine.high %v970_v63, %v978_v46  ;;  %v1113_v43 = vld [vmem:[%s18329_s3 + $0x1518] sm:$0xff] }
 0x2ad   :  { %v1121_v38 = vld [vmem:[%s18329_s3 + $0x1558] sm:$0xff] }
 0x2ae   :  { %7230 = vmatpush1.bf16.msra.mxu1 %v11748_v10  ;;  %v986_v10 = vld [vmem:[%s18329_s3 + $0x1120] sm:$0xff] }
 0x2af   :  { %7386 = vmatpush1.bf16.msra.mxu0 %v11686_v11  ;;  %7240 = vmatprep.subr.bf16.mxu1 %v11765_v53  ;;  %v994_v11 = vld [vmem:[%s18329_s3 + $0x1160] sm:$0xff]  ;;  %v11844_v53 = vcombine.low %v1033_v61, %v1041_v62  ;;  %v11925_v61 = vcombine.high %v1113_v43, %v1121_v38 }
 0x2b0   :  { %7387 = vmatprep.subr.bf16.mxu0 %v11703_v12  ;;  %v11782_v12 = vcombine.low %v970_v63, %v978_v46  ;;  %v11799_v14 = vcombine.high %v986_v10, %v994_v11  ;;  %v1129_v63 = vld [vmem:[%s18329_s3 + $0x1598] sm:$0xff] }
 0x2b1   :  { %7232 = vmatmul.mubr.bf16.vlgmr.msra.gmra.mrb[12].mxu1 %v14254_v36  ;;  %v1137_v46 = vld [vmem:[%s18329_s3 + $0x15d8] sm:$0xff] }
 0x2b2   :  { %7241 = vmatpush1.bf16.msra.mxu1 %v11764_v17  ;;  %7272 = vmatprep.mubr.bf16.mxu1 %v14094_v31  ;;  %v1002_v17 = vld [vmem:[%s18329_s3 + $0x11a0] sm:$0xff] }
 0x2b3   :  { %7388 = vmatpush1.bf16.msra.mxu0 %v11702_v18  ;;  %7242 = vmatprep.subr.bf16.mxu1 %v11781_v19  ;;  %v1010_v18 = vld [vmem:[%s18329_s3 + $0x11e0] sm:$0xff]  ;;  %v11860_v19 = vcombine.low %v1049_v8, %v1057_v9  ;;  %v11941_v8 = vcombine.high %v1129_v63, %v1137_v46 }
 0x2b4   :  { %7389 = vmatprep.subr.bf16.mxu0 %v11719_v22  ;;  %v11798_v22 = vcombine.low %v986_v10, %v994_v11  ;;  %v11815_v24 = vcombine.high %v1002_v17, %v1010_v18  ;;  %v1145_v10 = vld [vmem:[%s18329_s3 + $0x1618] sm:$0xff] }
 0x2b5   :  { %v1153_v11 = vld [vmem:[%s18329_s3 + $0x1658] sm:$0xff] }
 0x2b6   :  { %7243 = vmatpush1.bf16.msra.mxu1 %v11780_v26  ;;  %v1018_v26 = vld [vmem:[%s18329_s3 + $0x1220] sm:$0xff] }
 0x2b7   :  { %7390 = vmatpush1.bf16.msra.mxu0 %v11718_v27  ;;  %7244 = vmatprep.subr.bf16.mxu1 %v11797_v28  ;;  %v1026_v27 = vld [vmem:[%s18329_s3 + $0x1260] sm:$0xff]  ;;  %v11876_v28 = vcombine.low %v1065_v15, %v1073_v16  ;;  %v11957_v15 = vcombine.high %v1145_v10, %v1153_v11 }
 0x2b8   :  { %7391 = vmatprep.subr.bf16.mxu0 %v11735_v29  ;;  %v11814_v29 = vcombine.low %v1002_v17, %v1010_v18  ;;  %v11831_v3 = vcombine.high %v1018_v26, %v1026_v27  ;;  %v1161_v17 = vld [vmem:[%s18329_s3 + $0x1698] sm:$0xff] }
 0x2b9   :  { %v1169_v18 = vld [vmem:[%s18329_s3 + $0x16d8] sm:$0xff] }
 0x2ba   :  { %7245 = vmatpush1.bf16.msra.mxu1 %v11796_v48  ;;  %v1034_v48 = vld [vmem:[%s18329_s3 + $0x12a0] sm:$0xff] }
 0x2bb   :  { %7392 = vmatpush1.bf16.msra.mxu0 %v11734_v49  ;;  %7246 = vmatprep.subr.bf16.mxu1 %v11813_v50  ;;  %v1042_v49 = vld [vmem:[%s18329_s3 + $0x12e0] sm:$0xff]  ;;  %v11892_v50 = vcombine.low %v1081_v25, %v1089_v45  ;;  %v11973_v25 = vcombine.high %v1161_v17, %v1169_v18 }
 0x2bc   :  { %7393 = vmatprep.subr.bf16.mxu0 %v11751_v51  ;;  %v11830_v51 = vcombine.low %v1018_v26, %v1026_v27  ;;  %v11847_v54 = vcombine.high %v1034_v48, %v1042_v49  ;;  %v1177_v26 = vld [vmem:[%s18329_s3 + $0x1718] sm:$0xff] }
 0x2bd   :  { %v1185_v27 = vld [vmem:[%s18329_s3 + $0x1758] sm:$0xff] }
 0x2be   :  { %7247 = vmatpush1.bf16.msra.mxu1 %v11812_v39  ;;  %v1050_v39 = vld [vmem:[%s18329_s3 + $0x1320] sm:$0xff] }
 0x2bf   :  { %7394 = vmatpush1.bf16.msra.mxu0 %v11750_v40  ;;  %7248 = vmatprep.subr.bf16.mxu1 %v11829_v55  ;;  %v1058_v40 = vld [vmem:[%s18329_s3 + $0x1360] sm:$0xff]  ;;  %v11908_v55 = vcombine.low %v1097_v35, %v1105_v37  ;;  %v11989_v35 = vcombine.high %v1177_v26, %v1185_v27 }
 0x2c0   :  { %7404 = vmatprep.subr.bf16.mxu0 %v11767_v56  ;;  %v11846_v56 = vcombine.low %v1034_v48, %v1042_v49  ;;  %v11863_v62 = vcombine.high %v1050_v39, %v1058_v40  ;;  %v1193_v48 = vld [vmem:[%s18329_s3 + $0x1798] sm:$0xff] }
 0x2c1   :  { %v1201_v49 = vld [vmem:[%s18329_s3 + $0x17d8] sm:$0xff] }
 0x2c2   :  { %7396 = vmatmul.mubr.bf16.vlgmr.msra.gmra.mrb[12].mxu0 %v14254_v36  ;;  %7249 = vmatpush1.bf16.msra.mxu1 %v11828_v1  ;;  %v1066_v1 = vld [vmem:[%s18329_s3 + $0x13a0] sm:$0xff] }
 0x2c3   :  { %7405 = vmatpush1.bf16.msra.mxu0 %v11766_v2  ;;  %7436 = vmatprep.mubr.bf16.mxu0 %v14094_v31  ;;  %v1074_v2 = vld [vmem:[%s18329_s3 + $0x13e0] sm:$0xff] }
 0x2c4   :  { %7250 = vmatprep.subr.bf16.mxu1 %v11845_v5  ;;  %7406 = vmatprep.subr.bf16.mxu0 %v11783_v6  ;;  %v11924_v5 = vcombine.low %v1113_v43, %v1121_v38  ;;  %v11862_v6 = vcombine.low %v1050_v39, %v1058_v40  ;;  %v11879_v9 = vcombine.high %v1066_v1, %v1074_v2  ;;  %v1209_v39 = vld [vmem:[%s18329_s3 + $0x1818] sm:$0xff] }
 0x2c5   :  { %v12005_v43 = vcombine.high %v1193_v48, %v1201_v49  ;;  %v1217_v40 = vld [vmem:[%s18329_s3 + $0x1858] sm:$0xff] }
 0x2c6   :  { %7251 = vmatpush1.bf16.msra.mxu1 %v11844_v53  ;;  %v1082_v53 = vld [vmem:[%s18329_s3 + $0x1420] sm:$0xff] }
 0x2c7   :  { %7407 = vmatpush1.bf16.msra.mxu0 %v11782_v12  ;;  %7252 = vmatprep.subr.bf16.mxu1 %v11861_v13  ;;  %v1090_v12 = vld [vmem:[%s18329_s3 + $0x1460] sm:$0xff]  ;;  %v11940_v13 = vcombine.low %v1129_v63, %v1137_v46  ;;  %v12021_v63 = vcombine.high %v1209_v39, %v1217_v40 }
 0x2c8   :  { %7408 = vmatprep.subr.bf16.mxu0 %v11799_v14  ;;  %v11878_v14 = vcombine.low %v1066_v1, %v1074_v2  ;;  %v11895_v16 = vcombine.high %v1082_v53, %v1090_v12  ;;  %v1225_v1 = vld [vmem:[%s18329_s3 + $0x1898] sm:$0xff] }
 0x2c9   :  { %v1233_v2 = vld [vmem:[%s18329_s3 + $0x18d8] sm:$0xff] }
 0x2ca   :  { %7253 = vmatpush1.bf16.msra.mxu1 %v11860_v19  ;;  %v1098_v19 = vld [vmem:[%s18329_s3 + $0x14a0] sm:$0xff] }
 0x2cb   :  { %7409 = vmatpush1.bf16.msra.mxu0 %v11798_v22  ;;  %7254 = vmatprep.subr.bf16.mxu1 %v11877_v23  ;;  %v1106_v22 = vld [vmem:[%s18329_s3 + $0x14e0] sm:$0xff]  ;;  %v11956_v23 = vcombine.low %v1145_v10, %v1153_v11  ;;  %v12037_v10 = vcombine.high %v1225_v1, %v1233_v2 }
 0x2cc   :  { %7410 = vmatprep.subr.bf16.mxu0 %v11815_v24  ;;  %v11894_v24 = vcombine.low %v1082_v53, %v1090_v12  ;;  %v11911_v45 = vcombine.high %v1098_v19, %v1106_v22  ;;  %v1241_v53 = vld [vmem:[%s18329_s3 + $0x1918] sm:$0xff] }
 0x2cd   :  { %v1249_v12 = vld [vmem:[%s18329_s3 + $0x1958] sm:$0xff] }
 0x2ce   :  { %7255 = vmatpush1.bf16.msra.mxu1 %v11876_v28  ;;  %v1114_v28 = vld [vmem:[%s18329_s3 + $0x1520] sm:$0xff] }
 0x2cf   :  { %7411 = vmatpush1.bf16.msra.mxu0 %v11814_v29  ;;  %7256 = vmatprep.subr.bf16.mxu1 %v11893_v32  ;;  %v1122_v29 = vld [vmem:[%s18329_s3 + $0x1560] sm:$0xff]  ;;  %v11972_v32 = vcombine.low %v1161_v17, %v1169_v18  ;;  %v12053_v17 = vcombine.high %v1241_v53, %v1249_v12 }
 0x2d0   :  { %7412 = vmatprep.subr.bf16.mxu0 %v11831_v3  ;;  %v11910_v3 = vcombine.low %v1098_v19, %v1106_v22  ;;  %v11927_v37 = vcombine.high %v1114_v28, %v1122_v29  ;;  %v1257_v19 = vld [vmem:[%s18329_s3 + $0x1998] sm:$0xff] }
 0x2d1   :  { %v1265_v22 = vld [vmem:[%s18329_s3 + $0x19d8] sm:$0xff] }
 0x2d2   :  { %7257 = vmatpush1.bf16.msra.mxu1 %v11892_v50  ;;  %v1130_v50 = vld [vmem:[%s18329_s3 + $0x15a0] sm:$0xff] }
 0x2d3   :  { %7413 = vmatpush1.bf16.msra.mxu0 %v11830_v51  ;;  %7258 = vmatprep.subr.bf16.mxu1 %v11909_v52  ;;  %v1138_v51 = vld [vmem:[%s18329_s3 + $0x15e0] sm:$0xff]  ;;  %v11988_v52 = vcombine.low %v1177_v26, %v1185_v27  ;;  %v12069_v26 = vcombine.high %v1257_v19, %v1265_v22 }
 0x2d4   :  { %7414 = vmatprep.subr.bf16.mxu0 %v11847_v54  ;;  %v11926_v54 = vcombine.low %v1114_v28, %v1122_v29  ;;  %v11943_v38 = vcombine.high %v1130_v50, %v1138_v51  ;;  %v1273_v28 = vld [vmem:[%s18329_s3 + $0x1a18] sm:$0xff] }
 0x2d5   :  { %v1281_v29 = vld [vmem:[%s18329_s3 + $0x1a58] sm:$0xff] }
 0x2d6   :  { %7259 = vmatpush1.bf16.msra.mxu1 %v11908_v55  ;;  %v1146_v55 = vld [vmem:[%s18329_s3 + $0x1620] sm:$0xff] }
 0x2d7   :  { %7415 = vmatpush1.bf16.msra.mxu0 %v11846_v56  ;;  %7260 = vmatprep.subr.bf16.mxu1 %v11925_v61  ;;  %v1154_v56 = vld [vmem:[%s18329_s3 + $0x1660] sm:$0xff]  ;;  %v12004_v61 = vcombine.low %v1193_v48, %v1201_v49  ;;  %v12085_v48 = vcombine.high %v1273_v28, %v1281_v29 }
 0x2d8   :  { %7416 = vmatprep.subr.bf16.mxu0 %v11863_v62  ;;  %v11942_v62 = vcombine.low %v1130_v50, %v1138_v51  ;;  %v11959_v46 = vcombine.high %v1146_v55, %v1154_v56  ;;  %v1289_v50 = vld [vmem:[%s18329_s3 + $0x1a98] sm:$0xff] }
 0x2d9   :  { %v1297_v51 = vld [vmem:[%s18329_s3 + $0x1ad8] sm:$0xff] }
 0x2da   :  { %7261 = vmatpush1.bf16.msra.mxu1 %v11924_v5  ;;  %v1162_v5 = vld [vmem:[%s18329_s3 + $0x16a0] sm:$0xff] }
 0x2db   :  { %7417 = vmatpush1.bf16.msra.mxu0 %v11862_v6  ;;  %7262 = vmatprep.subr.bf16.mxu1 %v11941_v8  ;;  %v1170_v6 = vld [vmem:[%s18329_s3 + $0x16e0] sm:$0xff]  ;;  %v12020_v8 = vcombine.low %v1209_v39, %v1217_v40  ;;  %v12101_v39 = vcombine.high %v1289_v50, %v1297_v51 }
 0x2dc   :  { %7418 = vmatprep.subr.bf16.mxu0 %v11879_v9  ;;  %v11958_v9 = vcombine.low %v1146_v55, %v1154_v56  ;;  %v11975_v11 = vcombine.high %v1162_v5, %v1170_v6  ;;  %v1305_v55 = vld [vmem:[%s18329_s3 + $0x1b18] sm:$0xff] }
 0x2dd   :  { %v1313_v56 = vld [vmem:[%s18329_s3 + $0x1b58] sm:$0xff] }
 0x2de   :  { %7263 = vmatpush1.bf16.msra.mxu1 %v11940_v13  ;;  %v1178_v13 = vld [vmem:[%s18329_s3 + $0x1720] sm:$0xff] }
 0x2df   :  { %7419 = vmatpush1.bf16.msra.mxu0 %v11878_v14  ;;  %7264 = vmatprep.subr.bf16.mxu1 %v11957_v15  ;;  %v1186_v14 = vld [vmem:[%s18329_s3 + $0x1760] sm:$0xff]  ;;  %v12036_v15 = vcombine.low %v1225_v1, %v1233_v2  ;;  %v12117_v1 = vcombine.high %v1305_v55, %v1313_v56 }
 0x2e0   :  { %7420 = vmatprep.subr.bf16.mxu0 %v11895_v16  ;;  %v11974_v16 = vcombine.low %v1162_v5, %v1170_v6  ;;  %v11991_v18 = vcombine.high %v1178_v13, %v1186_v14  ;;  %v1321_v6 = vld [vmem:[%s18329_s3 + $0x1b98] sm:$0xff] }
 0x2e2   :  { %7265 = vmatpush1.bf16.msra.mxu1 %v11956_v23  ;;  %v1194_v23 = vld [vmem:[%s18329_s3 + $0x17a0] sm:$0xff] }
 0x2e3   :  { %7421 = vmatpush1.bf16.msra.mxu0 %v11894_v24  ;;  %7266 = vmatprep.subr.bf16.mxu1 %v11973_v25  ;;  %v1202_v24 = vld [vmem:[%s18329_s3 + $0x17e0] sm:$0xff]  ;;  %v12052_v25 = vcombine.low %v1241_v53, %v1249_v12  ;;  %v12116_v12 = vcombine.low %v1305_v55, %v1313_v56 }
 0x2e4   :  { %7422 = vmatprep.subr.bf16.mxu0 %v11911_v45  ;;  %v11990_v45 = vcombine.low %v1178_v13, %v1186_v14  ;;  %v12007_v27 = vcombine.high %v1194_v23, %v1202_v24  ;;  %v1322_v56 = vld [vmem:[%s18329_s3 + $0x1ba0] sm:$0xff] }
 0x2e6   :  { %7267 = vmatpush1.bf16.msra.mxu1 %v11972_v32  ;;  %v1210_v32 = vld [vmem:[%s18329_s3 + $0x1820] sm:$0xff] }
 0x2e7   :  { %7423 = vmatpush1.bf16.msra.mxu0 %v11910_v3  ;;  %7268 = vmatprep.subr.bf16.mxu1 %v11989_v35  ;;  %v1218_v3 = vld [vmem:[%s18329_s3 + $0x1860] sm:$0xff]  ;;  %v12068_v35 = vcombine.low %v1257_v19, %v1265_v22 }
 0x2e8   :  { %7424 = vmatprep.subr.bf16.mxu0 %v11927_v37  ;;  %v12006_v37 = vcombine.low %v1194_v23, %v1202_v24  ;;  %v12023_v49 = vcombine.high %v1210_v32, %v1218_v3  ;;  %v1274_v19 = vld [vmem:[%s18329_s3 + $0x1a20] sm:$0xff] }
 0x2e9   :  { %v1282_v22 = vld [vmem:[%s18329_s3 + $0x1a60] sm:$0xff] }
 0x2ea   :  { %7269 = vmatpush1.bf16.msra.mxu1 %v11988_v52  ;;  %v1226_v52 = vld [vmem:[%s18329_s3 + $0x18a0] sm:$0xff] }
 0x2eb   :  { %7425 = vmatpush1.bf16.msra.mxu0 %v11926_v54  ;;  %7270 = vmatprep.subr.bf16.mxu1 %v12005_v43  ;;  %v1234_v54 = vld [vmem:[%s18329_s3 + $0x18e0] sm:$0xff]  ;;  %v12084_v43 = vcombine.low %v1273_v28, %v1281_v29 }
 0x2ec   :  { %7426 = vmatprep.subr.bf16.mxu0 %v11943_v38  ;;  %v12022_v38 = vcombine.low %v1210_v32, %v1218_v3  ;;  %v12039_v40 = vcombine.high %v1226_v52, %v1234_v54  ;;  %v1290_v28 = vld [vmem:[%s18329_s3 + $0x1aa0] sm:$0xff]  ;;  %v12086_v3 = vcombine.low %v1274_v19, %v1282_v22 }
 0x2ed   :  { %v1298_v29 = vld [vmem:[%s18329_s3 + $0x1ae0] sm:$0xff] }
 0x2ee   :  { %7271 = vmatpush1.bf16.msra.mxu1 %v12004_v61  ;;  %v1242_v61 = vld [vmem:[%s18329_s3 + $0x1920] sm:$0xff] }
 0x2ef   :  { %7427 = vmatpush1.bf16.msra.mxu0 %v11942_v62  ;;  %7281 = vmatprep.subr.bf16.mxu1 %v12021_v63  ;;  %v1250_v62 = vld [vmem:[%s18329_s3 + $0x1960] sm:$0xff]  ;;  %v12100_v63 = vcombine.low %v1289_v50, %v1297_v51 }
 0x2f0   :  { %7428 = vmatprep.subr.bf16.mxu0 %v11959_v46  ;;  %v12038_v46 = vcombine.low %v1226_v52, %v1234_v54  ;;  %v12055_v5 = vcombine.high %v1242_v61, %v1250_v62  ;;  %v12054_v14 = vcombine.low %v1242_v61, %v1250_v62  ;;  %v1306_v50 = vld [vmem:[%s18329_s3 + $0x1b20] sm:$0xff]  ;;  %v12102_v54 = vcombine.low %v1290_v28, %v1298_v29 }
 0x2f1   :  { %7273 = vmatmul.mubr.bf16.vlgmr.msra.gmra.mrb[12].mxu1 %v14096_v33  ;;  %v1314_v51 = vld [vmem:[%s18329_s3 + $0x1b60] sm:$0xff] }
 0x2f2   :  { %7282 = vmatpush1.bf16.msra.mxu1 %v12020_v8  ;;  %7313 = vmatprep.mubr.bf16.mxu1 %v14143_v7  ;;  %v1329_v8 = vld [vmem:[%s18329_s3 + $0x1bd8] sm:$0xff]  ;;  %v1330_v61 = vld [vmem:[%s18329_s3 + $0x1be0] sm:$0xff] }
 0x2f3   :  { %7429 = vmatpush1.bf16.msra.mxu0 %v11958_v9  ;;  %7283 = vmatprep.subr.bf16.mxu1 %v12037_v10  ;;  %v1258_v10 = vld [vmem:[%s18329_s3 + $0x19a0] sm:$0xff]  ;;  %v12132_v23 = vcombine.low %v1321_v6, %v1329_v8 }
 0x2f4   :  { %7430 = vmatprep.subr.bf16.mxu0 %v11975_v11  ;;  %v1266_v11 = vld [vmem:[%s18329_s3 + $0x19e0] sm:$0xff] }
 0x2f5   :  { %v12070_v24 = vcombine.low %v1258_v10, %v1266_v11 }
 0x2f6   :  { %7284 = vmatpush1.bf16.msra.mxu1 %v12036_v15  ;;  %v12133_v15 = vcombine.high %v1321_v6, %v1329_v8  ;;  %v12135_v8 = vcombine.high %v1322_v56, %v1330_v61 }
 0x2f7   :  { %7431 = vmatpush1.bf16.msra.mxu0 %v11974_v16  ;;  %7285 = vmatprep.subr.bf16.mxu1 %v12053_v17  ;;  %v12071_v16 = vcombine.high %v1258_v10, %v1266_v11  ;;  %v1337_v17 = vld [vmem:[%s18329_s3 + $0x1c18] sm:$0xff] }
 0x2f8   :  { %7432 = vmatprep.subr.bf16.mxu0 %v11991_v18  ;;  %v1345_v18 = vld [vmem:[%s18329_s3 + $0x1c58] sm:$0xff] }
 0x2f9   :  { %v12148_v32 = vcombine.low %v1337_v17, %v1345_v18  ;;  %v1401_v10 = vld [vmem:[%s18329_s3 + $0x1e18] sm:$0xff] }
 0x2fa   :  { %7286 = vmatpush1.bf16.msra.mxu1 %v12052_v25  ;;  %v12149_v25 = vcombine.high %v1337_v17, %v1345_v18  ;;  %v1409_v11 = vld [vmem:[%s18329_s3 + $0x1e58] sm:$0xff] }
 0x2fb   :  { %7433 = vmatpush1.bf16.msra.mxu0 %v11990_v45  ;;  %7287 = vmatprep.subr.bf16.mxu1 %v12069_v26  ;;  %v12087_v45 = vcombine.high %v1274_v19, %v1282_v22  ;;  %v1353_v26 = vld [vmem:[%s18329_s3 + $0x1c98] sm:$0xff]  ;;  %v1354_v19 = vld [vmem:[%s18329_s3 + $0x1ca0] sm:$0xff] }
 0x2fc   :  { %7434 = vmatprep.subr.bf16.mxu0 %v12007_v27  ;;  %v1361_v27 = vld [vmem:[%s18329_s3 + $0x1cd8] sm:$0xff]  ;;  %v1362_v22 = vld [vmem:[%s18329_s3 + $0x1ce0] sm:$0xff] }
 0x2fd   :  { %v12164_v52 = vcombine.low %v1353_v26, %v1361_v27  ;;  %v1417_v17 = vld [vmem:[%s18329_s3 + $0x1e98] sm:$0xff] }
 0x2fe   :  { %7288 = vmatpush1.bf16.msra.mxu1 %v12068_v35  ;;  %v12165_v35 = vcombine.high %v1353_v26, %v1361_v27  ;;  %v1425_v18 = vld [vmem:[%s18329_s3 + $0x1ed8] sm:$0xff] }
 0x2ff   :  { %7435 = vmatpush1.bf16.msra.mxu0 %v12006_v37  ;;  %7289 = vmatprep.subr.bf16.mxu1 %v12085_v48  ;;  %v12103_v37 = vcombine.high %v1290_v28, %v1298_v29  ;;  %v1369_v48 = vld [vmem:[%s18329_s3 + $0x1d18] sm:$0xff]  ;;  %v1370_v28 = vld [vmem:[%s18329_s3 + $0x1d20] sm:$0xff] }
 0x300   :  { %7445 = vmatprep.subr.bf16.mxu0 %v12023_v49  ;;  %v1377_v49 = vld [vmem:[%s18329_s3 + $0x1d58] sm:$0xff]  ;;  %v1378_v29 = vld [vmem:[%s18329_s3 + $0x1d60] sm:$0xff] }
 0x301   :  { %v1433_v26 = vld [vmem:[%s18329_s3 + $0x1f18] sm:$0xff] }
 0x302   :  { %7437 = vmatmul.mubr.bf16.vlgmr.msra.gmra.mrb[12].mxu0 %v14096_v33  ;;  %7290 = vmatpush1.bf16.msra.mxu1 %v12084_v43  ;;  %v12181_v43 = vcombine.high %v1369_v48, %v1377_v49  ;;  %v1441_v27 = vld [vmem:[%s18329_s3 + $0x1f58] sm:$0xff] }
 0x303   :  { %7446 = vmatpush1.bf16.msra.mxu0 %v12022_v38  ;;  %7477 = vmatprep.mubr.bf16.mxu0 %v14143_v7  ;;  %v12119_v38 = vcombine.high %v1306_v50, %v1314_v51 }
 0x304   :  { %v15715_v2 = vpop.f32.mrb[8].mxu1  ;;  %7291 = vmatprep.subr.bf16.mxu1 %v12101_v39  ;;  %7447 = vmatprep.subr.bf16.mxu0 %v12039_v40  ;;  %v1385_v39 = vld [vmem:[%s18329_s3 + $0x1d98] sm:$0xff] }
 0x305   :  { %v15723_v9 = vpop.f32.mrb[9].mxu1  ;;  %v1393_v40 = vld [vmem:[%s18329_s3 + $0x1dd8] sm:$0xff] }
 0x306   :  { %v6991_v53 = vpop.f32.mrb[10].mxu1  ;;  %7292 = vmatpush1.bf16.msra.mxu1 %v12100_v63  ;;  %v12180_v63 = vcombine.low %v1369_v48, %v1377_v49  ;;  %v1449_v48 = vld [vmem:[%s18329_s3 + $0x1f98] sm:$0xff] }
 0x307   :  { %7448 = vmatpush1.bf16.msra.mxu0 %v12038_v46  ;;  %v6992_v13 = vpop.f32.mrb[11].mxu1  ;;  %7293 = vmatprep.subr.bf16.mxu1 %v12117_v1  ;;  %v12118_v1 = vcombine.low %v1306_v50, %v1314_v51  ;;  %v1338_v53 = vld [vmem:[%s18329_s3 + $0x1c20] sm:$0xff]  ;;  %v1457_v49 = vld [vmem:[%s18329_s3 + $0x1fd8] sm:$0xff] }
 0x308   :  { %7449 = vmatprep.subr.bf16.mxu0 %v12055_v5  ;;  %v12197_v5 = vcombine.high %v1385_v39, %v1393_v40  ;;  %v12196_v13 = vcombine.low %v1385_v39, %v1393_v40  ;;  %v1386_v50 = vld [vmem:[%s18329_s3 + $0x1da0] sm:$0xff]  ;;  %v443_v39 = vld [vmem:[%s18329_s3 + $0x28] sm:$0xff] }
 0x309   :  { %v1394_v51 = vld [vmem:[%s18329_s3 + $0x1de0] sm:$0xff]  ;;  %v451_v40 = vld [vmem:[%s18329_s3 + $0x68] sm:$0xff] }
 0x30a   :  { %7294 = vmatpush1.bf16.msra.mxu1 %v12116_v12  ;;  %v1346_v12 = vld [vmem:[%s18329_s3 + $0x1c60] sm:$0xff] }
 0x30b   :  { %7450 = vmatpush1.bf16.msra.mxu0 %v12054_v14  ;;  %7295 = vmatprep.subr.bf16.mxu1 %v12133_v15  ;;  %v12134_v14 = vcombine.low %v1322_v56, %v1330_v61  ;;  %v12213_v15 = vcombine.high %v1401_v10, %v1409_v11  ;;  %v1402_v56 = vld [vmem:[%s18329_s3 + $0x1e20] sm:$0xff] }
 0x30c   :  { %7451 = vmatprep.subr.bf16.mxu0 %v12071_v16  ;;  %v12151_v16 = vcombine.high %v1338_v53, %v1346_v12  ;;  %v1410_v61 = vld [vmem:[%s18329_s3 + $0x1e60] sm:$0xff] }
 0x30e   :  { %7296 = vmatpush1.bf16.msra.mxu1 %v12132_v23  ;;  %v12212_v23 = vcombine.low %v1401_v10, %v1409_v11  ;;  %v1418_v10 = vld [vmem:[%s18329_s3 + $0x1ea0] sm:$0xff] }
 0x30f   :  { %7452 = vmatpush1.bf16.msra.mxu0 %v12070_v24  ;;  %7297 = vmatprep.subr.bf16.mxu1 %v12149_v25  ;;  %v12150_v24 = vcombine.low %v1338_v53, %v1346_v12  ;;  %v12229_v25 = vcombine.high %v1417_v17, %v1425_v18  ;;  %v1426_v11 = vld [vmem:[%s18329_s3 + $0x1ee0] sm:$0xff]  ;;  %v11256_v53 = vcombine.low %v443_v39, %v451_v40 }
 0x310   :  { %7453 = vmatprep.subr.bf16.mxu0 %v12087_v45  ;;  %v12167_v45 = vcombine.high %v1354_v19, %v1362_v22  ;;  %v12214_v12 = vcombine.low %v1402_v56, %v1410_v61 }
 0x312   :  { %7298 = vmatpush1.bf16.msra.mxu1 %v12148_v32  ;;  %v12228_v32 = vcombine.low %v1417_v17, %v1425_v18  ;;  %v1434_v17 = vld [vmem:[%s18329_s3 + $0x1f20] sm:$0xff] }
 0x313   :  { %7454 = vmatpush1.bf16.msra.mxu0 %v12086_v3  ;;  %7299 = vmatprep.subr.bf16.mxu1 %v12165_v35  ;;  %v12166_v3 = vcombine.low %v1354_v19, %v1362_v22  ;;  %v12245_v35 = vcombine.high %v1433_v26, %v1441_v27  ;;  %v1442_v18 = vld [vmem:[%s18329_s3 + $0x1f60] sm:$0xff]  ;;  %v12230_v22 = vcombine.low %v1418_v10, %v1426_v11 }
 0x314   :  { %7455 = vmatprep.subr.bf16.mxu0 %v12103_v37  ;;  %v12183_v37 = vcombine.high %v1370_v28, %v1378_v29 }
 0x315   :  { %v15773_v55 = vpop.f32.mrb[8].mxu0 }
 0x316   :  { %v15781_v62 = vpop.f32.mrb[9].mxu0  ;;  %7300 = vmatpush1.bf16.msra.mxu1 %v12164_v52  ;;  %v12244_v52 = vcombine.low %v1433_v26, %v1441_v27  ;;  %v1450_v26 = vld [vmem:[%s18329_s3 + $0x1fa0] sm:$0xff] }
 0x317   :  { %v7155_v46 = vpop.f32.mrb[10].mxu0  ;;  %7456 = vmatpush1.bf16.msra.mxu0 %v12102_v54  ;;  %7301 = vmatprep.subr.bf16.mxu1 %v12181_v43  ;;  %v12182_v54 = vcombine.low %v1370_v28, %v1378_v29  ;;  %v12261_v43 = vcombine.high %v1449_v48, %v1457_v49  ;;  %v1458_v27 = vld [vmem:[%s18329_s3 + $0x1fe0] sm:$0xff]  ;;  %v12246_v29 = vcombine.low %v1434_v17, %v1442_v18 }
 0x318   :  { %v7156_v6 = vpop.f32.mrb[11].mxu0  ;;  %7457 = vmatprep.subr.bf16.mxu0 %v12119_v38  ;;  %v12199_v38 = vcombine.high %v1386_v50, %v1394_v51  ;;  %v12198_v46 = vcombine.low %v1386_v50, %v1394_v51  ;;  %v12262_v51 = vcombine.low %v1450_v26, %v1458_v27 }
 0x319   :  { %v459_v6 = vld [vmem:[%s18329_s3 + $0xa8] sm:$0xff] }
 0x31a   :  { %7302 = vmatpush1.bf16.msra.mxu1 %v12180_v63  ;;  %v12260_v63 = vcombine.low %v1449_v48, %v1457_v49  ;;  %v444_v48 = vld [vmem:[%s18329_s3 + $0x30] sm:$0xff] }
 0x31b   :  { %7458 = vmatpush1.bf16.msra.mxu0 %v12118_v1  ;;  %7303 = vmatprep.subr.bf16.mxu1 %v12197_v5  ;;  %v11257_v1 = vcombine.high %v443_v39, %v451_v40  ;;  %v12215_v5 = vcombine.high %v1402_v56, %v1410_v61  ;;  %v452_v49 = vld [vmem:[%s18329_s3 + $0x70] sm:$0xff] }
 0x31c   :  { %7459 = vmatprep.subr.bf16.mxu0 %v12135_v8  ;;  %v467_v8 = vld [vmem:[%s18329_s3 + $0xe8] sm:$0xff]  ;;  %v460_v39 = vld [vmem:[%s18329_s3 + $0xb0] sm:$0xff]  ;;  %v11258_v61 = vcombine.low %v444_v48, %v452_v49 }
 0x31d   :  { %v11272_v19 = vcombine.low %v459_v6, %v467_v8  ;;  %v468_v40 = vld [vmem:[%s18329_s3 + $0xf0] sm:$0xff] }
 0x31e   :  { %7304 = vmatpush1.bf16.msra.mxu1 %v12196_v13  ;;  %v11273_v13 = vcombine.high %v459_v6, %v467_v8  ;;  %v476_v6 = vld [vmem:[%s18329_s3 + $0x130] sm:$0xff] }
 0x31f   :  { %7460 = vmatpush1.bf16.msra.mxu0 %v12134_v14  ;;  %7305 = vmatprep.subr.bf16.mxu1 %v12213_v15  ;;  %v12231_v14 = vcombine.high %v1418_v10, %v1426_v11  ;;  %v475_v15 = vld [vmem:[%s18329_s3 + $0x128] sm:$0xff]  ;;  %v484_v8 = vld [vmem:[%s18329_s3 + $0x170] sm:$0xff]  ;;  %v11274_v11 = vcombine.low %v460_v39, %v468_v40 }
 0x320   :  { %7461 = vmatprep.subr.bf16.mxu0 %v12151_v16  ;;  %v483_v16 = vld [vmem:[%s18329_s3 + $0x168] sm:$0xff] }
 0x321   :  { %v11288_v28 = vcombine.low %v475_v15, %v483_v16 }
 0x322   :  { %7306 = vmatpush1.bf16.msra.mxu1 %v12212_v23  ;;  %v11289_v23 = vcombine.high %v475_v15, %v483_v16  ;;  %v492_v15 = vld [vmem:[%s18329_s3 + $0x1b0] sm:$0xff] }
 0x323   :  { %7462 = vmatpush1.bf16.msra.mxu0 %v12150_v24  ;;  %7307 = vmatprep.subr.bf16.mxu1 %v12229_v25  ;;  %v12247_v24 = vcombine.high %v1434_v17, %v1442_v18  ;;  %v491_v25 = vld [vmem:[%s18329_s3 + $0x1a8] sm:$0xff]  ;;  %v500_v16 = vld [vmem:[%s18329_s3 + $0x1f0] sm:$0xff]  ;;  %v11290_v18 = vcombine.low %v476_v6, %v484_v8 }
 0x324   :  { %7463 = vmatprep.subr.bf16.mxu0 %v12167_v45  ;;  %v499_v45 = vld [vmem:[%s18329_s3 + $0x1e8] sm:$0xff] }
 0x325   :  { %v11304_v50 = vcombine.low %v491_v25, %v499_v45 }
 0x326   :  { %7308 = vmatpush1.bf16.msra.mxu1 %v12228_v32  ;;  %v11305_v32 = vcombine.high %v491_v25, %v499_v45  ;;  %v508_v25 = vld [vmem:[%s18329_s3 + $0x230] sm:$0xff] }
 0x327   :  { %7464 = vmatpush1.bf16.msra.mxu0 %v12166_v3  ;;  %7309 = vmatprep.subr.bf16.mxu1 %v12245_v35  ;;  %v12263_v3 = vcombine.high %v1450_v26, %v1458_v27  ;;  %v507_v35 = vld [vmem:[%s18329_s3 + $0x228] sm:$0xff]  ;;  %v516_v45 = vld [vmem:[%s18329_s3 + $0x270] sm:$0xff]  ;;  %v11306_v27 = vcombine.low %v492_v15, %v500_v16 }
 0x328   :  { %7465 = vmatprep.subr.bf16.mxu0 %v12183_v37  ;;  %v515_v37 = vld [vmem:[%s18329_s3 + $0x268] sm:$0xff] }
 0x329   :  { %v11320_v56 = vcombine.low %v507_v35, %v515_v37 }
 0x32a   :  { %7310 = vmatpush1.bf16.msra.mxu1 %v12244_v52  ;;  %v11321_v52 = vcombine.high %v507_v35, %v515_v37  ;;  %v524_v35 = vld [vmem:[%s18329_s3 + $0x2b0] sm:$0xff] }
 0x32b   :  { %7466 = vmatpush1.bf16.msra.mxu0 %v12182_v54  ;;  %7311 = vmatprep.subr.bf16.mxu1 %v12261_v43  ;;  %v11259_v54 = vcombine.high %v444_v48, %v452_v49  ;;  %v523_v43 = vld [vmem:[%s18329_s3 + $0x2a8] sm:$0xff]  ;;  %v532_v37 = vld [vmem:[%s18329_s3 + $0x2f0] sm:$0xff]  ;;  %v11322_v49 = vcombine.low %v508_v25, %v516_v45 }
 0x32c   :  { %7467 = vmatprep.subr.bf16.mxu0 %v12199_v38  ;;  %v531_v38 = vld [vmem:[%s18329_s3 + $0x2e8] sm:$0xff] }
 0x32d   :  { %v11336_v10 = vcombine.low %v523_v43, %v531_v38 }
 0x32e   :  { %7312 = vmatpush1.bf16.msra.mxu1 %v12260_v63  ;;  %v11337_v63 = vcombine.high %v523_v43, %v531_v38  ;;  %v540_v43 = vld [vmem:[%s18329_s3 + $0x330] sm:$0xff] }
 0x32f   :  { %7468 = vmatpush1.bf16.msra.mxu0 %v12198_v46  ;;  %7486 = vmatprep.subr.bf16.mxu1 %v11257_v1  ;;  %v11275_v46 = vcombine.high %v460_v39, %v468_v40  ;;  %v539_v1 = vld [vmem:[%s18329_s3 + $0x328] sm:$0xff]  ;;  %v548_v38 = vld [vmem:[%s18329_s3 + $0x370] sm:$0xff]  ;;  %v11338_v40 = vcombine.low %v524_v35, %v532_v37 }
 0x330   :  { %7469 = vmatprep.subr.bf16.mxu0 %v12215_v5  ;;  %v547_v5 = vld [vmem:[%s18329_s3 + $0x368] sm:$0xff] }
 0x331   :  { %7314 = vmatmul.mubr.bf16.vlgmr.msra.gmra.mrb[12].mxu1 %v14312_v21  ;;  %v11352_v17 = vcombine.low %v539_v1, %v547_v5 }
 0x332   :  { %7487 = vmatpush1.bf16.msra.mxu1 %v11256_v53  ;;  %7518 = vmatprep.mubr.bf16.mxu1 %v14040_v60  ;;  %v11353_v53 = vcombine.high %v539_v1, %v547_v5  ;;  %v556_v1 = vld [vmem:[%s18329_s3 + $0x3b0] sm:$0xff] }
 0x333   :  { %7470 = vmatpush1.bf16.msra.mxu0 %v12214_v12  ;;  %7488 = vmatprep.subr.bf16.mxu1 %v11273_v13  ;;  %v11291_v12 = vcombine.high %v476_v6, %v484_v8  ;;  %v555_v13 = vld [vmem:[%s18329_s3 + $0x3a8] sm:$0xff]  ;;  %v564_v5 = vld [vmem:[%s18329_s3 + $0x3f0] sm:$0xff]  ;;  %v11354_v8 = vcombine.low %v540_v43, %v548_v38 }
 0x334   :  { %7471 = vmatprep.subr.bf16.mxu0 %v12231_v14  ;;  %v563_v14 = vld [vmem:[%s18329_s3 + $0x3e8] sm:$0xff] }
 0x335   :  { %v11368_v26 = vcombine.low %v555_v13, %v563_v14 }
 0x336   :  { %7489 = vmatpush1.bf16.msra.mxu1 %v11272_v19  ;;  %v11369_v19 = vcombine.high %v555_v13, %v563_v14  ;;  %v572_v13 = vld [vmem:[%s18329_s3 + $0x430] sm:$0xff] }
 0x337   :  { %7472 = vmatpush1.bf16.msra.mxu0 %v12230_v22  ;;  %7490 = vmatprep.subr.bf16.mxu1 %v11289_v23  ;;  %v11307_v22 = vcombine.high %v492_v15, %v500_v16  ;;  %v571_v23 = vld [vmem:[%s18329_s3 + $0x428] sm:$0xff]  ;;  %v580_v14 = vld [vmem:[%s18329_s3 + $0x470] sm:$0xff]  ;;  %v11370_v16 = vcombine.low %v556_v1, %v564_v5 }
 0x338   :  { %7473 = vmatprep.subr.bf16.mxu0 %v12247_v24  ;;  %v579_v24 = vld [vmem:[%s18329_s3 + $0x468] sm:$0xff] }
 0x339   :  { %v11384_v48 = vcombine.low %v571_v23, %v579_v24 }
 0x33a   :  { %7491 = vmatpush1.bf16.msra.mxu1 %v11288_v28  ;;  %v11385_v28 = vcombine.high %v571_v23, %v579_v24  ;;  %v588_v23 = vld [vmem:[%s18329_s3 + $0x4b0] sm:$0xff] }
 0x33b   :  { %7474 = vmatpush1.bf16.msra.mxu0 %v12246_v29  ;;  %7492 = vmatprep.subr.bf16.mxu1 %v11305_v32  ;;  %v11323_v29 = vcombine.high %v508_v25, %v516_v45  ;;  %v587_v32 = vld [vmem:[%s18329_s3 + $0x4a8] sm:$0xff]  ;;  %v596_v24 = vld [vmem:[%s18329_s3 + $0x4f0] sm:$0xff]  ;;  %v11386_v45 = vcombine.low %v572_v13, %v580_v14 }
 0x33c   :  { %7475 = vmatprep.subr.bf16.mxu0 %v12263_v3  ;;  %v595_v3 = vld [vmem:[%s18329_s3 + $0x4e8] sm:$0xff] }
 0x33d   :  { %v11400_v39 = vcombine.low %v587_v32, %v595_v3 }
 0x33e   :  { %7493 = vmatpush1.bf16.msra.mxu1 %v11304_v50  ;;  %v11401_v50 = vcombine.high %v587_v32, %v595_v3  ;;  %v604_v32 = vld [vmem:[%s18329_s3 + $0x530] sm:$0xff] }
 0x33f   :  { %7476 = vmatpush1.bf16.msra.mxu0 %v12262_v51  ;;  %7494 = vmatprep.subr.bf16.mxu1 %v11321_v52  ;;  %v11339_v51 = vcombine.high %v524_v35, %v532_v37  ;;  %v603_v52 = vld [vmem:[%s18329_s3 + $0x528] sm:$0xff]  ;;  %v612_v3 = vld [vmem:[%s18329_s3 + $0x570] sm:$0xff]  ;;  %v11402_v37 = vcombine.low %v588_v23, %v596_v24 }
 0x340   :  { %7650 = vmatprep.subr.bf16.mxu0 %v11259_v54  ;;  %v611_v54 = vld [vmem:[%s18329_s3 + $0x568] sm:$0xff] }
 0x341   :  { %v11416_v6 = vcombine.low %v603_v52, %v611_v54 }
 0x342   :  { %7478 = vmatmul.mubr.bf16.vlgmr.msra.gmra.mrb[12].mxu0 %v14312_v21  ;;  %7495 = vmatpush1.bf16.msra.mxu1 %v11320_v56  ;;  %v11417_v56 = vcombine.high %v603_v52, %v611_v54  ;;  %v620_v52 = vld [vmem:[%s18329_s3 + $0x5b0] sm:$0xff] }
 0x343   :  { %7651 = vmatpush1.bf16.msra.mxu0 %v11258_v61  ;;  %7682 = vmatprep.mubr.bf16.mxu0 %v14040_v60  ;;  %v11355_v61 = vcombine.high %v540_v43, %v548_v38  ;;  %v628_v54 = vld [vmem:[%s18329_s3 + $0x5f0] sm:$0xff]  ;;  %v11418_v38 = vcombine.low %v604_v32, %v612_v3 }
 0x344   :  { %7496 = vmatprep.subr.bf16.mxu1 %v11337_v63  ;;  %7652 = vmatprep.subr.bf16.mxu0 %v11275_v46  ;;  %v619_v63 = vld [vmem:[%s18329_s3 + $0x5a8] sm:$0xff] }
 0x345   :  { %v627_v46 = vld [vmem:[%s18329_s3 + $0x5e8] sm:$0xff] }
 0x346   :  { %7497 = vmatpush1.bf16.msra.mxu1 %v11336_v10  ;;  %v11433_v10 = vcombine.high %v619_v63, %v627_v46  ;;  %v11432_v15 = vcombine.low %v619_v63, %v627_v46  ;;  %v636_v63 = vld [vmem:[%s18329_s3 + $0x630] sm:$0xff] }
 0x347   :  { %7653 = vmatpush1.bf16.msra.mxu0 %v11274_v11  ;;  %7498 = vmatprep.subr.bf16.mxu1 %v11353_v53  ;;  %v11371_v11 = vcombine.high %v556_v1, %v564_v5  ;;  %v635_v53 = vld [vmem:[%s18329_s3 + $0x628] sm:$0xff]  ;;  %v644_v46 = vld [vmem:[%s18329_s3 + $0x670] sm:$0xff]  ;;  %v11434_v5 = vcombine.low %v620_v52, %v628_v54 }
 0x348   :  { %7654 = vmatprep.subr.bf16.mxu0 %v11291_v12  ;;  %v643_v12 = vld [vmem:[%s18329_s3 + $0x668] sm:$0xff] }
 0x349   :  { %v11448_v25 = vcombine.low %v635_v53, %v643_v12 }
 0x34a   :  { %7499 = vmatpush1.bf16.msra.mxu1 %v11352_v17  ;;  %v11449_v17 = vcombine.high %v635_v53, %v643_v12  ;;  %v652_v53 = vld [vmem:[%s18329_s3 + $0x6b0] sm:$0xff] }
 0x34b   :  { %7655 = vmatpush1.bf16.msra.mxu0 %v11290_v18  ;;  %7500 = vmatprep.subr.bf16.mxu1 %v11369_v19  ;;  %v11387_v18 = vcombine.high %v572_v13, %v580_v14  ;;  %v651_v19 = vld [vmem:[%s18329_s3 + $0x6a8] sm:$0xff]  ;;  %v660_v12 = vld [vmem:[%s18329_s3 + $0x6f0] sm:$0xff]  ;;  %v11450_v14 = vcombine.low %v636_v63, %v644_v46 }
 0x34c   :  { %7656 = vmatprep.subr.bf16.mxu0 %v11307_v22  ;;  %v659_v22 = vld [vmem:[%s18329_s3 + $0x6e8] sm:$0xff] }
 0x34d   :  { %v11464_v35 = vcombine.low %v651_v19, %v659_v22 }
 0x34e   :  { %7501 = vmatpush1.bf16.msra.mxu1 %v11368_v26  ;;  %v11465_v26 = vcombine.high %v651_v19, %v659_v22  ;;  %v668_v19 = vld [vmem:[%s18329_s3 + $0x730] sm:$0xff] }
 0x34f   :  { %7657 = vmatpush1.bf16.msra.mxu0 %v11306_v27  ;;  %7502 = vmatprep.subr.bf16.mxu1 %v11385_v28  ;;  %v11403_v27 = vcombine.high %v588_v23, %v596_v24  ;;  %v667_v28 = vld [vmem:[%s18329_s3 + $0x728] sm:$0xff]  ;;  %v676_v22 = vld [vmem:[%s18329_s3 + $0x770] sm:$0xff]  ;;  %v11466_v24 = vcombine.low %v652_v53, %v660_v12 }
 0x350   :  { %7658 = vmatprep.subr.bf16.mxu0 %v11323_v29  ;;  %v675_v29 = vld [vmem:[%s18329_s3 + $0x768] sm:$0xff] }
 0x351   :  { %v11480_v43 = vcombine.low %v667_v28, %v675_v29 }
 0x352   :  { %7503 = vmatpush1.bf16.msra.mxu1 %v11384_v48  ;;  %v11481_v48 = vcombine.high %v667_v28, %v675_v29  ;;  %v684_v28 = vld [vmem:[%s18329_s3 + $0x7b0] sm:$0xff] }
 0x353   :  { %7659 = vmatpush1.bf16.msra.mxu0 %v11322_v49  ;;  %7504 = vmatprep.subr.bf16.mxu1 %v11401_v50  ;;  %v11419_v49 = vcombine.high %v604_v32, %v612_v3  ;;  %v683_v50 = vld [vmem:[%s18329_s3 + $0x7a8] sm:$0xff]  ;;  %v692_v29 = vld [vmem:[%s18329_s3 + $0x7f0] sm:$0xff]  ;;  %v11482_v3 = vcombine.low %v668_v19, %v676_v22 }
 0x354   :  { %7660 = vmatprep.subr.bf16.mxu0 %v11339_v51  ;;  %v691_v51 = vld [vmem:[%s18329_s3 + $0x7e8] sm:$0xff] }
 0x355   :  { %v11496_v1 = vcombine.low %v683_v50, %v691_v51 }
 0x356   :  { %7505 = vmatpush1.bf16.msra.mxu1 %v11400_v39  ;;  %v11497_v39 = vcombine.high %v683_v50, %v691_v51  ;;  %v700_v50 = vld [vmem:[%s18329_s3 + $0x830] sm:$0xff] }
 0x357   :  { %7661 = vmatpush1.bf16.msra.mxu0 %v11338_v40  ;;  %7506 = vmatprep.subr.bf16.mxu1 %v11417_v56  ;;  %v11435_v40 = vcombine.high %v620_v52, %v628_v54  ;;  %v699_v56 = vld [vmem:[%s18329_s3 + $0x828] sm:$0xff]  ;;  %v708_v51 = vld [vmem:[%s18329_s3 + $0x870] sm:$0xff]  ;;  %v11498_v54 = vcombine.low %v684_v28, %v692_v29 }
 0x358   :  { %7662 = vmatprep.subr.bf16.mxu0 %v11355_v61  ;;  %v707_v61 = vld [vmem:[%s18329_s3 + $0x868] sm:$0xff] }
 0x359   :  { %v11512_v13 = vcombine.low %v699_v56, %v707_v61 }
 0x35a   :  { %7507 = vmatpush1.bf16.msra.mxu1 %v11416_v6  ;;  %v11513_v6 = vcombine.high %v699_v56, %v707_v61  ;;  %v716_v56 = vld [vmem:[%s18329_s3 + $0x8b0] sm:$0xff] }
 0x35b   :  { %7663 = vmatpush1.bf16.msra.mxu0 %v11354_v8  ;;  %7508 = vmatprep.subr.bf16.mxu1 %v11433_v10  ;;  %v11451_v8 = vcombine.high %v636_v63, %v644_v46  ;;  %v715_v10 = vld [vmem:[%s18329_s3 + $0x8a8] sm:$0xff]  ;;  %v724_v61 = vld [vmem:[%s18329_s3 + $0x8f0] sm:$0xff]  ;;  %v11514_v46 = vcombine.low %v700_v50, %v708_v51 }
 0x35c   :  { %7664 = vmatprep.subr.bf16.mxu0 %v11371_v11  ;;  %v723_v11 = vld [vmem:[%s18329_s3 + $0x8e8] sm:$0xff] }
 0x35d   :  { %v11528_v23 = vcombine.low %v715_v10, %v723_v11 }
 0x35e   :  { %7509 = vmatpush1.bf16.msra.mxu1 %v11432_v15  ;;  %v11529_v15 = vcombine.high %v715_v10, %v723_v11  ;;  %v732_v10 = vld [vmem:[%s18329_s3 + $0x930] sm:$0xff] }
 0x35f   :  { %7665 = vmatpush1.bf16.msra.mxu0 %v11370_v16  ;;  %7510 = vmatprep.subr.bf16.mxu1 %v11449_v17  ;;  %v11467_v16 = vcombine.high %v652_v53, %v660_v12  ;;  %v731_v17 = vld [vmem:[%s18329_s3 + $0x928] sm:$0xff]  ;;  %v740_v11 = vld [vmem:[%s18329_s3 + $0x970] sm:$0xff]  ;;  %v11530_v12 = vcombine.low %v716_v56, %v724_v61 }
 0x360   :  { %7666 = vmatprep.subr.bf16.mxu0 %v11387_v18  ;;  %v739_v18 = vld [vmem:[%s18329_s3 + $0x968] sm:$0xff] }
 0x361   :  { %v11544_v32 = vcombine.low %v731_v17, %v739_v18 }
 0x362   :  { %7511 = vmatpush1.bf16.msra.mxu1 %v11448_v25  ;;  %v11545_v25 = vcombine.high %v731_v17, %v739_v18  ;;  %v748_v17 = vld [vmem:[%s18329_s3 + $0x9b0] sm:$0xff] }
 0x363   :  { %7667 = vmatpush1.bf16.msra.mxu0 %v11386_v45  ;;  %7512 = vmatprep.subr.bf16.mxu1 %v11465_v26  ;;  %v11483_v45 = vcombine.high %v668_v19, %v676_v22  ;;  %v747_v26 = vld [vmem:[%s18329_s3 + $0x9a8] sm:$0xff]  ;;  %v756_v18 = vld [vmem:[%s18329_s3 + $0x9f0] sm:$0xff]  ;;  %v11546_v22 = vcombine.low %v732_v10, %v740_v11 }
 0x364   :  { %7668 = vmatprep.subr.bf16.mxu0 %v11403_v27  ;;  %v755_v27 = vld [vmem:[%s18329_s3 + $0x9e8] sm:$0xff] }
 0x365   :  { %v11560_v52 = vcombine.low %v747_v26, %v755_v27 }
 0x366   :  { %7513 = vmatpush1.bf16.msra.mxu1 %v11464_v35  ;;  %v11561_v35 = vcombine.high %v747_v26, %v755_v27  ;;  %v764_v26 = vld [vmem:[%s18329_s3 + $0xa30] sm:$0xff] }
 0x367   :  { %7669 = vmatpush1.bf16.msra.mxu0 %v11402_v37  ;;  %7514 = vmatprep.subr.bf16.mxu1 %v11481_v48  ;;  %v11499_v37 = vcombine.high %v684_v28, %v692_v29  ;;  %v763_v48 = vld [vmem:[%s18329_s3 + $0xa28] sm:$0xff]  ;;  %v772_v27 = vld [vmem:[%s18329_s3 + $0xa70] sm:$0xff]  ;;  %v11562_v29 = vcombine.low %v748_v17, %v756_v18 }
 0x368   :  { %7670 = vmatprep.subr.bf16.mxu0 %v11419_v49  ;;  %v771_v49 = vld [vmem:[%s18329_s3 + $0xa68] sm:$0xff] }
 0x369   :  { %v11576_v63 = vcombine.low %v763_v48, %v771_v49 }
 0x36a   :  { %7515 = vmatpush1.bf16.msra.mxu1 %v11480_v43  ;;  %v11577_v43 = vcombine.high %v763_v48, %v771_v49  ;;  %v780_v48 = vld [vmem:[%s18329_s3 + $0xab0] sm:$0xff] }
 0x36b   :  { %7671 = vmatpush1.bf16.msra.mxu0 %v11418_v38  ;;  %7516 = vmatprep.subr.bf16.mxu1 %v11497_v39  ;;  %v11515_v38 = vcombine.high %v700_v50, %v708_v51  ;;  %v779_v39 = vld [vmem:[%s18329_s3 + $0xaa8] sm:$0xff]  ;;  %v788_v49 = vld [vmem:[%s18329_s3 + $0xaf0] sm:$0xff]  ;;  %v11578_v51 = vcombine.low %v764_v26, %v772_v27 }
 0x36c   :  { %7672 = vmatprep.subr.bf16.mxu0 %v11435_v40  ;;  %v787_v40 = vld [vmem:[%s18329_s3 + $0xae8] sm:$0xff] }
 0x36d   :  { %v11592_v53 = vcombine.low %v779_v39, %v787_v40 }
 0x36e   :  { %7517 = vmatpush1.bf16.msra.mxu1 %v11496_v1  ;;  %v11593_v1 = vcombine.high %v779_v39, %v787_v40  ;;  %v796_v39 = vld [vmem:[%s18329_s3 + $0xb30] sm:$0xff] }
 0x36f   :  { %7673 = vmatpush1.bf16.msra.mxu0 %v11434_v5  ;;  %7527 = vmatprep.subr.bf16.mxu1 %v11513_v6  ;;  %v11531_v5 = vcombine.high %v716_v56, %v724_v61  ;;  %v795_v6 = vld [vmem:[%s18329_s3 + $0xb28] sm:$0xff]  ;;  %v804_v40 = vld [vmem:[%s18329_s3 + $0xb70] sm:$0xff]  ;;  %v11594_v61 = vcombine.low %v780_v48, %v788_v49 }
 0x370   :  { %7674 = vmatprep.subr.bf16.mxu0 %v11451_v8  ;;  %v803_v8 = vld [vmem:[%s18329_s3 + $0xb68] sm:$0xff] }
 0x371   :  { %7519 = vmatmul.mubr.bf16.vlgmr.msra.gmra.mrb[16].mxu1 %v14035_v58  ;;  %v11608_v19 = vcombine.low %v795_v6, %v803_v8 }
 0x372   :  { %7528 = vmatpush1.bf16.msra.mxu1 %v11512_v13  ;;  %7559 = vmatprep.mubr.bf16.mxu1 %v14076_v20  ;;  %v11609_v13 = vcombine.high %v795_v6, %v803_v8  ;;  %v812_v6 = vld [vmem:[%s18329_s3 + $0xbb0] sm:$0xff] }
 0x373   :  { %7675 = vmatpush1.bf16.msra.mxu0 %v11450_v14  ;;  %7529 = vmatprep.subr.bf16.mxu1 %v11529_v15  ;;  %v11547_v14 = vcombine.high %v732_v10, %v740_v11  ;;  %v811_v15 = vld [vmem:[%s18329_s3 + $0xba8] sm:$0xff]  ;;  %v820_v8 = vld [vmem:[%s18329_s3 + $0xbf0] sm:$0xff]  ;;  %v11610_v11 = vcombine.low %v796_v39, %v804_v40 }
 0x374   :  { %7676 = vmatprep.subr.bf16.mxu0 %v11467_v16  ;;  %v819_v16 = vld [vmem:[%s18329_s3 + $0xbe8] sm:$0xff] }
 0x375   :  { %v11624_v28 = vcombine.low %v811_v15, %v819_v16 }
 0x376   :  { %7530 = vmatpush1.bf16.msra.mxu1 %v11528_v23  ;;  %v11625_v23 = vcombine.high %v811_v15, %v819_v16  ;;  %v828_v15 = vld [vmem:[%s18329_s3 + $0xc30] sm:$0xff] }
 0x377   :  { %7677 = vmatpush1.bf16.msra.mxu0 %v11466_v24  ;;  %7531 = vmatprep.subr.bf16.mxu1 %v11545_v25  ;;  %v11563_v24 = vcombine.high %v748_v17, %v756_v18  ;;  %v827_v25 = vld [vmem:[%s18329_s3 + $0xc28] sm:$0xff]  ;;  %v836_v16 = vld [vmem:[%s18329_s3 + $0xc70] sm:$0xff]  ;;  %v11626_v18 = vcombine.low %v812_v6, %v820_v8 }
 0x378   :  { %7678 = vmatprep.subr.bf16.mxu0 %v11483_v45  ;;  %v835_v45 = vld [vmem:[%s18329_s3 + $0xc68] sm:$0xff] }
 0x379   :  { %v11640_v50 = vcombine.low %v827_v25, %v835_v45 }
 0x37a   :  { %7532 = vmatpush1.bf16.msra.mxu1 %v11544_v32  ;;  %v11641_v32 = vcombine.high %v827_v25, %v835_v45  ;;  %v844_v25 = vld [vmem:[%s18329_s3 + $0xcb0] sm:$0xff] }
 0x37b   :  { %7679 = vmatpush1.bf16.msra.mxu0 %v11482_v3  ;;  %7533 = vmatprep.subr.bf16.mxu1 %v11561_v35  ;;  %v11579_v3 = vcombine.high %v764_v26, %v772_v27  ;;  %v843_v35 = vld [vmem:[%s18329_s3 + $0xca8] sm:$0xff]  ;;  %v852_v45 = vld [vmem:[%s18329_s3 + $0xcf0] sm:$0xff]  ;;  %v11642_v27 = vcombine.low %v828_v15, %v836_v16 }
 0x37c   :  { %7680 = vmatprep.subr.bf16.mxu0 %v11499_v37  ;;  %v851_v37 = vld [vmem:[%s18329_s3 + $0xce8] sm:$0xff] }
 0x37d   :  { %v11656_v56 = vcombine.low %v843_v35, %v851_v37 }
 0x37e   :  { %7534 = vmatpush1.bf16.msra.mxu1 %v11560_v52  ;;  %v11657_v52 = vcombine.high %v843_v35, %v851_v37  ;;  %v860_v35 = vld [vmem:[%s18329_s3 + $0xd30] sm:$0xff] }
 0x37f   :  { %7681 = vmatpush1.bf16.msra.mxu0 %v11498_v54  ;;  %7535 = vmatprep.subr.bf16.mxu1 %v11577_v43  ;;  %v11595_v54 = vcombine.high %v780_v48, %v788_v49  ;;  %v859_v43 = vld [vmem:[%s18329_s3 + $0xd28] sm:$0xff]  ;;  %v868_v37 = vld [vmem:[%s18329_s3 + $0xd70] sm:$0xff]  ;;  %v11658_v49 = vcombine.low %v844_v25, %v852_v45 }
 0x380   :  { %7691 = vmatprep.subr.bf16.mxu0 %v11515_v38  ;;  %v867_v38 = vld [vmem:[%s18329_s3 + $0xd68] sm:$0xff] }
 0x381   :  { %v11672_v10 = vcombine.low %v859_v43, %v867_v38 }
 0x382   :  { %7683 = vmatmul.mubr.bf16.vlgmr.msra.gmra.mrb[16].mxu0 %v14035_v58  ;;  %7536 = vmatpush1.bf16.msra.mxu1 %v11576_v63  ;;  %v11673_v63 = vcombine.high %v859_v43, %v867_v38  ;;  %v876_v43 = vld [vmem:[%s18329_s3 + $0xdb0] sm:$0xff] }
 0x383   :  { %7692 = vmatpush1.bf16.msra.mxu0 %v11514_v46  ;;  %7723 = vmatprep.mubr.bf16.mxu0 %v14076_v20  ;;  %v11611_v46 = vcombine.high %v796_v39, %v804_v40  ;;  %v884_v38 = vld [vmem:[%s18329_s3 + $0xdf0] sm:$0xff]  ;;  %v11674_v40 = vcombine.low %v860_v35, %v868_v37 }
 0x384   :  { %7537 = vmatprep.subr.bf16.mxu1 %v11593_v1  ;;  %7693 = vmatprep.subr.bf16.mxu0 %v11531_v5  ;;  %v875_v1 = vld [vmem:[%s18329_s3 + $0xda8] sm:$0xff] }
 0x385   :  { %v883_v5 = vld [vmem:[%s18329_s3 + $0xde8] sm:$0xff] }
 0x386   :  { %7538 = vmatpush1.bf16.msra.mxu1 %v11592_v53  ;;  %v11689_v53 = vcombine.high %v875_v1, %v883_v5  ;;  %v11688_v17 = vcombine.low %v875_v1, %v883_v5  ;;  %v892_v1 = vld [vmem:[%s18329_s3 + $0xe30] sm:$0xff] }
 0x387   :  { %7694 = vmatpush1.bf16.msra.mxu0 %v11530_v12  ;;  %7539 = vmatprep.subr.bf16.mxu1 %v11609_v13  ;;  %v11627_v12 = vcombine.high %v812_v6, %v820_v8  ;;  %v891_v13 = vld [vmem:[%s18329_s3 + $0xe28] sm:$0xff]  ;;  %v900_v5 = vld [vmem:[%s18329_s3 + $0xe70] sm:$0xff]  ;;  %v11690_v8 = vcombine.low %v876_v43, %v884_v38 }
 0x388   :  { %7695 = vmatprep.subr.bf16.mxu0 %v11547_v14  ;;  %v899_v14 = vld [vmem:[%s18329_s3 + $0xe68] sm:$0xff] }
 0x389   :  { %v11704_v26 = vcombine.low %v891_v13, %v899_v14 }
 0x38a   :  { %7540 = vmatpush1.bf16.msra.mxu1 %v11608_v19  ;;  %v11705_v19 = vcombine.high %v891_v13, %v899_v14  ;;  %v908_v13 = vld [vmem:[%s18329_s3 + $0xeb0] sm:$0xff] }
 0x38b   :  { %7696 = vmatpush1.bf16.msra.mxu0 %v11546_v22  ;;  %7541 = vmatprep.subr.bf16.mxu1 %v11625_v23  ;;  %v11643_v22 = vcombine.high %v828_v15, %v836_v16  ;;  %v907_v23 = vld [vmem:[%s18329_s3 + $0xea8] sm:$0xff]  ;;  %v916_v14 = vld [vmem:[%s18329_s3 + $0xef0] sm:$0xff]  ;;  %v11706_v16 = vcombine.low %v892_v1, %v900_v5 }
 0x38c   :  { %7697 = vmatprep.subr.bf16.mxu0 %v11563_v24  ;;  %v915_v24 = vld [vmem:[%s18329_s3 + $0xee8] sm:$0xff] }
 0x38d   :  { %v11720_v48 = vcombine.low %v907_v23, %v915_v24 }
 0x38e   :  { %7542 = vmatpush1.bf16.msra.mxu1 %v11624_v28  ;;  %v11721_v28 = vcombine.high %v907_v23, %v915_v24  ;;  %v924_v23 = vld [vmem:[%s18329_s3 + $0xf30] sm:$0xff] }
 0x38f   :  { %7698 = vmatpush1.bf16.msra.mxu0 %v11562_v29  ;;  %7543 = vmatprep.subr.bf16.mxu1 %v11641_v32  ;;  %v11659_v29 = vcombine.high %v844_v25, %v852_v45  ;;  %v923_v32 = vld [vmem:[%s18329_s3 + $0xf28] sm:$0xff]  ;;  %v932_v24 = vld [vmem:[%s18329_s3 + $0xf70] sm:$0xff]  ;;  %v11722_v45 = vcombine.low %v908_v13, %v916_v14 }
 0x390   :  { %7699 = vmatprep.subr.bf16.mxu0 %v11579_v3  ;;  %v931_v3 = vld [vmem:[%s18329_s3 + $0xf68] sm:$0xff] }
 0x391   :  { %v11736_v39 = vcombine.low %v923_v32, %v931_v3 }
 0x392   :  { %7544 = vmatpush1.bf16.msra.mxu1 %v11640_v50  ;;  %v11737_v50 = vcombine.high %v923_v32, %v931_v3  ;;  %v940_v32 = vld [vmem:[%s18329_s3 + $0xfb0] sm:$0xff] }
 0x393   :  { %7700 = vmatpush1.bf16.msra.mxu0 %v11578_v51  ;;  %7545 = vmatprep.subr.bf16.mxu1 %v11657_v52  ;;  %v11675_v51 = vcombine.high %v860_v35, %v868_v37  ;;  %v939_v52 = vld [vmem:[%s18329_s3 + $0xfa8] sm:$0xff]  ;;  %v948_v3 = vld [vmem:[%s18329_s3 + $0xff0] sm:$0xff]  ;;  %v11738_v37 = vcombine.low %v924_v23, %v932_v24 }
 0x394   :  { %7701 = vmatprep.subr.bf16.mxu0 %v11595_v54  ;;  %v947_v54 = vld [vmem:[%s18329_s3 + $0xfe8] sm:$0xff] }
 0x395   :  { %v11752_v6 = vcombine.low %v939_v52, %v947_v54 }
 0x396   :  { %7546 = vmatpush1.bf16.msra.mxu1 %v11656_v56  ;;  %v11753_v56 = vcombine.high %v939_v52, %v947_v54  ;;  %v956_v52 = vld [vmem:[%s18329_s3 + $0x1030] sm:$0xff] }
 0x397   :  { %7702 = vmatpush1.bf16.msra.mxu0 %v11594_v61  ;;  %7547 = vmatprep.subr.bf16.mxu1 %v11673_v63  ;;  %v11691_v61 = vcombine.high %v876_v43, %v884_v38  ;;  %v955_v63 = vld [vmem:[%s18329_s3 + $0x1028] sm:$0xff]  ;;  %v964_v54 = vld [vmem:[%s18329_s3 + $0x1070] sm:$0xff]  ;;  %v11754_v38 = vcombine.low %v940_v32, %v948_v3 }
 0x398   :  { %7703 = vmatprep.subr.bf16.mxu0 %v11611_v46  ;;  %v963_v46 = vld [vmem:[%s18329_s3 + $0x1068] sm:$0xff] }
 0x399   :  { %v11768_v15 = vcombine.low %v955_v63, %v963_v46 }
 0x39a   :  { %7548 = vmatpush1.bf16.msra.mxu1 %v11672_v10  ;;  %v11769_v10 = vcombine.high %v955_v63, %v963_v46  ;;  %v972_v63 = vld [vmem:[%s18329_s3 + $0x10b0] sm:$0xff] }
 0x39b   :  { %7704 = vmatpush1.bf16.msra.mxu0 %v11610_v11  ;;  %7549 = vmatprep.subr.bf16.mxu1 %v11689_v53  ;;  %v11707_v11 = vcombine.high %v892_v1, %v900_v5  ;;  %v971_v53 = vld [vmem:[%s18329_s3 + $0x10a8] sm:$0xff]  ;;  %v980_v46 = vld [vmem:[%s18329_s3 + $0x10f0] sm:$0xff]  ;;  %v11770_v5 = vcombine.low %v956_v52, %v964_v54 }
 0x39c   :  { %7705 = vmatprep.subr.bf16.mxu0 %v11627_v12  ;;  %v979_v12 = vld [vmem:[%s18329_s3 + $0x10e8] sm:$0xff] }
 0x39d   :  { %v11784_v25 = vcombine.low %v971_v53, %v979_v12 }
 0x39e   :  { %7550 = vmatpush1.bf16.msra.mxu1 %v11688_v17  ;;  %v11785_v17 = vcombine.high %v971_v53, %v979_v12  ;;  %v988_v53 = vld [vmem:[%s18329_s3 + $0x1130] sm:$0xff] }
 0x39f   :  { %7706 = vmatpush1.bf16.msra.mxu0 %v11626_v18  ;;  %7551 = vmatprep.subr.bf16.mxu1 %v11705_v19  ;;  %v11723_v18 = vcombine.high %v908_v13, %v916_v14  ;;  %v987_v19 = vld [vmem:[%s18329_s3 + $0x1128] sm:$0xff]  ;;  %v996_v12 = vld [vmem:[%s18329_s3 + $0x1170] sm:$0xff]  ;;  %v11786_v14 = vcombine.low %v972_v63, %v980_v46 }
 0x3a0   :  { %7707 = vmatprep.subr.bf16.mxu0 %v11643_v22  ;;  %v995_v22 = vld [vmem:[%s18329_s3 + $0x1168] sm:$0xff] }
 0x3a1   :  { %v11800_v35 = vcombine.low %v987_v19, %v995_v22 }
 0x3a2   :  { %7552 = vmatpush1.bf16.msra.mxu1 %v11704_v26  ;;  %v11801_v26 = vcombine.high %v987_v19, %v995_v22  ;;  %v1004_v19 = vld [vmem:[%s18329_s3 + $0x11b0] sm:$0xff] }
 0x3a3   :  { %7708 = vmatpush1.bf16.msra.mxu0 %v11642_v27  ;;  %7553 = vmatprep.subr.bf16.mxu1 %v11721_v28  ;;  %v11739_v27 = vcombine.high %v924_v23, %v932_v24  ;;  %v1003_v28 = vld [vmem:[%s18329_s3 + $0x11a8] sm:$0xff]  ;;  %v1012_v22 = vld [vmem:[%s18329_s3 + $0x11f0] sm:$0xff]  ;;  %v11802_v24 = vcombine.low %v988_v53, %v996_v12 }
 0x3a4   :  { %7709 = vmatprep.subr.bf16.mxu0 %v11659_v29  ;;  %v1011_v29 = vld [vmem:[%s18329_s3 + $0x11e8] sm:$0xff] }
 0x3a5   :  { %v11816_v43 = vcombine.low %v1003_v28, %v1011_v29 }
 0x3a6   :  { %7554 = vmatpush1.bf16.msra.mxu1 %v11720_v48  ;;  %v11817_v48 = vcombine.high %v1003_v28, %v1011_v29  ;;  %v11819_v28 = vcombine.high %v1004_v19, %v1012_v22  ;;  %v1028_v29 = vld [vmem:[%s18329_s3 + $0x1270] sm:$0xff] }
 0x3a7   :  { %7710 = vmatpush1.bf16.msra.mxu0 %v11658_v49  ;;  %7555 = vmatprep.subr.bf16.mxu1 %v11737_v50  ;;  %v11755_v49 = vcombine.high %v940_v32, %v948_v3  ;;  %v1019_v50 = vld [vmem:[%s18329_s3 + $0x1228] sm:$0xff]  ;;  %v11818_v3 = vcombine.low %v1004_v19, %v1012_v22 }
 0x3a8   :  { %7711 = vmatprep.subr.bf16.mxu0 %v11675_v51  ;;  %v1027_v51 = vld [vmem:[%s18329_s3 + $0x1268] sm:$0xff] }
 0x3a9   :  { %v11832_v1 = vcombine.low %v1019_v50, %v1027_v51 }
 0x3aa   :  { %7556 = vmatpush1.bf16.msra.mxu1 %v11736_v39  ;;  %v11833_v39 = vcombine.high %v1019_v50, %v1027_v51  ;;  %v1044_v51 = vld [vmem:[%s18329_s3 + $0x12f0] sm:$0xff] }
 0x3ab   :  { %7712 = vmatpush1.bf16.msra.mxu0 %v11674_v40  ;;  %7557 = vmatprep.subr.bf16.mxu1 %v11753_v56  ;;  %v11771_v40 = vcombine.high %v956_v52, %v964_v54  ;;  %v1035_v56 = vld [vmem:[%s18329_s3 + $0x12a8] sm:$0xff] }
 0x3ac   :  { %7713 = vmatprep.subr.bf16.mxu0 %v11691_v61  ;;  %v1043_v61 = vld [vmem:[%s18329_s3 + $0x12e8] sm:$0xff] }
 0x3ad   :  { %v11848_v13 = vcombine.low %v1035_v56, %v1043_v61 }
 0x3ae   :  { %7558 = vmatpush1.bf16.msra.mxu1 %v11752_v6  ;;  %v1051_v6 = vld [vmem:[%s18329_s3 + $0x1328] sm:$0xff] }
 0x3af   :  { %7714 = vmatpush1.bf16.msra.mxu0 %v11690_v8  ;;  %7568 = vmatprep.subr.bf16.mxu1 %v11769_v10  ;;  %v1059_v8 = vld [vmem:[%s18329_s3 + $0x1368] sm:$0xff]  ;;  %v11849_v10 = vcombine.high %v1035_v56, %v1043_v61  ;;  %v1060_v61 = vld [vmem:[%s18329_s3 + $0x1370] sm:$0xff] }
 0x3b0   :  { %7715 = vmatprep.subr.bf16.mxu0 %v11707_v11  ;;  %v11787_v11 = vcombine.high %v972_v63, %v980_v46  ;;  %v11864_v23 = vcombine.low %v1051_v6, %v1059_v8 }
 0x3b1   :  { %7560 = vmatmul.mubr.bf16.vlgmr.msra.gmra.mrb[16].mxu1 %v14254_v36 }
 0x3b2   :  { %7569 = vmatpush1.bf16.msra.mxu1 %v11768_v15  ;;  %7600 = vmatprep.mubr.bf16.mxu1 %v14094_v31  ;;  %v11865_v15 = vcombine.high %v1051_v6, %v1059_v8  ;;  %v1139_v6 = vld [vmem:[%s18329_s3 + $0x15e8] sm:$0xff]  ;;  %v1068_v8 = vld [vmem:[%s18329_s3 + $0x13b0] sm:$0xff] }
 0x3b3   :  { %7716 = vmatpush1.bf16.msra.mxu0 %v11706_v16  ;;  %7570 = vmatprep.subr.bf16.mxu1 %v11785_v17  ;;  %v1067_v16 = vld [vmem:[%s18329_s3 + $0x13a8] sm:$0xff] }
 0x3b4   :  { %7717 = vmatprep.subr.bf16.mxu0 %v11723_v18  ;;  %v1075_v17 = vld [vmem:[%s18329_s3 + $0x13e8] sm:$0xff]  ;;  %v11803_v18 = vcombine.high %v988_v53, %v996_v12 }
 0x3b5   :  { %v11880_v32 = vcombine.low %v1067_v16, %v1075_v17 }
 0x3b6   :  { %7571 = vmatpush1.bf16.msra.mxu1 %v11784_v25  ;;  %v11881_v25 = vcombine.high %v1067_v16, %v1075_v17  ;;  %v1084_v16 = vld [vmem:[%s18329_s3 + $0x1430] sm:$0xff] }
 0x3b7   :  { %7718 = vmatpush1.bf16.msra.mxu0 %v11722_v45  ;;  %7572 = vmatprep.subr.bf16.mxu1 %v11801_v26  ;;  %v1083_v45 = vld [vmem:[%s18329_s3 + $0x1428] sm:$0xff] }
 0x3b8   :  { %7719 = vmatprep.subr.bf16.mxu0 %v11739_v27  ;;  %v1091_v26 = vld [vmem:[%s18329_s3 + $0x1468] sm:$0xff]  ;;  %v1020_v27 = vld [vmem:[%s18329_s3 + $0x1230] sm:$0xff] }
 0x3b9   :  { %v11835_v50 = vcombine.high %v1020_v27, %v1028_v29  ;;  %v11896_v52 = vcombine.low %v1083_v45, %v1091_v26  ;;  %v11834_v54 = vcombine.low %v1020_v27, %v1028_v29  ;;  %v1108_v27 = vld [vmem:[%s18329_s3 + $0x14f0] sm:$0xff] }
 0x3ba   :  { %7573 = vmatpush1.bf16.msra.mxu1 %v11800_v35  ;;  %v11897_v35 = vcombine.high %v1083_v45, %v1091_v26  ;;  %v1100_v45 = vld [vmem:[%s18329_s3 + $0x14b0] sm:$0xff] }
 0x3bb   :  { %7720 = vmatpush1.bf16.msra.mxu0 %v11738_v37  ;;  %7574 = vmatprep.subr.bf16.mxu1 %v11817_v48  ;;  %v1099_v37 = vld [vmem:[%s18329_s3 + $0x14a8] sm:$0xff] }
 0x3bc   :  { %7721 = vmatprep.subr.bf16.mxu0 %v11755_v49  ;;  %v1107_v48 = vld [vmem:[%s18329_s3 + $0x14e8] sm:$0xff]  ;;  %v1036_v49 = vld [vmem:[%s18329_s3 + $0x12b0] sm:$0xff] }
 0x3bd   :  { %v11851_v56 = vcombine.high %v1036_v49, %v1044_v51  ;;  %v11912_v63 = vcombine.low %v1099_v37, %v1107_v48  ;;  %v11850_v46 = vcombine.low %v1036_v49, %v1044_v51  ;;  %v1124_v49 = vld [vmem:[%s18329_s3 + $0x1570] sm:$0xff]  ;;  %v11914_v51 = vcombine.low %v1100_v45, %v1108_v27 }
 0x3be   :  { %7575 = vmatpush1.bf16.msra.mxu1 %v11816_v43  ;;  %v11913_v43 = vcombine.high %v1099_v37, %v1107_v48  ;;  %v1116_v37 = vld [vmem:[%s18329_s3 + $0x1530] sm:$0xff]  ;;  %v11915_v48 = vcombine.high %v1100_v45, %v1108_v27 }
 0x3bf   :  { %7722 = vmatpush1.bf16.msra.mxu0 %v11754_v38  ;;  %7576 = vmatprep.subr.bf16.mxu1 %v11833_v39  ;;  %v1115_v38 = vld [vmem:[%s18329_s3 + $0x1528] sm:$0xff]  ;;  %v1188_v45 = vld [vmem:[%s18329_s3 + $0x1770] sm:$0xff] }
 0x3c0   :  { %7732 = vmatprep.subr.bf16.mxu0 %v11771_v40  ;;  %v1123_v39 = vld [vmem:[%s18329_s3 + $0x1568] sm:$0xff]  ;;  %v1052_v40 = vld [vmem:[%s18329_s3 + $0x1330] sm:$0xff] }
 0x3c1   :  { %v11928_v53 = vcombine.low %v1115_v38, %v1123_v39  ;;  %v11866_v12 = vcombine.low %v1052_v40, %v1060_v61 }
 0x3c2   :  { %7724 = vmatmul.mubr.bf16.vlgmr.msra.gmra.mrb[16].mxu0 %v14254_v36  ;;  %7577 = vmatpush1.bf16.msra.mxu1 %v11832_v1  ;;  %v11929_v1 = vcombine.high %v1115_v38, %v1123_v39  ;;  %v1132_v38 = vld [vmem:[%s18329_s3 + $0x15b0] sm:$0xff]  ;;  %v11931_v39 = vcombine.high %v1116_v37, %v1124_v49 }
 0x3c3   :  { %7733 = vmatpush1.bf16.msra.mxu0 %v11770_v5  ;;  %7764 = vmatprep.mubr.bf16.mxu0 %v14094_v31  ;;  %v1131_v5 = vld [vmem:[%s18329_s3 + $0x15a8] sm:$0xff] }
 0x3c4   :  { %7578 = vmatprep.subr.bf16.mxu1 %v11849_v10  ;;  %7734 = vmatprep.subr.bf16.mxu0 %v11787_v11  ;;  %v11867_v10 = vcombine.high %v1052_v40, %v1060_v61  ;;  %v1076_v11 = vld [vmem:[%s18329_s3 + $0x13f0] sm:$0xff]  ;;  %v11944_v19 = vcombine.low %v1131_v5, %v1139_v6  ;;  %v11930_v61 = vcombine.low %v1116_v37, %v1124_v49 }
 0x3c5   :  { %v11883_v17 = vcombine.high %v1068_v8, %v1076_v11  ;;  %v11882_v22 = vcombine.low %v1068_v8, %v1076_v11  ;;  %v1140_v40 = vld [vmem:[%s18329_s3 + $0x15f0] sm:$0xff] }
 0x3c6   :  { %7579 = vmatpush1.bf16.msra.mxu1 %v11848_v13  ;;  %v11945_v13 = vcombine.high %v1131_v5, %v1139_v6  ;;  %v1148_v5 = vld [vmem:[%s18329_s3 + $0x1630] sm:$0xff]  ;;  %v11947_v6 = vcombine.high %v1132_v38, %v1140_v40  ;;  %v11946_v11 = vcombine.low %v1132_v38, %v1140_v40 }
 0x3c7   :  { %7735 = vmatpush1.bf16.msra.mxu0 %v11786_v14  ;;  %7580 = vmatprep.subr.bf16.mxu1 %v11865_v15  ;;  %v1147_v14 = vld [vmem:[%s18329_s3 + $0x1628] sm:$0xff]  ;;  %v1156_v8 = vld [vmem:[%s18329_s3 + $0x1670] sm:$0xff] }
 0x3c8   :  { %7736 = vmatprep.subr.bf16.mxu0 %v11803_v18  ;;  %v1155_v15 = vld [vmem:[%s18329_s3 + $0x1668] sm:$0xff]  ;;  %v1092_v18 = vld [vmem:[%s18329_s3 + $0x1470] sm:$0xff] }
 0x3c9   :  { %v11899_v26 = vcombine.high %v1084_v16, %v1092_v18  ;;  %v11898_v29 = vcombine.low %v1084_v16, %v1092_v18  ;;  %v1172_v16 = vld [vmem:[%s18329_s3 + $0x16f0] sm:$0xff]  ;;  %v11962_v18 = vcombine.low %v1148_v5, %v1156_v8 }
 0x3ca   :  { %7581 = vmatpush1.bf16.msra.mxu1 %v11864_v23  ;;  %v11961_v23 = vcombine.high %v1147_v14, %v1155_v15  ;;  %v1204_v37 = vld [vmem:[%s18329_s3 + $0x17f0] sm:$0xff] }
 0x3cb   :  { %7737 = vmatpush1.bf16.msra.mxu0 %v11802_v24  ;;  %7582 = vmatprep.subr.bf16.mxu1 %v11881_v25  ;;  %v1163_v24 = vld [vmem:[%s18329_s3 + $0x16a8] sm:$0xff]  ;;  %v1220_v38 = vld [vmem:[%s18329_s3 + $0x1870] sm:$0xff] }
 0x3cc   :  { %7738 = vmatprep.subr.bf16.mxu0 %v11819_v28  ;;  %v1171_v25 = vld [vmem:[%s18329_s3 + $0x16e8] sm:$0xff]  ;;  %v11960_v28 = vcombine.low %v1147_v14, %v1155_v15  ;;  %v1164_v14 = vld [vmem:[%s18329_s3 + $0x16b0] sm:$0xff]  ;;  %v11963_v15 = vcombine.high %v1148_v5, %v1156_v8 }
 0x3cd   :  { %v11978_v27 = vcombine.low %v1164_v14, %v1172_v16  ;;  %v1236_v5 = vld [vmem:[%s18329_s3 + $0x18f0] sm:$0xff] }
 0x3ce   :  { %7583 = vmatpush1.bf16.msra.mxu1 %v11880_v32  ;;  %v11977_v32 = vcombine.high %v1163_v24, %v1171_v25 }
 0x3cf   :  { %7739 = vmatpush1.bf16.msra.mxu0 %v11818_v3  ;;  %7584 = vmatprep.subr.bf16.mxu1 %v11897_v35  ;;  %v1179_v3 = vld [vmem:[%s18329_s3 + $0x1728] sm:$0xff] }
 0x3d0   :  { %7740 = vmatprep.subr.bf16.mxu0 %v11835_v50  ;;  %v1187_v35 = vld [vmem:[%s18329_s3 + $0x1768] sm:$0xff]  ;;  %v11976_v50 = vcombine.low %v1163_v24, %v1171_v25  ;;  %v11979_v24 = vcombine.high %v1164_v14, %v1172_v16  ;;  %v1180_v25 = vld [vmem:[%s18329_s3 + $0x1730] sm:$0xff] }
 0x3d1   :  { %v11994_v49 = vcombine.low %v1180_v25, %v1188_v45  ;;  %v1252_v14 = vld [vmem:[%s18329_s3 + $0x1970] sm:$0xff] }
 0x3d2   :  { %7585 = vmatpush1.bf16.msra.mxu1 %v11896_v52  ;;  %v11993_v52 = vcombine.high %v1179_v3, %v1187_v35 }
 0x3d3   :  { %7741 = vmatpush1.bf16.msra.mxu0 %v11834_v54  ;;  %7586 = vmatprep.subr.bf16.mxu1 %v11913_v43  ;;  %v1195_v54 = vld [vmem:[%s18329_s3 + $0x17a8] sm:$0xff] }
 0x3d4   :  { %7742 = vmatprep.subr.bf16.mxu0 %v11851_v56  ;;  %v1203_v43 = vld [vmem:[%s18329_s3 + $0x17e8] sm:$0xff]  ;;  %v11992_v56 = vcombine.low %v1179_v3, %v1187_v35  ;;  %v1196_v3 = vld [vmem:[%s18329_s3 + $0x17b0] sm:$0xff]  ;;  %v11995_v35 = vcombine.high %v1180_v25, %v1188_v45 }
 0x3d5   :  { %v12010_v40 = vcombine.low %v1196_v3, %v1204_v37  ;;  %v1268_v25 = vld [vmem:[%s18329_s3 + $0x19f0] sm:$0xff] }
 0x3d6   :  { %7587 = vmatpush1.bf16.msra.mxu1 %v11912_v63  ;;  %v12009_v63 = vcombine.high %v1195_v54, %v1203_v43 }
 0x3d7   :  { %7743 = vmatpush1.bf16.msra.mxu0 %v11850_v46  ;;  %7588 = vmatprep.subr.bf16.mxu1 %v11929_v1  ;;  %v1211_v46 = vld [vmem:[%s18329_s3 + $0x1828] sm:$0xff] }
 0x3d8   :  { %7744 = vmatprep.subr.bf16.mxu0 %v11867_v10  ;;  %v1219_v1 = vld [vmem:[%s18329_s3 + $0x1868] sm:$0xff]  ;;  %v12008_v10 = vcombine.low %v1195_v54, %v1203_v43  ;;  %v1212_v54 = vld [vmem:[%s18329_s3 + $0x1830] sm:$0xff]  ;;  %v12011_v43 = vcombine.high %v1196_v3, %v1204_v37 }
 0x3d9   :  { %v12026_v8 = vcombine.low %v1212_v54, %v1220_v38  ;;  %v1339_v3 = vld [vmem:[%s18329_s3 + $0x1c28] sm:$0xff]  ;;  %v1276_v37 = vld [vmem:[%s18329_s3 + $0x1a30] sm:$0xff] }
 0x3da   :  { %7589 = vmatpush1.bf16.msra.mxu1 %v11928_v53  ;;  %v12025_v53 = vcombine.high %v1211_v46, %v1219_v1 }
 0x3db   :  { %7745 = vmatpush1.bf16.msra.mxu0 %v11866_v12  ;;  %7590 = vmatprep.subr.bf16.mxu1 %v11945_v13  ;;  %v1227_v12 = vld [vmem:[%s18329_s3 + $0x18a8] sm:$0xff] }
 0x3dc   :  { %7746 = vmatprep.subr.bf16.mxu0 %v11883_v17  ;;  %v1235_v13 = vld [vmem:[%s18329_s3 + $0x18e8] sm:$0xff]  ;;  %v12024_v17 = vcombine.low %v1211_v46, %v1219_v1  ;;  %v1228_v46 = vld [vmem:[%s18329_s3 + $0x18b0] sm:$0xff]  ;;  %v12027_v1 = vcombine.high %v1212_v54, %v1220_v38 }
 0x3dd   :  { %v12042_v16 = vcombine.low %v1228_v46, %v1236_v5  ;;  %v1355_v54 = vld [vmem:[%s18329_s3 + $0x1ca8] sm:$0xff]  ;;  %v1292_v38 = vld [vmem:[%s18329_s3 + $0x1ab0] sm:$0xff] }
 0x3de   :  { %7591 = vmatpush1.bf16.msra.mxu1 %v11944_v19  ;;  %v12041_v19 = vcombine.high %v1227_v12, %v1235_v13 }
 0x3df   :  { %7747 = vmatpush1.bf16.msra.mxu0 %v11882_v22  ;;  %7592 = vmatprep.subr.bf16.mxu1 %v11961_v23  ;;  %v1243_v22 = vld [vmem:[%s18329_s3 + $0x1928] sm:$0xff] }
 0x3e0   :  { %7748 = vmatprep.subr.bf16.mxu0 %v11899_v26  ;;  %v1251_v23 = vld [vmem:[%s18329_s3 + $0x1968] sm:$0xff]  ;;  %v12040_v26 = vcombine.low %v1227_v12, %v1235_v13  ;;  %v12043_v12 = vcombine.high %v1228_v46, %v1236_v5  ;;  %v1244_v13 = vld [vmem:[%s18329_s3 + $0x1930] sm:$0xff] }
 0x3e1   :  { %v1371_v46 = vld [vmem:[%s18329_s3 + $0x1d28] sm:$0xff]  ;;  %v1308_v5 = vld [vmem:[%s18329_s3 + $0x1b30] sm:$0xff] }
 0x3e2   :  { %7593 = vmatpush1.bf16.msra.mxu1 %v11960_v28  ;;  %v12057_v28 = vcombine.high %v1243_v22, %v1251_v23 }
 0x3e3   :  { %7749 = vmatpush1.bf16.msra.mxu0 %v11898_v29  ;;  %7594 = vmatprep.subr.bf16.mxu1 %v11977_v32  ;;  %v1259_v29 = vld [vmem:[%s18329_s3 + $0x19a8] sm:$0xff] }
 0x3e4   :  { %7750 = vmatprep.subr.bf16.mxu0 %v11915_v48  ;;  %v1267_v32 = vld [vmem:[%s18329_s3 + $0x19e8] sm:$0xff]  ;;  %v12056_v48 = vcombine.low %v1243_v22, %v1251_v23  ;;  %v12059_v23 = vcombine.high %v1244_v13, %v1252_v14 }
 0x3e6   :  { %7595 = vmatpush1.bf16.msra.mxu1 %v11976_v50  ;;  %v12073_v50 = vcombine.high %v1259_v29, %v1267_v32 }
 0x3e7   :  { %7751 = vmatpush1.bf16.msra.mxu0 %v11914_v51  ;;  %7596 = vmatprep.subr.bf16.mxu1 %v11993_v52  ;;  %v1275_v51 = vld [vmem:[%s18329_s3 + $0x1a28] sm:$0xff] }
 0x3e8   :  { %7752 = vmatprep.subr.bf16.mxu0 %v11931_v39  ;;  %v1283_v52 = vld [vmem:[%s18329_s3 + $0x1a68] sm:$0xff]  ;;  %v12072_v39 = vcombine.low %v1259_v29, %v1267_v32  ;;  %v12058_v29 = vcombine.low %v1244_v13, %v1252_v14  ;;  %v1324_v14 = vld [vmem:[%s18329_s3 + $0x1bb0] sm:$0xff] }
 0x3e9   :  { %v1395_v13 = vld [vmem:[%s18329_s3 + $0x1de8] sm:$0xff] }
 0x3ea   :  { %7597 = vmatpush1.bf16.msra.mxu1 %v11992_v56  ;;  %v12089_v56 = vcombine.high %v1275_v51, %v1283_v52 }
 0x3eb   :  { %7753 = vmatpush1.bf16.msra.mxu0 %v11930_v61  ;;  %7598 = vmatprep.subr.bf16.mxu1 %v12009_v63  ;;  %v1291_v61 = vld [vmem:[%s18329_s3 + $0x1aa8] sm:$0xff] }
 0x3ec   :  { %7754 = vmatprep.subr.bf16.mxu0 %v11947_v6  ;;  %v1299_v63 = vld [vmem:[%s18329_s3 + $0x1ae8] sm:$0xff]  ;;  %v12088_v6 = vcombine.low %v1275_v51, %v1283_v52 }
 0x3ee   :  { %7599 = vmatpush1.bf16.msra.mxu1 %v12008_v10  ;;  %v1307_v10 = vld [vmem:[%s18329_s3 + $0x1b28] sm:$0xff] }
 0x3ef   :  { %7755 = vmatpush1.bf16.msra.mxu0 %v11946_v11  ;;  %7609 = vmatprep.subr.bf16.mxu1 %v12025_v53  ;;  %v1315_v11 = vld [vmem:[%s18329_s3 + $0x1b68] sm:$0xff]  ;;  %v12105_v53 = vcombine.high %v1291_v61, %v1299_v63 }
 0x3f0   :  { %7756 = vmatprep.subr.bf16.mxu0 %v11963_v15  ;;  %v12104_v15 = vcombine.low %v1291_v61, %v1299_v63 }
 0x3f1   :  { %7601 = vmatmul.mubr.bf16.vlgmr.msra.gmra.mrb[16].mxu1 %v14096_v33 }
 0x3f2   :  { %7610 = vmatpush1.bf16.msra.mxu1 %v12024_v17  ;;  %7641 = vmatprep.mubr.bf16.mxu1 %v14143_v7  ;;  %v12121_v17 = vcombine.high %v1307_v10, %v1315_v11 }
 0x3f3   :  { %7757 = vmatpush1.bf16.msra.mxu0 %v11962_v18  ;;  %7611 = vmatprep.subr.bf16.mxu1 %v12041_v19  ;;  %v1323_v18 = vld [vmem:[%s18329_s3 + $0x1ba8] sm:$0xff] }
 0x3f4   :  { %7758 = vmatprep.subr.bf16.mxu0 %v11979_v24  ;;  %v1331_v19 = vld [vmem:[%s18329_s3 + $0x1be8] sm:$0xff]  ;;  %v1260_v24 = vld [vmem:[%s18329_s3 + $0x19b0] sm:$0xff] }
 0x3f5   :  { %v12137_v32 = vcombine.high %v1323_v18, %v1331_v19  ;;  %v12074_v51 = vcombine.low %v1260_v24, %v1268_v25 }
 0x3f6   :  { %7612 = vmatpush1.bf16.msra.mxu1 %v12040_v26 }
 0x3f7   :  { %7759 = vmatpush1.bf16.msra.mxu0 %v11978_v27  ;;  %7613 = vmatprep.subr.bf16.mxu1 %v12057_v28  ;;  %v12120_v27 = vcombine.low %v1307_v10, %v1315_v11 }
 0x3f8   :  { %7760 = vmatprep.subr.bf16.mxu0 %v11995_v35  ;;  %v1347_v35 = vld [vmem:[%s18329_s3 + $0x1c68] sm:$0xff] }
 0x3f9   :  { %v12153_v52 = vcombine.high %v1339_v3, %v1347_v35 }
 0x3fa   :  { %7614 = vmatpush1.bf16.msra.mxu1 %v12056_v48  ;;  %v12075_v48 = vcombine.high %v1260_v24, %v1268_v25 }
 0x3fb   :  { %7761 = vmatpush1.bf16.msra.mxu0 %v11994_v49  ;;  %7615 = vmatprep.subr.bf16.mxu1 %v12073_v50  ;;  %v1284_v49 = vld [vmem:[%s18329_s3 + $0x1a70] sm:$0xff]  ;;  %v12136_v50 = vcombine.low %v1323_v18, %v1331_v19 }
 0x3fc   :  { %7762 = vmatprep.subr.bf16.mxu0 %v12011_v43  ;;  %v1363_v43 = vld [vmem:[%s18329_s3 + $0x1ce8] sm:$0xff]  ;;  %v12090_v61 = vcombine.low %v1276_v37, %v1284_v49 }
 0x3fd   :  { %v12169_v63 = vcombine.high %v1355_v54, %v1363_v43  ;;  %v12168_v10 = vcombine.low %v1355_v54, %v1363_v43  ;;  %v1364_v54 = vld [vmem:[%s18329_s3 + $0x1cf0] sm:$0xff] }
 0x3fe   :  { %7616 = vmatpush1.bf16.msra.mxu1 %v12072_v39  ;;  %v12091_v39 = vcombine.high %v1276_v37, %v1284_v49  ;;  %v1419_v49 = vld [vmem:[%s18329_s3 + $0x1ea8] sm:$0xff] }
 0x3ff   :  { %7763 = vmatpush1.bf16.msra.mxu0 %v12010_v40  ;;  %7617 = vmatprep.subr.bf16.mxu1 %v12089_v56  ;;  %v1300_v40 = vld [vmem:[%s18329_s3 + $0x1af0] sm:$0xff]  ;;  %v12152_v56 = vcombine.low %v1339_v3, %v1347_v35 }
 0x400   :  { %7773 = vmatprep.subr.bf16.mxu0 %v12027_v1  ;;  %v1379_v1 = vld [vmem:[%s18329_s3 + $0x1d68] sm:$0xff]  ;;  %v12106_v11 = vcombine.low %v1292_v38, %v1300_v40  ;;  %v1348_v3 = vld [vmem:[%s18329_s3 + $0x1c70] sm:$0xff] }
 0x401   :  { %v12184_v19 = vcombine.low %v1371_v46, %v1379_v1 }
 0x402   :  { %7765 = vmatmul.mubr.bf16.vlgmr.msra.gmra.mrb[16].mxu0 %v14096_v33  ;;  %7618 = vmatpush1.bf16.msra.mxu1 %v12088_v6  ;;  %v12107_v6 = vcombine.high %v1292_v38, %v1300_v40  ;;  %v1435_v40 = vld [vmem:[%s18329_s3 + $0x1f28] sm:$0xff] }
 0x403   :  { %7774 = vmatpush1.bf16.msra.mxu0 %v12026_v8  ;;  %7805 = vmatprep.mubr.bf16.mxu0 %v14143_v7  ;;  %v1316_v8 = vld [vmem:[%s18329_s3 + $0x1b70] sm:$0xff] }
 0x404   :  { %v16513_v22 = vpop.f32.mrb[12].mxu1  ;;  %7619 = vmatprep.subr.bf16.mxu1 %v12105_v53  ;;  %7775 = vmatprep.subr.bf16.mxu0 %v12043_v12  ;;  %v12185_v53 = vcombine.high %v1371_v46, %v1379_v1  ;;  %v1387_v12 = vld [vmem:[%s18329_s3 + $0x1da8] sm:$0xff]  ;;  %v12122_v24 = vcombine.low %v1308_v5, %v1316_v8  ;;  %v1380_v46 = vld [vmem:[%s18329_s3 + $0x1d70] sm:$0xff] }
 0x405   :  { %v16521_v45 = vpop.f32.mrb[13].mxu1  ;;  %v12201_v25 = vcombine.high %v1387_v12, %v1395_v13  ;;  %v12200_v35 = vcombine.low %v1387_v12, %v1395_v13  ;;  %v1396_v12 = vld [vmem:[%s18329_s3 + $0x1df0] sm:$0xff] }
 0x406   :  { %v7319_v26 = vpop.f32.mrb[14].mxu1  ;;  %7620 = vmatpush1.bf16.msra.mxu1 %v12104_v15  ;;  %v12123_v15 = vcombine.high %v1308_v5, %v1316_v8  ;;  %v1451_v8 = vld [vmem:[%s18329_s3 + $0x1fa8] sm:$0xff] }
 0x407   :  { %7776 = vmatpush1.bf16.msra.mxu0 %v12042_v16  ;;  %v7320_v28 = vpop.f32.mrb[15].mxu1  ;;  %7621 = vmatprep.subr.bf16.mxu1 %v12121_v17  ;;  %v1332_v16 = vld [vmem:[%s18329_s3 + $0x1bf0] sm:$0xff]  ;;  %v1403_v26 = vld [vmem:[%s18329_s3 + $0x1e28] sm:$0xff] }
 0x408   :  { %7777 = vmatprep.subr.bf16.mxu0 %v12059_v23  ;;  %v1340_v28 = vld [vmem:[%s18329_s3 + $0x1c30] sm:$0xff]  ;;  %v12138_v37 = vcombine.low %v1324_v14, %v1332_v16 }
 0x409   :  { %v12154_v38 = vcombine.low %v1340_v28, %v1348_v3 }
 0x40a   :  { %7622 = vmatpush1.bf16.msra.mxu1 %v12120_v27  ;;  %v1411_v27 = vld [vmem:[%s18329_s3 + $0x1e68] sm:$0xff] }
 0x40b   :  { %7778 = vmatpush1.bf16.msra.mxu0 %v12058_v29  ;;  %7623 = vmatprep.subr.bf16.mxu1 %v12137_v32  ;;  %v12139_v32 = vcombine.high %v1324_v14, %v1332_v16  ;;  %v12216_v43 = vcombine.low %v1403_v26, %v1411_v27  ;;  %v1404_v16 = vld [vmem:[%s18329_s3 + $0x1e30] sm:$0xff] }
 0x40c   :  { %7779 = vmatprep.subr.bf16.mxu0 %v12075_v48  ;;  %v12217_v48 = vcombine.high %v1403_v26, %v1411_v27 }
 0x40e   :  { %7624 = vmatpush1.bf16.msra.mxu1 %v12136_v50  ;;  %v1427_v50 = vld [vmem:[%s18329_s3 + $0x1ee8] sm:$0xff] }
 0x40f   :  { %7780 = vmatpush1.bf16.msra.mxu0 %v12074_v51  ;;  %7625 = vmatprep.subr.bf16.mxu1 %v12153_v52  ;;  %v1356_v51 = vld [vmem:[%s18329_s3 + $0x1cb0] sm:$0xff]  ;;  %v12155_v52 = vcombine.high %v1340_v28, %v1348_v3  ;;  %v12232_v1 = vcombine.low %v1419_v49, %v1427_v50  ;;  %v461_v3 = vld [vmem:[%s18329_s3 + $0xb8] sm:$0xff] }
 0x410   :  { %7781 = vmatprep.subr.bf16.mxu0 %v12091_v39  ;;  %v12233_v39 = vcombine.high %v1419_v49, %v1427_v50  ;;  %v12170_v5 = vcombine.low %v1356_v51, %v1364_v54 }
 0x412   :  { %7626 = vmatpush1.bf16.msra.mxu1 %v12152_v56  ;;  %v1443_v56 = vld [vmem:[%s18329_s3 + $0x1f68] sm:$0xff] }
 0x413   :  { %7782 = vmatpush1.bf16.msra.mxu0 %v12090_v61  ;;  %7627 = vmatprep.subr.bf16.mxu1 %v12169_v63  ;;  %v1372_v61 = vld [vmem:[%s18329_s3 + $0x1d30] sm:$0xff]  ;;  %v12171_v63 = vcombine.high %v1356_v51, %v1364_v54  ;;  %v12248_v13 = vcombine.low %v1435_v40, %v1443_v56 }
 0x414   :  { %7783 = vmatprep.subr.bf16.mxu0 %v12107_v6  ;;  %v12249_v6 = vcombine.high %v1435_v40, %v1443_v56  ;;  %v12186_v14 = vcombine.low %v1372_v61, %v1380_v46  ;;  %v1436_v51 = vld [vmem:[%s18329_s3 + $0x1f30] sm:$0xff] }
 0x415   :  { %v16571_v17 = vpop.f32.mrb[12].mxu0 }
 0x416   :  { %v16573_v18 = vpop.f32.mrb[13].mxu0  ;;  %7628 = vmatpush1.bf16.msra.mxu1 %v12168_v10  ;;  %v1459_v10 = vld [vmem:[%s18329_s3 + $0x1fe8] sm:$0xff] }
 0x417   :  { %v7483_v23 = vpop.f32.mrb[14].mxu0  ;;  %7784 = vmatpush1.bf16.msra.mxu0 %v12106_v11  ;;  %7629 = vmatprep.subr.bf16.mxu1 %v12185_v53  ;;  %v1388_v11 = vld [vmem:[%s18329_s3 + $0x1db0] sm:$0xff]  ;;  %v12187_v53 = vcombine.high %v1372_v61, %v1380_v46  ;;  %v12264_v26 = vcombine.low %v1451_v8, %v1459_v10  ;;  %v493_v46 = vld [vmem:[%s18329_s3 + $0x1b8] sm:$0xff] }
 0x418   :  { %v7484_v29 = vpop.f32.mrb[15].mxu0  ;;  %7785 = vmatprep.subr.bf16.mxu0 %v12123_v15  ;;  %v12265_v15 = vcombine.high %v1451_v8, %v1459_v10  ;;  %v445_v23 = vld [vmem:[%s18329_s3 + $0x38] sm:$0xff]  ;;  %v12202_v27 = vcombine.low %v1388_v11, %v1396_v12  ;;  %v1452_v61 = vld [vmem:[%s18329_s3 + $0x1fb0] sm:$0xff] }
 0x419   :  { %v1420_v29 = vld [vmem:[%s18329_s3 + $0x1eb0] sm:$0xff]  ;;  %v509_v10 = vld [vmem:[%s18329_s3 + $0x238] sm:$0xff] }
 0x41a   :  { %7630 = vmatpush1.bf16.msra.mxu1 %v12184_v19  ;;  %v1412_v19 = vld [vmem:[%s18329_s3 + $0x1e70] sm:$0xff] }
 0x41b   :  { %7786 = vmatpush1.bf16.msra.mxu0 %v12122_v24  ;;  %7631 = vmatprep.subr.bf16.mxu1 %v12201_v25  ;;  %v12203_v24 = vcombine.high %v1388_v11, %v1396_v12  ;;  %v453_v25 = vld [vmem:[%s18329_s3 + $0x78] sm:$0xff]  ;;  %v12218_v49 = vcombine.low %v1404_v16, %v1412_v19 }
 0x41c   :  { %7787 = vmatprep.subr.bf16.mxu0 %v12139_v32  ;;  %v11261_v28 = vcombine.high %v445_v23, %v453_v25  ;;  %v1428_v32 = vld [vmem:[%s18329_s3 + $0x1ef0] sm:$0xff] }
 0x41d   :  { %v12235_v54 = vcombine.high %v1420_v29, %v1428_v32  ;;  %v12234_v40 = vcombine.low %v1420_v29, %v1428_v32 }
 0x41e   :  { %7632 = vmatpush1.bf16.msra.mxu1 %v12200_v35  ;;  %v12219_v35 = vcombine.high %v1404_v16, %v1412_v19  ;;  %v525_v16 = vld [vmem:[%s18329_s3 + $0x2b8] sm:$0xff]  ;;  %v7979_v19 = vmax.f32 %v14989_v41, 0.0 }
 0x41f   :  { %7788 = vmatpush1.bf16.msra.mxu0 %v12138_v37  ;;  %7633 = vmatprep.subr.bf16.mxu1 %v12217_v48  ;;  %v469_v37 = vld [vmem:[%s18329_s3 + $0xf8] sm:$0xff]  ;;  %v11260_v48 = vcombine.low %v445_v23, %v453_v25 }
 0x420   :  { %7789 = vmatprep.subr.bf16.mxu0 %v12155_v52  ;;  %v11277_v50 = vcombine.high %v461_v3, %v469_v37  ;;  %v477_v52 = vld [vmem:[%s18329_s3 + $0x138] sm:$0xff]  ;;  %v16701_v29 = vpack.c.bf16 %v7979_v19, %v7979_v19 }
 0x421   :  { %v533_v23 = vld [vmem:[%s18329_s3 + $0x2f8] sm:$0xff] }
 0x422   :  { %7634 = vmatpush1.bf16.msra.mxu1 %v12216_v43  ;;  %v485_v43 = vld [vmem:[%s18329_s3 + $0x178] sm:$0xff]  ;;  %v11340_v32 = vcombine.low %v525_v16, %v533_v23 }
 0x423   :  { %7790 = vmatpush1.bf16.msra.mxu0 %v12154_v38  ;;  %7635 = vmatprep.subr.bf16.mxu1 %v12233_v39  ;;  %v1444_v38 = vld [vmem:[%s18329_s3 + $0x1f70] sm:$0xff]  ;;  %v11276_v39 = vcombine.low %v461_v3, %v469_v37  ;;  %v11293_v56 = vcombine.high %v477_v52, %v485_v43  ;;  %v541_v41 = vld [vmem:[%s18329_s3 + $0x338] sm:$0xff] }
 0x424   :  { %7791 = vmatprep.subr.bf16.mxu0 %v12171_v63  ;;  %v1460_v63 = vld [vmem:[%s18329_s3 + $0x1ff0] sm:$0xff]  ;;  %v13038_v3 = vld [vmem:[%s18332_s5 + $0x18] ss:$12 sps:$4 sm:$0xff]  }
 0x425   :  { %v12267_v11 = vcombine.high %v1452_v61, %v1460_v63  ;;  %v13043_v37 = vld [vmem:[%s18332_s5 + $0x34] ss:$12 sps:$4 sm:$0xff]   ;;  %v13053_v19 = vld [vmem:[%s18332_s5 + $0x90] ss:$12 sps:$4 sm:$0xff]  }
 0x426   :  { %7636 = vmatpush1.bf16.msra.mxu1 %v12232_v1  ;;  %v12251_v1 = vcombine.high %v1436_v51, %v1444_v38 }
 0x427   :  { %7792 = vmatpush1.bf16.msra.mxu0 %v12170_v5  ;;  %7637 = vmatprep.subr.bf16.mxu1 %v12249_v6  ;;  %v11292_v5 = vcombine.low %v477_v52, %v485_v43  ;;  %v12250_v6 = vcombine.low %v1436_v51, %v1444_v38  ;;  %v13041_v51 = vld [vmem:[%s18332_s5 + $0x30] ss:$12 sps:$4 sm:$0xff]  }
 0x428   :  { %7793 = vmatprep.subr.bf16.mxu0 %v12187_v53  ;;  %v517_v53 = vld [vmem:[%s18329_s3 + $0x278] sm:$0xff] }
 0x429   :  { %v11324_v25 = vcombine.low %v509_v10, %v517_v53  ;;  %v573_v43 = vld [vmem:[%s18329_s3 + $0x438] sm:$0xff] }
 0x42a   :  { %7638 = vmatpush1.bf16.msra.mxu1 %v12248_v13  ;;  %v12266_v13 = vcombine.low %v1452_v61, %v1460_v63  ;;  %v581_v38 = vld [vmem:[%s18329_s3 + $0x478] sm:$0xff]  ;;  %v13049_v61 = vld [vmem:[%s18332_s5 + $0x64] ss:$12 sps:$4 sm:$0xff]  }
 0x42b   :  { %7794 = vmatpush1.bf16.msra.mxu0 %v12186_v14  ;;  %7639 = vmatprep.subr.bf16.mxu1 %v12265_v15  ;;  %v11325_v14 = vcombine.high %v509_v10, %v517_v53  ;;  %v13037_v15 = vld [vmem:[%s18332_s5 + $0x4] ss:$12 sps:$4 sm:$0xff]   ;;  %v589_v63 = vld [vmem:[%s18329_s3 + $0x4b8] sm:$0xff] }
 0x42c   :  { %7795 = vmatprep.subr.bf16.mxu0 %v12203_v24  ;;  %v13035_v24 = vld [vmem:[%s18332_s5] ss:$12 sps:$4 sm:$0xff]   ;;  %v613_v10 = vld [vmem:[%s18329_s3 + $0x578] sm:$0xff] }
 0x42d   :  { %v13050_v53 = vld [vmem:[%s18332_s5 + $0x78] ss:$12 sps:$4 sm:$0xff]  }
 0x42e   :  { %7640 = vmatpush1.bf16.msra.mxu1 %v12264_v26  ;;  %v13040_v26 = vld [vmem:[%s18332_s5 + $0x1c] ss:$12 sps:$4 sm:$0xff]  }
 0x42f   :  { %7796 = vmatpush1.bf16.msra.mxu0 %v12202_v27  ;;  %7814 = vmatprep.subr.bf16.mxu1 %v11261_v28  ;;  %v11341_v27 = vcombine.high %v525_v16, %v533_v23  ;;  %v549_v28 = vld [vmem:[%s18329_s3 + $0x378] sm:$0xff] }
 0x430   :  { %7797 = vmatprep.subr.bf16.mxu0 %v12219_v35  ;;  %v11357_v35 = vcombine.high %v541_v41, %v549_v28 }
 0x431   :  { %7642 = vmatmul.mubr.bf16.vlgmr.msra.gmra.mrb[16].mxu1 %v14312_v21 }
 0x432   :  { %7815 = vmatpush1.bf16.msra.mxu1 %v11260_v48  ;;  %7846 = vmatprep.mubr.bf16.mxu1 %v14040_v60  ;;  %v501_v60 = vld [vmem:[%s18329_s3 + $0x1f8] sm:$0xff] }
 0x433   :  { %7798 = vmatpush1.bf16.msra.mxu0 %v12218_v49  ;;  %7816 = vmatprep.subr.bf16.mxu1 %v11277_v50  ;;  %v11309_v8 = vcombine.high %v493_v46, %v501_v60  ;;  %v11308_v12 = vcombine.low %v493_v46, %v501_v60  ;;  %v557_v48 = vld [vmem:[%s18329_s3 + $0x3b8] sm:$0xff]  ;;  %v11356_v50 = vcombine.low %v541_v41, %v549_v28  ;;  %v13047_v60 = vld [vmem:[%s18332_s5 + $0x60] ss:$12 sps:$4 sm:$0xff]  }
 0x434   :  { %7799 = vmatprep.subr.bf16.mxu0 %v12235_v54  ;;  %v565_v49 = vld [vmem:[%s18329_s3 + $0x3f8] sm:$0xff] }
 0x435   :  { %v11373_v52 = vcombine.high %v557_v48, %v565_v49  ;;  %v13046_v54 = vld [vmem:[%s18332_s5 + $0x4c] ss:$12 sps:$4 sm:$0xff]  }
 0x436   :  { %7817 = vmatpush1.bf16.msra.mxu1 %v11276_v39  ;;  %v11372_v39 = vcombine.low %v557_v48, %v565_v49  ;;  %v597_v46 = vld [vmem:[%s18329_s3 + $0x4f8] sm:$0xff]  ;;  %v13059_v48 = vld [vmem:[%s18332_s5 + $0xc0] ss:$12 sps:$4 sm:$0xff]  }
 0x437   :  { %7800 = vmatpush1.bf16.msra.mxu0 %v12234_v40  ;;  %7818 = vmatprep.subr.bf16.mxu1 %v11293_v56  ;;  %v13044_v40 = vld [vmem:[%s18332_s5 + $0x48] ss:$12 sps:$4 sm:$0xff]   ;;  %v11389_v56 = vcombine.high %v573_v43, %v581_v38 }
 0x438   :  { %7801 = vmatprep.subr.bf16.mxu0 %v12251_v1  ;;  %v11388_v1 = vcombine.low %v573_v43, %v581_v38  ;;  %v13062_v43 = vld [vmem:[%s18332_s5 + $0xd8] ss:$12 sps:$4 sm:$0xff]  }
 0x43a   :  { %7819 = vmatpush1.bf16.msra.mxu1 %v11292_v5  ;;  %v11405_v5 = vcombine.high %v589_v63, %v597_v46 }
 0x43b   :  { %7802 = vmatpush1.bf16.msra.mxu0 %v12250_v6  ;;  %7820 = vmatprep.subr.bf16.mxu1 %v11309_v8  ;;  %v13052_v6 = vld [vmem:[%s18332_s5 + $0x7c] ss:$12 sps:$4 sm:$0xff]  }
 0x43c   :  { %7803 = vmatprep.subr.bf16.mxu0 %v12267_v11  ;;  %v605_v8 = vld [vmem:[%s18329_s3 + $0x538] sm:$0xff]  ;;  %v11404_v11 = vcombine.low %v589_v63, %v597_v46 }
 0x43d   :  { %v11420_v16 = vcombine.low %v605_v8, %v613_v10  ;;  %v13065_v63 = vld [vmem:[%s18332_s5 + $0xf0] ss:$12 sps:$4 sm:$0xff]  }
 0x43e   :  { %7821 = vmatpush1.bf16.msra.mxu1 %v11308_v12  ;;  %v11421_v12 = vcombine.high %v605_v8, %v613_v10  ;;  %v13068_v8 = vld [vmem:[%s18332_s5 + $0x108] ss:$12 sps:$4 sm:$0xff]  }
 0x43f   :  { %7804 = vmatpush1.bf16.msra.mxu0 %v12266_v13  ;;  %7822 = vmatprep.subr.bf16.mxu1 %v11325_v14  ;;  %v13055_v13 = vld [vmem:[%s18332_s5 + $0x94] ss:$12 sps:$4 sm:$0xff]   ;;  %v621_v14 = vld [vmem:[%s18329_s3 + $0x5b8] sm:$0xff] }
 0x440   :  { %10587 = vmatprep.subr.bf16.mxu0 %v13037_v15  ;;  %v629_v15 = vld [vmem:[%s18329_s3 + $0x5f8] sm:$0xff] }
 0x441   :  { %v11437_v23 = vcombine.high %v621_v14, %v629_v15  ;;  %v11436_v41 = vcombine.low %v621_v14, %v629_v15 }
 0x442   :  { %7806 = vmatmul.mubr.bf16.vlgmr.msra.gmra.mrb[16].mxu0 %v14312_v21  ;;  %7823 = vmatpush1.bf16.msra.mxu1 %v11324_v25  ;;  %v637_v25 = vld [vmem:[%s18329_s3 + $0x638] sm:$0xff] }
 0x443   :  { %10588 = vmatpush1.bf16.msra.mxu0 %v13035_v24  ;;  %10619 = vmatprep.mubr.bf16.mxu0 %v16701_v29  ;;  %v13058_v24 = vld [vmem:[%s18332_s5 + $0xac] ss:$12 sps:$4 sm:$0xff]  }
 0x444   :  { %7824 = vmatprep.subr.bf16.mxu1 %v11341_v27  ;;  %10589 = vmatprep.subr.bf16.mxu0 %v13040_v26  ;;  %v645_v26 = vld [vmem:[%s18329_s3 + $0x678] sm:$0xff]  ;;  %v13056_v27 = vld [vmem:[%s18332_s5 + $0xa8] ss:$12 sps:$4 sm:$0xff]  }
 0x445   :  { %v11453_v28 = vcombine.high %v637_v25, %v645_v26 }
 0x446   :  { %7825 = vmatpush1.bf16.msra.mxu1 %v11340_v32  ;;  %v13061_v32 = vld [vmem:[%s18332_s5 + $0xc4] ss:$12 sps:$4 sm:$0xff]  }
 0x447   :  { %10590 = vmatpush1.bf16.msra.mxu0 %v13038_v3  ;;  %7826 = vmatprep.subr.bf16.mxu1 %v11357_v35  ;;  %v653_v3 = vld [vmem:[%s18329_s3 + $0x6b8] sm:$0xff] }
 0x448   :  { %10591 = vmatprep.subr.bf16.mxu0 %v13043_v37  ;;  %v661_v35 = vld [vmem:[%s18329_s3 + $0x6f8] sm:$0xff]  ;;  %v11452_v37 = vcombine.low %v637_v25, %v645_v26 }
 0x449   :  { %v11469_v49 = vcombine.high %v653_v3, %v661_v35  ;;  %v13074_v25 = vld [vmem:[%s18332_s5 + $0x138] ss:$12 sps:$4 sm:$0xff]  }
 0x44a   :  { %7827 = vmatpush1.bf16.msra.mxu1 %v11356_v50  ;;  %v13064_v50 = vld [vmem:[%s18332_s5 + $0xdc] ss:$12 sps:$4 sm:$0xff]  }
 0x44b   :  { %10592 = vmatpush1.bf16.msra.mxu0 %v13041_v51  ;;  %7828 = vmatprep.subr.bf16.mxu1 %v11373_v52  ;;  %v669_v51 = vld [vmem:[%s18329_s3 + $0x738] sm:$0xff] }
 0x44c   :  { %10593 = vmatprep.subr.bf16.mxu0 %v13046_v54  ;;  %v677_v52 = vld [vmem:[%s18329_s3 + $0x778] sm:$0xff]  ;;  %v11468_v54 = vcombine.low %v653_v3, %v661_v35 }
 0x44d   :  { %v11485_v38 = vcombine.high %v669_v51, %v677_v52  ;;  %v13077_v3 = vld [vmem:[%s18332_s5 + $0x150] ss:$12 sps:$4 sm:$0xff]  }
 0x44e   :  { %7829 = vmatpush1.bf16.msra.mxu1 %v11372_v39  ;;  %v13067_v39 = vld [vmem:[%s18332_s5 + $0xf4] ss:$12 sps:$4 sm:$0xff]  }
 0x44f   :  { %10594 = vmatpush1.bf16.msra.mxu0 %v13044_v40  ;;  %7830 = vmatprep.subr.bf16.mxu1 %v11389_v56  ;;  %v685_v40 = vld [vmem:[%s18329_s3 + $0x7b8] sm:$0xff] }
 0x450   :  { %10595 = vmatprep.subr.bf16.mxu0 %v13049_v61  ;;  %v693_v56 = vld [vmem:[%s18329_s3 + $0x7f8] sm:$0xff]  ;;  %v11484_v61 = vcombine.low %v669_v51, %v677_v52  ;;  %v13080_v52 = vld [vmem:[%s18332_s5 + $0x168] ss:$12 sps:$4 sm:$0xff]  }
 0x451   :  { %v11501_v46 = vcombine.high %v685_v40, %v693_v56 }
 0x452   :  { %7831 = vmatpush1.bf16.msra.mxu1 %v11388_v1  ;;  %v13070_v1 = vld [vmem:[%s18332_s5 + $0x10c] ss:$12 sps:$4 sm:$0xff]  }
 0x453   :  { %10596 = vmatpush1.bf16.msra.mxu0 %v13047_v60  ;;  %7832 = vmatprep.subr.bf16.mxu1 %v11405_v5  ;;  %v701_v60 = vld [vmem:[%s18329_s3 + $0x838] sm:$0xff] }
 0x454   :  { %10597 = vmatprep.subr.bf16.mxu0 %v13052_v6  ;;  %v709_v5 = vld [vmem:[%s18329_s3 + $0x878] sm:$0xff]  ;;  %v11500_v6 = vcombine.low %v685_v40, %v693_v56  ;;  %v13083_v56 = vld [vmem:[%s18332_s5 + $0x180] ss:$12 sps:$4 sm:$0xff]  }
 0x455   :  { %v11517_v10 = vcombine.high %v701_v60, %v709_v5  ;;  %v11516_v14 = vcombine.low %v701_v60, %v709_v5  ;;  %v805_v60 = vld [vmem:[%s18329_s3 + $0xb78] sm:$0xff] }
 0x456   :  { %7833 = vmatpush1.bf16.msra.mxu1 %v11404_v11  ;;  %v13073_v11 = vld [vmem:[%s18332_s5 + $0x124] ss:$12 sps:$4 sm:$0xff]  }
 0x457   :  { %10598 = vmatpush1.bf16.msra.mxu0 %v13050_v53  ;;  %7834 = vmatprep.subr.bf16.mxu1 %v11421_v12  ;;  %v717_v53 = vld [vmem:[%s18329_s3 + $0x8b8] sm:$0xff] }
 0x458   :  { %10599 = vmatprep.subr.bf16.mxu0 %v13055_v13  ;;  %v725_v12 = vld [vmem:[%s18329_s3 + $0x8f8] sm:$0xff]  ;;  %v13071_v13 = vld [vmem:[%s18332_s5 + $0x120] ss:$12 sps:$4 sm:$0xff]  }
 0x459   :  { %v11533_v15 = vcombine.high %v717_v53, %v725_v12 }
 0x45a   :  { %7835 = vmatpush1.bf16.msra.mxu1 %v11420_v16  ;;  %v13076_v16 = vld [vmem:[%s18332_s5 + $0x13c] ss:$12 sps:$4 sm:$0xff]  }
 0x45b   :  { %10600 = vmatpush1.bf16.msra.mxu0 %v13053_v19  ;;  %7836 = vmatprep.subr.bf16.mxu1 %v11437_v23  ;;  %v733_v19 = vld [vmem:[%s18329_s3 + $0x938] sm:$0xff] }
 0x45c   :  { %10601 = vmatprep.subr.bf16.mxu0 %v13058_v24  ;;  %v741_v23 = vld [vmem:[%s18329_s3 + $0x978] sm:$0xff]  ;;  %v11532_v24 = vcombine.low %v717_v53, %v725_v12 }
 0x45d   :  { %v11549_v26 = vcombine.high %v733_v19, %v741_v23  ;;  %v813_v53 = vld [vmem:[%s18329_s3 + $0xbb8] sm:$0xff] }
 0x45e   :  { %7837 = vmatpush1.bf16.msra.mxu1 %v11436_v41  ;;  %v13079_v41 = vld [vmem:[%s18332_s5 + $0x154] ss:$12 sps:$4 sm:$0xff]   ;;  %v821_v12 = vld [vmem:[%s18329_s3 + $0xbf8] sm:$0xff] }
 0x45f   :  { %10602 = vmatpush1.bf16.msra.mxu0 %v13056_v27  ;;  %7838 = vmatprep.subr.bf16.mxu1 %v11453_v28  ;;  %v749_v27 = vld [vmem:[%s18329_s3 + $0x9b8] sm:$0xff] }
 0x460   :  { %10603 = vmatprep.subr.bf16.mxu0 %v13061_v32  ;;  %v11548_v32 = vcombine.low %v733_v19, %v741_v23  ;;  %v829_v19 = vld [vmem:[%s18329_s3 + $0xc38] sm:$0xff] }
 0x461   :  { %v837_v23 = vld [vmem:[%s18329_s3 + $0xc78] sm:$0xff] }
 0x462   :  { %7839 = vmatpush1.bf16.msra.mxu1 %v11452_v37  ;;  %v13082_v37 = vld [vmem:[%s18332_s5 + $0x16c] ss:$12 sps:$4 sm:$0xff]  }
 0x463   :  { %10604 = vmatpush1.bf16.msra.mxu0 %v13059_v48  ;;  %7840 = vmatprep.subr.bf16.mxu1 %v11469_v49  ;;  %v765_v48 = vld [vmem:[%s18329_s3 + $0xa38] sm:$0xff] }
 0x464   :  { %10605 = vmatprep.subr.bf16.mxu0 %v13064_v50  ;;  %v773_v49 = vld [vmem:[%s18329_s3 + $0xa78] sm:$0xff] }
 0x466   :  { %7841 = vmatpush1.bf16.msra.mxu1 %v11468_v54  ;;  %v11581_v54 = vcombine.high %v765_v48, %v773_v49 }
 0x467   :  { %10606 = vmatpush1.bf16.msra.mxu0 %v13062_v43  ;;  %7842 = vmatprep.subr.bf16.mxu1 %v11485_v38  ;;  %v13085_v43 = vld [vmem:[%s18332_s5 + $0x184] ss:$12 sps:$4 sm:$0xff]   ;;  %v781_v38 = vld [vmem:[%s18329_s3 + $0xab8] sm:$0xff] }
 0x468   :  { %10607 = vmatprep.subr.bf16.mxu0 %v13067_v39  ;;  %v7978_v39 = vmax.f32 %v14981_v34, 0.0  ;;  %v797_v34 = vld [vmem:[%s18329_s3 + $0xb38] sm:$0xff] }
 0x46a   :  { %7843 = vmatpush1.bf16.msra.mxu1 %v11484_v61  ;;  %v11580_v61 = vcombine.low %v765_v48, %v773_v49  ;;  %v869_v48 = vld [vmem:[%s18329_s3 + $0xd78] sm:$0xff] }
 0x46b   :  { %10608 = vmatpush1.bf16.msra.mxu0 %v13065_v63  ;;  %7844 = vmatprep.subr.bf16.mxu1 %v11501_v46  ;;  %v13088_v63 = vld [vmem:[%s18332_s5 + $0x19c] ss:$12 sps:$4 sm:$0xff]   ;;  %v16905_v46 = vpack.c.bf16 %v7978_v39, %v7978_v39  ;;  %v13098_v49 = vld [vmem:[%s18332_s5 + $0x1f8] ss:$12 sps:$4 sm:$0xff]  }
 0x46c   :  { %10609 = vmatprep.subr.bf16.mxu0 %v13070_v1 }
 0x46e   :  { %7845 = vmatpush1.bf16.msra.mxu1 %v11500_v6  ;;  %v13086_v6 = vld [vmem:[%s18332_s5 + $0x198] ss:$12 sps:$4 sm:$0xff]  }
 0x46f   :  { %10610 = vmatpush1.bf16.msra.mxu0 %v13068_v8  ;;  %7855 = vmatprep.subr.bf16.mxu1 %v11517_v10  ;;  %v11613_v10 = vcombine.high %v797_v34, %v805_v60 }
 0x470   :  { %10611 = vmatprep.subr.bf16.mxu0 %v13073_v11  ;;  %v13091_v11 = vld [vmem:[%s18332_s5 + $0x1b4] ss:$12 sps:$4 sm:$0xff]  }
 0x471   :  { %7847 = vmatmul.mubr.bf16.vlgmr.msra.gmra.mrb[20].mxu1 %v14035_v58  ;;  %v757_v58 = vld [vmem:[%s18329_s3 + $0x9f8] sm:$0xff] }
 0x472   :  { %7856 = vmatpush1.bf16.msra.mxu1 %v11516_v14  ;;  %7887 = vmatprep.mubr.bf16.mxu1 %v14076_v20  ;;  %v16866_v20 = vld [vmem:[%s18331_s4] sm:$0xff]  ;;  %v11565_v35 = vcombine.high %v749_v27, %v757_v58  ;;  %v11564_v51 = vcombine.low %v749_v27, %v757_v58  ;;  %v11612_v14 = vcombine.low %v797_v34, %v805_v60  ;;  %v845_v27 = vld [vmem:[%s18329_s3 + $0xcb8] sm:$0xff]  ;;  %v13104_v34 = vld [vmem:[%s18332_s5 + $0x228] ss:$12 sps:$4 sm:$0xff]  }
 0x473   :  { %10612 = vmatpush1.bf16.msra.mxu0 %v13071_v13  ;;  %7857 = vmatprep.subr.bf16.mxu1 %v11533_v15  ;;  %v1481_v28 = vrot.slane %v16866_v20, %v14038_v59  ;;  %v13089_v13 = vld [vmem:[%s18332_s5 + $0x1b0] ss:$12 sps:$4 sm:$0xff]   ;;  %v11629_v15 = vcombine.high %v813_v53, %v821_v12 }
 0x474   :  { %10613 = vmatprep.subr.bf16.mxu0 %v13076_v16  ;;  %v13094_v16 = vld [vmem:[%s18332_s5 + $0x1cc] ss:$12 sps:$4 sm:$0xff]   ;;  %v13109_v60 = vld [vmem:[%s18332_s5 + $0x244] ss:$12 sps:$4 sm:$0xff]  }
 0x475   :  { %v12899_v50 = vadd.f32 %v15723_v9, %v1481_v28  ;;  %v789_v9 = vld [vmem:[%s18329_s3 + $0xaf8] sm:$0xff]  ;;  %v11644_v28 = vcombine.low %v829_v19, %v837_v23 }
 0x476   :  { %7858 = vmatpush1.bf16.msra.mxu1 %v11532_v24  ;;  %v11597_v1 = vcombine.high %v781_v38, %v789_v9  ;;  %v11596_v8 = vcombine.low %v781_v38, %v789_v9  ;;  %v11628_v24 = vcombine.low %v813_v53, %v821_v12  ;;  %v853_v58 = vld [vmem:[%s18329_s3 + $0xcf8] sm:$0xff] }
 0x477   :  { %10614 = vmatpush1.bf16.msra.mxu0 %v13074_v25  ;;  %7859 = vmatprep.subr.bf16.mxu1 %v11549_v26  ;;  %v7981_v40 = vmax.f32 %v12899_v50, 0.0  ;;  %v13092_v25 = vld [vmem:[%s18332_s5 + $0x1c8] ss:$12 sps:$4 sm:$0xff]   ;;  %v11645_v26 = vcombine.high %v829_v19, %v837_v23  ;;  %v11660_v50 = vcombine.low %v845_v27, %v853_v58  ;;  %v13101_v38 = vld [vmem:[%s18332_s5 + $0x210] ss:$12 sps:$4 sm:$0xff]  }
 0x478   :  { %10615 = vmatprep.subr.bf16.mxu0 %v13079_v41  ;;  %v13097_v41 = vld [vmem:[%s18332_s5 + $0x1e4] ss:$12 sps:$4 sm:$0xff]   ;;  %v13112_v12 = vld [vmem:[%s18332_s5 + $0x25c] ss:$12 sps:$4 sm:$0xff]   ;;  %v13115_v23 = vld [vmem:[%s18332_s5 + $0x274] ss:$12 sps:$4 sm:$0xff]  }
 0x479   :  { %v16910_v5 = vpack.c.bf16 %v7981_v40, %v7981_v40  ;;  %v13106_v40 = vld [vmem:[%s18332_s5 + $0x22c] ss:$12 sps:$4 sm:$0xff]  }
 0x47a   :  { %7860 = vmatpush1.bf16.msra.mxu1 %v11548_v32  ;;  %v13095_v32 = vld [vmem:[%s18332_s5 + $0x1e0] ss:$12 sps:$4 sm:$0xff]  }
 0x47b   :  { %10616 = vmatpush1.bf16.msra.mxu0 %v13077_v3  ;;  %7861 = vmatprep.subr.bf16.mxu1 %v11565_v35  ;;  %v11661_v3 = vcombine.high %v845_v27, %v853_v58  ;;  %v13100_v35 = vld [vmem:[%s18332_s5 + $0x1fc] ss:$12 sps:$4 sm:$0xff]   ;;  %v13118_v58 = vld [vmem:[%s18332_s5 + $0x28c] ss:$12 sps:$4 sm:$0xff]  }
 0x47c   :  { %10617 = vmatprep.subr.bf16.mxu0 %v13082_v37  ;;  %v861_v37 = vld [vmem:[%s18329_s3 + $0xd38] sm:$0xff] }
 0x47d   :  { %v11676_v39 = vcombine.low %v861_v37, %v869_v48 }
 0x47e   :  { %7862 = vmatpush1.bf16.msra.mxu1 %v11564_v51  ;;  %v11677_v51 = vcombine.high %v861_v37, %v869_v48  ;;  %v13121_v48 = vld [vmem:[%s18332_s5 + $0x2a4] ss:$12 sps:$4 sm:$0xff]  }
 0x47f   :  { %10618 = vmatpush1.bf16.msra.mxu0 %v13080_v52  ;;  %7863 = vmatprep.subr.bf16.mxu1 %v11581_v54  ;;  %v13103_v52 = vld [vmem:[%s18332_s5 + $0x214] ss:$12 sps:$4 sm:$0xff]   ;;  %v877_v54 = vld [vmem:[%s18329_s3 + $0xdb8] sm:$0xff] }
 0x480   :  { %10628 = vmatprep.subr.bf16.mxu0 %v13085_v43  ;;  %v885_v43 = vld [vmem:[%s18329_s3 + $0xdf8] sm:$0xff] }
 0x481   :  { %v11693_v9 = vcombine.high %v877_v54, %v885_v43 }
 0x482   :  { %10620 = vmatmul.mubr.bf16.vlgmr.msra.gmra.mrb[20].mxu0 %v16905_v46  ;;  %7864 = vmatpush1.bf16.msra.mxu1 %v11580_v61  ;;  %v901_v61 = vld [vmem:[%s18329_s3 + $0xe78] sm:$0xff] }
 0x483   :  { %10629 = vmatpush1.bf16.msra.mxu0 %v13083_v56  ;;  %10660 = vmatprep.mubr.bf16.mxu0 %v16910_v5  ;;  %v893_v56 = vld [vmem:[%s18329_s3 + $0xe38] sm:$0xff] }
 0x484   :  { %7865 = vmatprep.subr.bf16.mxu1 %v11597_v1  ;;  %10630 = vmatprep.subr.bf16.mxu0 %v13088_v63  ;;  %v11692_v63 = vcombine.low %v877_v54, %v885_v43  ;;  %v11709_v1 = vcombine.high %v893_v56, %v901_v61  ;;  %v13124_v54 = vld [vmem:[%s18332_s5 + $0x2bc] ss:$12 sps:$4 sm:$0xff]  }
 0x486   :  { %7866 = vmatpush1.bf16.msra.mxu1 %v11596_v8  ;;  %v917_v8 = vld [vmem:[%s18329_s3 + $0xef8] sm:$0xff] }
 0x487   :  { %10631 = vmatpush1.bf16.msra.mxu0 %v13086_v6  ;;  %7867 = vmatprep.subr.bf16.mxu1 %v11613_v10  ;;  %v909_v6 = vld [vmem:[%s18329_s3 + $0xeb8] sm:$0xff]  ;;  %v11708_v10 = vcombine.low %v893_v56, %v901_v61  ;;  %v13127_v61 = vld [vmem:[%s18332_s5 + $0x2d4] ss:$12 sps:$4 sm:$0xff]  }
 0x488   :  { %10632 = vmatprep.subr.bf16.mxu0 %v13091_v11  ;;  %v13107_v11 = vld [vmem:[%s18332_s5 + $0x240] ss:$12 sps:$4 sm:$0xff]   ;;  %v11725_v53 = vcombine.high %v909_v6, %v917_v8 }
 0x48a   :  { %7868 = vmatpush1.bf16.msra.mxu1 %v11612_v14  ;;  %v933_v14 = vld [vmem:[%s18329_s3 + $0xf78] sm:$0xff] }
 0x48b   :  { %10633 = vmatpush1.bf16.msra.mxu0 %v13089_v13  ;;  %7869 = vmatprep.subr.bf16.mxu1 %v11629_v15  ;;  %v925_v13 = vld [vmem:[%s18329_s3 + $0xf38] sm:$0xff]  ;;  %v11724_v15 = vcombine.low %v909_v6, %v917_v8 }
 0x48c   :  { %10634 = vmatprep.subr.bf16.mxu0 %v13094_v16  ;;  %v13110_v16 = vld [vmem:[%s18332_s5 + $0x258] ss:$12 sps:$4 sm:$0xff]   ;;  %v11741_v19 = vcombine.high %v925_v13, %v933_v14 }
 0x48d   :  { %v13130_v8 = vld [vmem:[%s18332_s5 + $0x2ec] ss:$12 sps:$4 sm:$0xff]  }
 0x48e   :  { %7870 = vmatpush1.bf16.msra.mxu1 %v11628_v24  ;;  %v941_v24 = vld [vmem:[%s18329_s3 + $0xfb8] sm:$0xff] }
 0x48f   :  { %10635 = vmatpush1.bf16.msra.mxu0 %v13092_v25  ;;  %7871 = vmatprep.subr.bf16.mxu1 %v11645_v26  ;;  %v949_v25 = vld [vmem:[%s18329_s3 + $0xff8] sm:$0xff]  ;;  %v11740_v26 = vcombine.low %v925_v13, %v933_v14  ;;  %v13128_v14 = vld [vmem:[%s18332_s5 + $0x2e8] ss:$12 sps:$4 sm:$0xff]  }
 0x490   :  { %10636 = vmatprep.subr.bf16.mxu0 %v13097_v41  ;;  %v13113_v41 = vld [vmem:[%s18332_s5 + $0x270] ss:$12 sps:$4 sm:$0xff]   ;;  %v11757_v27 = vcombine.high %v941_v24, %v949_v25 }
 0x492   :  { %7872 = vmatpush1.bf16.msra.mxu1 %v11644_v28  ;;  %v957_v28 = vld [vmem:[%s18329_s3 + $0x1038] sm:$0xff] }
 0x493   :  { %10637 = vmatpush1.bf16.msra.mxu0 %v13095_v32  ;;  %7873 = vmatprep.subr.bf16.mxu1 %v11661_v3  ;;  %v965_v32 = vld [vmem:[%s18329_s3 + $0x1078] sm:$0xff]  ;;  %v11756_v3 = vcombine.low %v941_v24, %v949_v25  ;;  %v13131_v25 = vld [vmem:[%s18332_s5 + $0x300] ss:$12 sps:$4 sm:$0xff]  }
 0x494   :  { %10638 = vmatprep.subr.bf16.mxu0 %v13100_v35  ;;  %v13116_v35 = vld [vmem:[%s18332_s5 + $0x288] ss:$12 sps:$4 sm:$0xff]   ;;  %v11773_v37 = vcombine.high %v957_v28, %v965_v32 }
 0x496   :  { %7874 = vmatpush1.bf16.msra.mxu1 %v11660_v50  ;;  %v981_v50 = vld [vmem:[%s18329_s3 + $0x10f8] sm:$0xff] }
 0x497   :  { %10639 = vmatpush1.bf16.msra.mxu0 %v13098_v49  ;;  %7875 = vmatprep.subr.bf16.mxu1 %v11677_v51  ;;  %v973_v49 = vld [vmem:[%s18329_s3 + $0x10b8] sm:$0xff]  ;;  %v13119_v51 = vld [vmem:[%s18332_s5 + $0x2a0] ss:$12 sps:$4 sm:$0xff]  }
 0x498   :  { %10640 = vmatprep.subr.bf16.mxu0 %v13103_v52  ;;  %v11772_v52 = vcombine.low %v957_v28, %v965_v32  ;;  %v11789_v43 = vcombine.high %v973_v49, %v981_v50  ;;  %v1061_v28 = vld [vmem:[%s18329_s3 + $0x1378] sm:$0xff] }
 0x49a   :  { %7876 = vmatpush1.bf16.msra.mxu1 %v11676_v39  ;;  %v997_v39 = vld [vmem:[%s18329_s3 + $0x1178] sm:$0xff] }
 0x49b   :  { %10641 = vmatpush1.bf16.msra.mxu0 %v13101_v38  ;;  %7877 = vmatprep.subr.bf16.mxu1 %v11693_v9  ;;  %v989_v38 = vld [vmem:[%s18329_s3 + $0x1138] sm:$0xff] }
 0x49c   :  { %10642 = vmatprep.subr.bf16.mxu0 %v13106_v40  ;;  %v13122_v9 = vld [vmem:[%s18332_s5 + $0x2b8] ss:$12 sps:$4 sm:$0xff]   ;;  %v11788_v40 = vcombine.low %v973_v49, %v981_v50  ;;  %v11805_v56 = vcombine.high %v989_v38, %v997_v39 }
 0x49d   :  { %v1069_v49 = vld [vmem:[%s18329_s3 + $0x13b8] sm:$0xff] }
 0x49e   :  { %7878 = vmatpush1.bf16.msra.mxu1 %v11692_v63  ;;  %v1005_v63 = vld [vmem:[%s18329_s3 + $0x11b8] sm:$0xff] }
 0x49f   :  { %10643 = vmatpush1.bf16.msra.mxu0 %v13104_v34  ;;  %7879 = vmatprep.subr.bf16.mxu1 %v11709_v1  ;;  %v1489_v34 = vrot.slane %v16866_v20, %v14056_v4  ;;  %v13125_v1 = vld [vmem:[%s18332_s5 + $0x2d0] ss:$12 sps:$4 sm:$0xff]  }
 0x4a0   :  { %10644 = vmatprep.subr.bf16.mxu0 %v13109_v60  ;;  %v11804_v60 = vcombine.low %v989_v38, %v997_v39  ;;  %v1077_v50 = vld [vmem:[%s18329_s3 + $0x13f8] sm:$0xff] }
 0x4a1   :  { %v1085_v38 = vld [vmem:[%s18329_s3 + $0x1438] sm:$0xff] }
 0x4a2   :  { %7880 = vmatpush1.bf16.msra.mxu1 %v11708_v10  ;;  %v1021_v10 = vld [vmem:[%s18329_s3 + $0x1238] sm:$0xff] }
 0x4a3   :  { %10645 = vmatpush1.bf16.msra.mxu0 %v13107_v11  ;;  %7881 = vmatprep.subr.bf16.mxu1 %v11725_v53  ;;  %v1029_v53 = vld [vmem:[%s18329_s3 + $0x1278] sm:$0xff] }
 0x4a4   :  { %10646 = vmatprep.subr.bf16.mxu0 %v13112_v12  ;;  %v12901_v12 = vadd.f32 %v15781_v62, %v1489_v34  ;;  %v11836_v24 = vcombine.low %v1021_v10, %v1029_v53  ;;  %v1093_v39 = vld [vmem:[%s18329_s3 + $0x1478] sm:$0xff]  ;;  %v13143_v34 = vld [vmem:[%s18332_s5 + $0x360] ss:$12 sps:$4 sm:$0xff]  }
 0x4a6   :  { %7882 = vmatpush1.bf16.msra.mxu1 %v11724_v15  ;;  %v11837_v15 = vcombine.high %v1021_v10, %v1029_v53  ;;  %v7983_v62 = vmax.f32 %v12901_v12, 0.0  ;;  %v13151_v12 = vld [vmem:[%s18332_s5 + $0x394] ss:$12 sps:$4 sm:$0xff]  }
 0x4a7   :  { %10647 = vmatpush1.bf16.msra.mxu0 %v13110_v16  ;;  %7883 = vmatprep.subr.bf16.mxu1 %v11741_v19  ;;  %v1037_v19 = vld [vmem:[%s18329_s3 + $0x12b8] sm:$0xff] }
 0x4a8   :  { %10648 = vmatprep.subr.bf16.mxu0 %v13115_v23  ;;  %v1045_v23 = vld [vmem:[%s18329_s3 + $0x12f8] sm:$0xff]  ;;  %v17116_v32 = vpack.c.bf16 %v7983_v62, %v7983_v62 }
 0x4a9   :  { %v1149_v62 = vld [vmem:[%s18329_s3 + $0x1638] sm:$0xff] }
 0x4aa   :  { %7884 = vmatpush1.bf16.msra.mxu1 %v11740_v26 }
 0x4ab   :  { %10649 = vmatpush1.bf16.msra.mxu0 %v13113_v41  ;;  %7885 = vmatprep.subr.bf16.mxu1 %v11757_v27  ;;  %v11853_v41 = vcombine.high %v1037_v19, %v1045_v23  ;;  %v13136_v27 = vld [vmem:[%s18332_s5 + $0x31c] ss:$12 sps:$4 sm:$0xff]  }
 0x4ac   :  { %10650 = vmatprep.subr.bf16.mxu0 %v13118_v58  ;;  %v1053_v58 = vld [vmem:[%s18329_s3 + $0x1338] sm:$0xff] }
 0x4ae   :  { %7886 = vmatpush1.bf16.msra.mxu1 %v11756_v3  ;;  %v11852_v3 = vcombine.low %v1037_v19, %v1045_v23  ;;  %v13154_v19 = vld [vmem:[%s18332_s5 + $0x3ac] ss:$12 sps:$4 sm:$0xff]  }
 0x4af   :  { %10651 = vmatpush1.bf16.msra.mxu0 %v13116_v35  ;;  %7896 = vmatprep.subr.bf16.mxu1 %v11773_v37  ;;  %v13134_v35 = vld [vmem:[%s18332_s5 + $0x318] ss:$12 sps:$4 sm:$0xff]   ;;  %v11869_v37 = vcombine.high %v1053_v58, %v1061_v28 }
 0x4b0   :  { %10652 = vmatprep.subr.bf16.mxu0 %v13121_v48  ;;  %v13139_v48 = vld [vmem:[%s18332_s5 + $0x334] ss:$12 sps:$4 sm:$0xff]   ;;  %v1157_v23 = vld [vmem:[%s18329_s3 + $0x1678] sm:$0xff] }
 0x4b1   :  { %7888 = vmatmul.mubr.bf16.vlgmr.msra.gmra.mrb[20].mxu1 %v14254_v36  ;;  %v1477_v36 = vrot.slane %v16866_v20, %v14207_v57 }
 0x4b2   :  { %7897 = vmatpush1.bf16.msra.mxu1 %v11772_v52  ;;  %7928 = vmatprep.mubr.bf16.mxu1 %v14094_v31  ;;  %v1013_v31 = vld [vmem:[%s18329_s3 + $0x11f8] sm:$0xff] }
 0x4b3   :  { %10653 = vmatpush1.bf16.msra.mxu0 %v13119_v51  ;;  %7898 = vmatprep.subr.bf16.mxu1 %v11789_v43  ;;  %v11821_v6 = vcombine.high %v1005_v63, %v1013_v31  ;;  %v12898_v11 = vadd.f32 %v15715_v2, %v1477_v36  ;;  %v11820_v13 = vcombine.low %v1005_v63, %v1013_v31  ;;  %v13133_v2 = vld [vmem:[%s18332_s5 + $0x304] ss:$12 sps:$4 sm:$0xff]   ;;  %v13142_v43 = vld [vmem:[%s18332_s5 + $0x34c] ss:$12 sps:$4 sm:$0xff]  }
 0x4b4   :  { %10654 = vmatprep.subr.bf16.mxu0 %v13124_v54  ;;  %v11868_v51 = vcombine.low %v1053_v58, %v1061_v28  ;;  %v13137_v52 = vld [vmem:[%s18332_s5 + $0x330] ss:$12 sps:$4 sm:$0xff]   ;;  %v11885_v54 = vcombine.high %v1069_v49, %v1077_v50  ;;  %v11900_v31 = vcombine.low %v1085_v38, %v1093_v39 }
 0x4b5   :  { %v7980_v16 = vmax.f32 %v12898_v11, 0.0  ;;  %v1101_v63 = vld [vmem:[%s18329_s3 + $0x14b8] sm:$0xff] }
 0x4b6   :  { %7899 = vmatpush1.bf16.msra.mxu1 %v11788_v40  ;;  %v13140_v40 = vld [vmem:[%s18332_s5 + $0x348] ss:$12 sps:$4 sm:$0xff]   ;;  %v1109_v36 = vld [vmem:[%s18329_s3 + $0x14f8] sm:$0xff] }
 0x4b7   :  { %10655 = vmatpush1.bf16.msra.mxu0 %v13122_v9  ;;  %7900 = vmatprep.subr.bf16.mxu1 %v11805_v56  ;;  %v17105_v26 = vpack.c.bf16 %v7980_v16, %v7980_v16  ;;  %v11884_v9 = vcombine.low %v1069_v49, %v1077_v50  ;;  %v11901_v56 = vcombine.high %v1085_v38, %v1093_v39  ;;  %v13146_v11 = vld [vmem:[%s18332_s5 + $0x378] ss:$12 sps:$4 sm:$0xff]  }
 0x4b8   :  { %10656 = vmatprep.subr.bf16.mxu0 %v13127_v61  ;;  %v13145_v61 = vld [vmem:[%s18332_s5 + $0x364] ss:$12 sps:$4 sm:$0xff]   ;;  %v11916_v10 = vcombine.low %v1101_v63, %v1109_v36  ;;  %v1165_v58 = vld [vmem:[%s18329_s3 + $0x16b8] sm:$0xff] }
 0x4b9   :  { %v1173_v28 = vld [vmem:[%s18329_s3 + $0x16f8] sm:$0xff] }
 0x4ba   :  { %7901 = vmatpush1.bf16.msra.mxu1 %v11804_v60  ;;  %v13148_v60 = vld [vmem:[%s18332_s5 + $0x37c] ss:$12 sps:$4 sm:$0xff]  }
 0x4bb   :  { %10657 = vmatpush1.bf16.msra.mxu0 %v13125_v1  ;;  %7902 = vmatprep.subr.bf16.mxu1 %v11821_v6  ;;  %v11917_v1 = vcombine.high %v1101_v63, %v1109_v36  ;;  %v1117_v6 = vld [vmem:[%s18329_s3 + $0x1538] sm:$0xff] }
 0x4bc   :  { %10658 = vmatprep.subr.bf16.mxu0 %v13130_v8  ;;  %v1125_v8 = vld [vmem:[%s18329_s3 + $0x1578] sm:$0xff] }
 0x4bd   :  { %v11933_v53 = vcombine.high %v1117_v6, %v1125_v8  ;;  %v1181_v49 = vld [vmem:[%s18329_s3 + $0x1738] sm:$0xff] }
 0x4be   :  { %7903 = vmatpush1.bf16.msra.mxu1 %v11820_v13  ;;  %v1133_v13 = vld [vmem:[%s18329_s3 + $0x15b8] sm:$0xff] }
 0x4bf   :  { %10659 = vmatpush1.bf16.msra.mxu0 %v13128_v14  ;;  %7904 = vmatprep.subr.bf16.mxu1 %v11837_v15  ;;  %v1141_v14 = vld [vmem:[%s18329_s3 + $0x15f8] sm:$0xff]  ;;  %v11932_v15 = vcombine.low %v1117_v6, %v1125_v8 }
 0x4c0   :  { %10669 = vmatprep.subr.bf16.mxu0 %v13133_v2  ;;  %v13149_v2 = vld [vmem:[%s18332_s5 + $0x390] ss:$12 sps:$4 sm:$0xff]   ;;  %v11949_v16 = vcombine.high %v1133_v13, %v1141_v14 }
 0x4c1   :  { %v1189_v50 = vld [vmem:[%s18329_s3 + $0x1778] sm:$0xff] }
 0x4c2   :  { %10661 = vmatmul.mubr.bf16.vlgmr.msra.gmra.mrb[20].mxu0 %v17105_v26  ;;  %7905 = vmatpush1.bf16.msra.mxu1 %v11836_v24  ;;  %v11948_v24 = vcombine.low %v1133_v13, %v1141_v14  ;;  %v1197_v38 = vld [vmem:[%s18329_s3 + $0x17b8] sm:$0xff] }
 0x4c3   :  { %10670 = vmatpush1.bf16.msra.mxu0 %v13131_v25  ;;  %10701 = vmatprep.mubr.bf16.mxu0 %v17116_v32  ;;  %v13152_v25 = vld [vmem:[%s18332_s5 + $0x3a8] ss:$12 sps:$4 sm:$0xff]   ;;  %v1205_v39 = vld [vmem:[%s18329_s3 + $0x17f8] sm:$0xff] }
 0x4c4   :  { %7906 = vmatprep.subr.bf16.mxu1 %v11853_v41  ;;  %10671 = vmatprep.subr.bf16.mxu0 %v13136_v27  ;;  %v11965_v41 = vcombine.high %v1149_v62, %v1157_v23  ;;  %v13157_v27 = vld [vmem:[%s18332_s5 + $0x3c4] ss:$12 sps:$4 sm:$0xff]   ;;  %v1213_v63 = vld [vmem:[%s18329_s3 + $0x1838] sm:$0xff] }
 0x4c5   :  { %v1221_v36 = vld [vmem:[%s18329_s3 + $0x1878] sm:$0xff] }
 0x4c6   :  { %7907 = vmatpush1.bf16.msra.mxu1 %v11852_v3  ;;  %v11964_v3 = vcombine.low %v1149_v62, %v1157_v23  ;;  %v1229_v6 = vld [vmem:[%s18329_s3 + $0x18b8] sm:$0xff]  ;;  %v13175_v62 = vld [vmem:[%s18332_s5 + $0x454] ss:$12 sps:$4 sm:$0xff]   ;;  %v1497_v23 = vrot.slane %v16866_v20, %v14092_v30 }
 0x4c7   :  { %10672 = vmatpush1.bf16.msra.mxu0 %v13134_v35  ;;  %7908 = vmatprep.subr.bf16.mxu1 %v11869_v37  ;;  %v13155_v35 = vld [vmem:[%s18332_s5 + $0x3c0] ss:$12 sps:$4 sm:$0xff]   ;;  %v11981_v37 = vcombine.high %v1165_v58, %v1173_v28  ;;  %v1237_v8 = vld [vmem:[%s18329_s3 + $0x18f8] sm:$0xff] }
 0x4c8   :  { %10673 = vmatprep.subr.bf16.mxu0 %v13139_v48  ;;  %v13160_v48 = vld [vmem:[%s18332_s5 + $0x3dc] ss:$12 sps:$4 sm:$0xff]  }
 0x4c9   :  { %v1245_v13 = vld [vmem:[%s18329_s3 + $0x1938] sm:$0xff] }
 0x4ca   :  { %7909 = vmatpush1.bf16.msra.mxu1 %v11868_v51  ;;  %v11980_v51 = vcombine.low %v1165_v58, %v1173_v28  ;;  %v1253_v14 = vld [vmem:[%s18329_s3 + $0x1978] sm:$0xff] }
 0x4cb   :  { %10674 = vmatpush1.bf16.msra.mxu0 %v13137_v52  ;;  %7910 = vmatprep.subr.bf16.mxu1 %v11885_v54  ;;  %v13158_v52 = vld [vmem:[%s18332_s5 + $0x3d8] ss:$12 sps:$4 sm:$0xff]   ;;  %v11997_v54 = vcombine.high %v1181_v49, %v1189_v50 }
 0x4cc   :  { %10675 = vmatprep.subr.bf16.mxu0 %v13142_v43  ;;  %v13163_v43 = vld [vmem:[%s18332_s5 + $0x3f4] ss:$12 sps:$4 sm:$0xff]   ;;  %v13178_v58 = vld [vmem:[%s18332_s5 + $0x46c] ss:$12 sps:$4 sm:$0xff]  }
 0x4cd   :  { %v1285_v28 = vld [vmem:[%s18329_s3 + $0x1a78] sm:$0xff] }
 0x4ce   :  { %7911 = vmatpush1.bf16.msra.mxu1 %v11884_v9  ;;  %v11996_v9 = vcombine.low %v1181_v49, %v1189_v50  ;;  %v13181_v49 = vld [vmem:[%s18332_s5 + $0x484] ss:$12 sps:$4 sm:$0xff]  }
 0x4cf   :  { %10676 = vmatpush1.bf16.msra.mxu0 %v13140_v40  ;;  %7912 = vmatprep.subr.bf16.mxu1 %v11901_v56  ;;  %v13161_v40 = vld [vmem:[%s18332_s5 + $0x3f0] ss:$12 sps:$4 sm:$0xff]   ;;  %v12013_v56 = vcombine.high %v1197_v38, %v1205_v39 }
 0x4d0   :  { %10677 = vmatprep.subr.bf16.mxu0 %v13145_v61  ;;  %v13166_v61 = vld [vmem:[%s18332_s5 + $0x40c] ss:$12 sps:$4 sm:$0xff]  }
 0x4d2   :  { %7913 = vmatpush1.bf16.msra.mxu1 %v11900_v31  ;;  %v12012_v31 = vcombine.low %v1197_v38, %v1205_v39  ;;  %v13184_v39 = vld [vmem:[%s18332_s5 + $0x49c] ss:$12 sps:$4 sm:$0xff]  }
 0x4d3   :  { %10678 = vmatpush1.bf16.msra.mxu0 %v13143_v34  ;;  %7914 = vmatprep.subr.bf16.mxu1 %v11917_v1  ;;  %v13164_v34 = vld [vmem:[%s18332_s5 + $0x408] ss:$12 sps:$4 sm:$0xff]   ;;  %v12029_v1 = vcombine.high %v1213_v63, %v1221_v36 }
 0x4d4   :  { %10679 = vmatprep.subr.bf16.mxu0 %v13148_v60  ;;  %v13169_v60 = vld [vmem:[%s18332_s5 + $0x424] ss:$12 sps:$4 sm:$0xff]  }
 0x4d6   :  { %7915 = vmatpush1.bf16.msra.mxu1 %v11916_v10  ;;  %v12028_v10 = vcombine.low %v1213_v63, %v1221_v36  ;;  %v13182_v63 = vld [vmem:[%s18332_s5 + $0x498] ss:$12 sps:$4 sm:$0xff]  }
 0x4d7   :  { %10680 = vmatpush1.bf16.msra.mxu0 %v13146_v11  ;;  %7916 = vmatprep.subr.bf16.mxu1 %v11933_v53  ;;  %v13167_v11 = vld [vmem:[%s18332_s5 + $0x420] ss:$12 sps:$4 sm:$0xff]   ;;  %v12045_v53 = vcombine.high %v1229_v6, %v1237_v8 }
 0x4d8   :  { %10681 = vmatprep.subr.bf16.mxu0 %v13151_v12  ;;  %v13172_v12 = vld [vmem:[%s18332_s5 + $0x43c] ss:$12 sps:$4 sm:$0xff]  }
 0x4da   :  { %7917 = vmatpush1.bf16.msra.mxu1 %v11932_v15  ;;  %v12044_v15 = vcombine.low %v1229_v6, %v1237_v8 }
 0x4db   :  { %10682 = vmatpush1.bf16.msra.mxu0 %v13149_v2  ;;  %7918 = vmatprep.subr.bf16.mxu1 %v11949_v16  ;;  %v13170_v2 = vld [vmem:[%s18332_s5 + $0x438] ss:$12 sps:$4 sm:$0xff]   ;;  %v12061_v16 = vcombine.high %v1245_v13, %v1253_v14 }
 0x4dc   :  { %10683 = vmatprep.subr.bf16.mxu0 %v13154_v19  ;;  %v1485_v19 = vrot.slane %v16866_v20, %v14051_v0  ;;  %v1277_v20 = vld [vmem:[%s18329_s3 + $0x1a38] sm:$0xff] }
 0x4de   :  { %7919 = vmatpush1.bf16.msra.mxu1 %v11948_v24  ;;  %v12060_v24 = vcombine.low %v1245_v13, %v1253_v14  ;;  %v13190_v13 = vld [vmem:[%s18332_s5 + $0x4cc] ss:$12 sps:$4 sm:$0xff]  }
 0x4df   :  { %10684 = vmatpush1.bf16.msra.mxu0 %v13152_v25  ;;  %7920 = vmatprep.subr.bf16.mxu1 %v11965_v41  ;;  %v13173_v25 = vld [vmem:[%s18332_s5 + $0x450] ss:$12 sps:$4 sm:$0xff]  }
 0x4e0   :  { %10685 = vmatprep.subr.bf16.mxu0 %v13157_v27  ;;  %v12900_v27 = vadd.f32 %v15773_v55, %v1485_v19  ;;  %v13176_v55 = vld [vmem:[%s18332_s5 + $0x468] ss:$12 sps:$4 sm:$0xff]   ;;  %v1341_v14 = vld [vmem:[%s18329_s3 + $0x1c38] sm:$0xff] }
 0x4e2   :  { %7921 = vmatpush1.bf16.msra.mxu1 %v11964_v3  ;;  %v12903_v3 = vadd.f32 %v16521_v45, %v1497_v23  ;;  %v1293_v45 = vld [vmem:[%s18329_s3 + $0x1ab8] sm:$0xff] }
 0x4e3   :  { %10686 = vmatpush1.bf16.msra.mxu0 %v13155_v35  ;;  %7922 = vmatprep.subr.bf16.mxu1 %v11981_v37  ;;  %v12093_v37 = vcombine.high %v1277_v20, %v1285_v28 }
 0x4e4   :  { %10687 = vmatprep.subr.bf16.mxu0 %v13160_v48  ;;  %v7982_v48 = vmax.f32 %v12900_v27, 0.0  ;;  %v7985_v50 = vmax.f32 %v12903_v3, 0.0  ;;  %v1373_v27 = vld [vmem:[%s18329_s3 + $0x1d38] sm:$0xff] }
 0x4e6   :  { %7923 = vmatpush1.bf16.msra.mxu1 %v11980_v51  ;;  %v1301_v51 = vld [vmem:[%s18329_s3 + $0x1af8] sm:$0xff] }
 0x4e7   :  { %10688 = vmatpush1.bf16.msra.mxu0 %v13158_v52  ;;  %7924 = vmatprep.subr.bf16.mxu1 %v11997_v54  ;;  %v12092_v52 = vcombine.low %v1277_v20, %v1285_v28  ;;  %v13179_v54 = vld [vmem:[%s18332_s5 + $0x480] ss:$12 sps:$4 sm:$0xff]   ;;  %v12109_v38 = vcombine.high %v1293_v45, %v1301_v51  ;;  %v13194_v28 = vld [vmem:[%s18332_s5 + $0x4f8] ss:$12 sps:$4 sm:$0xff]  }
 0x4e8   :  { %10689 = vmatprep.subr.bf16.mxu0 %v13163_v43  ;;  %v17311_v43 = vpack.c.bf16 %v7982_v48, %v7982_v48 }
 0x4ea   :  { %7925 = vmatpush1.bf16.msra.mxu1 %v11996_v9  ;;  %v1309_v9 = vld [vmem:[%s18329_s3 + $0x1b38] sm:$0xff] }
 0x4eb   :  { %10690 = vmatpush1.bf16.msra.mxu0 %v13161_v40  ;;  %7926 = vmatprep.subr.bf16.mxu1 %v12013_v56  ;;  %v1317_v40 = vld [vmem:[%s18329_s3 + $0x1b78] sm:$0xff]  ;;  %v17322_v56 = vpack.c.bf16 %v7985_v50, %v7985_v50 }
 0x4ec   :  { %10691 = vmatprep.subr.bf16.mxu0 %v13166_v61  ;;  %v12108_v61 = vcombine.low %v1293_v45, %v1301_v51  ;;  %v12125_v36 = vcombine.high %v1309_v9, %v1317_v40  ;;  %v13197_v51 = vld [vmem:[%s18332_s5 + $0x510] ss:$12 sps:$4 sm:$0xff]  }
 0x4ee   :  { %7927 = vmatpush1.bf16.msra.mxu1 %v12012_v31 }
 0x4ef   :  { %10692 = vmatpush1.bf16.msra.mxu0 %v13164_v34  ;;  %7937 = vmatprep.subr.bf16.mxu1 %v12029_v1  ;;  %v13187_v34 = vld [vmem:[%s18332_s5 + $0x4b4] ss:$12 sps:$4 sm:$0xff]   ;;  %v1325_v1 = vld [vmem:[%s18329_s3 + $0x1bb8] sm:$0xff] }
 0x4f0   :  { %10693 = vmatprep.subr.bf16.mxu0 %v13169_v60  ;;  %v1333_v60 = vld [vmem:[%s18329_s3 + $0x1bf8] sm:$0xff] }
 0x4f1   :  { %7929 = vmatmul.mubr.bf16.vlgmr.msra.gmra.mrb[20].mxu1 %v14096_v33  ;;  %v1261_v33 = vld [vmem:[%s18329_s3 + $0x19b8] sm:$0xff] }
 0x4f2   :  { %7938 = vmatpush1.bf16.msra.mxu1 %v12028_v10  ;;  %7969 = vmatprep.mubr.bf16.mxu1 %v14143_v7  ;;  %v1269_v7 = vld [vmem:[%s18329_s3 + $0x19f8] sm:$0xff]  ;;  %v12124_v10 = vcombine.low %v1309_v9, %v1317_v40 }
 0x4f3   :  { %10694 = vmatpush1.bf16.msra.mxu0 %v13167_v11  ;;  %7939 = vmatprep.subr.bf16.mxu1 %v12045_v53  ;;  %v12077_v41 = vcombine.high %v1261_v33, %v1269_v7  ;;  %v12076_v35 = vcombine.low %v1261_v33, %v1269_v7  ;;  %v13185_v53 = vld [vmem:[%s18332_s5 + $0x4b0] ss:$12 sps:$4 sm:$0xff]  }
 0x4f4   :  { %10695 = vmatprep.subr.bf16.mxu0 %v13172_v12  ;;  %v12141_v12 = vcombine.high %v1325_v1, %v1333_v60  ;;  %v1357_v33 = vld [vmem:[%s18329_s3 + $0x1cb8] sm:$0xff] }
 0x4f5   :  { %v1365_v7 = vld [vmem:[%s18329_s3 + $0x1cf8] sm:$0xff] }
 0x4f6   :  { %7940 = vmatpush1.bf16.msra.mxu1 %v12044_v15  ;;  %v1349_v15 = vld [vmem:[%s18329_s3 + $0x1c78] sm:$0xff]  ;;  %v12172_v20 = vcombine.low %v1357_v33, %v1365_v7 }
 0x4f7   :  { %10696 = vmatpush1.bf16.msra.mxu0 %v13170_v2  ;;  %7941 = vmatprep.subr.bf16.mxu1 %v12061_v16  ;;  %v12140_v2 = vcombine.low %v1325_v1, %v1333_v60  ;;  %v13188_v16 = vld [vmem:[%s18332_s5 + $0x4c8] ss:$12 sps:$4 sm:$0xff]   ;;  %v12157_v19 = vcombine.high %v1341_v14, %v1349_v15  ;;  %v12156_v23 = vcombine.low %v1341_v14, %v1349_v15  ;;  %v1413_v9 = vld [vmem:[%s18329_s3 + $0x1e78] sm:$0xff] }
 0x4f8   :  { %10697 = vmatprep.subr.bf16.mxu0 %v13175_v62  ;;  %v13193_v62 = vld [vmem:[%s18332_s5 + $0x4e4] ss:$12 sps:$4 sm:$0xff]   ;;  %v1429_v1 = vld [vmem:[%s18329_s3 + $0x1ef8] sm:$0xff] }
 0x4f9   :  { %v13206_v14 = vld [vmem:[%s18332_s5 + $0x558] ss:$12 sps:$4 sm:$0xff]  }
 0x4fa   :  { %7942 = vmatpush1.bf16.msra.mxu1 %v12060_v24  ;;  %v13191_v24 = vld [vmem:[%s18332_s5 + $0x4e0] ss:$12 sps:$4 sm:$0xff]  }
 0x4fb   :  { %10698 = vmatpush1.bf16.msra.mxu0 %v13173_v25  ;;  %7943 = vmatprep.subr.bf16.mxu1 %v12077_v41  ;;  %v12173_v25 = vcombine.high %v1357_v33, %v1365_v7  ;;  %v13196_v41 = vld [vmem:[%s18332_s5 + $0x4fc] ss:$12 sps:$4 sm:$0xff]  }
 0x4fc   :  { %10699 = vmatprep.subr.bf16.mxu0 %v13178_v58  ;;  %v1381_v58 = vld [vmem:[%s18329_s3 + $0x1d78] sm:$0xff] }
 0x4fd   :  { %v12189_v3 = vcombine.high %v1373_v27, %v1381_v58  ;;  %v12188_v50 = vcombine.low %v1373_v27, %v1381_v58  ;;  %v13209_v33 = vld [vmem:[%s18332_s5 + $0x570] ss:$12 sps:$4 sm:$0xff]   ;;  %v13219_v58 = vld [vmem:[%s18332_s5 + $0x8] ss:$12 sps:$4 sm:$0xff]  }
 0x4fe   :  { %7944 = vmatpush1.bf16.msra.mxu1 %v12076_v35  ;;  %v13199_v35 = vld [vmem:[%s18332_s5 + $0x514] ss:$12 sps:$4 sm:$0xff]   ;;  %v13217_v27 = vld [vmem:[%s18332_s5 + $0x5a4] ss:$12 sps:$4 sm:$0xff]  }
 0x4ff   :  { %10700 = vmatpush1.bf16.msra.mxu0 %v13176_v55  ;;  %7945 = vmatprep.subr.bf16.mxu1 %v12093_v37  ;;  %v1389_v55 = vld [vmem:[%s18329_s3 + $0x1db8] sm:$0xff] }
 0x500   :  { %10710 = vmatprep.subr.bf16.mxu0 %v13181_v49  ;;  %v1397_v37 = vld [vmem:[%s18329_s3 + $0x1df8] sm:$0xff] }
 0x501   :  { %v12204_v40 = vcombine.low %v1389_v55, %v1397_v37 }
 0x502   :  { %10702 = vmatmul.mubr.bf16.vlgmr.msra.gmra.mrb[20].mxu0 %v17311_v43  ;;  %7946 = vmatpush1.bf16.msra.mxu1 %v12092_v52  ;;  %v12205_v52 = vcombine.high %v1389_v55, %v1397_v37  ;;  %v13224_v55 = vld [vmem:[%s18332_s5 + $0x20] ss:$12 sps:$4 sm:$0xff]   ;;  %v13220_v37 = vld [vmem:[%s18332_s5 + $0x5b8] ss:$12 sps:$4 sm:$0xff]  }
 0x503   :  { %10711 = vmatpush1.bf16.msra.mxu0 %v13179_v54  ;;  %10742 = vmatprep.mubr.bf16.mxu0 %v17322_v56 }
 0x504   :  { %v17329_v31 = vpop.f32.mrb[16].mxu1  ;;  %7947 = vmatprep.subr.bf16.mxu1 %v12109_v38  ;;  %10712 = vmatprep.subr.bf16.mxu0 %v13184_v39  ;;  %v13202_v38 = vld [vmem:[%s18332_s5 + $0x52c] ss:$12 sps:$4 sm:$0xff]  }
 0x505   :  { %v17340_v6 = vpop.f32.mrb[17].mxu1  ;;  %v1405_v39 = vld [vmem:[%s18329_s3 + $0x1e38] sm:$0xff] }
 0x506   :  { %v7647_v8 = vpop.f32.mrb[18].mxu1  ;;  %7948 = vmatpush1.bf16.msra.mxu1 %v12108_v61  ;;  %v13200_v61 = vld [vmem:[%s18332_s5 + $0x528] ss:$12 sps:$4 sm:$0xff]   ;;  %v12220_v60 = vcombine.low %v1405_v39, %v1413_v9 }
 0x507   :  { %10713 = vmatpush1.bf16.msra.mxu0 %v13182_v63  ;;  %v7648_v11 = vpop.f32.mrb[19].mxu1  ;;  %7949 = vmatprep.subr.bf16.mxu1 %v12125_v36  ;;  %v12221_v63 = vcombine.high %v1405_v39, %v1413_v9  ;;  %v13205_v36 = vld [vmem:[%s18332_s5 + $0x544] ss:$12 sps:$4 sm:$0xff]   ;;  %v13203_v8 = vld [vmem:[%s18332_s5 + $0x540] ss:$12 sps:$4 sm:$0xff]  }
 0x508   :  { %10714 = vmatprep.subr.bf16.mxu0 %v13187_v34  ;;  %v1421_v34 = vld [vmem:[%s18329_s3 + $0x1eb8] sm:$0xff] }
 0x509   :  { %v13208_v11 = vld [vmem:[%s18332_s5 + $0x55c] ss:$12 sps:$4 sm:$0xff]   ;;  %v13232_v9 = vld [vmem:[%s18332_s5 + $0x5ec] ss:$12 sps:$4 sm:$0xff]  }
 0x50a   :  { %7950 = vmatpush1.bf16.msra.mxu1 %v12124_v10  ;;  %v12237_v10 = vcombine.high %v1421_v34, %v1429_v1 }
 0x50b   :  { %10715 = vmatpush1.bf16.msra.mxu0 %v13185_v53  ;;  %7951 = vmatprep.subr.bf16.mxu1 %v12141_v12  ;;  %v1437_v53 = vld [vmem:[%s18329_s3 + $0x1f38] sm:$0xff] }
 0x50c   :  { %10716 = vmatprep.subr.bf16.mxu0 %v13190_v13  ;;  %v1445_v12 = vld [vmem:[%s18329_s3 + $0x1f78] sm:$0xff]  ;;  %v12236_v13 = vcombine.low %v1421_v34, %v1429_v1  ;;  %v13239_v1 = vld [vmem:[%s18332_s5 + $0x68] ss:$12 sps:$4 sm:$0xff]  }
 0x50d   :  { %v12253_v15 = vcombine.high %v1437_v53, %v1445_v12 }
 0x50e   :  { %7952 = vmatpush1.bf16.msra.mxu1 %v12140_v2  ;;  %v13211_v2 = vld [vmem:[%s18332_s5 + $0x574] ss:$12 sps:$4 sm:$0xff]  }
 0x50f   :  { %10717 = vmatpush1.bf16.msra.mxu0 %v13188_v16  ;;  %7953 = vmatprep.subr.bf16.mxu1 %v12157_v19  ;;  %v1453_v16 = vld [vmem:[%s18329_s3 + $0x1fb8] sm:$0xff] }
 0x510   :  { %10718 = vmatprep.subr.bf16.mxu0 %v13193_v62  ;;  %v1461_v19 = vld [vmem:[%s18329_s3 + $0x1ff8] sm:$0xff]  ;;  %v12252_v62 = vcombine.low %v1437_v53, %v1445_v12  ;;  %v13244_v12 = vld [vmem:[%s18332_s5 + $0x80] ss:$12 sps:$4 sm:$0xff]  }
 0x511   :  { %v12269_v7 = vcombine.high %v1453_v16, %v1461_v19 }
 0x512   :  { %7954 = vmatpush1.bf16.msra.mxu1 %v12156_v23  ;;  %v13214_v23 = vld [vmem:[%s18332_s5 + $0x58c] ss:$12 sps:$4 sm:$0xff]  }
 0x513   :  { %10719 = vmatpush1.bf16.msra.mxu0 %v13191_v24  ;;  %7955 = vmatprep.subr.bf16.mxu1 %v12173_v25  ;;  %v12268_v24 = vcombine.low %v1453_v16, %v1461_v19  ;;  %v13212_v25 = vld [vmem:[%s18332_s5 + $0x588] ss:$12 sps:$4 sm:$0xff]   ;;  %v13245_v16 = vld [vmem:[%s18332_s5 + $0x630] ss:$12 sps:$4 sm:$0xff]  }
 0x514   :  { %10720 = vmatprep.subr.bf16.mxu0 %v13196_v41  ;;  %v13218_v41 = vld [vmem:[%s18332_s5 + $0xc8] ss:$12 sps:$4 sm:$0xff]   ;;  %v13253_v19 = vld [vmem:[%s18332_s5 + $0x170] ss:$12 sps:$4 sm:$0xff]  }
 0x515   :  { %v17390_v48 = vpop.f32.mrb[16].mxu0 }
 0x516   :  { %v17392_v49 = vpop.f32.mrb[17].mxu0  ;;  %7956 = vmatpush1.bf16.msra.mxu1 %v12172_v20  ;;  %v13215_v20 = vld [vmem:[%s18332_s5 + $0x5a0] ss:$12 sps:$4 sm:$0xff]  }
 0x517   :  { %v7811_v45 = vpop.f32.mrb[18].mxu0  ;;  %10721 = vmatpush1.bf16.msra.mxu0 %v13194_v28  ;;  %7957 = vmatprep.subr.bf16.mxu1 %v12189_v3  ;;  %v13223_v28 = vld [vmem:[%s18332_s5 + $0xe0] ss:$12 sps:$4 sm:$0xff]   ;;  %v13222_v3 = vld [vmem:[%s18332_s5 + $0x5bc] ss:$12 sps:$4 sm:$0xff]  }
 0x518   :  { %v7812_v54 = vpop.f32.mrb[19].mxu0  ;;  %10722 = vmatprep.subr.bf16.mxu0 %v13199_v35  ;;  %v17473_v35 = vld [vmem:[%s18331_s4 + $0x8] sm:$0xff]  ;;  %v13227_v45 = vld [vmem:[%s18332_s5 + $0x5d4] ss:$12 sps:$4 sm:$0xff]  }
 0x519   :  { %v13225_v54 = vld [vmem:[%s18332_s5 + $0x5d0] ss:$12 sps:$4 sm:$0xff]  }
 0x51a   :  { %7958 = vmatpush1.bf16.msra.mxu1 %v12188_v50  ;;  %v13548_v50 = vld [vmem:[%s18331_s4] sm:$0xff] }
 0x51b   :  { %10723 = vmatpush1.bf16.msra.mxu0 %v13197_v51  ;;  %7959 = vmatprep.subr.bf16.mxu1 %v12205_v52  ;;  %v1505_v51 = vrot.slane %v17473_v35, %v14023_v47  ;;  %v13229_v52 = vld [vmem:[%s18332_s5 + $0x38] ss:$12 sps:$4 sm:$0xff]  }
 0x51c   :  { %10724 = vmatprep.subr.bf16.mxu0 %v13202_v38  ;;  %v13233_v38 = vld [vmem:[%s18332_s5 + $0x110] ss:$12 sps:$4 sm:$0xff]  }
 0x51e   :  { %7960 = vmatpush1.bf16.msra.mxu1 %v12204_v40  ;;  %v12905_v40 = vadd.f32 %v16573_v18, %v1505_v51  ;;  %v13237_v18 = vld [vmem:[%s18332_s5 + $0x604] ss:$12 sps:$4 sm:$0xff]  }
 0x51f   :  { %10725 = vmatpush1.bf16.msra.mxu0 %v13200_v61  ;;  %7961 = vmatprep.subr.bf16.mxu1 %v12221_v63  ;;  %v13234_v61 = vld [vmem:[%s18332_s5 + $0x50] ss:$12 sps:$4 sm:$0xff]   ;;  %v13230_v63 = vld [vmem:[%s18332_s5 + $0x5e8] ss:$12 sps:$4 sm:$0xff]  }
 0x520   :  { %10726 = vmatprep.subr.bf16.mxu0 %v13205_v36  ;;  %v7987_v34 = vmax.f32 %v12905_v40, 0.0  ;;  %v13277_v51 = vld [vmem:[%s18332_s5 + $0x6c4] ss:$12 sps:$4 sm:$0xff]  }
 0x521   :  { %v13280_v40 = vld [vmem:[%s18332_s5 + $0x6d8] ss:$12 sps:$4 sm:$0xff]  }
 0x522   :  { %7962 = vmatpush1.bf16.msra.mxu1 %v12220_v60  ;;  %v13235_v60 = vld [vmem:[%s18332_s5 + $0x600] ss:$12 sps:$4 sm:$0xff]   ;;  %v17534_v53 = vpack.c.bf16 %v7987_v34, %v7987_v34 }
 0x523   :  { %10727 = vmatpush1.bf16.msra.mxu0 %v13203_v8  ;;  %7963 = vmatprep.subr.bf16.mxu1 %v12237_v10  ;;  %v13242_v10 = vld [vmem:[%s18332_s5 + $0x61c] ss:$12 sps:$4 sm:$0xff]   ;;  %v13292_v34 = vld [vmem:[%s18332_s5 + $0x70c] ss:$12 sps:$4 sm:$0xff]  }
 0x524   :  { %10728 = vmatprep.subr.bf16.mxu0 %v13208_v11  ;;  %v13243_v11 = vld [vmem:[%s18332_s5 + $0x140] ss:$12 sps:$4 sm:$0xff]  }
 0x526   :  { %7964 = vmatpush1.bf16.msra.mxu1 %v12236_v13  ;;  %v13240_v13 = vld [vmem:[%s18332_s5 + $0x618] ss:$12 sps:$4 sm:$0xff]  }
 0x527   :  { %10729 = vmatpush1.bf16.msra.mxu0 %v13206_v14  ;;  %7965 = vmatprep.subr.bf16.mxu1 %v12253_v15  ;;  %v13248_v14 = vld [vmem:[%s18332_s5 + $0x158] ss:$12 sps:$4 sm:$0xff]   ;;  %v13247_v15 = vld [vmem:[%s18332_s5 + $0x634] ss:$12 sps:$4 sm:$0xff]  }
 0x528   :  { %10730 = vmatprep.subr.bf16.mxu0 %v13211_v2  ;;  %v13249_v2 = vld [vmem:[%s18332_s5 + $0x98] ss:$12 sps:$4 sm:$0xff]  }
 0x52a   :  { %7966 = vmatpush1.bf16.msra.mxu1 %v12252_v62  ;;  %v13252_v62 = vld [vmem:[%s18332_s5 + $0x64c] ss:$12 sps:$4 sm:$0xff]  }
 0x52b   :  { %10731 = vmatpush1.bf16.msra.mxu0 %v13209_v33  ;;  %7967 = vmatprep.subr.bf16.mxu1 %v12269_v7  ;;  %v13254_v33 = vld [vmem:[%s18332_s5 + $0xb0] ss:$12 sps:$4 sm:$0xff]   ;;  %v13250_v7 = vld [vmem:[%s18332_s5 + $0x648] ss:$12 sps:$4 sm:$0xff]  }
 0x52c   :  { %10732 = vmatprep.subr.bf16.mxu0 %v13214_v23  ;;  %v13258_v23 = vld [vmem:[%s18332_s5 + $0x248] ss:$12 sps:$4 sm:$0xff]  }
 0x52e   :  { %7968 = vmatpush1.bf16.msra.mxu1 %v12268_v24  ;;  %v13257_v24 = vld [vmem:[%s18332_s5 + $0x664] ss:$12 sps:$4 sm:$0xff]  }
 0x52f   :  { %10733 = vmatpush1.bf16.msra.mxu0 %v13212_v25  ;;  %12654 = vmatprep.subr.bf16.mxu1 %v13218_v41  ;;  %v13259_v25 = vld [vmem:[%s18332_s5 + $0x188] ss:$12 sps:$4 sm:$0xff]   ;;  %v13255_v41 = vld [vmem:[%s18332_s5 + $0x660] ss:$12 sps:$4 sm:$0xff]  }
 0x530   :  { %10734 = vmatprep.subr.bf16.mxu0 %v13217_v27  ;;  %v13263_v27 = vld [vmem:[%s18332_s5 + $0x260] ss:$12 sps:$4 sm:$0xff]  }
 0x531   :  { %7970 = vmatmul.mubr.bf16.vlgmr.msra.gmra.mrb[20].mxu1 %v14312_v21  ;;  %v13228_v21 = vld [vmem:[%s18332_s5 + $0xf8] ss:$12 sps:$4 sm:$0xff]  }
 0x532   :  { %12655 = vmatpush3.bf16.msra.mxu1 %v13219_v58  ;;  %10947 = vmatprep.mubr.bf16.mxu1 %v16701_v29  ;;  %v1493_v29 = vrot.slane %v13548_v50, %v14263_v42  ;;  %v13262_v58 = vld [vmem:[%s18332_s5 + $0x67c] ss:$12 sps:$4 sm:$0xff]  }
 0x533   :  { %10735 = vmatpush1.bf16.msra.mxu0 %v13215_v20  ;;  %12656 = vmatprep.subr.bf16.mxu1 %v13223_v28  ;;  %v13264_v20 = vld [vmem:[%s18332_s5 + $0x1a0] ss:$12 sps:$4 sm:$0xff]   ;;  %v13260_v28 = vld [vmem:[%s18332_s5 + $0x678] ss:$12 sps:$4 sm:$0xff]   ;;  %v13274_v50 = vld [vmem:[%s18332_s5 + $0x1d0] ss:$12 sps:$4 sm:$0xff]  }
 0x534   :  { %10736 = vmatprep.subr.bf16.mxu0 %v13222_v3  ;;  %v12902_v39 = vadd.f32 %v16513_v22, %v1493_v29  ;;  %v13238_v22 = vld [vmem:[%s18332_s5 + $0x128] ss:$12 sps:$4 sm:$0xff]   ;;  %v13268_v3 = vld [vmem:[%s18332_s5 + $0x278] ss:$12 sps:$4 sm:$0xff]  }
 0x535   :  { %v13270_v29 = vld [vmem:[%s18332_s5 + $0x6a8] ss:$12 sps:$4 sm:$0xff]  }
 0x536   :  { %12657 = vmatpush3.bf16.msra.mxu1 %v13224_v55  ;;  %v7984_v36 = vmax.f32 %v12902_v39, 0.0  ;;  %v13265_v55 = vld [vmem:[%s18332_s5 + $0x690] ss:$12 sps:$4 sm:$0xff]  }
 0x537   :  { %10737 = vmatpush1.bf16.msra.mxu0 %v13220_v37  ;;  %12658 = vmatprep.subr.bf16.mxu1 %v13228_v21  ;;  %v13273_v37 = vld [vmem:[%s18332_s5 + $0x290] ss:$12 sps:$4 sm:$0xff]   ;;  %v13272_v21 = vld [vmem:[%s18332_s5 + $0x6ac] ss:$12 sps:$4 sm:$0xff]  }
 0x538   :  { %10738 = vmatprep.subr.bf16.mxu0 %v13227_v45  ;;  %v17526_v8 = vpack.c.bf16 %v7984_v36, %v7984_v36  ;;  %v13278_v45 = vld [vmem:[%s18332_s5 + $0x2a8] ss:$12 sps:$4 sm:$0xff]   ;;  %v13285_v36 = vld [vmem:[%s18332_s5 + $0x6f0] ss:$12 sps:$4 sm:$0xff]  }
 0x539   :  { %v13282_v39 = vld [vmem:[%s18332_s5 + $0x6dc] ss:$12 sps:$4 sm:$0xff]  }
 0x53a   :  { %12659 = vmatpush3.bf16.msra.mxu1 %v13229_v52  ;;  %v13279_v52 = vld [vmem:[%s18332_s5 + $0x1e8] ss:$12 sps:$4 sm:$0xff]  }
 0x53b   :  { %10739 = vmatpush1.bf16.msra.mxu0 %v13225_v54  ;;  %12660 = vmatprep.subr.bf16.mxu1 %v13233_v38  ;;  %v13275_v54 = vld [vmem:[%s18332_s5 + $0x6c0] ss:$12 sps:$4 sm:$0xff]  }
 0x53c   :  { %10740 = vmatprep.subr.bf16.mxu0 %v13232_v9  ;;  %v13283_v38 = vld [vmem:[%s18332_s5 + $0x2c0] ss:$12 sps:$4 sm:$0xff]  }
 0x53d   :  { %v13284_v9 = vld [vmem:[%s18332_s5 + $0x200] ss:$12 sps:$4 sm:$0xff]  }
 0x53e   :  { %12661 = vmatpush3.bf16.msra.mxu1 %v13234_v61  ;;  %v13288_v61 = vld [vmem:[%s18332_s5 + $0x2d8] ss:$12 sps:$4 sm:$0xff]  }
 0x53f   :  { %10741 = vmatpush1.bf16.msra.mxu0 %v13230_v63  ;;  %12662 = vmatprep.subr.bf16.mxu1 %v13238_v22  ;;  %v13287_v63 = vld [vmem:[%s18332_s5 + $0x6f4] ss:$12 sps:$4 sm:$0xff]   ;;  %v13289_v22 = vld [vmem:[%s18332_s5 + $0x218] ss:$12 sps:$4 sm:$0xff]  }
 0x540   :  { %10751 = vmatprep.subr.bf16.mxu0 %v13237_v18  ;;  %v13293_v18 = vld [vmem:[%s18332_s5 + $0x2f0] ss:$12 sps:$4 sm:$0xff]  }
 0x542   :  { %10743 = vmatmul.mubr.bf16.vlgmr.msra.gmra.mrb[20].mxu0 %v17526_v8  ;;  %12663 = vmatpush3.bf16.msra.mxu1 %v13239_v1  ;;  %v13294_v1 = vld [vmem:[%s18332_s5 + $0x230] ss:$12 sps:$4 sm:$0xff]  }
 0x543   :  { %10752 = vmatpush1.bf16.msra.mxu0 %v13235_v60  ;;  %10783 = vmatprep.mubr.bf16.mxu0 %v17534_v53  ;;  %v13290_v60 = vld [vmem:[%s18332_s5 + $0x708] ss:$12 sps:$4 sm:$0xff]  }
 0x544   :  { %10753 = vmatprep.subr.bf16.mxu0 %v13242_v10  ;;  %12664 = vmatprep.subr.bf16.mxu1 %v13243_v11  ;;  %v13298_v10 = vld [vmem:[%s18332_s5 + $0x3c8] ss:$12 sps:$4 sm:$0xff]   ;;  %v13297_v11 = vld [vmem:[%s18332_s5 + $0x724] ss:$12 sps:$4 sm:$0xff]  }
 0x546   :  { %12665 = vmatpush3.bf16.msra.mxu1 %v13244_v12  ;;  %v13299_v12 = vld [vmem:[%s18332_s5 + $0x308] ss:$12 sps:$4 sm:$0xff]  }
 0x547   :  { %10754 = vmatpush1.bf16.msra.mxu0 %v13240_v13  ;;  %12666 = vmatprep.subr.bf16.mxu1 %v13248_v14  ;;  %v13295_v13 = vld [vmem:[%s18332_s5 + $0x720] ss:$12 sps:$4 sm:$0xff]  }
 0x548   :  { %10755 = vmatprep.subr.bf16.mxu0 %v13247_v15  ;;  %v13303_v14 = vld [vmem:[%s18332_s5 + $0x3e0] ss:$12 sps:$4 sm:$0xff]   ;;  %v13302_v15 = vld [vmem:[%s18332_s5 + $0x73c] ss:$12 sps:$4 sm:$0xff]  }
 0x54a   :  { %12667 = vmatpush3.bf16.msra.mxu1 %v13249_v2  ;;  %v13304_v2 = vld [vmem:[%s18332_s5 + $0x320] ss:$12 sps:$4 sm:$0xff]  }
 0x54b   :  { %10756 = vmatpush1.bf16.msra.mxu0 %v13245_v16  ;;  %12668 = vmatprep.subr.bf16.mxu1 %v13253_v19  ;;  %v13300_v16 = vld [vmem:[%s18332_s5 + $0x738] ss:$12 sps:$4 sm:$0xff]  }
 0x54c   :  { %10757 = vmatprep.subr.bf16.mxu0 %v13252_v62  ;;  %v13308_v19 = vld [vmem:[%s18332_s5 + $0x3f8] ss:$12 sps:$4 sm:$0xff]   ;;  %v1513_v62 = vrot.slane %v17473_v35, %v14038_v59 }
 0x54d   :  { %v13312_v59 = vld [vmem:[%s18332_s5 + $0x76c] ss:$12 sps:$4 sm:$0xff]  }
 0x54e   :  { %12669 = vmatpush3.bf16.msra.mxu1 %v13254_v33  ;;  %v13309_v33 = vld [vmem:[%s18332_s5 + $0x338] ss:$12 sps:$4 sm:$0xff]  }
 0x54f   :  { %10758 = vmatpush1.bf16.msra.mxu0 %v13250_v7  ;;  %12676 = vmatprep.subr.bf16.mxu1 %v13258_v23  ;;  %v13305_v7 = vld [vmem:[%s18332_s5 + $0x750] ss:$12 sps:$4 sm:$0xff]  }
 0x550   :  { %10759 = vmatprep.subr.bf16.mxu0 %v13257_v24  ;;  %v13313_v23 = vld [vmem:[%s18332_s5 + $0x410] ss:$12 sps:$4 sm:$0xff]  }
 0x551   :  { %10948 = vmatmul.mubr.bf16.vlgmr.msra.gmra.mrb[24].mxu1 %v16905_v46  ;;  %v13267_v46 = vld [vmem:[%s18332_s5 + $0x694] ss:$12 sps:$4 sm:$0xff]  }
 0x552   :  { %12677 = vmatpush3.bf16.msra.mxu1 %v13259_v25  ;;  %10987 = vmatprep.mubr.bf16.mxu1 %v16910_v5  ;;  %v13269_v5 = vld [vmem:[%s18332_s5 + $0x1b8] ss:$12 sps:$4 sm:$0xff]   ;;  %v12907_v25 = vadd.f32 %v17340_v6, %v1513_v62  ;;  %v13364_v62 = vld [vmem:[%s18332_s5 + $0x500] ss:$12 sps:$4 sm:$0xff]  }
 0x553   :  { %10760 = vmatpush1.bf16.msra.mxu0 %v13255_v41  ;;  %12678 = vmatprep.subr.bf16.mxu1 %v13263_v27  ;;  %v13314_v41 = vld [vmem:[%s18332_s5 + $0x350] ss:$12 sps:$4 sm:$0xff]   ;;  %v13310_v27 = vld [vmem:[%s18332_s5 + $0x768] ss:$12 sps:$4 sm:$0xff]  }
 0x554   :  { %10761 = vmatprep.subr.bf16.mxu0 %v13262_v58  ;;  %v13317_v6 = vld [vmem:[%s18332_s5 + $0x784] ss:$12 sps:$4 sm:$0xff]  }
 0x556   :  { %12679 = vmatpush3.bf16.msra.mxu1 %v13264_v20  ;;  %v7989_v20 = vmax.f32 %v12907_v25, 0.0  ;;  %v13373_v25 = vld [vmem:[%s18332_s5 + $0x5f0] ss:$12 sps:$4 sm:$0xff]  }
 0x557   :  { %10762 = vmatpush1.bf16.msra.mxu0 %v13260_v28  ;;  %12680 = vmatprep.subr.bf16.mxu1 %v13268_v3  ;;  %v13319_v28 = vld [vmem:[%s18332_s5 + $0x368] ss:$12 sps:$4 sm:$0xff]   ;;  %v13315_v3 = vld [vmem:[%s18332_s5 + $0x780] ss:$12 sps:$4 sm:$0xff]  }
 0x558   :  { %10763 = vmatprep.subr.bf16.mxu0 %v13267_v46 }
 0x55a   :  { %12681 = vmatpush3.bf16.msra.mxu1 %v13269_v5  ;;  %v13322_v5 = vld [vmem:[%s18332_s5 + $0x79c] ss:$12 sps:$4 sm:$0xff]  }
 0x55b   :  { %10764 = vmatpush1.bf16.msra.mxu0 %v13265_v55  ;;  %12682 = vmatprep.subr.bf16.mxu1 %v13273_v37  ;;  %v13323_v55 = vld [vmem:[%s18332_s5 + $0x440] ss:$12 sps:$4 sm:$0xff]   ;;  %v17742_v37 = vpack.c.bf16 %v7989_v20, %v7989_v20  ;;  %v13379_v20 = vld [vmem:[%s18332_s5 + $0x608] ss:$12 sps:$4 sm:$0xff]  }
 0x55c   :  { %10765 = vmatprep.subr.bf16.mxu0 %v13272_v21  ;;  %v13324_v21 = vld [vmem:[%s18332_s5 + $0x380] ss:$12 sps:$4 sm:$0xff]  }
 0x55e   :  { %12683 = vmatpush3.bf16.msra.mxu1 %v13274_v50  ;;  %v13320_v50 = vld [vmem:[%s18332_s5 + $0x798] ss:$12 sps:$4 sm:$0xff]  }
 0x55f   :  { %10766 = vmatpush1.bf16.msra.mxu0 %v13270_v29  ;;  %12684 = vmatprep.subr.bf16.mxu1 %v13278_v45  ;;  %v13328_v29 = vld [vmem:[%s18332_s5 + $0x458] ss:$12 sps:$4 sm:$0xff]   ;;  %v13327_v45 = vld [vmem:[%s18332_s5 + $0x7b4] ss:$12 sps:$4 sm:$0xff]  }
 0x560   :  { %10767 = vmatprep.subr.bf16.mxu0 %v13277_v51  ;;  %v13329_v51 = vld [vmem:[%s18332_s5 + $0x398] ss:$12 sps:$4 sm:$0xff]  }
 0x562   :  { %12685 = vmatpush3.bf16.msra.mxu1 %v13279_v52  ;;  %v13325_v52 = vld [vmem:[%s18332_s5 + $0x7b0] ss:$12 sps:$4 sm:$0xff]  }
 0x563   :  { %10768 = vmatpush1.bf16.msra.mxu0 %v13275_v54  ;;  %12686 = vmatprep.subr.bf16.mxu1 %v13283_v38  ;;  %v13333_v54 = vld [vmem:[%s18332_s5 + $0x470] ss:$12 sps:$4 sm:$0xff]   ;;  %v13332_v38 = vld [vmem:[%s18332_s5 + $0x7cc] ss:$12 sps:$4 sm:$0xff]  }
 0x564   :  { %10769 = vmatprep.subr.bf16.mxu0 %v13282_v39  ;;  %v13334_v39 = vld [vmem:[%s18332_s5 + $0x3b0] ss:$12 sps:$4 sm:$0xff]  }
 0x566   :  { %12687 = vmatpush3.bf16.msra.mxu1 %v13284_v9  ;;  %v13330_v9 = vld [vmem:[%s18332_s5 + $0x7c8] ss:$12 sps:$4 sm:$0xff]  }
 0x567   :  { %10770 = vmatpush1.bf16.msra.mxu0 %v13280_v40  ;;  %12688 = vmatprep.subr.bf16.mxu1 %v13288_v61  ;;  %v13338_v40 = vld [vmem:[%s18332_s5 + $0x548] ss:$12 sps:$4 sm:$0xff]   ;;  %v13337_v61 = vld [vmem:[%s18332_s5 + $0x7e4] ss:$12 sps:$4 sm:$0xff]  }
 0x568   :  { %10771 = vmatprep.subr.bf16.mxu0 %v13287_v63  ;;  %v13339_v63 = vld [vmem:[%s18332_s5 + $0x488] ss:$12 sps:$4 sm:$0xff]  }
 0x56a   :  { %12689 = vmatpush3.bf16.msra.mxu1 %v13289_v22  ;;  %v13335_v22 = vld [vmem:[%s18332_s5 + $0x7e0] ss:$12 sps:$4 sm:$0xff]  }
 0x56b   :  { %10772 = vmatpush1.bf16.msra.mxu0 %v13285_v36  ;;  %12690 = vmatprep.subr.bf16.mxu1 %v13293_v18  ;;  %v13343_v36 = vld [vmem:[%s18332_s5 + $0x560] ss:$12 sps:$4 sm:$0xff]   ;;  %v13342_v18 = vld [vmem:[%s18332_s5 + $0x7fc] ss:$12 sps:$4 sm:$0xff]  }
 0x56c   :  { %10773 = vmatprep.subr.bf16.mxu0 %v13292_v34  ;;  %v13344_v34 = vld [vmem:[%s18332_s5 + $0x4a0] ss:$12 sps:$4 sm:$0xff]  }
 0x56e   :  { %12691 = vmatpush3.bf16.msra.mxu1 %v13294_v1  ;;  %v13340_v1 = vld [vmem:[%s18332_s5 + $0x7f8] ss:$12 sps:$4 sm:$0xff]  }
 0x56f   :  { %10774 = vmatpush1.bf16.msra.mxu0 %v13290_v60  ;;  %12698 = vmatprep.subr.bf16.mxu1 %v13298_v10  ;;  %v13348_v60 = vld [vmem:[%s18332_s5 + $0x578] ss:$12 sps:$4 sm:$0xff]   ;;  %v13345_v10 = vld [vmem:[%s18332_s5 + $0x810] ss:$12 sps:$4 sm:$0xff]  }
 0x570   :  { %10775 = vmatprep.subr.bf16.mxu0 %v13297_v11  ;;  %v13353_v11 = vld [vmem:[%s18332_s5 + $0x590] ss:$12 sps:$4 sm:$0xff]  }
 0x571   :  { %10988 = vmatmul.mubr.bf16.vlgmr.msra.gmra.mrb[28].mxu1 %v17105_v26  ;;  %v1501_v26 = vrot.slane %v17473_v35, %v14015_v44 }
 0x572   :  { %12699 = vmatpush3.bf16.msra.mxu1 %v13299_v12  ;;  %11027 = vmatprep.mubr.bf16.mxu1 %v17116_v32  ;;  %v13307_v32 = vld [vmem:[%s18332_s5 + $0x754] ss:$12 sps:$4 sm:$0xff]   ;;  %v13352_v12 = vld [vmem:[%s18332_s5 + $0x82c] ss:$12 sps:$4 sm:$0xff]  }
 0x573   :  { %10776 = vmatpush1.bf16.msra.mxu0 %v13295_v13  ;;  %12700 = vmatprep.subr.bf16.mxu1 %v13303_v14  ;;  %v12904_v24 = vadd.f32 %v16571_v17, %v1501_v26  ;;  %v13318_v17 = vld [vmem:[%s18332_s5 + $0x428] ss:$12 sps:$4 sm:$0xff]   ;;  %v13354_v13 = vld [vmem:[%s18332_s5 + $0x4d0] ss:$12 sps:$4 sm:$0xff]   ;;  %v13363_v26 = vld [vmem:[%s18332_s5 + $0x5c0] ss:$12 sps:$4 sm:$0xff]  }
 0x574   :  { %10777 = vmatprep.subr.bf16.mxu0 %v13302_v15  ;;  %v13350_v14 = vld [vmem:[%s18332_s5 + $0x828] ss:$12 sps:$4 sm:$0xff]  }
 0x575   :  { %v7986_v58 = vmax.f32 %v12904_v24, 0.0  ;;  %v13358_v15 = vld [vmem:[%s18332_s5 + $0x5a8] ss:$12 sps:$4 sm:$0xff]   ;;  %v13369_v24 = vld [vmem:[%s18332_s5 + $0x518] ss:$12 sps:$4 sm:$0xff]  }
 0x576   :  { %12701 = vmatpush3.bf16.msra.mxu1 %v13304_v2  ;;  %v13357_v2 = vld [vmem:[%s18332_s5 + $0x844] ss:$12 sps:$4 sm:$0xff]  }
 0x577   :  { %10778 = vmatpush1.bf16.msra.mxu0 %v13300_v16  ;;  %12702 = vmatprep.subr.bf16.mxu1 %v13308_v19  ;;  %v17734_v46 = vpack.c.bf16 %v7986_v58, %v7986_v58  ;;  %v13359_v16 = vld [vmem:[%s18332_s5 + $0x4e8] ss:$12 sps:$4 sm:$0xff]   ;;  %v13355_v19 = vld [vmem:[%s18332_s5 + $0x840] ss:$12 sps:$4 sm:$0xff]  }
 0x578   :  { %10779 = vmatprep.subr.bf16.mxu0 %v13307_v32  ;;  %v13362_v32 = vld [vmem:[%s18332_s5 + $0x85c] ss:$12 sps:$4 sm:$0xff]  }
 0x579   :  { %v13378_v58 = vld [vmem:[%s18332_s5 + $0x6c8] ss:$12 sps:$4 sm:$0xff]  }
 0x57a   :  { %12703 = vmatpush3.bf16.msra.mxu1 %v13309_v33  ;;  %v13360_v33 = vld [vmem:[%s18332_s5 + $0x858] ss:$12 sps:$4 sm:$0xff]  }
 0x57b   :  { %10780 = vmatpush1.bf16.msra.mxu0 %v13305_v7  ;;  %12704 = vmatprep.subr.bf16.mxu1 %v13313_v23  ;;  %v13368_v7 = vld [vmem:[%s18332_s5 + $0x5d8] ss:$12 sps:$4 sm:$0xff]   ;;  %v13367_v23 = vld [vmem:[%s18332_s5 + $0x874] ss:$12 sps:$4 sm:$0xff]  }
 0x57c   :  { %10781 = vmatprep.subr.bf16.mxu0 %v13312_v59  ;;  %v13365_v59 = vld [vmem:[%s18332_s5 + $0x870] ss:$12 sps:$4 sm:$0xff]  }
 0x57e   :  { %12705 = vmatpush3.bf16.msra.mxu1 %v13314_v41  ;;  %v13372_v41 = vld [vmem:[%s18332_s5 + $0x88c] ss:$12 sps:$4 sm:$0xff]  }
 0x57f   :  { %10782 = vmatpush1.bf16.msra.mxu0 %v13310_v27  ;;  %12706 = vmatprep.subr.bf16.mxu1 %v13318_v17  ;;  %v13374_v27 = vld [vmem:[%s18332_s5 + $0x530] ss:$12 sps:$4 sm:$0xff]   ;;  %v13370_v17 = vld [vmem:[%s18332_s5 + $0x888] ss:$12 sps:$4 sm:$0xff]  }
 0x580   :  { %10792 = vmatprep.subr.bf16.mxu0 %v13317_v6  ;;  %v13377_v6 = vld [vmem:[%s18332_s5 + $0x8a4] ss:$12 sps:$4 sm:$0xff]  }
 0x582   :  { %10784 = vmatmul.mubr.bf16.vlgmr.msra.gmra.mrb[20].mxu0 %v17734_v46  ;;  %12707 = vmatpush3.bf16.msra.mxu1 %v13319_v28  ;;  %v13375_v28 = vld [vmem:[%s18332_s5 + $0x8a0] ss:$12 sps:$4 sm:$0xff]  }
 0x583   :  { %10793 = vmatpush1.bf16.msra.mxu0 %v13315_v3  ;;  %10824 = vmatprep.mubr.bf16.mxu0 %v17742_v37  ;;  %v13383_v3 = vld [vmem:[%s18332_s5 + $0x6e0] ss:$12 sps:$4 sm:$0xff]  }
 0x584   :  { %10794 = vmatprep.subr.bf16.mxu0 %v13322_v5  ;;  %12708 = vmatprep.subr.bf16.mxu1 %v13323_v55  ;;  %v13382_v5 = vld [vmem:[%s18332_s5 + $0x8bc] ss:$12 sps:$4 sm:$0xff]   ;;  %v13384_v55 = vld [vmem:[%s18332_s5 + $0x620] ss:$12 sps:$4 sm:$0xff]  }
 0x586   :  { %12709 = vmatpush3.bf16.msra.mxu1 %v13324_v21  ;;  %v13380_v21 = vld [vmem:[%s18332_s5 + $0x8b8] ss:$12 sps:$4 sm:$0xff]  }
 0x587   :  { %10795 = vmatpush1.bf16.msra.mxu0 %v13320_v50  ;;  %12710 = vmatprep.subr.bf16.mxu1 %v13328_v29  ;;  %v13388_v50 = vld [vmem:[%s18332_s5 + $0x6f8] ss:$12 sps:$4 sm:$0xff]   ;;  %v1521_v29 = vrot.slane %v17473_v35, %v14056_v4 }
 0x588   :  { %10796 = vmatprep.subr.bf16.mxu0 %v13327_v45  ;;  %v13389_v45 = vld [vmem:[%s18332_s5 + $0x638] ss:$12 sps:$4 sm:$0xff]  }
 0x589   :  { %v13392_v4 = vld [vmem:[%s18332_s5 + $0x8ec] ss:$12 sps:$4 sm:$0xff]  }
 0x58a   :  { %12711 = vmatpush3.bf16.msra.mxu1 %v13329_v51  ;;  %v13385_v51 = vld [vmem:[%s18332_s5 + $0x8d0] ss:$12 sps:$4 sm:$0xff]  }
 0x58b   :  { %10797 = vmatpush1.bf16.msra.mxu0 %v13325_v52  ;;  %12712 = vmatprep.subr.bf16.mxu1 %v13333_v54  ;;  %v13393_v52 = vld [vmem:[%s18332_s5 + $0x710] ss:$12 sps:$4 sm:$0xff]  }
 0x58c   :  { %10798 = vmatprep.subr.bf16.mxu0 %v13332_v38  ;;  %v12909_v38 = vadd.f32 %v17392_v49, %v1521_v29  ;;  %v13397_v49 = vld [vmem:[%s18332_s5 + $0x904] ss:$12 sps:$4 sm:$0xff]  }
 0x58d   :  { %v13445_v29 = vld [vmem:[%s18332_s5 + $0x9f0] ss:$12 sps:$4 sm:$0xff]  }
 0x58e   :  { %12713 = vmatpush3.bf16.msra.mxu1 %v13334_v39  ;;  %v13394_v39 = vld [vmem:[%s18332_s5 + $0x650] ss:$12 sps:$4 sm:$0xff]  }
 0x58f   :  { %10799 = vmatpush1.bf16.msra.mxu0 %v13330_v9  ;;  %12720 = vmatprep.subr.bf16.mxu1 %v13338_v40  ;;  %v13390_v9 = vld [vmem:[%s18332_s5 + $0x8e8] ss:$12 sps:$4 sm:$0xff]  }
 0x590   :  { %10800 = vmatprep.subr.bf16.mxu0 %v13337_v61  ;;  %v7991_v61 = vmax.f32 %v12909_v38, 0.0  ;;  %v13457_v38 = vld [vmem:[%s18332_s5 + $0xa24] ss:$12 sps:$4 sm:$0xff]  }
 0x591   :  { %11028 = vmatmul.mubr.bf16.vlgmr.msra.gmra.mrb[32].mxu1 %v17311_v43  ;;  %v13347_v43 = vld [vmem:[%s18332_s5 + $0x814] ss:$12 sps:$4 sm:$0xff]  }
 0x592   :  { %12721 = vmatpush3.bf16.msra.mxu1 %v13339_v63  ;;  %11067 = vmatprep.mubr.bf16.mxu1 %v17322_v56  ;;  %v13349_v56 = vld [vmem:[%s18332_s5 + $0x4b8] ss:$12 sps:$4 sm:$0xff]   ;;  %v13399_v63 = vld [vmem:[%s18332_s5 + $0x668] ss:$12 sps:$4 sm:$0xff]  }
 0x593   :  { %10801 = vmatpush1.bf16.msra.mxu0 %v13335_v22  ;;  %12722 = vmatprep.subr.bf16.mxu1 %v13343_v36  ;;  %v13395_v22 = vld [vmem:[%s18332_s5 + $0x900] ss:$12 sps:$4 sm:$0xff]  }
 0x594   :  { %10802 = vmatprep.subr.bf16.mxu0 %v13342_v18  ;;  %v13402_v18 = vld [vmem:[%s18332_s5 + $0x91c] ss:$12 sps:$4 sm:$0xff]  }
 0x596   :  { %12723 = vmatpush3.bf16.msra.mxu1 %v13344_v34  ;;  %v13403_v34 = vld [vmem:[%s18332_s5 + $0x740] ss:$12 sps:$4 sm:$0xff]  }
 0x597   :  { %10803 = vmatpush1.bf16.msra.mxu0 %v13340_v1  ;;  %12724 = vmatprep.subr.bf16.mxu1 %v13348_v60  ;;  %v17950_v1 = vpack.c.bf16 %v7991_v61, %v7991_v61  ;;  %v13404_v60 = vld [vmem:[%s18332_s5 + $0x680] ss:$12 sps:$4 sm:$0xff]   ;;  %v13460_v61 = vld [vmem:[%s18332_s5 + $0xa38] ss:$12 sps:$4 sm:$0xff]  }
 0x598   :  { %10804 = vmatprep.subr.bf16.mxu0 %v13347_v43  ;;  %v13400_v43 = vld [vmem:[%s18332_s5 + $0x918] ss:$12 sps:$4 sm:$0xff]  }
 0x59a   :  { %12725 = vmatpush3.bf16.msra.mxu1 %v13349_v56  ;;  %v13408_v56 = vld [vmem:[%s18332_s5 + $0x758] ss:$12 sps:$4 sm:$0xff]  }
 0x59b   :  { %10805 = vmatpush1.bf16.msra.mxu0 %v13345_v10  ;;  %12726 = vmatprep.subr.bf16.mxu1 %v13353_v11  ;;  %v13407_v10 = vld [vmem:[%s18332_s5 + $0x934] ss:$12 sps:$4 sm:$0xff]   ;;  %v13409_v11 = vld [vmem:[%s18332_s5 + $0x698] ss:$12 sps:$4 sm:$0xff]  }
 0x59c   :  { %10806 = vmatprep.subr.bf16.mxu0 %v13352_v12  ;;  %v13405_v12 = vld [vmem:[%s18332_s5 + $0x930] ss:$12 sps:$4 sm:$0xff]  }
 0x59e   :  { %12727 = vmatpush3.bf16.msra.mxu1 %v13354_v13  ;;  %v13413_v13 = vld [vmem:[%s18332_s5 + $0x770] ss:$12 sps:$4 sm:$0xff]  }
 0x59f   :  { %10807 = vmatpush1.bf16.msra.mxu0 %v13350_v14  ;;  %12728 = vmatprep.subr.bf16.mxu1 %v13358_v15  ;;  %v13412_v14 = vld [vmem:[%s18332_s5 + $0x94c] ss:$12 sps:$4 sm:$0xff]   ;;  %v13414_v15 = vld [vmem:[%s18332_s5 + $0x6b0] ss:$12 sps:$4 sm:$0xff]  }
 0x5a0   :  { %10808 = vmatprep.subr.bf16.mxu0 %v13357_v2  ;;  %v13410_v2 = vld [vmem:[%s18332_s5 + $0x948] ss:$12 sps:$4 sm:$0xff]  }
 0x5a2   :  { %12729 = vmatpush3.bf16.msra.mxu1 %v13359_v16  ;;  %v13418_v16 = vld [vmem:[%s18332_s5 + $0x848] ss:$12 sps:$4 sm:$0xff]  }
 0x5a3   :  { %10809 = vmatpush1.bf16.msra.mxu0 %v13355_v19  ;;  %12730 = vmatprep.subr.bf16.mxu1 %v13363_v26  ;;  %v13417_v19 = vld [vmem:[%s18332_s5 + $0x964] ss:$12 sps:$4 sm:$0xff]   ;;  %v13419_v26 = vld [vmem:[%s18332_s5 + $0x788] ss:$12 sps:$4 sm:$0xff]  }
 0x5a4   :  { %10810 = vmatprep.subr.bf16.mxu0 %v13362_v32  ;;  %v13415_v32 = vld [vmem:[%s18332_s5 + $0x960] ss:$12 sps:$4 sm:$0xff]  }
 0x5a6   :  { %12731 = vmatpush3.bf16.msra.mxu1 %v13364_v62  ;;  %v13423_v62 = vld [vmem:[%s18332_s5 + $0x860] ss:$12 sps:$4 sm:$0xff]  }
 0x5a7   :  { %10811 = vmatpush1.bf16.msra.mxu0 %v13360_v33  ;;  %12732 = vmatprep.subr.bf16.mxu1 %v13368_v7  ;;  %v13422_v33 = vld [vmem:[%s18332_s5 + $0x97c] ss:$12 sps:$4 sm:$0xff]   ;;  %v13424_v7 = vld [vmem:[%s18332_s5 + $0x7a0] ss:$12 sps:$4 sm:$0xff]  }
 0x5a8   :  { %10812 = vmatprep.subr.bf16.mxu0 %v13367_v23  ;;  %v13420_v23 = vld [vmem:[%s18332_s5 + $0x978] ss:$12 sps:$4 sm:$0xff]  }
 0x5aa   :  { %12733 = vmatpush3.bf16.msra.mxu1 %v13369_v24  ;;  %v13428_v24 = vld [vmem:[%s18332_s5 + $0x878] ss:$12 sps:$4 sm:$0xff]  }
 0x5ab   :  { %10813 = vmatpush1.bf16.msra.mxu0 %v13365_v59  ;;  %12734 = vmatprep.subr.bf16.mxu1 %v13373_v25  ;;  %v13425_v59 = vld [vmem:[%s18332_s5 + $0x990] ss:$12 sps:$4 sm:$0xff]  }
 0x5ac   :  { %10814 = vmatprep.subr.bf16.mxu0 %v13372_v41  ;;  %v13433_v25 = vld [vmem:[%s18332_s5 + $0x890] ss:$12 sps:$4 sm:$0xff]   ;;  %v13432_v41 = vld [vmem:[%s18332_s5 + $0x9ac] ss:$12 sps:$4 sm:$0xff]  }
 0x5ae   :  { %12735 = vmatpush3.bf16.msra.mxu1 %v13374_v27  ;;  %v13434_v27 = vld [vmem:[%s18332_s5 + $0x7d0] ss:$12 sps:$4 sm:$0xff]  }
 0x5af   :  { %10815 = vmatpush1.bf16.msra.mxu0 %v13370_v17  ;;  %12742 = vmatprep.subr.bf16.mxu1 %v13378_v58  ;;  %v13430_v17 = vld [vmem:[%s18332_s5 + $0x9a8] ss:$12 sps:$4 sm:$0xff]  }
 0x5b0   :  { %10816 = vmatprep.subr.bf16.mxu0 %v13377_v6  ;;  %v13438_v58 = vld [vmem:[%s18332_s5 + $0x8a8] ss:$12 sps:$4 sm:$0xff]   ;;  %v13437_v6 = vld [vmem:[%s18332_s5 + $0x9c4] ss:$12 sps:$4 sm:$0xff]  }
 0x5b1   :  { %11068 = vmatmul.mubr.bf16.vlgmr.msra.gmra.mrb[36].mxu1 %v17526_v8  ;;  %v1509_v8 = vrot.slane %v17473_v35, %v14207_v57 }
 0x5b2   :  { %12743 = vmatpush3.bf16.msra.mxu1 %v13379_v20  ;;  %11107 = vmatprep.mubr.bf16.mxu1 %v17534_v53  ;;  %v13387_v53 = vld [vmem:[%s18332_s5 + $0x8d4] ss:$12 sps:$4 sm:$0xff]  }
 0x5b3   :  { %10817 = vmatpush1.bf16.msra.mxu0 %v13375_v28  ;;  %12744 = vmatprep.subr.bf16.mxu1 %v13383_v3  ;;  %v12906_v54 = vadd.f32 %v17329_v31, %v1509_v8  ;;  %v13398_v31 = vld [vmem:[%s18332_s5 + $0x728] ss:$12 sps:$4 sm:$0xff]   ;;  %v13435_v28 = vld [vmem:[%s18332_s5 + $0x9c0] ss:$12 sps:$4 sm:$0xff]  }
 0x5b4   :  { %10818 = vmatprep.subr.bf16.mxu0 %v13382_v5  ;;  %v13439_v20 = vld [vmem:[%s18332_s5 + $0x7e8] ss:$12 sps:$4 sm:$0xff]   ;;  %v13443_v3 = vld [vmem:[%s18332_s5 + $0x8c0] ss:$12 sps:$4 sm:$0xff]  }
 0x5b5   :  { %v7988_v40 = vmax.f32 %v12906_v54, 0.0  ;;  %v13442_v5 = vld [vmem:[%s18332_s5 + $0x9dc] ss:$12 sps:$4 sm:$0xff]   ;;  %v13447_v8 = vld [vmem:[%s18332_s5 + $0x9f4] ss:$12 sps:$4 sm:$0xff]  }
 0x5b6   :  { %12745 = vmatpush3.bf16.msra.mxu1 %v13384_v55  ;;  %v13444_v55 = vld [vmem:[%s18332_s5 + $0x800] ss:$12 sps:$4 sm:$0xff]   ;;  %v13450_v54 = vld [vmem:[%s18332_s5 + $0xa08] ss:$12 sps:$4 sm:$0xff]  }
 0x5b7   :  { %10819 = vmatpush1.bf16.msra.mxu0 %v13380_v21  ;;  %12746 = vmatprep.subr.bf16.mxu1 %v13388_v50  ;;  %v17942_v36 = vpack.c.bf16 %v7988_v40, %v7988_v40  ;;  %v13440_v21 = vld [vmem:[%s18332_s5 + $0x9d8] ss:$12 sps:$4 sm:$0xff]   ;;  %v13462_v40 = vld [vmem:[%s18332_s5 + $0xa3c] ss:$12 sps:$4 sm:$0xff]  }
 0x5b8   :  { %10820 = vmatprep.subr.bf16.mxu0 %v13387_v53  ;;  %v13448_v50 = vld [vmem:[%s18332_s5 + $0x8d8] ss:$12 sps:$4 sm:$0xff]  }
 0x5b9   :  { %v13449_v53 = vld [vmem:[%s18332_s5 + $0x818] ss:$12 sps:$4 sm:$0xff]  }
 0x5ba   :  { %12747 = vmatpush3.bf16.msra.mxu1 %v13389_v45  ;;  %v13453_v45 = vld [vmem:[%s18332_s5 + $0x8f0] ss:$12 sps:$4 sm:$0xff]  }
 0x5bb   :  { %10821 = vmatpush1.bf16.msra.mxu0 %v13385_v51  ;;  %12748 = vmatprep.subr.bf16.mxu1 %v13393_v52  ;;  %v13452_v51 = vld [vmem:[%s18332_s5 + $0xa0c] ss:$12 sps:$4 sm:$0xff]   ;;  %v13454_v52 = vld [vmem:[%s18332_s5 + $0x830] ss:$12 sps:$4 sm:$0xff]  }
 0x5bc   :  { %10822 = vmatprep.subr.bf16.mxu0 %v13392_v4  ;;  %v13458_v4 = vld [vmem:[%s18332_s5 + $0x9c8] ss:$12 sps:$4 sm:$0xff]  }
 0x5be   :  { %12749 = vmatpush3.bf16.msra.mxu1 %v13394_v39  ;;  %v13459_v39 = vld [vmem:[%s18332_s5 + $0x908] ss:$12 sps:$4 sm:$0xff]  }
 0x5bf   :  { %10823 = vmatpush1.bf16.msra.mxu0 %v13390_v9  ;;  %12750 = vmatprep.subr.bf16.mxu1 %v13398_v31  ;;  %v13455_v9 = vld [vmem:[%s18332_s5 + $0xa20] ss:$12 sps:$4 sm:$0xff]  }
 0x5c0   :  { %10833 = vmatprep.subr.bf16.mxu0 %v13397_v49  ;;  %v13463_v31 = vld [vmem:[%s18332_s5 + $0x9e0] ss:$12 sps:$4 sm:$0xff]  }
 0x5c1   :  { %v13464_v49 = vld [vmem:[%s18332_s5 + $0x920] ss:$12 sps:$4 sm:$0xff]  }
 0x5c2   :  { %10825 = vmatmul.mubr.bf16.vlgmr.msra.gmra.mrb[20].mxu0 %v17942_v36  ;;  %12751 = vmatpush3.bf16.msra.mxu1 %v13399_v63  ;;  %v13468_v63 = vld [vmem:[%s18332_s5 + $0x9f8] ss:$12 sps:$4 sm:$0xff]  }
 0x5c3   :  { %10834 = vmatpush1.bf16.msra.mxu0 %v13395_v22  ;;  %10865 = vmatprep.mubr.bf16.mxu0 %v17950_v1  ;;  %v1517_v22 = vrot.slane %v17473_v35, %v14051_v0  ;;  %v13473_v0 = vld [vmem:[%s18332_s5 + $0xa10] ss:$12 sps:$4 sm:$0xff]  }
 0x5c4   :  { %10835 = vmatprep.subr.bf16.mxu0 %v13402_v18  ;;  %12752 = vmatprep.subr.bf16.mxu1 %v13403_v34  ;;  %v13469_v18 = vld [vmem:[%s18332_s5 + $0x938] ss:$12 sps:$4 sm:$0xff]   ;;  %v13465_v34 = vld [vmem:[%s18332_s5 + $0xa50] ss:$12 sps:$4 sm:$0xff]  }
 0x5c6   :  { %12753 = vmatpush3.bf16.msra.mxu1 %v13404_v60  ;;  %v13472_v60 = vld [vmem:[%s18332_s5 + $0xa6c] ss:$12 sps:$4 sm:$0xff]  }
 0x5c7   :  { %10836 = vmatpush1.bf16.msra.mxu0 %v13400_v43  ;;  %12754 = vmatprep.subr.bf16.mxu1 %v13408_v56  ;;  %v13474_v43 = vld [vmem:[%s18332_s5 + $0x950] ss:$12 sps:$4 sm:$0xff]   ;;  %v13470_v56 = vld [vmem:[%s18332_s5 + $0xa68] ss:$12 sps:$4 sm:$0xff]  }
 0x5c8   :  { %10837 = vmatprep.subr.bf16.mxu0 %v13407_v10 }
 0x5ca   :  { %12755 = vmatpush3.bf16.msra.mxu1 %v13409_v11  ;;  %v13477_v11 = vld [vmem:[%s18332_s5 + $0xa84] ss:$12 sps:$4 sm:$0xff]  }
 0x5cb   :  { %10838 = vmatpush1.bf16.msra.mxu0 %v13405_v12  ;;  %12756 = vmatprep.subr.bf16.mxu1 %v13413_v13  ;;  %v13479_v12 = vld [vmem:[%s18332_s5 + $0x968] ss:$12 sps:$4 sm:$0xff]   ;;  %v13475_v13 = vld [vmem:[%s18332_s5 + $0xa80] ss:$12 sps:$4 sm:$0xff]  }
 0x5cc   :  { %10839 = vmatprep.subr.bf16.mxu0 %v13412_v14  ;;  %v13483_v14 = vld [vmem:[%s18332_s5 + $0xa40] ss:$12 sps:$4 sm:$0xff]  }
 0x5ce   :  { %12757 = vmatpush3.bf16.msra.mxu1 %v13414_v15 }
 0x5cf   :  { %10840 = vmatpush1.bf16.msra.mxu0 %v13410_v2  ;;  %12764 = vmatprep.subr.bf16.mxu1 %v13418_v16  ;;  %v13482_v2 = vld [vmem:[%s18332_s5 + $0xa9c] ss:$12 sps:$4 sm:$0xff]   ;;  %v1529_v16 = vrot.slane %v17473_v35, %v14092_v30  ;;  %v13487_v30 = vld [vmem:[%s18332_s5 + $0xab4] ss:$12 sps:$4 sm:$0xff]  }
 0x5d0   :  { %10841 = vmatprep.subr.bf16.mxu0 %v13417_v19  ;;  %v13484_v19 = vld [vmem:[%s18332_s5 + $0x980] ss:$12 sps:$4 sm:$0xff]  }
 0x5d1   :  { %11108 = vmatmul.mubr.bf16.vlgmr.msra.gmra.mrb[40].mxu1 %v17734_v46  ;;  %v13427_v46 = vld [vmem:[%s18332_s5 + $0x994] ss:$12 sps:$4 sm:$0xff]  }
 0x5d2   :  { %12765 = vmatpush3.bf16.msra.mxu1 %v13419_v26  ;;  %11147 = vmatprep.mubr.bf16.mxu1 %v17742_v37  ;;  %v13429_v37 = vld [vmem:[%s18332_s5 + $0x7b8] ss:$12 sps:$4 sm:$0xff]  }
 0x5d3   :  { %10842 = vmatpush1.bf16.msra.mxu0 %v13415_v32  ;;  %12766 = vmatprep.subr.bf16.mxu1 %v13423_v62  ;;  %v13480_v26 = vld [vmem:[%s18332_s5 + $0xa98] ss:$12 sps:$4 sm:$0xff]  }
 0x5d4   :  { %10843 = vmatprep.subr.bf16.mxu0 %v13422_v33  ;;  %v13488_v32 = vld [vmem:[%s18332_s5 + $0xa58] ss:$12 sps:$4 sm:$0xff]  }
 0x5d6   :  { %12767 = vmatpush3.bf16.msra.mxu1 %v13424_v7 }
 0x5d7   :  { %10844 = vmatpush1.bf16.msra.mxu0 %v13420_v23  ;;  %12768 = vmatprep.subr.bf16.mxu1 %v13428_v24  ;;  %v13489_v23 = vld [vmem:[%s18332_s5 + $0x998] ss:$12 sps:$4 sm:$0xff]  }
 0x5d8   :  { %10845 = vmatprep.subr.bf16.mxu0 %v13427_v46  ;;  %v13485_v46 = vld [vmem:[%s18332_s5 + $0xab0] ss:$12 sps:$4 sm:$0xff]  }
 0x5da   :  { %12769 = vmatpush3.bf16.msra.mxu1 %v13429_v37  ;;  %v13493_v37 = vld [vmem:[%s18332_s5 + $0xa70] ss:$12 sps:$4 sm:$0xff]  }
 0x5db   :  { %10846 = vmatpush1.bf16.msra.mxu0 %v13425_v59  ;;  %12770 = vmatprep.subr.bf16.mxu1 %v13433_v25  ;;  %v13492_v25 = vld [vmem:[%s18332_s5 + $0xacc] ss:$12 sps:$4 sm:$0xff]  }
 0x5dc   :  { %10847 = vmatprep.subr.bf16.mxu0 %v13432_v41 }
 0x5de   :  { %12771 = vmatpush3.bf16.msra.mxu1 %v13434_v27  ;;  %v13494_v27 = vld [vmem:[%s18332_s5 + $0x9b0] ss:$12 sps:$4 sm:$0xff]  }
 0x5df   :  { %10848 = vmatpush1.bf16.msra.mxu0 %v13430_v17  ;;  %12772 = vmatprep.subr.bf16.mxu1 %v13438_v58  ;;  %v13490_v17 = vld [vmem:[%s18332_s5 + $0xac8] ss:$12 sps:$4 sm:$0xff]  }
 0x5e0   :  { %10849 = vmatprep.subr.bf16.mxu0 %v13437_v6  ;;  %v13498_v58 = vld [vmem:[%s18332_s5 + $0xb48] ss:$12 sps:$4 sm:$0xff]   ;;  %v13497_v6 = vld [vmem:[%s18332_s5 + $0xae4] ss:$12 sps:$4 sm:$0xff]  }
 0x5e2   :  { %12773 = vmatpush3.bf16.msra.mxu1 %v13439_v20  ;;  %v13499_v20 = vld [vmem:[%s18332_s5 + $0xa88] ss:$12 sps:$4 sm:$0xff]  }
 0x5e3   :  { %10850 = vmatpush1.bf16.msra.mxu0 %v13435_v28  ;;  %12774 = vmatprep.subr.bf16.mxu1 %v13443_v3  ;;  %v13495_v28 = vld [vmem:[%s18332_s5 + $0xae0] ss:$12 sps:$4 sm:$0xff]  }
 0x5e4   :  { %10851 = vmatprep.subr.bf16.mxu0 %v13442_v5  ;;  %v13503_v3 = vld [vmem:[%s18332_s5 + $0xb60] ss:$12 sps:$4 sm:$0xff]   ;;  %v13502_v5 = vld [vmem:[%s18332_s5 + $0xafc] ss:$12 sps:$4 sm:$0xff]  }
 0x5e6   :  { %12775 = vmatpush3.bf16.msra.mxu1 %v13444_v55  ;;  %v13504_v55 = vld [vmem:[%s18332_s5 + $0xaa0] ss:$12 sps:$4 sm:$0xff]  }
 0x5e7   :  { %10852 = vmatpush1.bf16.msra.mxu0 %v13440_v21  ;;  %12776 = vmatprep.subr.bf16.mxu1 %v13448_v50  ;;  %v13500_v21 = vld [vmem:[%s18332_s5 + $0xaf8] ss:$12 sps:$4 sm:$0xff]  }
 0x5e8   :  { %10853 = vmatprep.subr.bf16.mxu0 %v13447_v8  ;;  %v13508_v50 = vld [vmem:[%s18332_s5 + $0xb78] ss:$12 sps:$4 sm:$0xff]   ;;  %v13507_v8 = vld [vmem:[%s18332_s5 + $0xb14] ss:$12 sps:$4 sm:$0xff]  }
 0x5ea   :  { %12777 = vmatpush3.bf16.msra.mxu1 %v13449_v53  ;;  %v13509_v53 = vld [vmem:[%s18332_s5 + $0xab8] ss:$12 sps:$4 sm:$0xff]  }
 0x5eb   :  { %10854 = vmatpush1.bf16.msra.mxu0 %v13445_v29  ;;  %12778 = vmatprep.subr.bf16.mxu1 %v13453_v45  ;;  %v13505_v29 = vld [vmem:[%s18332_s5 + $0xb10] ss:$12 sps:$4 sm:$0xff]  }
 0x5ec   :  { %10855 = vmatprep.subr.bf16.mxu0 %v13452_v51  ;;  %v13513_v45 = vld [vmem:[%s18332_s5 + $0xb90] ss:$12 sps:$4 sm:$0xff]   ;;  %v13512_v51 = vld [vmem:[%s18332_s5 + $0xb2c] ss:$12 sps:$4 sm:$0xff]  }
 0x5ee   :  { %12779 = vmatpush3.bf16.msra.mxu1 %v13454_v52  ;;  %v13514_v52 = vld [vmem:[%s18332_s5 + $0xad0] ss:$12 sps:$4 sm:$0xff]  }
 0x5ef   :  { %10856 = vmatpush1.bf16.msra.mxu0 %v13450_v54  ;;  %12786 = vmatprep.subr.bf16.mxu1 %v13458_v4  ;;  %v13510_v54 = vld [vmem:[%s18332_s5 + $0xb28] ss:$12 sps:$4 sm:$0xff]  }
 0x5f0   :  { %10857 = vmatprep.subr.bf16.mxu0 %v13457_v38  ;;  %v13518_v4 = vld [vmem:[%s18332_s5 + $0xba8] ss:$12 sps:$4 sm:$0xff]   ;;  %v13517_v38 = vld [vmem:[%s18332_s5 + $0xb44] ss:$12 sps:$4 sm:$0xff]  }
 0x5f1   :  { %11148 = vmatmul.mubr.bf16.vlgmr.msra.gmra.mrb[44].mxu1 %v17942_v36  ;;  %v13467_v36 = vld [vmem:[%s18332_s5 + $0xa54] ss:$12 sps:$4 sm:$0xff]  }
 0x5f2   :  { %12787 = vmatpush3.bf16.msra.mxu1 %v13459_v39  ;;  %11187 = vmatprep.mubr.bf16.mxu1 %v17950_v1  ;;  %v12908_v1 = vadd.f32 %v17390_v48, %v1517_v22  ;;  %v13478_v48 = vld [vmem:[%s18332_s5 + $0xa28] ss:$12 sps:$4 sm:$0xff]   ;;  %v13520_v22 = vld [vmem:[%s18332_s5 + $0xb58] ss:$12 sps:$4 sm:$0xff]  }
 0x5f3   :  { %10858 = vmatpush1.bf16.msra.mxu0 %v13455_v9  ;;  %12788 = vmatprep.subr.bf16.mxu1 %v13463_v31  ;;  %v13519_v39 = vld [vmem:[%s18332_s5 + $0xae8] ss:$12 sps:$4 sm:$0xff]   ;;  %v13515_v9 = vld [vmem:[%s18332_s5 + $0xb40] ss:$12 sps:$4 sm:$0xff]  }
 0x5f4   :  { %10859 = vmatprep.subr.bf16.mxu0 %v13462_v40  ;;  %v7990_v10 = vmax.f32 %v12908_v1, 0.0  ;;  %v13523_v31 = vld [vmem:[%s18332_s5 + $0xbc0] ss:$12 sps:$4 sm:$0xff]   ;;  %v13522_v40 = vld [vmem:[%s18332_s5 + $0xb5c] ss:$12 sps:$4 sm:$0xff]  }
 0x5f6   :  { %12789 = vmatpush3.bf16.msra.mxu1 %v13464_v49  ;;  %v8006_v15 = vpack.c.bf16 %v7990_v10, %v7990_v10  ;;  %v13524_v49 = vld [vmem:[%s18332_s5 + $0xb00] ss:$12 sps:$4 sm:$0xff]   ;;  %v13533_v10 = vld [vmem:[%s18332_s5 + $0xbf0] ss:$12 sps:$4 sm:$0xff]  }
 0x5f7   :  { %10860 = vmatpush1.bf16.msra.mxu0 %v13460_v61  ;;  %12790 = vmatprep.subr.bf16.mxu1 %v13468_v63  ;;  %v13549_v61 = vld [vmem:[%s18331_s4 + $0x8] sm:$0xff] }
 0x5f8   :  { %10861 = vmatprep.subr.bf16.mxu0 %v13467_v36  ;;  %v1525_v63 = vrot.slane %v13549_v61, %v14263_v42  ;;  %v13528_v36 = vld [vmem:[%s18332_s5 + $0xbd8] ss:$12 sps:$4 sm:$0xff]  }
 0x5f9   :  { %v13529_v42 = vld [vmem:[%s18332_s5 + $0xb18] ss:$12 sps:$4 sm:$0xff]  }
 0x5fa   :  { %12791 = vmatpush3.bf16.msra.mxu1 %v13469_v18 }
 0x5fb   :  { %10862 = vmatpush1.bf16.msra.mxu0 %v13465_v34  ;;  %12792 = vmatprep.subr.bf16.mxu1 %v13473_v0  ;;  %v13527_v34 = vld [vmem:[%s18332_s5 + $0xb74] ss:$12 sps:$4 sm:$0xff]  }
 0x5fc   :  { %10863 = vmatprep.subr.bf16.mxu0 %v13472_v60 }
 0x5fe   :  { %12793 = vmatpush3.bf16.msra.mxu1 %v13474_v43 }
 0x5ff   :  { %10864 = vmatpush1.bf16.msra.mxu0 %v13470_v56  ;;  %12794 = vmatprep.subr.bf16.mxu1 %v13478_v48  ;;  %v13525_v48 = vld [vmem:[%s18332_s5 + $0xb70] ss:$12 sps:$4 sm:$0xff]  }
 0x600   :  { %10874 = vmatprep.subr.bf16.mxu0 %v13477_v11  ;;  %v13532_v11 = vld [vmem:[%s18332_s5 + $0xb8c] ss:$12 sps:$4 sm:$0xff]  }
 0x602   :  { %10866 = vmatmul.mubr.bf16.vlgmr.msra.gmra.mrb[20].mxu0 %v8006_v15  ;;  %12795 = vmatpush3.bf16.msra.mxu1 %v13479_v12  ;;  %v13534_v12 = vld [vmem:[%s18332_s5 + $0xb30] ss:$12 sps:$4 sm:$0xff]  }
 0x603   :  { %10875 = vmatpush1.bf16.msra.mxu0 %v13475_v13  ;;  %12796 = vmatprep.subr.bf16.mxu1 %v13483_v14  ;;  %v13530_v14 = vld [vmem:[%s18332_s5 + $0xb88] ss:$12 sps:$4 sm:$0xff]  }
 0x604   :  { %v18164_v62 = vpop.f32.mrb[20].mxu1  ;;  %10876 = vmatprep.subr.bf16.mxu0 %v13482_v2 }
 0x605   :  { %v7973_v35 = vpop.f32.mrb[21].mxu1  ;;  %v12910_v43 = vadd.f32 %v18164_v62, %v1525_v63  ;;  %v13541_v62 = vld [vmem:[%s18332_s5 + $0xbd0] ss:$12 sps:$4 sm:$0xff]  }
 0x606   :  { %v12911_v33 = vadd.f32 %v7973_v35, %v1529_v16  ;;  %v7975_v7 = vpop.f32.mrb[22].mxu1  ;;  %12797 = vmatpush3.bf16.msra.mxu1 %v13484_v19  ;;  %v13535_v16 = vld [vmem:[%s18332_s5 + $0xba0] ss:$12 sps:$4 sm:$0xff]   ;;  %v13540_v19 = vld [vmem:[%s18332_s5 + $0xbbc] ss:$12 sps:$4 sm:$0xff]  }
 0x607   :  { %10877 = vmatpush1.bf16.msra.mxu0 %v13480_v26  ;;  %v7976_v24 = vpop.f32.mrb[23].mxu1  ;;  %12798 = vmatprep.subr.bf16.mxu1 %v13488_v32  ;;  %v7992_v13 = vmax.f32 %v12910_v43, 0.0  ;;  %v13538_v26 = vld [vmem:[%s18332_s5 + $0xbb8] ss:$12 sps:$4 sm:$0xff]   ;;  %v13543_v32 = vld [vmem:[%s18332_s5 + $0xbd4] ss:$12 sps:$4 sm:$0xff]  }
 0x608   :  { %v7993_v59 = vmax.f32 %v12911_v33, 0.0  ;;  %10878 = vmatprep.subr.bf16.mxu0 %v13487_v30  ;;  %v13546_v30 = vld [vmem:[%s18332_s5 + $0xbec] ss:$12 sps:$4 sm:$0xff]   ;;  %v13544_v35 = vld [vmem:[%s18332_s5 + $0xbe8] ss:$12 sps:$4 sm:$0xff]  }
 0x609   :  { %v8008_v2 = vpack.c.bf16 %v7992_v13, %v7992_v13  ;;  %v8522_v33 = vld [vmem:[%s18333_s6] sm:$0x7] }
 0x60a   :  { %v8009_v41 = vpack.c.bf16 %v7993_v59, %v7993_v59  ;;  %12799 = vmatpush3.bf16.msra.mxu1 %v13489_v23  ;;  %v8535_v7 = vrot.slane %v8522_v33, %v14207_v57  ;;  %v8527_v43 = vrot.slane %v8522_v33, %v14015_v44 }
 0x60b   :  { %10879 = vmatpush1.bf16.msra.mxu0 %v13485_v46  ;;  %12800 = vmatprep.subr.bf16.mxu1 %v13493_v37 }
 0x60c   :  { %10906 = vmatprep.mubr.bf16.mxu0 %v8009_v41  ;;  %10880 = vmatprep.subr.bf16.mxu0 %v13492_v25 }
 0x60e   :  { %12801 = vmatpush3.bf16.msra.mxu1 %v13494_v27 }
 0x60f   :  { %10881 = vmatpush1.bf16.msra.mxu0 %v13490_v17  ;;  %12808 = vmatprep.subr.bf16.mxu1 %v13498_v58 }
 0x610   :  { %10882 = vmatprep.subr.bf16.mxu0 %v13497_v6 }
 0x611   :  { %11188 = vmatmul.mubr.bf16.vlgmr.msra.gmra.mrb[48].mxu1 %v8006_v15  ;;  %v13537_v15 = vld [vmem:[%s18332_s5 + $0xba4] ss:$12 sps:$4 sm:$0xff]  }
 0x612   :  { %12809 = vmatpush3.bf16.msra.mxu1 %v13499_v20  ;;  %11227 = vmatprep.mubr.bf16.mxu1 %v8009_v41 }
 0x613   :  { %10883 = vmatpush1.bf16.msra.mxu0 %v13495_v28  ;;  %12810 = vmatprep.subr.bf16.mxu1 %v13503_v3 }
 0x614   :  { %10884 = vmatprep.subr.bf16.mxu0 %v13502_v5 }
 0x616   :  { %12811 = vmatpush3.bf16.msra.mxu1 %v13504_v55 }
 0x617   :  { %10885 = vmatpush1.bf16.msra.mxu0 %v13500_v21  ;;  %12812 = vmatprep.subr.bf16.mxu1 %v13508_v50 }
 0x618   :  { %10886 = vmatprep.subr.bf16.mxu0 %v13507_v8 }
 0x61a   :  { %12813 = vmatpush3.bf16.msra.mxu1 %v13509_v53 }
 0x61b   :  { %10887 = vmatpush1.bf16.msra.mxu0 %v13505_v29  ;;  %12814 = vmatprep.subr.bf16.mxu1 %v13513_v45 }
 0x61c   :  { %10888 = vmatprep.subr.bf16.mxu0 %v13512_v51 }
 0x61e   :  { %12815 = vmatpush3.bf16.msra.mxu1 %v13514_v52 }
 0x61f   :  { %10889 = vmatpush1.bf16.msra.mxu0 %v13510_v54  ;;  %12816 = vmatprep.subr.bf16.mxu1 %v13518_v4 }
 0x620   :  { %10890 = vmatprep.subr.bf16.mxu0 %v13517_v38 }
 0x622   :  { %12817 = vmatpush3.bf16.msra.mxu1 %v13519_v39 }
 0x623   :  { %10891 = vmatpush1.bf16.msra.mxu0 %v13515_v9  ;;  %12818 = vmatprep.subr.bf16.mxu1 %v13523_v31 }
 0x624   :  { %v12670_v18 = vpop.f32.mrb[24].mxu1  ;;  %10892 = vmatprep.subr.bf16.mxu0 %v13522_v40 }
 0x625   :  { %v12671_v0 = vpop.f32.mrb[25].mxu1 }
 0x626   :  { %v12672_v1 = vadd.f32 %v12671_v0, %v12670_v18  ;;  %v12673_v60 = vpop.f32.mrb[26].mxu1  ;;  %12819 = vmatpush3.bf16.msra.mxu1 %v13524_v49 }
 0x627   :  { %10893 = vmatpush1.bf16.msra.mxu0 %v13520_v22  ;;  %v12674_v56 = vpop.f32.mrb[27].mxu1  ;;  %12820 = vmatprep.subr.bf16.mxu1 %v13528_v36 }
 0x628   :  { %10894 = vmatprep.subr.bf16.mxu0 %v13527_v34  ;;  %v10950_v46 = vadd.f32 %v12672_v1, %v8535_v7  ;;  %v8531_v56 = vrot.slane %v8522_v33, %v14023_v47 }
 0x62a   :  { %12821 = vmatpush3.bf16.msra.mxu1 %v13529_v42 }
 0x62b   :  { %10895 = vmatpush1.bf16.msra.mxu0 %v13525_v48  ;;  %12822 = vmatprep.subr.bf16.mxu1 %v13533_v10 }
 0x62c   :  { %10896 = vmatprep.subr.bf16.mxu0 %v13532_v11 }
 0x62e   :  { %12823 = vmatpush3.bf16.msra.mxu1 %v13534_v12 }
 0x62f   :  { %10897 = vmatpush1.bf16.msra.mxu0 %v13530_v14 }
 0x630   :  { %10898 = vmatprep.subr.bf16.mxu0 %v13537_v15 }
 0x631   :  { %11228 = vmatmul.mubr.bf16.vlgmr.msra.gmra.mrb[52].mxu1 %v8008_v2 }
 0x633   :  { %10899 = vmatpush1.bf16.msra.mxu0 %v13535_v16 }
 0x634   :  { %10900 = vmatprep.subr.bf16.mxu0 %v13540_v19 }
 0x637   :  { %10901 = vmatpush1.bf16.msra.mxu0 %v13538_v26 }
 0x638   :  { %10902 = vmatprep.subr.bf16.mxu0 %v13543_v32 }
 0x63b   :  { %10903 = vmatpush1.bf16.msra.mxu0 %v13541_v62 }
 0x63c   :  { %10904 = vmatprep.subr.bf16.mxu0 %v13546_v30 }
 0x63f   :  { %10905 = vmatpush1.bf16.msra.mxu0 %v13544_v35 }
 0x642   :  { %10907 = vmatmul.mubr.bf16.vlgmr.msra.gmra.mrb[20].mxu0 %v8008_v2 }
 0x644   :  { %v12692_v23 = vpop.f32.mrb[28].mxu1 }
 0x645   :  { %v12693_v24 = vpop.f32.mrb[29].mxu1 }
 0x646   :  { %v12694_v37 = vadd.f32 %v12693_v24, %v12692_v23  ;;  %v12695_v59 = vpop.f32.mrb[30].mxu1 }
 0x647   :  { %v12696_v25 = vpop.f32.mrb[31].mxu1 }
 0x648   :  { %v10990_v41 = vadd.f32 %v12694_v37, %v10950_v46 }
 0x664   :  { %v12714_v27 = vpop.f32.mrb[32].mxu1 }
 0x665   :  { %v12715_v17 = vpop.f32.mrb[33].mxu1 }
 0x666   :  { %v12716_v58 = vadd.f32 %v12715_v17, %v12714_v27  ;;  %v12717_v6 = vpop.f32.mrb[34].mxu1 }
 0x667   :  { %v12718_v20 = vpop.f32.mrb[35].mxu1 }
 0x668   :  { %v11030_v28 = vadd.f32 %v12716_v58, %v10990_v41 }
 0x684   :  { %v12736_v3 = vpop.f32.mrb[36].mxu1 }
 0x685   :  { %v12737_v5 = vpop.f32.mrb[37].mxu1 }
 0x686   :  { %v12738_v55 = vadd.f32 %v12737_v5, %v12736_v3  ;;  %v12739_v21 = vpop.f32.mrb[38].mxu1 }
 0x687   :  { %v12740_v50 = vpop.f32.mrb[39].mxu1 }
 0x688   :  { %v11070_v57 = vadd.f32 %v12738_v55, %v11030_v28 }
 0x6a4   :  { %v12758_v8 = vpop.f32.mrb[40].mxu1 }
 0x6a5   :  { %v12759_v53 = vpop.f32.mrb[41].mxu1 }
 0x6a6   :  { %v12760_v29 = vadd.f32 %v12759_v53, %v12758_v8  ;;  %v12761_v45 = vpop.f32.mrb[42].mxu1 }
 0x6a7   :  { %v12762_v51 = vpop.f32.mrb[43].mxu1 }
 0x6a8   :  { %v11110_v52 = vadd.f32 %v12760_v29, %v11070_v57 }
 0x6c4   :  { %v12780_v54 = vpop.f32.mrb[44].mxu1 }
 0x6c5   :  { %v12781_v4 = vpop.f32.mrb[45].mxu1 }
 0x6c6   :  { %v12782_v38 = vadd.f32 %v12781_v4, %v12780_v54  ;;  %v12783_v39 = vpop.f32.mrb[46].mxu1 }
 0x6c7   :  { %v12784_v9 = vpop.f32.mrb[47].mxu1 }
 0x6c8   :  { %v11150_v31 = vadd.f32 %v12782_v38, %v11110_v52 }
 0x6e4   :  { %v12802_v40 = vpop.f32.mrb[48].mxu1 }
 0x6e5   :  { %v12803_v49 = vpop.f32.mrb[49].mxu1 }
 0x6e6   :  { %v12804_v61 = vadd.f32 %v12803_v49, %v12802_v40  ;;  %v12805_v63 = vpop.f32.mrb[50].mxu1 }
 0x6e7   :  { %v12806_v22 = vpop.f32.mrb[51].mxu1 }
 0x6e8   :  { %v11190_v36 = vadd.f32 %v12804_v61, %v11150_v31 }
 0x704   :  { %v12824_v18 = vpop.f32.mrb[52].mxu1 }
 0x705   :  { %v12825_v34 = vpop.f32.mrb[53].mxu1 }
 0x706   :  { %v12826_v0 = vadd.f32 %v12825_v34, %v12824_v18  ;;  %v12827_v1 = vpop.f32.mrb[54].mxu1 }
 0x707   :  { %v12828_v60 = vpop.f32.mrb[55].mxu1 }
 0x708   :  { %v11230_v42 = vadd.f32 %v12826_v0, %v11190_v36 }
 0x70a   :  { %11237 = vst [vmem:[%s18334_s7 + $0x10] sm:$0xff] %v11230_v42 }
 0x715   :  { %v10908_v48 = vpop.f32.mrb[20].mxu0 }
 0x716   :  { %v12912_v10 = vadd.f32 %v10908_v48, %v8527_v43  ;;  %v10910_v11 = vpop.f32.mrb[21].mxu0 }
 0x717   :  { %v12913_v12 = vadd.f32 %v10910_v11, %v8531_v56  ;;  %v10912_v13 = vpop.f32.mrb[22].mxu0 }
 0x718   :  { %11235 = vst [vmem:[%s18334_s7] sm:$0xff] %v12912_v10  ;;  %v10913_v14 = vpop.f32.mrb[23].mxu0 }
 0x719   :  { %11236 = vst [vmem:[%s18334_s7 + $0x8] sm:$0xff] %v12913_v12 }

// kernel: gru_model_forward.3
= control target key start
LH: loop header
LB: loop body
LE: loop exit
PB: predicated region body
PF: predicated region fallthrough
CT: control target
= control target key end

     0   :  { %v1606_v7 = vmov 0.0|0.0   ;;  %v1607_v8 = vmov 0.0   ;;  %vm1608_vm0 = vmmov 0   ;;  %s2142_s0 = inlined_call_operand.vmem [shape: f32[4,2,384], index: 0, kind: input, shape index: {}]   ;;  %s2143_s1 = inlined_call_operand.vmem [shape: f32[128,384], index: 1, kind: input, shape index: {}]   ;;  %s2144_s2 = inlined_call_operand.vmem [shape: f32[1,384], index: 2, kind: input, shape index: {}]   ;;  %s2145_s3 = inlined_call_operand.vmem [shape: f32[128,64], index: 3, kind: input, shape index: {}]   ;;  %s2146_s4 = inlined_call_operand.vmem [shape: f32[1,64], index: 4, kind: input, shape index: {}]   ;;  %s2147_s5 = inlined_call_operand.vmem [shape: f32[64,2], index: 5, kind: input, shape index: {}]   ;;  %s2148_s6 = inlined_call_operand.vmem [shape: f32[1,2], index: 6, kind: input, shape index: {}]   ;;  %s2149_s7 = inlined_call_operand.hbm [shape: f32[2,2], index: 7, kind: output, shape index: {}]  }
   0x1   :  { %v33_v0 = vld [vmem:[%s2143_s1 + $0x8] sm:$0xff]  ;;  %v36_v1 = vld [vmem:[%s2143_s1 + $0x20] sm:$0xff]  ;;  %v35_v4 = vld [vmem:[%s2143_s1 + $0x18] sm:$0xff]  ;;  %1310 = vmatprep.subr.bf16.mxu1 %v1606_v7  ;;  %163 = vmatprep.mubr.f32.mxu0 %v1607_v8  ;;  %31 = vst [vmem:[#allocation2] sm:$0x3] %v1607_v8 }
   0x2   :  { %v32_v2 = vld [vmem:[%s2143_s1] sm:$0xff]  ;;  %v1659_v3 = vpack.c.bf16 %v36_v1, %v33_v0  ;;  %v39_v5 = vld [vmem:[%s2143_s1 + $0x38] sm:$0xff]  ;;  %v42_v6 = vld [vmem:[%s2143_s1 + $0x50] sm:$0xff]  ;;  %1116 = vmatprep.mubr.msk.f32.mxu1 %vm1608_vm0, %v1607_v8 }
   0x3   :  { %v1673_v9 = vpack.c.bf16 %v35_v4, %v32_v2  ;;  %v1675_v10 = vpack.c.bf16 %v42_v6, %v39_v5  ;;  %v38_v11 = vld [vmem:[%s2143_s1 + $0x30] sm:$0xff]  ;;  %v41_v12 = vld [vmem:[%s2143_s1 + $0x48] sm:$0xff]  ;;  %v48_v14 = vld [vmem:[%s2143_s1 + $0x80] sm:$0xff] }
   0x4   :  { %v45_v13 = vld [vmem:[%s2143_s1 + $0x68] sm:$0xff]  ;;  %1279 = vmatprep.subr.bf16.mxu0 %v1659_v3  ;;  %v1693_v15 = vpack.c.bf16 %v41_v12, %v38_v11  ;;  %v44_v17 = vld [vmem:[%s2143_s1 + $0x60] sm:$0xff]  ;;  %v47_v18 = vld [vmem:[%s2143_s1 + $0x78] sm:$0xff] }
   0x5   :  { %1281 = vmatpush1.bf16.msra.mxu0 %v1673_v9  ;;  %v1696_v16 = vpack.c.bf16 %v48_v14, %v45_v13  ;;  %v51_v19 = vld [vmem:[%s2143_s1 + $0x98] sm:$0xff]  ;;  %v54_v20 = vld [vmem:[%s2143_s1 + $0xb0] sm:$0xff]  ;;  %v1711_v21 = vpack.c.bf16 %v47_v18, %v44_v17  ;;  %v53_v24 = vld [vmem:[%s2143_s1 + $0xa8] sm:$0xff] }
   0x6   :  { %1283 = vmatprep.subr.bf16.mxu0 %v1675_v10  ;;  %v1714_v22 = vpack.c.bf16 %v54_v20, %v51_v19  ;;  %v50_v23 = vld [vmem:[%s2143_s1 + $0x90] sm:$0xff]  ;;  %v57_v25 = vld [vmem:[%s2143_s1 + $0xc8] sm:$0xff]  ;;  %v60_v26 = vld [vmem:[%s2143_s1 + $0xe0] sm:$0xff] }
   0x7   :  { %v34_v27 = vld [vmem:[%s2143_s1 + $0x10] sm:$0xff]  ;;  %v37_v28 = vld [vmem:[%s2143_s1 + $0x28] sm:$0xff]  ;;  %v40_v30 = vld [vmem:[%s2143_s1 + $0x40] sm:$0xff]  ;;  %v1740_v31 = vpack.c.bf16 %v53_v24, %v50_v23  ;;  %v1746_v33 = vpack.c.bf16 %v60_v26, %v57_v25 }
   0x8   :  { %v1734_v29 = vpack.c.bf16 %v37_v28, %v34_v27  ;;  %v43_v32 = vld [vmem:[%s2143_s1 + $0x58] sm:$0xff]  ;;  %v56_v34 = vld [vmem:[%s2143_s1 + $0xc0] sm:$0xff]  ;;  %v66_v38 = vld [vmem:[%s2143_s1 + $0x110] sm:$0xff] }
   0x9   :  { %1285 = vmatpush1.bf16.msra.mxu0 %v1693_v15  ;;  %v59_v35 = vld [vmem:[%s2143_s1 + $0xd8] sm:$0xff]  ;;  %v1758_v37 = vpack.c.bf16 %v43_v32, %v40_v30  ;;  %v46_v39 = vld [vmem:[%s2143_s1 + $0x70] sm:$0xff]  ;;  %v49_v40 = vld [vmem:[%s2143_s1 + $0x88] sm:$0xff] }
   0xa   :  { %1287 = vmatprep.subr.bf16.mxu0 %v1696_v16  ;;  %v63_v36 = vld [vmem:[%s2143_s1 + $0xf8] sm:$0xff]  ;;  %1312 = vmatpush3.bf16.msra.mxu1 %v1734_v29  ;;  %v1771_v41 = vpack.c.bf16 %v59_v35, %v56_v34  ;;  %v62_v42 = vld [vmem:[%s2143_s1 + $0xf0] sm:$0xff]  ;;  %v65_v44 = vld [vmem:[%s2143_s1 + $0x108] sm:$0xff]  ;;  %v1786_v46 = vpack.c.bf16 %v49_v40, %v46_v39 }
   0xb   :  { %1313 = vmatprep.subr.bf16.mxu1 %v1606_v7  ;;  %v1777_v43 = vpack.c.bf16 %v66_v38, %v63_v36  ;;  %v69_v45 = vld [vmem:[%s2143_s1 + $0x128] sm:$0xff] }
   0xd   :  { %1289 = vmatpush1.bf16.msra.mxu0 %v1711_v21 }
   0xe   :  { %1291 = vmatprep.subr.bf16.mxu0 %v1714_v22  ;;  %1315 = vmatpush3.bf16.msra.mxu1 %v1758_v37 }
  0x11   :  { %1293 = vmatpush1.bf16.msra.mxu0 %v1740_v31 }
  0x12   :  { %1295 = vmatprep.subr.bf16.mxu0 %v1746_v33 }
  0x13   :  { %12 = vsyncpa [#allocation4], 0  ;;  %v72_v47 = vld [vmem:[%s2143_s1 + $0x140] sm:$0xff]  ;;  %1316 = vmatprep.subr.bf16.mxu1 %v1606_v7  ;;  %v55_v49 = vld [vmem:[%s2143_s1 + $0xb8] sm:$0xff]  ;;  %v1799_v50 = vpack.c.bf16 %v65_v44, %v62_v42  ;;  %v82_v18 = vlaneseq  ;;  %vm886_vm1 = vcmask 523264   ;;  %s1609_s13 = smov [#allocation3]  }
  0x14   :  { %v52_v48 = vld [vmem:[%s2143_s1 + $0xa0] sm:$0xff]  ;;  %v1802_v51 = vpack.c.bf16 %v72_v47, %v69_v45  ;;  %v71_v53 = vld [vmem:[%s2143_s1 + $0x138] sm:$0xff]  ;;  %1318 = vmatpush3.bf16.msra.mxu1 %v1786_v46  ;;  %v78_v56 = vld [vmem:[%s2143_s1 + $0x170] sm:$0xff]  ;;  %s968_s14 = sshll.u32 %s1609_s13, 4  ;;  %vm960_vm2 = vcmask 9216   ;;  %s969_s14 = int_to_ptr.vmem [resolvable:$true] %s968_s14 }
  0x15   :  { %1297 = vmatpush1.bf16.msra.mxu0 %v1771_v41  ;;  %v68_v52 = vld [vmem:[%s2143_s1 + $0x120] sm:$0xff]  ;;  %v75_v54 = vld [vmem:[%s2143_s1 + $0x158] sm:$0xff]  ;;  %v1814_v55 = vpack.c.bf16 %v55_v49, %v52_v48  ;;  %1319 = vmatprep.subr.bf16.mxu1 %v1606_v7  ;;  %v58_v57 = vld [vmem:[%s2143_s1 + $0xd0] sm:$0xff]  ;;  %v83_v19 = vshrl.u32 %v82_v18, 7  ;;  %p1587_p1 = scmp.lt.s32.totalorder %s969_s14, %s969_s14 }
  0x16   :  { %1299 = vmatprep.subr.bf16.mxu0 %v1777_v43  ;;  %v61_v58 = vld [vmem:[%s2143_s1 + $0xe8] sm:$0xff]  ;;  %v1827_v59 = vpack.c.bf16 %v71_v53, %v68_v52  ;;  %v1830_v60 = vpack.c.bf16 %v78_v56, %v75_v54  ;;  %v74_v61 = vld [vmem:[%s2143_s1 + $0x150] sm:$0xff]  ;;  %v64_v0 = vld [vmem:[%s2143_s1 + $0x100] sm:$0xff] }
  0x17   :  { %v77_v62 = vld [vmem:[%s2143_s1 + $0x168] sm:$0xff]  ;;  %v1839_v63 = vpack.c.bf16 %v61_v58, %v58_v57  ;;  %v67_v1 = vld [vmem:[%s2143_s1 + $0x118] sm:$0xff]  ;;  %v70_v5 = vld [vmem:[%s2143_s1 + $0x130] sm:$0xff]  ;;  %v84_v20 = vsub.s32 0, %v83_v19  ;;  %v88_v24 = vsub.s32 1, %v83_v19  ;;  %v92_v48 = vsub.s32 2, %v83_v19 }
  0x18   :  { %1321 = vmatpush3.bf16.msra.mxu1 %v1814_v55  ;;  %v1849_v2 = vpack.c.bf16 %v77_v62, %v74_v61  ;;  %v1853_v4 = vpack.c.bf16 %v67_v1, %v64_v0  ;;  %v73_v6 = vld [vmem:[%s2143_s1 + $0x148] sm:$0xff]  ;;  %v1863_v11 = vld [vmem:[#allocation2] sm:$0x3]  ;;  %v76_v13 = vld [vmem:[%s2143_s1 + $0x160] sm:$0xff] }
  0x19   :  { %1301 = vmatpush1.bf16.msra.mxu0 %v1799_v50  ;;  %1322 = vmatprep.subr.bf16.mxu1 %v1606_v7  ;;  %v1866_v12 = vpack.c.bf16 %v73_v6, %v70_v5  ;;  %v79_v14 = vld [vmem:[%s2143_s1 + $0x178] sm:$0xff]  ;;  %v80_v23 = vld [vmem:[%s2144_s2] sm:$0x7] }
  0x1a   :  { %1303 = vmatprep.subr.bf16.mxu0 %v1802_v51  ;;  %v1880_v17 = vpack.c.bf16 %v79_v14, %v76_v13  ;;  %v1922_v25 = vrot.slane %v80_v23, %v84_v20  ;;  %v1924_v26 = vrot.slane %v80_v23, %v88_v24  ;;  %v98_v27 = vld [vmem:[%s2142_s0] sm:$0x3f]  ;;  %v1931_v49 = vrot.slane %v80_v23, %v92_v48 }
  0x1b   :  { %v248_v35 = vrot.slane %v98_v27, 2  ;;  %v258_v56 = vrot.slane %v98_v27, 4 }
  0x1c   :  { %1324 = vmatpush3.bf16.msra.mxu1 %v1839_v63 }
  0x1d   :  { %1305 = vmatpush1.bf16.msra.mxu0 %v1827_v59  ;;  %1325 = vmatprep.subr.bf16.mxu1 %v1606_v7 }
  0x1e   :  { %1307 = vmatprep.subr.bf16.mxu0 %v1830_v60 }
  0x20   :  { %1327 = vmatpush3.bf16.msra.mxu1 %v1853_v4 }
  0x21   :  { %1309 = vmatpush1.bf16.msra.mxu0 %v1849_v2  ;;  %1328 = vmatprep.subr.bf16.mxu1 %v1606_v7 }
  0x22   :  { %1335 = vmatprep.subr.bf16.mxu0 %v1659_v3 }
  0x24   :  { %164 = vmatmul.mubr.f32.vlgmr.msra.gmra.mrb[0].mxu0 %v1863_v11  ;;  %1330 = vmatpush3.bf16.msra.mxu1 %v1866_v12 }
  0x25   :  { %1337 = vmatpush1.bf16.msra.mxu0 %v1673_v9  ;;  %332 = vmatprep.mubr.f32.mxu0 %v1607_v8 }
  0x26   :  { %1339 = vmatprep.subr.bf16.mxu0 %v1675_v10  ;;  %1331 = vmatprep.subr.bf16.mxu1 %v1606_v7 }
  0x28   :  { %1333 = vmatpush3.bf16.msra.mxu1 %v1880_v17 }
  0x29   :  { %1341 = vmatpush1.bf16.msra.mxu0 %v1693_v15  ;;  %1366 = vmatprep.subr.bf16.mxu1 %v1606_v7 }
  0x2a   :  { %1343 = vmatprep.subr.bf16.mxu0 %v1696_v16 }
  0x2b   :  { %1117 = vmatmul.mubr.f32.vlgmr.msra.gmra.mrb[0].mxu1 %v1863_v11 }
  0x2c   :  { %1368 = vmatpush3.bf16.msra.mxu1 %v1734_v29  ;;  %1151 = vmatprep.mubr.msk.f32.mxu1 %vm1608_vm0, %v1607_v8 }
  0x2d   :  { %1345 = vmatpush1.bf16.msra.mxu0 %v1711_v21  ;;  %1369 = vmatprep.subr.bf16.mxu1 %v1606_v7 }
  0x2e   :  { %1347 = vmatprep.subr.bf16.mxu0 %v1714_v22 }
  0x30   :  { %1371 = vmatpush3.bf16.msra.mxu1 %v1758_v37 }
  0x31   :  { %1349 = vmatpush1.bf16.msra.mxu0 %v1740_v31  ;;  %1372 = vmatprep.subr.bf16.mxu1 %v1606_v7 }
  0x32   :  { %1351 = vmatprep.subr.bf16.mxu0 %v1746_v33 }
  0x34   :  { %1374 = vmatpush3.bf16.msra.mxu1 %v1786_v46 }
  0x35   :  { %1353 = vmatpush1.bf16.msra.mxu0 %v1771_v41  ;;  %1375 = vmatprep.subr.bf16.mxu1 %v1606_v7 }
  0x36   :  { %1355 = vmatprep.subr.bf16.mxu0 %v1777_v43 }
  0x38   :  { %1377 = vmatpush3.bf16.msra.mxu1 %v1814_v55 }
  0x39   :  { %1357 = vmatpush1.bf16.msra.mxu0 %v1799_v50  ;;  %1378 = vmatprep.subr.bf16.mxu1 %v1606_v7 }
  0x3a   :  { %1359 = vmatprep.subr.bf16.mxu0 %v1802_v51 }
  0x3c   :  { %1380 = vmatpush3.bf16.msra.mxu1 %v1839_v63 }
  0x3d   :  { %1361 = vmatpush1.bf16.msra.mxu0 %v1827_v59  ;;  %1381 = vmatprep.subr.bf16.mxu1 %v1606_v7 }
  0x3e   :  { %1363 = vmatprep.subr.bf16.mxu0 %v1830_v60 }
  0x40   :  { %1383 = vmatpush3.bf16.msra.mxu1 %v1853_v4 }
  0x41   :  { %1365 = vmatpush1.bf16.msra.mxu0 %v1849_v2  ;;  %1384 = vmatprep.subr.bf16.mxu1 %v1606_v7 }
  0x42   :  { %1391 = vmatprep.subr.bf16.mxu0 %v1659_v3 }
  0x44   :  { %1386 = vmatpush3.bf16.msra.mxu1 %v1866_v12 }
  0x45   :  { %1387 = vmatprep.subr.bf16.mxu1 %v1606_v7 }
  0x48   :  { %1389 = vmatpush3.bf16.msra.mxu1 %v1880_v17 }
  0x49   :  { %1422 = vmatprep.subr.bf16.mxu1 %v1606_v7 }
  0xf7   :  { %v165_v28 = vpop.f32.mrb[0].mxu0 }
  0xf8   :  { %v166_v30 = vadd.f32 %v165_v28, %v1922_v25  ;;  %v167_v32 = vpop.f32.mrb[1].mxu0 }
  0xf9   :  { %v168_v34 = vadd.f32 %v167_v32, %v1924_v26 }
  0xfa   :  { %v240_v36 = vadd.f32 %v166_v30, %v98_v27 }
  0xfb   :  { %v250_v39 = vadd.f32 %v248_v35, %v168_v34 }
  0xfc   :  { %v976_v38 = vmul.f32 -1.442695, %v240_v36 }
  0xfd   :  { %v977_v42 = vmul.f32 -1.442695, %v250_v39 }
  0xfe   :  { %1542 = vpow2.f32 %v976_v38  ;;  %v236_v40 = vpop.f32.mrb[0].mxu1 }
  0xff   :  { %v1118_v44 = vpop.f32.mrb[1].mxu1  ;;  %1544 = vpow2.f32 %v977_v42  ;;  %v237_v54 = vadd.f32 %v236_v40, %v1931_v49 }
 0x108   :  { %v1543_v45 = vpop.eup %1542 }
 0x109   :  { %v244_v47 = vadd.f32 1.0, %v1543_v45  ;;  %v1545_v52 = vpop.eup %1544 }
 0x10a   :  { %v254_v53 = vadd.f32 1.0, %v1545_v52 }
 0x10b   :  { %1546 = vrcp.f32 %v244_v47 }
 0x10c   :  { %1548 = vrcp.f32 %v254_v53 }
 0x115   :  { %v1547_v57 = vpop.eup %1546 }
 0x116   :  { %v257_v58 = vmul.f32 %v1547_v57, %v237_v54  ;;  %v1549_v62 = vpop.eup %1548 }
 0x117   :  { %v262_v0 = vsub.f32 1.0, %v1549_v62  ;;  %v264_v6 = vmul.f32 %v1549_v62, %v1863_v11  ;;  %v978_v11 = vld [vmem:[%s2142_s0 + $0x6] sm:$0x3f] }
 0x118   :  { %v260_v61 = vadd.f32 %v258_v56, %v257_v58  ;;  %v417_v27 = vrot.slane %v978_v11, 2  ;;  %v427_v40 = vrot.slane %v978_v11, 4 }
 0x11a   :  { %1550 = vtanh.f32 %v260_v61 }
 0x124   :  { %v1551_v1 = vpop.eup %1550 }
 0x125   :  { %v263_v5 = vmul.f32 %v1551_v1, %v262_v0  ;;  %v777_v0 = vld [vmem:[%s2145_s3] sm:$0xff]  ;;  %v778_v1 = vld [vmem:[%s2145_s3 + $0x8] sm:$0xff] }
 0x127   :  { %v1935_v13 = vadd.f32 %v264_v6, %v263_v5  ;;  %v1503_v5 = vpack.c.bf16 %v778_v1, %v777_v0  ;;  %v779_v6 = vld [vmem:[%s2145_s3 + $0x10] sm:$0xff]  ;;  %v987_v0 = vld [vmem:[%s2146_s4] ss:$0 sm:$0xff] }
 0x129   :  { %333 = vmatmul.mubr.f32.vlgmr.msra.gmra.mrb[2].mxu0 %v1935_v13  ;;  %1152 = vmatmul.mubr.f32.vlgmr.msra.gmra.mrb[2].mxu1 %v1935_v13 }
 0x12a   :  { %1393 = vmatpush1.bf16.msra.mxu0 %v1673_v9  ;;  %1424 = vmatpush3.bf16.msra.mxu1 %v1734_v29 }
 0x12b   :  { %1395 = vmatprep.subr.bf16.mxu0 %v1675_v10  ;;  %1425 = vmatprep.subr.bf16.mxu1 %v1606_v7 }
 0x12c   :  { %501 = vmatprep.mubr.f32.mxu0 %v1607_v8  ;;  %1186 = vmatprep.mubr.msk.f32.mxu1 %vm1608_vm0, %v1607_v8 }
 0x12e   :  { %1397 = vmatpush1.bf16.msra.mxu0 %v1693_v15  ;;  %1427 = vmatpush3.bf16.msra.mxu1 %v1758_v37 }
 0x12f   :  { %1399 = vmatprep.subr.bf16.mxu0 %v1696_v16  ;;  %1428 = vmatprep.subr.bf16.mxu1 %v1606_v7 }
 0x132   :  { %1401 = vmatpush1.bf16.msra.mxu0 %v1711_v21  ;;  %1430 = vmatpush3.bf16.msra.mxu1 %v1786_v46 }
 0x133   :  { %1403 = vmatprep.subr.bf16.mxu0 %v1714_v22  ;;  %1431 = vmatprep.subr.bf16.mxu1 %v1606_v7 }
 0x136   :  { %1405 = vmatpush1.bf16.msra.mxu0 %v1740_v31  ;;  %1433 = vmatpush3.bf16.msra.mxu1 %v1814_v55 }
 0x137   :  { %1407 = vmatprep.subr.bf16.mxu0 %v1746_v33  ;;  %1434 = vmatprep.subr.bf16.mxu1 %v1606_v7 }
 0x13a   :  { %1409 = vmatpush1.bf16.msra.mxu0 %v1771_v41  ;;  %1436 = vmatpush3.bf16.msra.mxu1 %v1839_v63 }
 0x13b   :  { %1411 = vmatprep.subr.bf16.mxu0 %v1777_v43  ;;  %1437 = vmatprep.subr.bf16.mxu1 %v1606_v7 }
 0x13e   :  { %1413 = vmatpush1.bf16.msra.mxu0 %v1799_v50  ;;  %1439 = vmatpush3.bf16.msra.mxu1 %v1853_v4 }
 0x13f   :  { %1415 = vmatprep.subr.bf16.mxu0 %v1802_v51  ;;  %1440 = vmatprep.subr.bf16.mxu1 %v1606_v7 }
 0x142   :  { %1417 = vmatpush1.bf16.msra.mxu0 %v1827_v59  ;;  %1442 = vmatpush3.bf16.msra.mxu1 %v1866_v12 }
 0x143   :  { %1419 = vmatprep.subr.bf16.mxu0 %v1830_v60  ;;  %1443 = vmatprep.subr.bf16.mxu1 %v1606_v7 }
 0x146   :  { %1421 = vmatpush1.bf16.msra.mxu0 %v1849_v2  ;;  %1445 = vmatpush3.bf16.msra.mxu1 %v1880_v17 }
 0x147   :  { %1447 = vmatprep.subr.bf16.mxu0 %v1659_v3  ;;  %1478 = vmatprep.subr.bf16.mxu1 %v1606_v7 }
 0x1fc   :  { %v334_v14 = vpop.f32.mrb[2].mxu0  ;;  %v405_v18 = vpop.f32.mrb[2].mxu1 }
 0x1fd   :  { %v335_v19 = vadd.f32 %v334_v14, %v1922_v25  ;;  %v336_v20 = vpop.f32.mrb[3].mxu0  ;;  %v1153_v23 = vpop.f32.mrb[3].mxu1  ;;  %v406_v39 = vadd.f32 %v405_v18, %v1931_v49  ;;  %v782_v14 = vld [vmem:[%s2145_s3 + $0x28] sm:$0xff] }
 0x1fe   :  { %v337_v24 = vadd.f32 %v336_v20, %v1924_v26  ;;  %v784_v20 = vld [vmem:[%s2145_s3 + $0x38] sm:$0xff] }
 0x1ff   :  { %v409_v28 = vadd.f32 %v978_v11, %v335_v19  ;;  %v781_v11 = vld [vmem:[%s2145_s3 + $0x20] sm:$0xff]  ;;  %v783_v19 = vld [vmem:[%s2145_s3 + $0x30] sm:$0xff] }
 0x200   :  { %v419_v32 = vadd.f32 %v417_v27, %v337_v24  ;;  %v1509_v18 = vpack.c.bf16 %v782_v14, %v781_v11  ;;  %v1512_v23 = vpack.c.bf16 %v784_v20, %v783_v19  ;;  %v785_v24 = vld [vmem:[%s2145_s3 + $0x40] sm:$0xff]  ;;  %v786_v27 = vld [vmem:[%s2145_s3 + $0x48] sm:$0xff] }
 0x201   :  { %v979_v30 = vmul.f32 -1.442695, %v409_v28  ;;  %v1515_v28 = vpack.c.bf16 %v786_v27, %v785_v24 }
 0x202   :  { %v980_v3 = vmul.f32 -1.442695, %v419_v32  ;;  %v788_v32 = vld [vmem:[%s2145_s3 + $0x58] sm:$0xff] }
 0x203   :  { %1552 = vpow2.f32 %v979_v30  ;;  %v787_v30 = vld [vmem:[%s2145_s3 + $0x50] sm:$0xff] }
 0x204   :  { %1554 = vpow2.f32 %v980_v3  ;;  %v1518_v3 = vpack.c.bf16 %v788_v32, %v787_v30 }
 0x20d   :  { %v1553_v34 = vpop.eup %1552 }
 0x20e   :  { %v413_v35 = vadd.f32 1.0, %v1553_v34  ;;  %v1555_v36 = vpop.eup %1554  ;;  %v789_v34 = vld [vmem:[%s2145_s3 + $0x60] sm:$0xff] }
 0x20f   :  { %v423_v38 = vadd.f32 1.0, %v1555_v36 }
 0x210   :  { %1556 = vrcp.f32 %v413_v35  ;;  %v790_v35 = vld [vmem:[%s2145_s3 + $0x68] sm:$0xff] }
 0x211   :  { %1558 = vrcp.f32 %v423_v38  ;;  %v1521_v36 = vpack.c.bf16 %v790_v35, %v789_v34  ;;  %v791_v38 = vld [vmem:[%s2145_s3 + $0x70] sm:$0xff] }
 0x21a   :  { %v1557_v42 = vpop.eup %1556 }
 0x21b   :  { %v426_v44 = vmul.f32 %v1557_v42, %v406_v39  ;;  %v1559_v47 = vpop.eup %1558  ;;  %v792_v39 = vld [vmem:[%s2145_s3 + $0x78] sm:$0xff]  ;;  %v871_v42 = vld [vmem:[%s2147_s5] sm:$0xff] }
 0x21c   :  { %v431_v48 = vsub.f32 1.0, %v1559_v47  ;;  %v433_v54 = vmul.f32 %v1559_v47, %v1935_v13 }
 0x21d   :  { %v429_v45 = vadd.f32 %v427_v40, %v426_v44  ;;  %v1524_v40 = vpack.c.bf16 %v792_v39, %v791_v38  ;;  %v872_v44 = vld [vmem:[%s2147_s5 + $0x8] sm:$0xff] }
 0x21e   :  { %v1527_v47 = vpack.c.bf16 %v872_v44, %v871_v42 }
 0x21f   :  { %1560 = vtanh.f32 %v429_v45  ;;  %v873_v45 = vld [vmem:[%s2147_s5 + $0x10] sm:$0xff] }
 0x229   :  { %v1561_v52 = vpop.eup %1560 }
 0x22a   :  { %v432_v53 = vmul.f32 %v1561_v52, %v431_v48  ;;  %v874_v48 = vld [vmem:[%s2147_s5 + $0x18] sm:$0xff] }
 0x22b   :  { %v1530_v52 = vpack.c.bf16 %v874_v48, %v873_v45 }
 0x22c   :  { %v1981_v56 = vadd.f32 %v433_v54, %v432_v53  ;;  %v875_v53 = vld [vmem:[%s2147_s5 + $0x20] sm:$0xff]  ;;  %v876_v54 = vld [vmem:[%s2147_s5 + $0x28] sm:$0xff] }
 0x22e   :  { %502 = vmatmul.mubr.f32.vlgmr.msra.gmra.mrb[4].mxu0 %v1981_v56  ;;  %1187 = vmatmul.mubr.f32.vlgmr.msra.gmra.mrb[4].mxu1 %v1981_v56 }
 0x22f   :  { %1449 = vmatpush1.bf16.msra.mxu0 %v1673_v9  ;;  %1480 = vmatpush3.bf16.msra.mxu1 %v1734_v29  ;;  %v981_v9 = vld [vmem:[%s2142_s0 + $0xc] sm:$0x3f] }
 0x230   :  { %1451 = vmatprep.subr.bf16.mxu0 %v1675_v10  ;;  %1481 = vmatprep.subr.bf16.mxu1 %v1606_v7 }
 0x231   :  { %670 = vmatprep.mubr.f32.mxu0 %v1607_v8  ;;  %1221 = vmatprep.mubr.msk.f32.mxu1 %vm1608_vm0, %v1607_v8 }
 0x233   :  { %1453 = vmatpush1.bf16.msra.mxu0 %v1693_v15  ;;  %1483 = vmatpush3.bf16.msra.mxu1 %v1758_v37 }
 0x234   :  { %1455 = vmatprep.subr.bf16.mxu0 %v1696_v16  ;;  %1484 = vmatprep.subr.bf16.mxu1 %v1606_v7 }
 0x237   :  { %1457 = vmatpush1.bf16.msra.mxu0 %v1711_v21  ;;  %1486 = vmatpush3.bf16.msra.mxu1 %v1786_v46 }
 0x238   :  { %1459 = vmatprep.subr.bf16.mxu0 %v1714_v22  ;;  %1487 = vmatprep.subr.bf16.mxu1 %v1606_v7 }
 0x23b   :  { %1461 = vmatpush1.bf16.msra.mxu0 %v1740_v31  ;;  %1489 = vmatpush3.bf16.msra.mxu1 %v1814_v55  ;;  %v586_v31 = vrot.slane %v981_v9, 2 }
 0x23c   :  { %1463 = vmatprep.subr.bf16.mxu0 %v1746_v33  ;;  %1490 = vmatprep.subr.bf16.mxu1 %v1606_v7 }
 0x23f   :  { %1465 = vmatpush1.bf16.msra.mxu0 %v1771_v41  ;;  %1492 = vmatpush3.bf16.msra.mxu1 %v1839_v63 }
 0x240   :  { %1467 = vmatprep.subr.bf16.mxu0 %v1777_v43  ;;  %1493 = vmatprep.subr.bf16.mxu1 %v1606_v7 }
 0x243   :  { %1469 = vmatpush1.bf16.msra.mxu0 %v1799_v50  ;;  %1495 = vmatpush3.bf16.msra.mxu1 %v1853_v4 }
 0x244   :  { %1471 = vmatprep.subr.bf16.mxu0 %v1802_v51  ;;  %1496 = vmatprep.subr.bf16.mxu1 %v1606_v7 }
 0x247   :  { %1473 = vmatpush1.bf16.msra.mxu0 %v1827_v59  ;;  %1498 = vmatpush3.bf16.msra.mxu1 %v1866_v12 }
 0x248   :  { %1475 = vmatprep.subr.bf16.mxu0 %v1830_v60  ;;  %1499 = vmatprep.subr.bf16.mxu1 %v1606_v7  ;;  %v596_v60 = vrot.slane %v981_v9, 4 }
 0x24b   :  { %1477 = vmatpush1.bf16.msra.mxu0 %v1849_v2  ;;  %1501 = vmatpush3.bf16.msra.mxu1 %v1880_v17 }
 0x24c   :  { %1502 = vmatprep.subr.bf16.mxu0 %v1606_v7  ;;  %1526 = vmatprep.subr.bf16.mxu1 %v1606_v7 }
 0x301   :  { %v503_v10 = vpop.f32.mrb[4].mxu0  ;;  %v574_v15 = vpop.f32.mrb[4].mxu1 }
 0x302   :  { %v504_v16 = vadd.f32 %v503_v10, %v1922_v25  ;;  %v505_v21 = vpop.f32.mrb[5].mxu0  ;;  %v1188_v22 = vpop.f32.mrb[5].mxu1  ;;  %v575_v59 = vadd.f32 %v574_v15, %v1931_v49 }
 0x303   :  { %v506_v29 = vadd.f32 %v505_v21, %v1924_v26 }
 0x304   :  { %v578_v33 = vadd.f32 %v981_v9, %v504_v16  ;;  %v984_v9 = vld [vmem:[%s2142_s0 + $0x12] sm:$0x3f] }
 0x305   :  { %v588_v41 = vadd.f32 %v586_v31, %v506_v29  ;;  %v755_v31 = vrot.slane %v984_v9, 2 }
 0x306   :  { %v982_v37 = vmul.f32 -1.442695, %v578_v33 }
 0x307   :  { %v983_v43 = vmul.f32 -1.442695, %v588_v41 }
 0x308   :  { %1562 = vpow2.f32 %v982_v37 }
 0x309   :  { %1564 = vpow2.f32 %v983_v43 }
 0x312   :  { %v1563_v46 = vpop.eup %1562 }
 0x313   :  { %v582_v50 = vadd.f32 1.0, %v1563_v46  ;;  %v1565_v51 = vpop.eup %1564 }
 0x314   :  { %v592_v55 = vadd.f32 1.0, %v1565_v51 }
 0x315   :  { %1566 = vrcp.f32 %v582_v50 }
 0x316   :  { %1568 = vrcp.f32 %v592_v55 }
 0x31f   :  { %v1567_v63 = vpop.eup %1566 }
 0x320   :  { %v595_v2 = vmul.f32 %v1567_v63, %v575_v59  ;;  %v1569_v12 = vpop.eup %1568  ;;  %v765_v59 = vrot.slane %v984_v9, 4 }
 0x321   :  { %v600_v17 = vsub.f32 1.0, %v1569_v12  ;;  %v602_v61 = vmul.f32 %v1569_v12, %v1981_v56  ;;  %v1533_v56 = vpack.c.bf16 %v876_v54, %v875_v53 }
 0x322   :  { %v598_v4 = vadd.f32 %v596_v60, %v595_v2 }
 0x324   :  { %1570 = vtanh.f32 %v598_v4 }
 0x32e   :  { %v1571_v57 = vpop.eup %1570 }
 0x32f   :  { %v601_v58 = vmul.f32 %v1571_v57, %v600_v17 }
 0x331   :  { %v2027_v62 = vadd.f32 %v602_v61, %v601_v58  ;;  %v877_v58 = vld [vmem:[%s2147_s5 + $0x30] sm:$0xff] }
 0x333   :  { %671 = vmatmul.mubr.f32.vlgmr.msra.gmra.mrb[6].mxu0 %v2027_v62  ;;  %1222 = vmatmul.mubr.f32.vlgmr.msra.gmra.mrb[6].mxu1 %v2027_v62 }
 0x334   :  { %1256 = vmatprep.mubr.msk.f32.mxu0 %vm1608_vm0, %v1607_v8  ;;  %1275 = vmatprep.mubr.msk.f32.mxu1 %vm1608_vm0, %v1607_v8  ;;  %v780_v8 = vld [vmem:[%s2145_s3 + $0x18] sm:$0xff] }
 0x335   :  { %1504 = vmatpush3.bf16.msra.mxu0 %v1503_v5  ;;  %v1506_v13 = vpack.c.bf16 %v780_v8, %v779_v6  ;;  %1528 = vmatpush3.bf16.msra.mxu1 %v1527_v47  ;;  %v988_v8 = vld [vmem:[%s2148_s6] ss:$0 sm:$0xff] }
 0x336   :  { %1505 = vmatprep.subr.bf16.mxu0 %v1606_v7  ;;  %1529 = vmatprep.subr.bf16.mxu1 %v1606_v7 }
 0x339   :  { %1507 = vmatpush3.bf16.msra.mxu0 %v1506_v13  ;;  %1531 = vmatpush3.bf16.msra.mxu1 %v1530_v52 }
 0x33a   :  { %1508 = vmatprep.subr.bf16.mxu0 %v1606_v7  ;;  %1532 = vmatprep.subr.bf16.mxu1 %v1606_v7 }
 0x33d   :  { %1510 = vmatpush3.bf16.msra.mxu0 %v1509_v18  ;;  %1534 = vmatpush3.bf16.msra.mxu1 %v1533_v56 }
 0x33e   :  { %1511 = vmatprep.subr.bf16.mxu0 %v1606_v7  ;;  %1535 = vmatprep.subr.bf16.mxu1 %v1606_v7 }
 0x341   :  { %1513 = vmatpush3.bf16.msra.mxu0 %v1512_v23 }
 0x342   :  { %1514 = vmatprep.subr.bf16.mxu0 %v1606_v7 }
 0x345   :  { %1516 = vmatpush3.bf16.msra.mxu0 %v1515_v28 }
 0x346   :  { %1517 = vmatprep.subr.bf16.mxu0 %v1606_v7 }
 0x349   :  { %1519 = vmatpush3.bf16.msra.mxu0 %v1518_v3 }
 0x34a   :  { %1520 = vmatprep.subr.bf16.mxu0 %v1606_v7 }
 0x34d   :  { %1522 = vmatpush3.bf16.msra.mxu0 %v1521_v36 }
 0x34e   :  { %1523 = vmatprep.subr.bf16.mxu0 %v1606_v7 }
 0x351   :  { %1525 = vmatpush3.bf16.msra.mxu0 %v1524_v40 }
 0x406   :  { %v672_v10 = vpop.f32.mrb[6].mxu0  ;;  %v743_v15 = vpop.f32.mrb[6].mxu1 }
 0x407   :  { %v673_v16 = vadd.f32 %v672_v10, %v1922_v25  ;;  %v674_v21 = vpop.f32.mrb[7].mxu0  ;;  %v1223_v22 = vpop.f32.mrb[7].mxu1  ;;  %v744_v55 = vadd.f32 %v743_v15, %v1931_v49  ;;  %v878_v49 = vld [vmem:[%s2147_s5 + $0x38] sm:$0xff]  ;;  %s1582_s5 = scalar_lea.vmem %s969_s14, 32 }
 0x408   :  { %v675_v29 = vadd.f32 %v674_v21, %v1924_v26  ;;  %v1536_v61 = vpack.c.bf16 %v878_v49, %v877_v58  ;;  %p1583_p0 = scmp.ne.s32.totalorder %s969_s14, %s1582_s5  ;;  %p1588_p2 = scmp.lt.s32.totalorder %s1582_s5, %s1582_s5 }
 0x409   :  { %v747_v33 = vadd.f32 %v984_v9, %v673_v16 }
 0x40a   :  { %v757_v41 = vadd.f32 %v755_v31, %v675_v29  ;;  %1537 = vmatpush3.bf16.msra.mxu1 %v1536_v61  ;;  %p1589_p3 = por %p1588_p2, %p1587_p1 }
 0x40b   :  { %v985_v37 = vmul.f32 -1.442695, %v747_v33 }
 0x40c   :  { %v986_v43 = vmul.f32 -1.442695, %v757_v41  ;;  %p1590_p4 = pnand %p1589_p3, %p1583_p0 }
 0x40d   :  { %1572 = vpow2.f32 %v985_v37 }
 0x40e   :  { %1574 = vpow2.f32 %v986_v43 }
 0x417   :  { %v1573_v7 = vpop.eup %1572 }
 0x418   :  { %v751_v46 = vadd.f32 1.0, %v1573_v7  ;;  %v1575_v50 = vpop.eup %1574 }
 0x419   :  { %v761_v51 = vadd.f32 1.0, %v1575_v50 }
 0x41a   :  { %1576 = vrcp.f32 %v751_v46 }
 0x41b   :  { %1578 = vrcp.f32 %v761_v51 }
 0x424   :  { %v1577_v25 = vpop.eup %1576 }
 0x425   :  { %v764_v60 = vmul.f32 %v1577_v25, %v744_v55  ;;  %v1579_v26 = vpop.eup %1578 }
 0x426   :  { %v769_v2 = vsub.f32 1.0, %v1579_v26  ;;  %v771_v17 = vmul.f32 %v1579_v26, %v2027_v62 }
 0x427   :  { %v767_v63 = vadd.f32 %v765_v59, %v764_v60 }
 0x429   :  { %1580 = vtanh.f32 %v767_v63 }
 0x433   :  { %v1581_v4 = vpop.eup %1580 }
 0x434   :  { %v770_v12 = vmul.f32 %v1581_v4, %v769_v2 }
 0x436   :  { %v772_v57 = vadd.f32 %v771_v17, %v770_v12 }
 0x438   :  { %773 = vst [vmem:[#allocation2] sm:$0x3] %v772_v57  ;;  %1257 = vmatmul.mubr.f32.vlgmr.msra.gmra.mrb[8].mxu0 %v772_v57 }
 0x50b   :  { %v866_v1 = vpop.f32.mrb[8].mxu0 }
 0x50c   :  { %v867_v5 = vadd.f32 %v987_v0, %v866_v1  ;;  %v1258_v62 = vpop.f32.mrb[9].mxu0 }
 0x50e   :  { %v870_v6 = vmax.f32 %v867_v5, 0.0 }
 0x510   :  { %1276 = vmatmul.mubr.msk.f32.vlgmr.msra.gmra.mrb[8].mxu1 %vm886_vm1, %v870_v6 }
 0x5e3   :  { %v956_v13 = vpop.f32.mrb[8].mxu1 }
 0x5e4   :  { %v957_v11 = vadd.f32 %v988_v8, %v956_v13  ;;  %v1277_v14 = vpop.f32.mrb[9].mxu1 }
 0x5e6   :  { %961 = vst.msk [vmem:[#allocation3] sm:$0x3] %vm960_vm2, %v957_v11 }
 0x5e7   :  { %1593 = shalt.err (!%p1590_p4)
}
 0x5e8   :  { %s1594_s16 = scalar_lea.hbm %s2149_s7, 32 }
 0x5e9   :  { %p1595_p5 = scmp.ne.s32.totalorder %s2149_s7, %s1594_s16  ;;  %p1598_p6 = scmp.lt.u32.totalorder %s1594_s16, %s2149_s7 }
 0x5eb   :  { %p1600_p7 = pnand %p1598_p6, %p1595_p5 }
 0x5ed   :  { %1603 = shalt.err (!%p1600_p7)
}
 0x5ee   :  { %971 = dma.vmem_to_hbm [thread:$0]  %s969_s14, 32, %s2149_s7, [#allocation4]  }
 0x5ef   :  { %1604 = dma.done.wait [#allocation4], 32  }
 0x5f0   :  { %1605 = vsyncadd [#allocation4], 4294967264 }
 0x5f1   :  { %975 = vsyncpa [#allocation4], 1 }

</bundles_post_ra>
